<compile_context>
chip_gen: v5e
topology: v5e:2x2
jax: 0.10.0
libtpu: 0.0.40
codegen_flags: <defaults>
</compile_context>

<pallas_src>
import functools
import math

import jax
import jax.numpy as jnp
from jax import lax
from jax.experimental import pallas as pl
from jax.experimental.pallas import tpu as pltpu

# ----------------------- module hyper-parameters -----------------------
DEPTH = 4              # layers 0..3
WIDTH = 64             # MLP width
SKIPS = (2,)           # skip connection at layer 2 (0 < 2 < depth-1)
OUT_CH = 9             # 1 sdf value + 8 feature channels
MULTIRES = 4           # embedder frequencies 2^0..2^3
IN_DIMS = 3            # raw xyz
IN_CH = IN_DIMS * (1 + 2 * MULTIRES)   # 27 embedded channels
SOFTPLUS_BETA = 100.0
SOFTPLUS_THRESHOLD = 20.0              # PyTorch nn.Softplus default threshold
INV_SQRT2 = 1.0 / math.sqrt(2.0)
GEO_BIAS = 0.6


def _grouped_perm():
    """grouped-embedding channel j  ->  original interleaved channel perm[j].

    original : [xyz, sin(2^0 xyz), cos(2^0 xyz), ..., sin(2^3 xyz), cos(2^3 xyz)]
    grouped  : [xyz, sin(2^0 xyz), ..., sin(2^3 xyz), cos(2^0 xyz), ..., cos(2^3 xyz)]
    """
    perm = [0, 1, 2]
    for l in range(MULTIRES):                       # sin block
        perm += [3 + 6 * l + d for d in range(IN_DIMS)]
    for l in range(MULTIRES):                       # cos block
        perm += [3 + 6 * l + IN_DIMS + d for d in range(IN_DIMS)]
    return perm


# ------------------------------ kernel ---------------------------------
def _softplus(x, eup_dtype):
    """PyTorch nn.Softplus(beta=100, threshold=20) semantics, overflow-free:
    log1p(exp(b*x)) = max(b*x, 0) + log1p(exp(-|b*x|)).
    The exp (dominant EUP op) runs in `eup_dtype` (bf16 on v6e/v7x, f32 on v5e)."""
    bx = SOFTPLUS_BETA * x
    e = jnp.exp((-jnp.abs(bx)).astype(eup_dtype)).astype(jnp.float32)
    soft = (jnp.maximum(bx, 0.0) + jnp.log1p(e)) * (1.0 / SOFTPLUS_BETA)
    return jnp.where(bx > SOFTPLUS_THRESHOLD, x, soft)


def _embed_grouped(xyz):
    """(TN, 3) raw xyz -> (TN, 27) grouped positional embedding:
    [xyz | sin(2^0 xyz)..sin(2^3 xyz) | cos(2^0 xyz)..cos(2^3 xyz)].
    Two wide sin/cos launches over (TN, 12) instead of 8 narrow 3-lane ones;
    weight rows were permuted to this channel order in pack_params."""
    scaled = jnp.concatenate([xyz * (2.0 ** l) for l in range(MULTIRES)], axis=1)
    # TODO(synk): sin/cos kept in f32 (phase accuracy of the 2^l * x arguments);
    # they are only ~6% of the per-point transcendental count.
    return jnp.concatenate([xyz, jnp.sin(scaled), jnp.cos(scaled)], axis=1)


def sdf_mlp_kernel(x_ref,
                   w0_ref, b0_ref,
                   w1_ref, b1_ref,
                   w2a_ref, w2b_ref, b2_ref,
                   w3t_ref, b3t_ref,
                   o_ref, *, eup_dtype):
    f32 = jnp.float32
    bf16 = jnp.bfloat16

    xyz = x_ref[...]                               # (TN, 3) raw points
    inx = _embed_grouped(xyz)                      # (TN, 27) fused embedding
    inx_b = inx.astype(bf16)                       # MXU operand (layers 0 and 2b)

    # layer 0
    h = jnp.dot(inx_b, w0_ref[...], preferred_element_type=f32) + b0_ref[...]
    h = _softplus(h, eup_dtype)

    # layer 1
    h = jnp.dot(h.astype(bf16), w1_ref[...], preferred_element_type=f32) + b1_ref[...]
    h = _softplus(h, eup_dtype)

    # layer 2 -- skip: (cat([h, inx], 1) / sqrt(2)) @ w2 == h @ w2a + inx @ w2b
    # (the 1/sqrt(2) is folded into both weight halves once, in pack_params)
    h = (jnp.dot(h.astype(bf16), w2a_ref[...], preferred_element_type=f32)
         + jnp.dot(inx_b, w2b_ref[...], preferred_element_type=f32)
         + b2_ref[...])
    h = _softplus(h, eup_dtype)

    # layer 3 (no activation), transposed: out_t[o, n] = sum_k w3t[o, k] h[n, k]
    # so the store is lane-dense (tile_n lanes) instead of a 9-lane masked store.
    out_t = lax.dot_general(w3t_ref[...], h.astype(bf16),
                            (((1,), (1,)), ((), ())),
                            preferred_element_type=f32) + b3t_ref[...]
    o_ref[...] = out_t.astype(o_ref.dtype)


# ------------------------------ wrapper ---------------------------------
def _round_up(a, b):
    return ((a + b - 1) // b) * b


def _bf16_eup_ok():
    """bf16 transcendentals only on generations with a bf16 EUP/VPU (v6e, v7x)."""
    try:
        kind = jax.devices()[0].device_kind.lower()
    except Exception:
        return False
    if "tpu" not in kind:
        return False
    return not any(v in kind for v in ("v2", "v3", "v4", "v5"))


def init_params(key):
    """Deterministic geometric init (weights stored as (in, out))."""
    k0, k1, k2, k3 = jax.random.split(key, 4)
    s = math.sqrt(2.0) / math.sqrt(WIDTH)

    w0 = jnp.zeros((IN_CH, WIDTH), jnp.float32)
    w0 = w0.at[:3, :].set(jax.random.normal(k0, (3, WIDTH), jnp.float32) * s)
    b0 = jnp.zeros((1, WIDTH), jnp.float32)

    w1 = jax.random.normal(k1, (WIDTH, WIDTH), jnp.float32) * s
    b1 = jnp.zeros((1, WIDTH), jnp.float32)

    w2 = jax.random.normal(k2, (WIDTH + IN_CH, WIDTH), jnp.float32) * s
    w2 = w2.at[-(IN_CH - 3):, :].set(0.0)
    b2 = jnp.zeros((1, WIDTH), jnp.float32)

    w3 = (math.sqrt(math.pi) / math.sqrt(WIDTH)
          + 1e-4 * jax.random.normal(k3, (WIDTH, OUT_CH), jnp.float32))
    b3 = jnp.full((1, OUT_CH), -GEO_BIAS, jnp.float32)

    return [(w0, b0), (w1, b1), (w2, b2), (w3, b3)]


def pack_params(params):
    """One-time layout transform: split the skip layer and fold 1/sqrt(2),
    permute embedding rows to the grouped channel order, transpose layer 3,
    and cast all matmul weights to bf16 (biases stay f32)."""
    (w0, b0), (w1, b1), (w2, b2), (w3, b3) = params
    perm = jnp.asarray(_grouped_perm(), dtype=jnp.int32)
    bf16 = jnp.bfloat16

    w0g = w0[perm, :]                          # (IN_CH, WIDTH), grouped rows
    w2a = w2[:WIDTH] * INV_SQRT2               # (WIDTH, WIDTH)  -- hidden half
    w2b = (w2[WIDTH:] * INV_SQRT2)[perm, :]    # (IN_CH, WIDTH)  -- embedded half
    w3t = w3.T                                 # (OUT_CH, WIDTH)
    b3t = b3.reshape(OUT_CH, 1)                # (OUT_CH, 1)

    return (w0g.astype(bf16), b0.astype(jnp.float32),
            w1.astype(bf16), b1.astype(jnp.float32),
            w2a.astype(bf16), w2b.astype(bf16), b2.astype(jnp.float32),
            w3t.astype(bf16), b3t.astype(jnp.float32))


def sdfnet_forward(x_raw, packed_params, *, tile_n=2048):
    """Pallas implementation of SDFNet.forward (embedding fused in-kernel)."""
    n = x_raw.shape[0]
    # Keep >= 2 grid steps when the problem allows it so v7x's two TensorCores
    # both get work; never below 128 rows, always a multiple of 128.
    cap = max(128, _round_up((n + 1) // 2, 128))
    tile_n = _round_up(max(128, min(tile_n, cap)), 128)
    n_pad = _round_up(n, tile_n)

    x = x_raw.astype(jnp.float32)
    if n_pad != n:
        x = jnp.pad(x, ((0, n_pad - n), (0, 0)))

    # Input tile; weights/biases use full-array blocks with a constant
    # index_map (block index never changes -> DMA'd once, kept resident).
    in_specs = [pl.BlockSpec((tile_n, IN_DIMS), lambda i: (i, 0))]
    for a in packed_params:
        in_specs.append(pl.BlockSpec(a.shape, lambda i: (0, 0)))

    param_bytes = int(sum(a.size * a.dtype.itemsize for a in packed_params))
    flops = 2 * n_pad * (IN_CH * WIDTH + WIDTH * WIDTH
                         + (WIDTH + IN_CH) * WIDTH + WIDTH * OUT_CH)
    transcendentals = n_pad * (2 * IN_DIMS * MULTIRES + 2 * (DEPTH - 1) * WIDTH)
    bytes_accessed = n_pad * 4 * (IN_DIMS + OUT_CH) + param_bytes

    eup_dtype = jnp.bfloat16 if _bf16_eup_ok() else jnp.float32
    kernel = functools.partial(sdf_mlp_kernel, eup_dtype=eup_dtype)

    out_t = pl.pallas_call(
        kernel,
        out_shape=jax.ShapeDtypeStruct((OUT_CH, n_pad), jnp.float32),
        grid_spec=pltpu.PrefetchScalarGridSpec(
            num_scalar_prefetch=0,
            grid=(n_pad // tile_n,),
            in_specs=in_specs,
            out_specs=pl.BlockSpec((OUT_CH, tile_n), lambda i: (0, i)),
        ),
        compiler_params=pltpu.CompilerParams(
            dimension_semantics=("parallel",),
            vmem_limit_bytes=48 << 20),
        cost_estimate=pl.CostEstimate(
            flops=flops,
            transcendentals=transcendentals,
            bytes_accessed=bytes_accessed),
    )(x, *packed_params)

    # back to the module's (N, out_ch) layout; drop padded rows.
    return out_t[:, :n].T


# ------------------------- pure-JAX reference ---------------------------
def embed_ref(x):
    outs = [x]
    for l in range(MULTIRES):
        f = 2.0 ** l
        outs.append(jnp.sin(x * f))
        outs.append(jnp.cos(x * f))
    return jnp.concatenate(outs, axis=1)          # (N, IN_CH), interleaved order


def _softplus_ref(x):
    bx = SOFTPLUS_BETA * x
    soft = jnp.log1p(jnp.exp(jnp.minimum(bx, SOFTPLUS_THRESHOLD))) / SOFTPLUS_BETA
    return jnp.where(bx > SOFTPLUS_THRESHOLD, x, soft)


def sdfnet_forward_ref(x_raw, params):
    """All-f32 reference of the same forward pass (original parameterization)."""
    inx = embed_ref(x_raw.astype(jnp.float32))
    x = inx
    for i, (w, b) in enumerate(params):
        if i in SKIPS:
            x = jnp.concatenate([x, inx], axis=1) * INV_SQRT2
        x = x @ w + b
        if i < DEPTH - 1:
            x = _softplus_ref(x)
    return x


# TODO(synk): get_all_outputs / get_gradient rely on torch.autograd.grad; the
# gradient / LaplaceDensity / sphere-clamp paths are not reimplemented here
# (only SDFNet.forward is kernelized).

if __name__ == "__main__":
    key = jax.random.PRNGKey(0)
    k_param, k_noise, k_x = jax.random.split(key, 3)

    params = init_params(k_param)
    # Perturb all weights a little so the embedding / skip channels (zeroed by
    # the geometric init) actually contribute -- this exercises the grouped
    # channel permutation and the skip split in pack_params.
    nk = jax.random.split(k_noise, 2 * len(params))
    params = [(w + 0.1 * jax.random.normal(nk[2 * i], w.shape, jnp.float32),
               b + 0.05 * jax.random.normal(nk[2 * i + 1], b.shape, jnp.float32))
              for i, (w, b) in enumerate(params)]

    packed = pack_params(params)                  # one-time layout transform
    x = jax.random.normal(k_x, (256, IN_DIMS), jnp.float32)   # 256 query points

    out = jax.block_until_ready(sdfnet_forward(x, packed))
    ref = sdfnet_forward_ref(x, params)

    assert out.shape == (256, OUT_CH)
    assert bool(jnp.all(jnp.isfinite(out)))
    # bf16 MXU operands (and bf16 softplus exp on v6e/v7x) => relaxed tolerance
    # against the all-f32 reference; still tight enough to catch any packing,
    # permutation, tiling or transpose bug.
    assert jnp.allclose(out, ref, atol=1e-1, rtol=5e-2), "mismatch vs reference"
    print("KERNEL_OK")
</pallas_src>

<mosaic_0001>
module attributes {stable_mosaic.version = 11 : i64} {
  func.func @sdf_mlp_kernel(%arg0: i32, %arg1: memref<128x3xf32, #tpu.memory_space<vmem>>, %arg2: memref<27x64xbf16, #tpu.memory_space<vmem>>, %arg3: memref<1x64xf32, #tpu.memory_space<vmem>>, %arg4: memref<64x64xbf16, #tpu.memory_space<vmem>>, %arg5: memref<1x64xf32, #tpu.memory_space<vmem>>, %arg6: memref<64x64xbf16, #tpu.memory_space<vmem>>, %arg7: memref<27x64xbf16, #tpu.memory_space<vmem>>, %arg8: memref<1x64xf32, #tpu.memory_space<vmem>>, %arg9: memref<9x64xbf16, #tpu.memory_space<vmem>>, %arg10: memref<9x1xf32, #tpu.memory_space<vmem>>, %arg11: memref<9x128xf32, #tpu.memory_space<vmem>>) attributes {dimension_semantics = [#tpu.dimension_semantics<parallel>], iteration_bounds = array<i64: 2>, scalar_prefetch = 0 : i64, scratch_operands = 0 : i64, tpu.core_type = #tpu.core_type<tc>, window_params = [{transform_indices = @transform_0, window_bounds = array<i64: 128, 3>}, {pipeline_mode = #tpu.pipeline_mode<synchronous>, transform_indices = @transform_1, window_bounds = array<i64: 27, 64>}, {pipeline_mode = #tpu.pipeline_mode<synchronous>, transform_indices = @transform_2, window_bounds = array<i64: 1, 64>}, {pipeline_mode = #tpu.pipeline_mode<synchronous>, transform_indices = @transform_3, window_bounds = array<i64: 64, 64>}, {pipeline_mode = #tpu.pipeline_mode<synchronous>, transform_indices = @transform_4, window_bounds = array<i64: 1, 64>}, {pipeline_mode = #tpu.pipeline_mode<synchronous>, transform_indices = @transform_5, window_bounds = array<i64: 64, 64>}, {pipeline_mode = #tpu.pipeline_mode<synchronous>, transform_indices = @transform_6, window_bounds = array<i64: 27, 64>}, {pipeline_mode = #tpu.pipeline_mode<synchronous>, transform_indices = @transform_7, window_bounds = array<i64: 1, 64>}, {pipeline_mode = #tpu.pipeline_mode<synchronous>, transform_indices = @transform_8, window_bounds = array<i64: 9, 64>}, {pipeline_mode = #tpu.pipeline_mode<synchronous>, transform_indices = @transform_9, window_bounds = array<i64: 9, 1>}, {transform_indices = @transform_10, window_bounds = array<i64: 9, 128>}]} {
    %c0 = arith.constant 0 : index
    %c0_0 = arith.constant 0 : index
    %0 = vector.load %arg1[%c0, %c0_0] : memref<128x3xf32, #tpu.memory_space<vmem>>, vector<128x3xf32>
    %cst = arith.constant 1.000000e+00 : f32
    %1 = vector.broadcast %cst : f32 to vector<128x3xf32>
    %2 = arith.mulf %0, %1 : vector<128x3xf32>
    %cst_1 = arith.constant 2.000000e+00 : f32
    %3 = vector.broadcast %cst_1 : f32 to vector<128x3xf32>
    %4 = arith.mulf %0, %3 : vector<128x3xf32>
    %cst_2 = arith.constant 4.000000e+00 : f32
    %5 = vector.broadcast %cst_2 : f32 to vector<128x3xf32>
    %6 = arith.mulf %0, %5 : vector<128x3xf32>
    %cst_3 = arith.constant 8.000000e+00 : f32
    %7 = vector.broadcast %cst_3 : f32 to vector<128x3xf32>
    %8 = arith.mulf %0, %7 : vector<128x3xf32>
    %9 = tpu.concatenate %2, %4, %6, %8 in 1 : vector<128x3xf32>, vector<128x3xf32>, vector<128x3xf32>, vector<128x3xf32> -> vector<128x12xf32>
    %10 = math.sin %9 : vector<128x12xf32>
    %11 = math.cos %9 : vector<128x12xf32>
    %12 = tpu.concatenate %0, %10, %11 in 1 : vector<128x3xf32>, vector<128x12xf32>, vector<128x12xf32> -> vector<128x27xf32>
    %13 = arith.truncf %12 : vector<128x27xf32> to vector<128x27xbf16>
    %c0_4 = arith.constant 0 : index
    %c0_5 = arith.constant 0 : index
    %14 = vector.load %arg2[%c0_4, %c0_5] : memref<27x64xbf16, #tpu.memory_space<vmem>>, vector<27x64xbf16>
    %cst_6 = arith.constant dense<0.000000e+00> : vector<128x64xf32>
    %15 = tpu.matmul %13, %14, %cst_6 {dimension_numbers = #tpu.dot_dimension_numbers<[1], [0], [0], [1], [0, 0, 1, 1], [], []>} : vector<128x27xbf16>, vector<27x64xbf16>, vector<128x64xf32> -> vector<128x64xf32>
    %c0_7 = arith.constant 0 : index
    %c0_8 = arith.constant 0 : index
    %16 = vector.load %arg3[%c0_7, %c0_8] : memref<1x64xf32, #tpu.memory_space<vmem>>, vector<1x64xf32>
    %17 = vector.broadcast %16 : vector<1x64xf32> to vector<128x64xf32>
    %18 = arith.addf %15, %17 : vector<128x64xf32>
    %cst_9 = arith.constant 1.000000e+02 : f32
    %19 = vector.broadcast %cst_9 : f32 to vector<128x64xf32>
    %20 = arith.mulf %19, %18 : vector<128x64xf32>
    %21 = math.absf %20 : vector<128x64xf32>
    %cst_10 = arith.constant 0.000000e+00 : f32
    %22 = vector.broadcast %cst_10 : f32 to vector<128x64xf32>
    %23 = arith.subf %22, %21 : vector<128x64xf32>
    %24 = math.exp %23 : vector<128x64xf32>
    %cst_11 = arith.constant 0.000000e+00 : f32
    %25 = vector.broadcast %cst_11 : f32 to vector<128x64xf32>
    %26 = arith.maximumf %20, %25 : vector<128x64xf32>
    %27 = math.log1p %24 : vector<128x64xf32>
    %28 = arith.addf %26, %27 : vector<128x64xf32>
    %cst_12 = arith.constant 0.00999999977 : f32
    %29 = vector.broadcast %cst_12 : f32 to vector<128x64xf32>
    %30 = arith.mulf %28, %29 : vector<128x64xf32>
    %cst_13 = arith.constant 2.000000e+01 : f32
    %31 = vector.broadcast %cst_13 : f32 to vector<128x64xf32>
    %32 = arith.cmpf ogt, %20, %31 : vector<128x64xf32>
    %33 = arith.select %32, %18, %30 : vector<128x64xi1>, vector<128x64xf32>
    %34 = arith.truncf %33 : vector<128x64xf32> to vector<128x64xbf16>
    %c0_14 = arith.constant 0 : index
    %c0_15 = arith.constant 0 : index
    %35 = vector.load %arg4[%c0_14, %c0_15] : memref<64x64xbf16, #tpu.memory_space<vmem>>, vector<64x64xbf16>
    %cst_16 = arith.constant dense<0.000000e+00> : vector<128x64xf32>
    %36 = tpu.matmul %34, %35, %cst_16 {dimension_numbers = #tpu.dot_dimension_numbers<[1], [0], [0], [1], [0, 0, 1, 1], [], []>} : vector<128x64xbf16>, vector<64x64xbf16>, vector<128x64xf32> -> vector<128x64xf32>
    %c0_17 = arith.constant 0 : index
    %c0_18 = arith.constant 0 : index
    %37 = vector.load %arg5[%c0_17, %c0_18] : memref<1x64xf32, #tpu.memory_space<vmem>>, vector<1x64xf32>
    %38 = vector.broadcast %37 : vector<1x64xf32> to vector<128x64xf32>
    %39 = arith.addf %36, %38 : vector<128x64xf32>
    %cst_19 = arith.constant 1.000000e+02 : f32
    %40 = vector.broadcast %cst_19 : f32 to vector<128x64xf32>
    %41 = arith.mulf %40, %39 : vector<128x64xf32>
    %42 = math.absf %41 : vector<128x64xf32>
    %cst_20 = arith.constant 0.000000e+00 : f32
    %43 = vector.broadcast %cst_20 : f32 to vector<128x64xf32>
    %44 = arith.subf %43, %42 : vector<128x64xf32>
    %45 = math.exp %44 : vector<128x64xf32>
    %cst_21 = arith.constant 0.000000e+00 : f32
    %46 = vector.broadcast %cst_21 : f32 to vector<128x64xf32>
    %47 = arith.maximumf %41, %46 : vector<128x64xf32>
    %48 = math.log1p %45 : vector<128x64xf32>
    %49 = arith.addf %47, %48 : vector<128x64xf32>
    %cst_22 = arith.constant 0.00999999977 : f32
    %50 = vector.broadcast %cst_22 : f32 to vector<128x64xf32>
    %51 = arith.mulf %49, %50 : vector<128x64xf32>
    %cst_23 = arith.constant 2.000000e+01 : f32
    %52 = vector.broadcast %cst_23 : f32 to vector<128x64xf32>
    %53 = arith.cmpf ogt, %41, %52 : vector<128x64xf32>
    %54 = arith.select %53, %39, %51 : vector<128x64xi1>, vector<128x64xf32>
    %55 = arith.truncf %54 : vector<128x64xf32> to vector<128x64xbf16>
    %c0_24 = arith.constant 0 : index
    %c0_25 = arith.constant 0 : index
    %56 = vector.load %arg6[%c0_24, %c0_25] : memref<64x64xbf16, #tpu.memory_space<vmem>>, vector<64x64xbf16>
    %cst_26 = arith.constant dense<0.000000e+00> : vector<128x64xf32>
    %57 = tpu.matmul %55, %56, %cst_26 {dimension_numbers = #tpu.dot_dimension_numbers<[1], [0], [0], [1], [0, 0, 1, 1], [], []>} : vector<128x64xbf16>, vector<64x64xbf16>, vector<128x64xf32> -> vector<128x64xf32>
    %c0_27 = arith.constant 0 : index
    %c0_28 = arith.constant 0 : index
    %58 = vector.load %arg7[%c0_27, %c0_28] : memref<27x64xbf16, #tpu.memory_space<vmem>>, vector<27x64xbf16>
    %cst_29 = arith.constant dense<0.000000e+00> : vector<128x64xf32>
    %59 = tpu.matmul %13, %58, %cst_29 {dimension_numbers = #tpu.dot_dimension_numbers<[1], [0], [0], [1], [0, 0, 1, 1], [], []>} : vector<128x27xbf16>, vector<27x64xbf16>, vector<128x64xf32> -> vector<128x64xf32>
    %60 = arith.addf %57, %59 : vector<128x64xf32>
    %c0_30 = arith.constant 0 : index
    %c0_31 = arith.constant 0 : index
    %61 = vector.load %arg8[%c0_30, %c0_31] : memref<1x64xf32, #tpu.memory_space<vmem>>, vector<1x64xf32>
    %62 = vector.broadcast %61 : vector<1x64xf32> to vector<128x64xf32>
    %63 = arith.addf %60, %62 : vector<128x64xf32>
    %cst_32 = arith.constant 1.000000e+02 : f32
    %64 = vector.broadcast %cst_32 : f32 to vector<128x64xf32>
    %65 = arith.mulf %64, %63 : vector<128x64xf32>
    %66 = math.absf %65 : vector<128x64xf32>
    %cst_33 = arith.constant 0.000000e+00 : f32
    %67 = vector.broadcast %cst_33 : f32 to vector<128x64xf32>
    %68 = arith.subf %67, %66 : vector<128x64xf32>
    %69 = math.exp %68 : vector<128x64xf32>
    %cst_34 = arith.constant 0.000000e+00 : f32
    %70 = vector.broadcast %cst_34 : f32 to vector<128x64xf32>
    %71 = arith.maximumf %65, %70 : vector<128x64xf32>
    %72 = math.log1p %69 : vector<128x64xf32>
    %73 = arith.addf %71, %72 : vector<128x64xf32>
    %cst_35 = arith.constant 0.00999999977 : f32
    %74 = vector.broadcast %cst_35 : f32 to vector<128x64xf32>
    %75 = arith.mulf %73, %74 : vector<128x64xf32>
    %cst_36 = arith.constant 2.000000e+01 : f32
    %76 = vector.broadcast %cst_36 : f32 to vector<128x64xf32>
    %77 = arith.cmpf ogt, %65, %76 : vector<128x64xf32>
    %78 = arith.select %77, %63, %75 : vector<128x64xi1>, vector<128x64xf32>
    %c0_37 = arith.constant 0 : index
    %c0_38 = arith.constant 0 : index
    %79 = vector.load %arg9[%c0_37, %c0_38] : memref<9x64xbf16, #tpu.memory_space<vmem>>, vector<9x64xbf16>
    %80 = arith.truncf %78 : vector<128x64xf32> to vector<128x64xbf16>
    %cst_39 = arith.constant dense<0.000000e+00> : vector<9x128xf32>
    %81 = tpu.matmul %79, %80, %cst_39 {dimension_numbers = #tpu.dot_dimension_numbers<[1], [1], [0], [0], [0, 0, 1, 0], [], []>} : vector<9x64xbf16>, vector<128x64xbf16>, vector<9x128xf32> -> vector<9x128xf32>
    %c0_40 = arith.constant 0 : index
    %c0_41 = arith.constant 0 : index
    %82 = vector.load %arg10[%c0_40, %c0_41] : memref<9x1xf32, #tpu.memory_space<vmem>>, vector<9x1xf32>
    %83 = vector.broadcast %82 : vector<9x1xf32> to vector<9x128xf32>
    %84 = arith.addf %81, %83 : vector<9x128xf32>
    %c0_42 = arith.constant 0 : index
    %c0_43 = arith.constant 0 : index
    %85 = vector.load %arg11[%c0_42, %c0_43] : memref<9x128xf32, #tpu.memory_space<vmem>>, vector<9x128xf32>
    tpu.vector_store %arg11[%c0_42, %c0_43], %84 {strides = array<i32>} : memref<9x128xf32, #tpu.memory_space<vmem>>, vector<9x128xf32>,
    return
  }
  func.func @transform_0(%arg0: i32) -> (i32, i32) {
    %c0_i32 = arith.constant 0 : i32
    %c0_i32_0 = arith.constant 0 : i32
    return %arg0, %c0_i32 : i32, i32
  }
  func.func @transform_1(%arg0: i32) -> (i32, i32) {
    %c0_i32 = arith.constant 0 : i32
    %c0_i32_0 = arith.constant 0 : i32
    %c0_i32_1 = arith.constant 0 : i32
    return %c0_i32, %c0_i32_0 : i32, i32
  }
  func.func @transform_2(%arg0: i32) -> (i32, i32) {
    %c0_i32 = arith.constant 0 : i32
    %c0_i32_0 = arith.constant 0 : i32
    %c0_i32_1 = arith.constant 0 : i32
    return %c0_i32, %c0_i32_0 : i32, i32
  }
  func.func @transform_3(%arg0: i32) -> (i32, i32) {
    %c0_i32 = arith.constant 0 : i32
    %c0_i32_0 = arith.constant 0 : i32
    %c0_i32_1 = arith.constant 0 : i32
    return %c0_i32, %c0_i32_0 : i32, i32
  }
  func.func @transform_4(%arg0: i32) -> (i32, i32) {
    %c0_i32 = arith.constant 0 : i32
    %c0_i32_0 = arith.constant 0 : i32
    %c0_i32_1 = arith.constant 0 : i32
    return %c0_i32, %c0_i32_0 : i32, i32
  }
  func.func @transform_5(%arg0: i32) -> (i32, i32) {
    %c0_i32 = arith.constant 0 : i32
    %c0_i32_0 = arith.constant 0 : i32
    %c0_i32_1 = arith.constant 0 : i32
    return %c0_i32, %c0_i32_0 : i32, i32
  }
  func.func @transform_6(%arg0: i32) -> (i32, i32) {
    %c0_i32 = arith.constant 0 : i32
    %c0_i32_0 = arith.constant 0 : i32
    %c0_i32_1 = arith.constant 0 : i32
    return %c0_i32, %c0_i32_0 : i32, i32
  }
  func.func @transform_7(%arg0: i32) -> (i32, i32) {
    %c0_i32 = arith.constant 0 : i32
    %c0_i32_0 = arith.constant 0 : i32
    %c0_i32_1 = arith.constant 0 : i32
    return %c0_i32, %c0_i32_0 : i32, i32
  }
  func.func @transform_8(%arg0: i32) -> (i32, i32) {
    %c0_i32 = arith.constant 0 : i32
    %c0_i32_0 = arith.constant 0 : i32
    %c0_i32_1 = arith.constant 0 : i32
    return %c0_i32, %c0_i32_0 : i32, i32
  }
  func.func @transform_9(%arg0: i32) -> (i32, i32) {
    %c0_i32 = arith.constant 0 : i32
    %c0_i32_0 = arith.constant 0 : i32
    %c0_i32_1 = arith.constant 0 : i32
    return %c0_i32, %c0_i32_0 : i32, i32
  }
  func.func @transform_10(%arg0: i32) -> (i32, i32) {
    %c0_i32 = arith.constant 0 : i32
    %c0_i32_0 = arith.constant 0 : i32
    return %c0_i32, %arg0 : i32, i32
  }
}

</mosaic_0001>

<bundles_post_ra>
// kernel: tpu_custom_call.1
= control target key start
LH: loop header
LB: loop body
LE: loop exit
PB: predicated region body
PF: predicated region fallthrough
CT: control target
= control target key end

     0   :  { %s11961_s0 = inlined_call_operand.vmem [shape: f32[256,3], index: 0, kind: input, shape index: {}]   ;;  %s11962_s1 = inlined_call_operand.vmem [shape: bf16[27,64], index: 1, kind: input, shape index: {}]   ;;  %s11963_s2 = inlined_call_operand.vmem [shape: f32[1,64], index: 2, kind: input, shape index: {}]   ;;  %s11964_s3 = inlined_call_operand.vmem [shape: bf16[64,64], index: 3, kind: input, shape index: {}]   ;;  %s11965_s4 = inlined_call_operand.vmem [shape: f32[1,64], index: 4, kind: input, shape index: {}]   ;;  %s11966_s5 = inlined_call_operand.vmem [shape: bf16[64,64], index: 5, kind: input, shape index: {}]   ;;  %s11967_s6 = inlined_call_operand.vmem [shape: bf16[27,64], index: 6, kind: input, shape index: {}]   ;;  %s11968_s7 = inlined_call_operand.vmem [shape: f32[1,64], index: 7, kind: input, shape index: {}]   ;;  %s11969_s8 = inlined_call_operand.vmem [shape: bf16[9,64], index: 8, kind: input, shape index: {}]   ;;  %s11970_s9 = inlined_call_operand.vmem [shape: f32[9,1], index: 9, kind: input, shape index: {}]   ;;  %s11971_s10 = inlined_call_operand.hbm [shape: f32[9,256], index: 10, kind: output, shape index: {}]  }
   0x1   :  { %12101 = sst [smem:[#allocation49_spill]] %s11961_s0 }
   0x2   :  { %15 = vsyncpa [#allocation3], 0 }
   0x3   :  { %17 = vsyncpa [#allocation3 + $0x1], 0  ;;  %s7956_s13 = smov 0   ;;  %s7958_s14 = smov 0  }
   0x4   :  { %s7960_s15 = smov 0   ;;  %s7962_s16 = smov 0  }
   0x5 LB: > { %s7977_s17 = sadd.s32 4294967295, %s7884_s16   ;;  %s7258_s18 = sadd.s32 4294967294, %s7884_s16   ;;  %s7884_s16 = sphi %s7962_s16, %s12362_s16   ;;  %s7880_s15 = sphi %s7960_s15, %s12361_s15   ;;  %s7876_s14 = sphi %s7958_s14, %s12360_s14   ;;  %s7872_s13 = sphi %s7956_s13, %s12359_s13  }
   0x6   : > { %s7981_s19 = sadd.s32 1, %s7884_s16   ;;  %s245_s20 = sadd.s32 1, %s7880_s15 }
   0x7   : > { %s242_s21 = ssub.s32 %s7884_s16, %s7981_s19  ;;  %p255_p0 = scmp.ne.s32.totalorder %s7880_s15, %s7876_s14 }
   0x8   : > { %p243_p1 = scmp.eq.s32.totalorder %s242_s21, 0  ;;  %p256_p2 = scmp.eq.s32.totalorder %s7977_s17, 1 }
   0x9   : > { %p261_p3 = scmp.ne.s32.totalorder %s7876_s14, %s7872_s13  ;;  %p262_p4 = scmp.eq.s32.totalorder %s7258_s18, 1 }
   0xa   : > { %s7992_s22 = scalar_select %p243_p1, %s7880_s15, %s245_s20  }
   0xb   : > { %p7994_p5 = por %p256_p2, %p255_p0  ;;  %p7998_p6 = por %p262_p4, %p261_p3 }
   0xc   : > { %p7261_p7 = scmp.ge.s32.totalorder %s7884_s16, 1  ;;  %p316_p8 = scmp.lt.s32.totalorder %s7884_s16, 3 }
   0xe   : > { %p317_p9 = pnand %p7261_p7, %p316_p8 }
  0x10   : > { %320 = sbr.rel (%p317_p9) target bundleno = 1665 (0x681), region = 60 }
  0x15   : > { %s7263_s25 = sshll.u32 %s7977_s17, 4  ;;  %s12104_s0 = sld [smem:[#allocation49_spill]]  ;;  %v11995_v48 = vmov 0   ;;  %vm12077_vm0 = vcmask 23552   ;;  %vm12074_vm1 = vcmask 48128   ;;  %vm12073_vm2 = vcmask 72704  }
  0x16   : > { %p355_p10 = scmp.lt.s32.totalorder %s7263_s25, 31  ;;  %s7886_s30 = smov 6   ;;  %7597 = vset.pattern.permute.xlu1 %v11995_v48  ;;  %7598 = vset.pattern.permute.xlu2 %v11995_v48 }
  0x17   : > { %s7887_s11 = smov 3   ;;  %s7888_s12 = smov 9   ;;  %7599 = vset.pattern.permute.xlu0 %v11995_v48 }
  0x18   : > { %s12364_s25 = smov (!%p355_p10, %s7263_s25), 31  ;;  %s7896_s18 = smov 15  }
  0x19   : > { %s7264_s26 = sshll.u32 %s12364_s25, 3  ;;  %s351_s21 = sand.u32 1, %s7876_s14  }
  0x1a   : > { %s7262_s25 = sshll.u32 %s351_s21, 4 }
  0x1b   : > { %s8008_s29 = scalar_lea.vmem %s12104_s0, %s7264_s26  ;;  %s7447_s26 = sshll.u32 %s7977_s17, 3 }
  0x1c   : > { %v8011_v0 = vld [vmem:[%s8008_s29] sm:$0xff]  ;;  %v8019_v4 = vld [vmem:[%s8008_s29 + $0x8] sm:$0xff]  ;;  %v8028_v8 = vld [vmem:[%s8008_s29 + $0x18] sm:$0xff]  ;;  %s7192_s27 = scalar_lea.hbm %s11971_s10, %s7447_s26  ;;  %s7842_s26 = scalar_lea.hbm %s11971_s10, 32 }
  0x1d   : > { %v393_v1 = vmul.f32 4.0, %v8011_v0  ;;  %v377_v2 = vmul.f32 2.0, %v8011_v0  ;;  %v409_v3 = vmul.f32 8.0, %v8011_v0  ;;  %v394_v5 = vmul.f32 4.0, %v8019_v4  ;;  %v8031_v9 = vld [vmem:[%s8008_s29 + $0x10] sm:$0xff]  ;;  %v366_v16 = vld [vmem:[%s8008_s29 + $0x28] sm:$0xff] }
  0x1e   : > { %v378_v6 = vmul.f32 2.0, %v8019_v4  ;;  %v410_v7 = vmul.f32 8.0, %v8019_v4  ;;  %v380_v10 = vmul.f32 2.0, %v8028_v8  ;;  %v379_v11 = vmul.f32 2.0, %v8031_v9  ;;  %v8047_v17 = vld [vmem:[%s8008_s29 + $0x20] sm:$0xff]  ;;  %v368_v24 = vld [vmem:[%s8008_s29 + $0x38] sm:$0xff] }
  0x1f   : > { %505 = vrot.lane.b32.xlu1 %v393_v1, %s7886_s30  ;;  %441 = vrot.lane.b32.xlu0 %v377_v2, %s7887_s11  ;;  %v395_v12 = vmul.f32 4.0, %v8031_v9  ;;  %v411_v13 = vmul.f32 8.0, %v8031_v9  ;;  %v396_v14 = vmul.f32 4.0, %v8028_v8  ;;  %v412_v15 = vmul.f32 8.0, %v8028_v8  ;;  %v367_v25 = vld [vmem:[%s8008_s29 + $0x30] sm:$0xff]  ;;  %v370_v32 = vld [vmem:[%s8008_s29 + $0x48] sm:$0xff] }
  0x20   : > { %569 = vrot.lane.b32.xlu2 %v409_v3, %s7888_s12  ;;  %v382_v18 = vmul.f32 2.0, %v366_v16  ;;  %v381_v19 = vmul.f32 2.0, %v8047_v17  ;;  %v397_v20 = vmul.f32 4.0, %v8047_v17  ;;  %v413_v21 = vmul.f32 8.0, %v8047_v17  ;;  %v369_v33 = vld [vmem:[%s8008_s29 + $0x40] sm:$0xff]  ;;  %v372_v40 = vld [vmem:[%s8008_s29 + $0x58] sm:$0xff] }
  0x21   : > { %v398_v22 = vmul.f32 4.0, %v366_v16  ;;  %v414_v23 = vmul.f32 8.0, %v366_v16  ;;  %v384_v26 = vmul.f32 2.0, %v368_v24  ;;  %v383_v27 = vmul.f32 2.0, %v367_v25  ;;  %v371_v41 = vld [vmem:[%s8008_s29 + $0x50] sm:$0xff]  ;;  %v374_v49 = vld [vmem:[%s8008_s29 + $0x68] sm:$0xff] }
  0x22   : > { %v399_v28 = vmul.f32 4.0, %v367_v25  ;;  %v415_v29 = vmul.f32 8.0, %v367_v25  ;;  %v400_v30 = vmul.f32 4.0, %v368_v24  ;;  %v416_v31 = vmul.f32 8.0, %v368_v24  ;;  %v373_v50 = vld [vmem:[%s8008_s29 + $0x60] sm:$0xff]  ;;  %v8094_v56 = vld [vmem:[%s8008_s29 + $0x78] sm:$0xff] }
  0x23   : > { %v386_v34 = vmul.f32 2.0, %v370_v32  ;;  %v385_v35 = vmul.f32 2.0, %v369_v33  ;;  %v401_v36 = vmul.f32 4.0, %v369_v33  ;;  %v417_v37 = vmul.f32 8.0, %v369_v33  ;;  %v375_v57 = vld [vmem:[%s8008_s29 + $0x70] sm:$0xff] }
  0x24   : > { %v402_v38 = vmul.f32 4.0, %v370_v32  ;;  %v418_v39 = vmul.f32 8.0, %v370_v32  ;;  %v388_v42 = vmul.f32 2.0, %v372_v40  ;;  %v387_v43 = vmul.f32 2.0, %v371_v41 }
  0x25   : > { %v403_v44 = vmul.f32 4.0, %v371_v41  ;;  %v419_v45 = vmul.f32 8.0, %v371_v41  ;;  %v404_v46 = vmul.f32 4.0, %v372_v40  ;;  %v420_v47 = vmul.f32 8.0, %v372_v40 }
  0x26   : > { %v390_v51 = vmul.f32 2.0, %v374_v49  ;;  %v389_v52 = vmul.f32 2.0, %v373_v50  ;;  %v405_v53 = vmul.f32 4.0, %v373_v50  ;;  %v421_v54 = vmul.f32 8.0, %v373_v50 }
  0x27   : > { %507 = vrot.lane.b32.xlu1 %v394_v5, %s7886_s30  ;;  %443 = vrot.lane.b32.xlu0 %v378_v6, %s7887_s11  ;;  %v406_v55 = vmul.f32 4.0, %v374_v49  ;;  %v392_v58 = vmul.f32 2.0, %v8094_v56  ;;  %v391_v59 = vmul.f32 2.0, %v375_v57  ;;  %v422_v63 = vmul.f32 8.0, %v374_v49 }
  0x28   : > { %571 = vrot.lane.b32.xlu2 %v410_v7, %s7888_s12  ;;  %v423_v3 = vmul.f32 8.0, %v375_v57  ;;  %v408_v5 = vmul.f32 4.0, %v8094_v56  ;;  %v11984_v33 = vmov 2131351028  }
  0x2f   : > { %447 = vrot.lane.b32.xlu1 %v380_v10, %s7887_s11  ;;  %445 = vrot.lane.b32.xlu0 %v379_v11, %s7887_s11 }
  0x30   : > { %509 = vrot.lane.b32.xlu2 %v395_v12, %s7886_s30 }
  0x37   : > { %573 = vrot.lane.b32.xlu1 %v411_v13, %s7888_s12  ;;  %511 = vrot.lane.b32.xlu0 %v396_v14, %s7886_s30  ;;  %v407_v14 = vmul.f32 4.0, %v375_v57 }
  0x38   : > { %575 = vrot.lane.b32.xlu2 %v412_v15, %s7888_s12 }
  0x3f   : > { %451 = vrot.lane.b32.xlu1 %v382_v18, %s7887_s11  ;;  %449 = vrot.lane.b32.xlu0 %v381_v19, %s7887_s11 }
  0x40   : > { %513 = vrot.lane.b32.xlu2 %v397_v20, %s7886_s30 }
  0x47   : > { %577 = vrot.lane.b32.xlu1 %v413_v21, %s7888_s12  ;;  %515 = vrot.lane.b32.xlu0 %v398_v22, %s7886_s30 }
  0x48   : > { %579 = vrot.lane.b32.xlu2 %v414_v23, %s7888_s12 }
  0x4f   : > { %455 = vrot.lane.b32.xlu1 %v384_v26, %s7887_s11  ;;  %453 = vrot.lane.b32.xlu0 %v383_v27, %s7887_s11 }
  0x50   : > { %517 = vrot.lane.b32.xlu2 %v399_v28, %s7886_s30  ;;  %v11988_v28 = vmov 683565275  }
  0x57   : > { %581 = vrot.lane.b32.xlu1 %v415_v29, %s7888_s12  ;;  %519 = vrot.lane.b32.xlu0 %v400_v30, %s7886_s30  ;;  %v11986_v30 = vmov 2475754826  }
  0x58   : > { %583 = vrot.lane.b32.xlu2 %v416_v31, %s7888_s12 }
  0x5f   : > { %459 = vrot.lane.b32.xlu1 %v386_v34, %s7887_s11  ;;  %457 = vrot.lane.b32.xlu0 %v385_v35, %s7887_s11 }
  0x60   : > { %521 = vrot.lane.b32.xlu2 %v401_v36, %s7886_s30  ;;  %v11982_v36 = vmov 2102212464  }
  0x67   : > { %585 = vrot.lane.b32.xlu1 %v417_v37, %s7888_s12  ;;  %523 = vrot.lane.b32.xlu0 %v402_v38, %s7886_s30 }
  0x68   : > { %587 = vrot.lane.b32.xlu2 %v418_v39, %s7888_s12  ;;  %v11980_v39 = vmov 920167782  }
  0x6f   : > { %463 = vrot.lane.b32.xlu1 %v388_v42, %s7887_s11  ;;  %461 = vrot.lane.b32.xlu0 %v387_v43, %s7887_s11  ;;  %v11978_v42 = vmov 1326507024  }
  0x70   : > { %525 = vrot.lane.b32.xlu2 %v403_v44, %s7886_s30 }
  0x77   : > { %589 = vrot.lane.b32.xlu1 %v419_v45, %s7888_s12  ;;  %527 = vrot.lane.b32.xlu0 %v404_v46, %s7886_s30 }
  0x78   : > { %591 = vrot.lane.b32.xlu2 %v420_v47, %s7888_s12 }
  0x7a   : > { %v570_v60 = vpop.permute.xlu2 %569 }
  0x7f   : > { %467 = vrot.lane.b32.xlu1 %v390_v51, %s7887_s11  ;;  %465 = vrot.lane.b32.xlu0 %v389_v52, %s7887_s11 }
  0x80   : > { %529 = vrot.lane.b32.xlu2 %v405_v53, %s7886_s30 }
  0x82   : > { %v572_v11 = vpop.permute.xlu2 %571 }
  0x87   : > { %593 = vrot.lane.b32.xlu1 %v421_v54, %s7888_s12  ;;  %531 = vrot.lane.b32.xlu0 %v406_v55, %s7886_s30 }
  0x88   : > { %595 = vrot.lane.b32.xlu2 %v422_v63, %s7888_s12 }
  0x8f   : > { %471 = vrot.lane.b32.xlu1 %v392_v58, %s7887_s11  ;;  %469 = vrot.lane.b32.xlu0 %v391_v59, %s7887_s11 }
  0x90   : > { %533 = vrot.lane.b32.xlu2 %v407_v14, %s7886_s30 }
  0x91   : > { %v506_v61 = vpop.permute.xlu1 %505  ;;  %v442_v62 = vpop.permute.xlu0 %441 }
  0x92   : > { %v618_v1 = vsel %vm12077_vm0, %v8011_v0, %v442_v62 }
  0x93   : > { %v635_v2 = vsel %vm12074_vm1, %v618_v1, %v506_v61 }
  0x94   : > { %v8106_v6 = vsel %vm12073_vm2, %v635_v2, %v570_v60 }
  0x95   : > { %12105 = vst [vmem:[#allocation5_spill] sm:$0xff] %v8106_v6  ;;  %v671_v7 = vand.u32 2139095040, %v8106_v6  ;;  %v11975_v15 = vand.u32 2147483647, %v8106_v6 }
  0x97   : > { %v672_v10 = vshrl.u32 %v671_v7, 23  ;;  %597 = vrot.lane.b32.xlu1 %v423_v3, %s7888_s12  ;;  %535 = vrot.lane.b32.xlu0 %v408_v5, %s7886_s30  ;;  %v675_v21 = vand.u32 8388607, %v11975_v15  ;;  %s7195_s30 = sshll.u32 %s7192_s27, 4  ;;  %s7196_s30 = int_to_ptr.hbm [resolvable:$true] %s7195_s30 }
  0x98   : > { %s7836_s20 = sshra.s32 %s7196_s30, 4  ;;  %s7837_s20 = int_to_ptr.hbm [resolvable:$true] %s7836_s20 }
  0x99   : > { %v7265_v12 = vadd.s32 4294967169, %v672_v10  ;;  %v508_v0 = vpop.permute.xlu1 %507  ;;  %v444_v13 = vpop.permute.xlu0 %443  ;;  %s7838_s17 = scalar_lea.hbm %s7837_s20, 16  ;;  %p7843_p0 = scmp.lt.s32.totalorder %s7837_s20, %s11971_s10 }
  0x9a   : > { %v619_v16 = vsel %vm12077_vm0, %v8019_v4, %v444_v13  ;;  %v676_v4 = vor.u32 8388608, %v675_v21  ;;  %p7839_p11 = scmp.ne.s32.totalorder %s7837_s20, %s7838_s17  ;;  %p7844_p1 = scmp.lt.s32.totalorder %s7842_s26, %s7838_s17 }
  0x9b   : > { %v678_v18 = vadd.s32 1, %v7265_v12  ;;  %v636_v19 = vsel %vm12074_vm1, %v619_v16, %v508_v0 }
  0x9c   : > { %v8117_v20 = vsel %vm12073_vm2, %v636_v19, %v572_v11  ;;  %v8169_v60 = vshll.u32 %v676_v4, 8  ;;  %p7840_p12 = pnand %p7839_p11, %p7994_p5  ;;  %p7845_p2 = por %p7844_p1, %p7843_p0 }
  0x9d   : > { %12106 = vst [vmem:[#allocation6_spill] sm:$0xff] %v8117_v20  ;;  %vm679_vm3 = vcmp.gt.s32.totalorder %v678_v18, 0  ;;  %v826_v23 = vand.u32 2139095040, %v8117_v20  ;;  %v11974_v53 = vand.u32 2147483647, %v8117_v20 }
  0x9e   : > { %v680_v22 = vsel %vm679_vm3, %v678_v18, 0  ;;  %v717_v2 = vand.u32 65535, %v8169_v60  ;;  %v718_v14 = vshrl.u32 %v8169_v60, 16  ;;  %p7841_p13 = pneg %p7840_p12 }
  0x9f   : > { %v682_v24 = vand.u32 31, %v680_v22  ;;  %v827_v26 = vshrl.u32 %v826_v23, 23  ;;  %v8124_v27 = vshrl.u32 %v680_v22, 5  ;;  %v830_v1 = vand.u32 8388607, %v11974_v53 }
  0xa0   : > { %p7846_p3 = pnand %p7845_p2, %p7841_p13 }
  0xa1   : > { %v8122_v25 = vsub.s32 32, %v682_v24  ;;  %v685_v29 = vshll.u32 %v11988_v28, %v682_v24  ;;  %v688_v31 = vshll.u32 %v11986_v30, %v682_v24  ;;  %v691_v35 = vshll.u32 %v11984_v33, %v682_v24 }
  0xa2   : > { %v694_v38 = vshll.u32 %v11982_v36, %v682_v24  ;;  %v697_v41 = vshll.u32 %v11980_v39, %v682_v24  ;;  %v7268_v47 = vadd.s32 4294967169, %v827_v26  ;;  %vm700_vm4 = vcmp.lt.s32.totalorder %v8124_v27, 1 }
  0xa3   : > { %v686_v32 = vshrl.u32 %v11986_v30, %v8122_v25  ;;  %v689_v34 = vshrl.u32 %v11984_v33, %v8122_v25  ;;  %v692_v37 = vshrl.u32 %v11982_v36, %v8122_v25  ;;  %v695_v40 = vshrl.u32 %v11980_v39, %v8122_v25 }
  0xa4   : > { %v698_v43 = vshrl.u32 %v11978_v42, %v8122_v25  ;;  %vm703_vm5 = vcmp.lt.s32.totalorder %v8124_v27, 4  ;;  %vm702_vm6 = vcmp.lt.s32.totalorder %v8124_v27, 3  ;;  %v833_v57 = vadd.s32 1, %v7268_v47 }
  0xa5   : > { %v8141_v44 = vor.u32 %v686_v32, %v685_v29  ;;  %v8143_v45 = vor.u32 %v689_v34, %v688_v31  ;;  %v8145_v46 = vor.u32 %v692_v37, %v691_v35  ;;  %v696_v49 = vor.u32 %v695_v40, %v694_v38 }
  0xa6   : > { %v699_v50 = vor.u32 %v698_v43, %v697_v41  ;;  %vm701_vm7 = vcmp.lt.s32.totalorder %v8124_v27, 2  ;;  %vm834_vm8 = vcmp.gt.s32.totalorder %v833_v57, 0  ;;  %v831_v11 = vor.u32 8388608, %v830_v1 }
  0xa7   : > { %v708_v51 = vsel %vm700_vm4, %v8141_v44, %v8143_v45  ;;  %v712_v52 = vsel %vm700_vm4, %v8143_v45, %v8145_v46  ;;  %v709_v54 = vsel %vm703_vm5, %v696_v49, 920167782  ;;  %v835_v5 = vsel %vm834_vm8, %v833_v57, 0 }
  0xa8   : > { %v713_v55 = vsel %vm703_vm5, %v699_v50, 1326507024  ;;  %v710_v58 = vsel %vm702_vm6, %v8145_v46, %v709_v54  ;;  %v837_v13 = vand.u32 31, %v835_v5  ;;  %v8188_v22 = vshll.u32 %v831_v11, 8 }
  0xa9   : > { %v714_v59 = vsel %vm702_vm6, %v696_v49, %v713_v55  ;;  %v711_v61 = vsel %vm701_vm7, %v708_v51, %v710_v58  ;;  %v8201_v37 = vshrl.u32 %v835_v5, 5 }
  0xaa   : > { %v715_v62 = vsel %vm701_vm7, %v712_v52, %v714_v59  ;;  %v742_v63 = vshrl.u32 %v711_v61, 16  ;;  %v741_v0 = vand.u32 65535, %v711_v61  ;;  %v8184_v18 = vsub.s32 32, %v837_v13 }
  0xab   : > { %v720_v3 = vshrl.u32 %v715_v62, 16  ;;  %v719_v10 = vand.u32 65535, %v715_v62  ;;  %v840_v29 = vshll.u32 %v11988_v28, %v837_v13  ;;  %v843_v32 = vshll.u32 %v11986_v30, %v837_v13 }
  0xac   : > { %v8178_v7 = vmul.u32 %v742_v63, %v717_v2  ;;  %v743_v26 = vmul.u32 %v741_v0, %v717_v2  ;;  %v8191_v4 = vmul.u32 %v741_v0, %v718_v14  ;;  %v841_v31 = vshrl.u32 %v11986_v30, %v8184_v18 }
  0xad   : > { %v8180_v12 = vmul.u32 %v720_v3, %v717_v2  ;;  %v721_v19 = vmul.u32 %v719_v10, %v717_v2  ;;  %v8186_v21 = vmul.u32 %v719_v10, %v718_v14  ;;  %v724_v23 = vmul.u32 %v720_v3, %v718_v14  ;;  %v8243_v10 = vpop.permute.xlu1 %447 }
  0xae   : > { %v747_v16 = vshll.u32 %v8178_v7, 16  ;;  %v844_v34 = vshrl.u32 %v11984_v33, %v8184_v18  ;;  %v846_v38 = vshll.u32 %v11984_v33, %v837_v13  ;;  %v847_v40 = vshrl.u32 %v11982_v36, %v8184_v18 }
  0xaf   : > { %v725_v24 = vshll.u32 %v8180_v12, 16  ;;  %v8206_v41 = vor.u32 %v841_v31, %v840_v29  ;;  %v849_v47 = vshll.u32 %v11982_v36, %v837_v13  ;;  %v850_v49 = vshrl.u32 %v11980_v39, %v8184_v18 }
  0xb0   : > { %v8199_v35 = vadd.s32 %v747_v16, %v743_v26  ;;  %v8208_v43 = vor.u32 %v844_v34, %v843_v32  ;;  %vm751_vm9 = vc.u32 %v743_v26, %v747_v16  ;;  %v8213_v50 = vor.u32 %v847_v40, %v846_v38  ;;  %v446_v40 = vpop.permute.xlu0 %445 }
  0xb1   : > { %v852_v51 = vshll.u32 %v11980_v39, %v837_v13  ;;  %v853_v52 = vshrl.u32 %v11978_v42, %v8184_v18  ;;  %v727_v54 = vshll.u32 %v8186_v21, 16  ;;  %v746_v55 = vmul.u32 %v742_v63, %v718_v14 }
  0xb2   : > { %v749_v57 = vshll.u32 %v8191_v4, 16  ;;  %v851_v58 = vor.u32 %v850_v49, %v849_v47  ;;  %vm729_vm10 = vc.u32 %v721_v19, %v725_v24  ;;  %v731_v59 = vadd.s32 %v725_v24, %v721_v19 }
  0xb3   : > { %v854_v61 = vor.u32 %v853_v52, %v852_v51  ;;  %vm855_vm11 = vcmp.lt.s32.totalorder %v8201_v37, 1  ;;  %v752_v62 = vsel %vm751_vm9, 1, %v11995_v48  ;;  %vm858_vm13 = vcmp.lt.s32.totalorder %v8201_v37, 4 }
  0xb4   : > { %vm8225_vm12 = vc.u32 %v8199_v35, %v749_v57  ;;  %v863_v63 = vsel %vm855_vm11, %v8206_v41, %v8208_v43  ;;  %vm857_vm14 = vcmp.lt.s32.totalorder %v8201_v37, 3  ;;  %v864_v2 = vsel %vm858_vm13, %v851_v58, 920167782 }
  0xb5   : > { %v867_v3 = vsel %vm855_vm11, %v8208_v43, %v8213_v50  ;;  %v868_v5 = vsel %vm858_vm13, %v854_v61, 1326507024  ;;  %v730_v11 = vsel %vm729_vm10, 1, %v11995_v48  ;;  %vm856_vm15 = vcmp.lt.s32.totalorder %v8201_v37, 2  ;;  %v574_v61 = vpop.permute.xlu1 %573 }
  0xb6   : > { %v865_v0 = vsel %vm857_vm14, %v8213_v50, %v864_v2  ;;  %v869_v13 = vsel %vm857_vm14, %v851_v58, %v868_v5  ;;  %vm733_vm3 = vc.u32 %v731_v59, %v727_v54  ;;  %v754_v14 = vadd.s32 %v752_v62, %v746_v55  ;;  %v510_v58 = vpop.permute.xlu2 %509 }
  0xb7   : > { %v866_v16 = vsel %vm856_vm15, %v863_v63, %v865_v0  ;;  %v870_v19 = vsel %vm856_vm15, %v867_v3, %v869_v13  ;;  %v756_v24 = vsel %vm8225_vm12, 1, %v11995_v48  ;;  %v732_v29 = vadd.s32 %v730_v11, %v724_v23 }
  0xb8   : > { %v875_v26 = vshrl.u32 %v870_v19, 16  ;;  %v734_v31 = vsel %vm733_vm3, 1, %v11995_v48  ;;  %v872_v32 = vand.u32 65535, %v8188_v22  ;;  %v897_v34 = vshrl.u32 %v866_v16, 16 }
  0xb9   : > { %v758_v38 = vadd.s32 %v756_v24, %v754_v14  ;;  %v736_v49 = vadd.s32 %v734_v31, %v732_v29  ;;  %v748_v51 = vshrl.u32 %v8178_v7, 16  ;;  %v874_v52 = vand.u32 65535, %v870_v19 }
  0xba   : > { %v8261_v47 = vmul.u32 %v875_v26, %v872_v32  ;;  %v8264_v54 = vmul.u32 %v897_v34, %v872_v32  ;;  %v620_v55 = vsel %vm12077_vm0, %v8031_v9, %v446_v40  ;;  %v726_v23 = vshrl.u32 %v8180_v12, 16 }
  0xbb   : > { %v759_v59 = vadd.s32 %v758_v38, %v748_v51  ;;  %v873_v62 = vshrl.u32 %v8188_v22, 16  ;;  %v896_v63 = vand.u32 65535, %v866_v16  ;;  %v750_v3 = vshrl.u32 %v8191_v4, 16 }
  0xbc   : > { %v880_v1 = vshll.u32 %v8261_v47, 16  ;;  %v737_v2 = vadd.s32 %v736_v49, %v726_v23  ;;  %v637_v7 = vsel %vm12074_vm1, %v620_v55, %v510_v58  ;;  %v876_v5 = vmul.u32 %v874_v52, %v872_v32 }
  0xbd   : > { %v8273_v11 = vmul.u32 %v874_v52, %v873_v62  ;;  %v902_v9 = vshll.u32 %v8264_v54, 16  ;;  %v8277_v0 = vsel %vm12073_vm2, %v637_v7, %v574_v61  ;;  %v684_v12 = vshrl.u32 %v11988_v28, %v8122_v25  ;;  %v512_v7 = vpop.permute.xlu0 %511 }
  0xbe   : > { %12109 = vst [vmem:[#allocation7_spill] sm:$0xff] %v8277_v0  ;;  %v705_v13 = vsel %vm703_vm5, %v8145_v46, 2102212464  ;;  %v728_v14 = vshrl.u32 %v8186_v21, 16  ;;  %v760_v16 = vadd.s32 %v759_v59, %v750_v3  ;;  %vm884_vm8 = vc.u32 %v876_v5, %v880_v1 }
  0xbf   : > { %v886_v19 = vadd.s32 %v880_v1, %v876_v5  ;;  %v898_v24 = vmul.u32 %v896_v63, %v872_v32  ;;  %v8285_v29 = vmul.u32 %v896_v63, %v873_v62  ;;  %v981_v38 = vand.u32 2139095040, %v8277_v0 }
  0xc0   : > { %v8287_v31 = vadd.s32 %v737_v2, %v728_v14  ;;  %v704_v25 = vsel %vm700_vm4, %v684_v12, %v8141_v44  ;;  %v882_v40 = vshll.u32 %v8273_v11, 16  ;;  %v706_v21 = vsel %vm702_vm6, %v8143_v45, %v705_v13  ;;  %v576_v13 = vpop.permute.xlu2 %575 }
  0xc1   : > { %vm906_vm9 = vc.u32 %v898_v24, %v902_v9  ;;  %v908_v46 = vadd.s32 %v902_v9, %v898_v24  ;;  %v8300_v32 = vadd.s32 %v8199_v35, %v749_v57  ;;  %v885_v49 = vsel %vm884_vm8, 1, %v11995_v48 }
  0xc2   : > { %v982_v51 = vshrl.u32 %v981_v38, 23  ;;  %v764_v52 = vadd.s32 1, %v760_v16  ;;  %v879_v55 = vmul.u32 %v875_v26, %v873_v62  ;;  %vm888_vm5 = vc.u32 %v886_v19, %v882_v40 }
  0xc3   : > { %v904_v44 = vshll.u32 %v8285_v29, 16  ;;  %vm763_vm4 = vc.u32 %v8287_v31, %v8300_v32  ;;  %v907_v58 = vsel %vm906_vm9, 1, %v11995_v48  ;;  %v707_v45 = vsel %vm701_vm7, %v704_v25, %v706_v21 }
  0xc4   : > { %v7271_v23 = vadd.s32 4294967169, %v982_v51  ;;  %v887_v4 = vadd.s32 %v885_v49, %v879_v55  ;;  %v901_v35 = vmul.u32 %v897_v34, %v873_v62  ;;  %v889_v57 = vsel %vm888_vm5, 1, %v11995_v48 }
  0xc5   : > { %vm910_vm6 = vc.u32 %v908_v46, %v904_v44  ;;  %v765_v61 = vsel %vm763_vm4, %v764_v52, %v760_v16  ;;  %v761_v1 = vmul.u32 %v8169_v60, %v707_v45  ;;  %v881_v9 = vshrl.u32 %v8261_v47, 16 }
  0xc6   : > { %v988_v59 = vadd.s32 1, %v7271_v23  ;;  %v909_v26 = vadd.s32 %v907_v58, %v901_v35  ;;  %v911_v63 = vsel %vm910_vm6, 1, %v11995_v48  ;;  %v891_v2 = vadd.s32 %v889_v57, %v887_v4 }
  0xc7   : > { %v8312_v5 = vadd.s32 %v765_v61, %v761_v1  ;;  %v621_v62 = vsel %vm12077_vm0, %v8028_v8, %v8243_v10  ;;  %v860_v14 = vsel %vm858_vm13, %v8213_v50, 2102212464  ;;  %v903_v19 = vshrl.u32 %v8264_v54, 16 }
  0xc8   : > { %vm989_vm10 = vcmp.gt.s32.totalorder %v988_v59, 0  ;;  %v913_v34 = vadd.s32 %v911_v63, %v909_v26  ;;  %v638_v60 = vsel %vm12074_vm1, %v621_v62, %v512_v7  ;;  %v892_v16 = vadd.s32 %v891_v2, %v881_v9 }
  0xc9   : > { %v990_v3 = vsel %vm989_vm10, %v988_v59, 0  ;;  %v11973_v24 = vand.u32 2147483647, %v8277_v0  ;;  %v767_v47 = vadd.s32 536870912, %v8312_v5  ;;  %v883_v38 = vshrl.u32 %v8273_v11, 16 }
  0xca   : > { %v992_v27 = vand.u32 31, %v990_v3  ;;  %v905_v25 = vshrl.u32 %v8285_v29, 16  ;;  %v914_v40 = vadd.s32 %v913_v34, %v903_v19  ;;  %v8336_v54 = vsel %vm12073_vm2, %v638_v60, %v576_v13 }
  0xcb   : > { %12110 = vst [vmem:[#allocation8_spill] sm:$0xff] %v8336_v54  ;;  %v8344_v52 = vadd.s32 %v892_v16, %v883_v38  ;;  %v985_v29 = vand.u32 8388607, %v11973_v24  ;;  %v8348_v55 = vshrl.u32 %v990_v3, 5  ;;  %v839_v57 = vshrl.u32 %v11988_v28, %v8184_v18 }
  0xcc   : > { %v8318_v12 = vsub.s32 32, %v992_v27  ;;  %v995_v21 = vshll.u32 %v11988_v28, %v992_v27  ;;  %v998_v49 = vshll.u32 %v11986_v30, %v992_v27  ;;  %v1004_v58 = vshll.u32 %v11982_v36, %v992_v27 }
  0xcd   : > { %v1001_v4 = vshll.u32 %v11984_v33, %v992_v27  ;;  %v1007_v35 = vshll.u32 %v11980_v39, %v992_v27  ;;  %v915_v59 = vadd.s32 %v914_v40, %v905_v25  ;;  %v1136_v26 = vand.u32 2139095040, %v8336_v54 }
  0xce   : > { %v996_v8 = vshrl.u32 %v11986_v30, %v8318_v12  ;;  %v999_v10 = vshrl.u32 %v11984_v33, %v8318_v12  ;;  %v1005_v50 = vshrl.u32 %v11980_v39, %v8318_v12  ;;  %v1002_v11 = vshrl.u32 %v11982_v36, %v8318_v12 }
  0xcf   : > { %v1008_v51 = vshrl.u32 %v11978_v42, %v8318_v12  ;;  %v8360_v1 = vadd.s32 %v908_v46, %v904_v44  ;;  %v859_v3 = vsel %vm855_vm11, %v839_v57, %v8206_v41  ;;  %v861_v7 = vsel %vm857_vm14, %v8208_v43, %v860_v14 }
  0xd0   : > { %v8351_v23 = vor.u32 %v996_v8, %v995_v21  ;;  %v8353_v45 = vor.u32 %v999_v10, %v998_v49  ;;  %v1006_v61 = vor.u32 %v1005_v50, %v1004_v58  ;;  %v8362_v63 = vor.u32 %v1002_v11, %v1001_v4 }
  0xd1   : > { %v1009_v2 = vor.u32 %v1008_v51, %v1007_v35  ;;  %v986_v27 = vor.u32 8388608, %v985_v29  ;;  %vm1010_vm7 = vcmp.lt.s32.totalorder %v8348_v55, 1  ;;  %v8371_v18 = vshrl.u32 %v767_v47, 30 }
  0xd2   : > { %vm918_vm12 = vc.u32 %v8344_v52, %v8360_v1  ;;  %vm1013_vm13 = vcmp.lt.s32.totalorder %v8348_v55, 4  ;;  %v1018_v46 = vsel %vm1010_vm7, %v8351_v23, %v8353_v45  ;;  %v919_v41 = vadd.s32 1, %v915_v59 }
  0xd3   : > { %vm1012_vm11 = vcmp.lt.s32.totalorder %v8348_v55, 3  ;;  %v1019_v43 = vsel %vm1013_vm13, %v1006_v61, 920167782  ;;  %v1137_v44 = vshrl.u32 %v1136_v26, 23  ;;  %vm1011_vm14 = vcmp.lt.s32.totalorder %v8348_v55, 2 }
  0xd4   : > { %v1020_v9 = vsel %vm1012_vm11, %v8362_v63, %v1019_v43  ;;  %v1022_v34 = vsel %vm1010_vm7, %v8353_v45, %v8362_v63  ;;  %v1023_v62 = vsel %vm1013_vm13, %v1009_v2, 1326507024  ;;  %v862_v60 = vsel %vm856_vm15, %v859_v3, %v861_v7 }
  0xd5   : > { %v1021_v13 = vsel %vm1011_vm14, %v1018_v46, %v1020_v9  ;;  %v1024_v14 = vsel %vm1012_vm11, %v1006_v61, %v1023_v62  ;;  %v8399_v16 = vshll.u32 %v986_v27, 8  ;;  %v920_v47 = vsel %vm918_vm12, %v919_v41, %v915_v59 }
  0xd6   : > { %v1025_v19 = vsel %vm1011_vm14, %v1022_v34, %v1024_v14  ;;  %v7274_v8 = vadd.s32 4294967169, %v1137_v44  ;;  %v769_v37 = vshll.u32 %v8371_v18, 30  ;;  %v916_v10 = vmul.u32 %v8188_v22, %v862_v60 }
  0xd7   : > { %v1030_v38 = vshrl.u32 %v1025_v19, 16  ;;  %v1052_v25 = vshrl.u32 %v1021_v13, 16  ;;  %v1027_v40 = vand.u32 65535, %v8399_v16  ;;  %v1029_v29 = vand.u32 65535, %v1025_v19 }
  0xd8   : > { %v921_v50 = vadd.s32 %v920_v47, %v916_v10  ;;  %v1143_v49 = vadd.s32 1, %v7274_v8  ;;  %v8412_v11 = vsub.s32 %v8312_v5, %v769_v37  ;;  %v11972_v58 = vand.u32 2147483647, %v8336_v54 }
  0xd9   : > { %v8409_v21 = vmul.u32 %v1030_v38, %v1027_v40  ;;  %v8414_v51 = vmul.u32 %v1052_v25, %v1027_v40  ;;  %v1051_v35 = vand.u32 65535, %v1021_v13  ;;  %v1028_v57 = vshrl.u32 %v8399_v16, 16 }
  0xda   : > { %v922_v4 = vadd.s32 536870912, %v921_v50  ;;  %vm1144_vm15 = vcmp.gt.s32.totalorder %v1143_v49, 0  ;;  %vm771_vm3 = vcmp.lt.s32.totalorder %v8412_v11, 0  ;;  %v772_v61 = vsub.s32 0, %v8412_v11 }
  0xdb   : > { %v1035_v22 = vshll.u32 %v8409_v21, 16  ;;  %v1057_v59 = vshll.u32 %v8414_v51, 16  ;;  %v1031_v5 = vmul.u32 %v1029_v29, %v1027_v40  ;;  %v8422_v26 = vmul.u32 %v1029_v29, %v1028_v57 }
  0xdc   : > { %v1140_v2 = vand.u32 8388607, %v11972_v58  ;;  %v8426_v3 = vshrl.u32 %v922_v4, 30  ;;  %v1053_v7 = vmul.u32 %v1051_v35, %v1027_v40  ;;  %v8428_v27 = vmul.u32 %v1051_v35, %v1028_v57 }
  0xdd   : > { %v1145_v46 = vsel %vm1144_vm15, %v1143_v49, 0  ;;  %v1041_v41 = vadd.s32 %v1035_v22, %v1031_v5  ;;  %vm1039_vm8 = vc.u32 %v1031_v5, %v1035_v22  ;;  %v773_v9 = vsel %vm771_vm3, %v772_v61, %v8412_v11 }
  0xde   : > { %vm1061_vm9 = vc.u32 %v1053_v7, %v1057_v59  ;;  %v8430_v43 = vadd.s32 %v1057_v59, %v1053_v7  ;;  %v1147_v44 = vand.u32 31, %v1145_v46  ;;  %v1037_v34 = vshll.u32 %v8422_v26, 16 }
  0xdf   : > { %v1141_v62 = vor.u32 8388608, %v1140_v2  ;;  %v924_v60 = vshll.u32 %v8426_v3, 30  ;;  %v1034_v13 = vmul.u32 %v1030_v38, %v1028_v57  ;;  %v1059_v14 = vshll.u32 %v8428_v27, 16 }
  0xe0   : > { %v8436_v19 = vsub.s32 32, %v1147_v44  ;;  %v1040_v47 = vsel %vm1039_vm8, 1, %v11995_v48  ;;  %vm8439_vm5 = vc.u32 %v1041_v41, %v1037_v34  ;;  %v1056_v37 = vmul.u32 %v1052_v25, %v1028_v57 }
  0xe1   : > { %v1062_v10 = vsel %vm1061_vm9, 1, %v11995_v48  ;;  %vm8447_vm4 = vc.u32 %v8430_v43, %v1059_v14  ;;  %v8451_v38 = vshrl.u32 %v1145_v46, 5  ;;  %v1150_v49 = vshll.u32 %v11988_v28, %v1147_v44 }
  0xe2   : > { %v1153_v29 = vshll.u32 %v11986_v30, %v1147_v44  ;;  %v1151_v4 = vshrl.u32 %v11986_v30, %v8436_v19  ;;  %v1154_v25 = vshrl.u32 %v11984_v33, %v8436_v19  ;;  %v1156_v35 = vshll.u32 %v11984_v33, %v1147_v44 }
  0xe3   : > { %v1159_v57 = vshll.u32 %v11982_v36, %v1147_v44  ;;  %v1157_v22 = vshrl.u32 %v11982_v36, %v8436_v19  ;;  %v1160_v59 = vshrl.u32 %v11980_v39, %v8436_v19  ;;  %v1162_v61 = vshll.u32 %v11980_v39, %v1147_v44 }
  0xe4   : > { %v1163_v5 = vshrl.u32 %v11978_v42, %v8436_v19  ;;  %v1042_v2 = vadd.s32 %v1040_v47, %v1034_v13  ;;  %v1064_v7 = vadd.s32 %v1062_v10, %v1056_v37  ;;  %v8468_v46 = vor.u32 %v1151_v4, %v1150_v49 }
  0xe5   : > { %v8470_v41 = vor.u32 %v1154_v25, %v1153_v29  ;;  %v1066_v34 = vsel %vm8447_vm4, 1, %v11995_v48  ;;  %v8475_v58 = vor.u32 %v1157_v22, %v1156_v35  ;;  %v1161_v24 = vor.u32 %v1160_v59, %v1159_v57 }
  0xe6   : > { %v1164_v53 = vor.u32 %v1163_v5, %v1162_v61  ;;  %v774_v15 = vclz %v773_v9  ;;  %v1044_v44 = vsel %vm8439_vm5, 1, %v11995_v48  ;;  %vm1165_vm6 = vcmp.lt.s32.totalorder %v8451_v38, 1 }
  0xe7   : > { %vm1168_vm10 = vcmp.lt.s32.totalorder %v8451_v38, 4  ;;  %v8482_v13 = vsub.s32 %v921_v50, %v924_v60  ;;  %vm1167_vm12 = vcmp.lt.s32.totalorder %v8451_v38, 3  ;;  %v1173_v47 = vsel %vm1165_vm6, %v8468_v46, %v8470_v41 }
  0xe8   : > { %v1174_v9 = vsel %vm1168_vm10, %v1161_v24, 920167782  ;;  %v1068_v37 = vadd.s32 %v1066_v34, %v1064_v7  ;;  %vm1166_vm15 = vcmp.lt.s32.totalorder %v8451_v38, 2  ;;  %v1177_v50 = vsel %vm1165_vm6, %v8470_v41, %v8475_v58 }
  0xe9   : > { %v1175_v8 = vsel %vm1167_vm12, %v8475_v58, %v1174_v9  ;;  %v1046_v60 = vadd.s32 %v1044_v44, %v1042_v2  ;;  %v1178_v40 = vsel %vm1168_vm10, %v1164_v53, 1326507024  ;;  %v8505_v49 = vshll.u32 %v1141_v62, 8 }
  0xea   : > { %v8501_v10 = vsel %vm1166_vm15, %v1173_v47, %v1175_v8  ;;  %v1058_v29 = vshrl.u32 %v8414_v51, 16  ;;  %v1179_v4 = vsel %vm1167_vm12, %v1161_v24, %v1178_v40  ;;  %v7266_v25 = vadd.s32 4294967294, %v774_v15  ;;  %v8521_v24 = vpop.permute.xlu1 %451 }
  0xeb   : > { %v1036_v35 = vshrl.u32 %v8409_v21, 16  ;;  %v8513_v57 = vsel %vm1166_vm15, %v1177_v50, %v1179_v4  ;;  %v1207_v22 = vshrl.u32 %v8501_v10, 16  ;;  %v927_v61 = vsub.s32 0, %v8482_v13 }
  0xec   : > { %v1069_v59 = vadd.s32 %v1068_v37, %v1058_v29  ;;  %v1182_v62 = vand.u32 65535, %v8505_v49  ;;  %vm926_vm3 = vcmp.lt.s32.totalorder %v8482_v13, 0  ;;  %v1060_v51 = vshrl.u32 %v8428_v27, 16 }
  0xed   : > { %v1047_v53 = vadd.s32 %v1046_v60, %v1036_v35  ;;  %v1185_v15 = vshrl.u32 %v8513_v57, 16  ;;  %vm7267_vm8 = vcmp.lt.s32.totalorder %v7266_v25, 0  ;;  %v1038_v21 = vshrl.u32 %v8422_v26, 16 }
  0xee   : > { %v8524_v5 = vmul.u32 %v1207_v22, %v1182_v62  ;;  %v994_v2 = vshrl.u32 %v11988_v28, %v8318_v12  ;;  %v1015_v7 = vsel %vm1013_vm13, %v8362_v63, 2102212464  ;;  %v1070_v34 = vadd.s32 %v1069_v59, %v1060_v51 }
  0xef   : > { %v928_v44 = vsel %vm926_vm3, %v927_v61, %v8482_v13  ;;  %v8532_v47 = vadd.s32 %v1047_v53, %v1038_v21  ;;  %v1206_v9 = vand.u32 65535, %v8501_v10  ;;  %v8535_v37 = vsel %vm7267_vm8, 0, %v7266_v25  ;;  %v514_v61 = vpop.permute.xlu2 %513 }
  0xf0   : > { %v1014_v26 = vsel %vm1010_vm7, %v994_v2, %v8351_v23  ;;  %v8540_v8 = vmul.u32 %v1185_v15, %v1182_v62  ;;  %v1016_v12 = vsel %vm1012_vm11, %v8353_v45, %v1015_v7  ;;  %v8548_v63 = vadd.s32 %v8430_v43, %v1059_v14  ;;  %v450_v23 = vpop.permute.xlu0 %449 }
  0xf1   : > { %v1183_v50 = vshrl.u32 %v8505_v49, 16  ;;  %v1212_v60 = vshll.u32 %v8524_v5, 16  ;;  %v929_v10 = vclz %v928_v44  ;;  %v1074_v40 = vadd.s32 1, %v1070_v34 }
  0xf2   : > { %v1184_v29 = vand.u32 65535, %v8513_v57  ;;  %v782_v4 = vsub.s32 4294967266, %v8535_v37  ;;  %vm1073_vm7 = vc.u32 %v8532_v47, %v8548_v63  ;;  %v1208_v45 = vmul.u32 %v1206_v9, %v1182_v62  ;;  %v578_v55 = vpop.permute.xlu1 %577 }
  0xf3   : > { %v8556_v25 = vmul.u32 %v1206_v9, %v1183_v50  ;;  %v1017_v27 = vsel %vm1011_vm14, %v1014_v26, %v1016_v12  ;;  %v1190_v43 = vshll.u32 %v8540_v8, 16  ;;  %v424_v57 = vmul.f32 8.0, %v8094_v56 }
  0xf4   : > { %vm8561_vm13 = vc.u32 %v1208_v45, %v1212_v60  ;;  %v8565_v35 = vadd.s32 %v1212_v60, %v1208_v45  ;;  %v622_v59 = vsel %vm12077_vm0, %v8047_v17, %v450_v23  ;;  %v7269_v53 = vadd.s32 4294967294, %v929_v10 }
  0xf5   : > { %v1075_v51 = vsel %vm1073_vm7, %v1074_v40, %v1070_v34  ;;  %v1186_v21 = vmul.u32 %v1184_v29, %v1182_v62  ;;  %v8570_v2 = vmul.u32 %v1184_v29, %v1183_v50  ;;  %v783_v7 = vadd.s32 127, %v782_v4  ;;  %599 = vrot.lane.b32.xlu2 %v424_v57, %s7888_s12  ;;  %s7182_s12 = scalar_lea.sflag [#allocation3], %s351_s21 }
  0xf6   : > { %v1071_v44 = vmul.u32 %v8399_v16, %v1017_v27  ;;  %v1214_v9 = vshll.u32 %v8556_v25, 16  ;;  %v1217_v17 = vsel %vm8561_vm13, 1, %v11995_v48  ;;  %v639_v56 = vsel %vm12074_vm1, %v622_v59, %v514_v61 }
  0xf7   : > { %vm1194_vm11 = vc.u32 %v1186_v21, %v1190_v43  ;;  %v1196_v26 = vadd.s32 %v1190_v43, %v1186_v21  ;;  %v1211_v62 = vmul.u32 %v1207_v22, %v1183_v50  ;;  %v8583_v16 = vsel %vm12073_vm2, %v639_v56, %v578_v55 }
  0xf8   : > { %v1076_v34 = vadd.s32 %v1075_v51, %v1071_v44  ;;  %vm1220_vm14 = vc.u32 %v8565_v35, %v1214_v9  ;;  %12117 = vst [vmem:[#allocation9_spill] sm:$0xff] %v8583_v16  ;;  %v778_v12 = vsub.s32 32, %v8535_v37  ;;  %vm7270_vm9 = vcmp.lt.s32.totalorder %v7269_v53, 0 }
  0xf9   : > { %v1192_v60 = vshll.u32 %v8570_v2, 16  ;;  %v784_v10 = vshll.u32 %v783_v7, 23  ;;  %v1195_v40 = vsel %vm1194_vm11, 1, %v11995_v48  ;;  %v1219_v29 = vadd.s32 %v1217_v17, %v1211_v62  ;;  %v516_v17 = vpop.permute.xlu0 %515 }
  0xfa   : > { %v1291_v23 = vand.u32 2139095040, %v8583_v16  ;;  %v762_v22 = vadd.s32 %v8300_v32, %v8287_v31  ;;  %v1189_v4 = vmul.u32 %v1185_v15, %v1183_v50  ;;  %v1221_v45 = vsel %vm1220_vm14, 1, %v11995_v48 }
  0xfb   : > { %vm1198_vm5 = vc.u32 %v1196_v26, %v1192_v60  ;;  %v8592_v27 = vsel %vm7270_vm9, 0, %v7269_v53  ;;  %v1077_v43 = vadd.s32 536870912, %v1076_v34  ;;  %v8594_v61 = vor.u32 4788187, %v784_v10  ;;  %v7795_v60 = vld [vmem:[%s8008_s29 + $0x28] sm:$0xff] }
  0xfc   : > { %v1292_v14 = vshrl.u32 %v1291_v23, 23  ;;  %v780_v57 = vshrl.u32 %v762_v22, %v778_v12  ;;  %v1197_v59 = vadd.s32 %v1195_v40, %v1189_v4  ;;  %v1199_v51 = vsel %vm1198_vm5, 1, %v11995_v48  ;;  %v580_v23 = vpop.permute.xlu2 %579 }
  0xfd   : > { %v1223_v21 = vadd.s32 %v1221_v45, %v1219_v29  ;;  %v779_v31 = vshll.u32 %v8412_v11, %v8535_v37  ;;  %v937_v32 = vsub.s32 4294967266, %v8592_v27  ;;  %v8600_v15 = vshrl.u32 %v1077_v43, 30 }
  0xfe   : > { %v7277_v55 = vadd.s32 4294967169, %v1292_v14  ;;  %v1213_v50 = vshrl.u32 %v8524_v5, 16  ;;  %v917_v44 = vadd.s32 %v8360_v1, %v8344_v52  ;;  %v1201_v26 = vadd.s32 %v1199_v51, %v1197_v59 }
  0xff   : > { %v8603_v7 = vor.u32 %v780_v57, %v779_v31  ;;  %v786_v56 = vand.u32 2147483647, %v8594_v61  ;;  %v933_v62 = vsub.s32 32, %v8592_v27  ;;  %v938_v11 = vadd.s32 127, %v937_v32 }
 0x100   : > { %v1298_v53 = vadd.s32 1, %v7277_v55  ;;  %v1224_v12 = vadd.s32 %v1223_v21, %v1213_v50  ;;  %v1191_v37 = vshrl.u32 %v8540_v8, 16  ;;  %v623_v5 = vsel %vm12077_vm0, %v7795_v60, %v8521_v24 }
 0x101   : > { %v1079_v40 = vshll.u32 %v8600_v15, 30  ;;  %v1215_v52 = vshrl.u32 %v8556_v25, 16  ;;  %v640_v29 = vsel %vm12074_vm1, %v623_v5, %v516_v17  ;;  %v1149_v22 = vshrl.u32 %v11988_v28, %v8436_v19 }
 0x102   : > { %vm1299_vm4 = vcmp.gt.s32.totalorder %v1298_v53, 0  ;;  %v1170_v8 = vsel %vm1168_vm10, %v8475_v58, 2102212464  ;;  %v1202_v4 = vadd.s32 %v1201_v26, %v1191_v37  ;;  %v11977_v45 = vand.u32 2147483647, %v8583_v16 }
 0x103   : > { %v1300_v10 = vsel %vm1299_vm4, %v1298_v53, 0  ;;  %v934_v24 = vshll.u32 %v8482_v13, %v8592_v27  ;;  %v935_v43 = vshrl.u32 %v917_v44, %v933_v62  ;;  %v1225_v14 = vadd.s32 %v1224_v12, %v1215_v52 }
 0x104   : > { %v1302_v1 = vand.u32 31, %v1300_v10  ;;  %v939_v59 = vshll.u32 %v938_v11, 23  ;;  %v1169_v51 = vsel %vm1165_vm6, %v1149_v22, %v8468_v46  ;;  %v1193_v19 = vshrl.u32 %v8570_v2, 16 }
 0x105   : > { %v8631_v21 = vsel %vm12073_vm2, %v640_v29, %v580_v23  ;;  %v8633_v58 = vsub.s32 %v1076_v34, %v1079_v40  ;;  %v1171_v13 = vsel %vm1167_vm12, %v8470_v41, %v1170_v8  ;;  %v1295_v46 = vand.u32 8388607, %v11977_v45 }
 0x106   : > { %v8624_v57 = vsub.s32 32, %v1302_v1  ;;  %12118 = vst [vmem:[#allocation10_spill] sm:$0xff] %v8631_v21  ;;  %v8642_v31 = vadd.s32 %v1202_v4, %v1193_v19  ;;  %v1305_v2 = vshll.u32 %v11988_v28, %v1302_v1  ;;  %v8652_v41 = vadd.s32 %v8565_v35, %v1214_v9 }
 0x107   : > { %v1229_v32 = vadd.s32 1, %v1225_v14  ;;  %v1308_v50 = vshll.u32 %v11986_v30, %v1302_v1  ;;  %v1446_v53 = vand.u32 2139095040, %v8631_v21  ;;  %v8656_v44 = vshrl.u32 %v1300_v10, 5 }
 0x108   : > { %v1306_v27 = vshrl.u32 %v11986_v30, %v8624_v57  ;;  %v1309_v55 = vshrl.u32 %v11984_v33, %v8624_v57  ;;  %v1312_v34 = vshrl.u32 %v11982_v36, %v8624_v57  ;;  %v1311_v17 = vshll.u32 %v11984_v33, %v1302_v1 }
 0x109   : > { %v1314_v62 = vshll.u32 %v11982_v36, %v1302_v1  ;;  %v1315_v25 = vshrl.u32 %v11980_v39, %v8624_v57  ;;  %v1317_v35 = vshll.u32 %v11980_v39, %v1302_v1  ;;  %v1318_v9 = vshrl.u32 %v11978_v42, %v8624_v57 }
 0x10a   : > { %v8658_v26 = vor.u32 %v1306_v27, %v1305_v2  ;;  %v8662_v12 = vor.u32 %v1309_v55, %v1308_v50  ;;  %v940_v11 = vor.u32 4788187, %v939_v59  ;;  %vm1228_vm6 = vc.u32 %v8642_v31, %v8652_v41 }
 0x10b   : > { %v1296_v37 = vor.u32 8388608, %v1295_v46  ;;  %v8671_v60 = vor.u32 %v1312_v34, %v1311_v17  ;;  %vm1081_vm10 = vcmp.lt.s32.totalorder %v8633_v58, 0  ;;  %v1172_v5 = vsel %vm1166_vm15, %v1169_v51, %v1171_v13 }
 0x10c   : > { %v1316_v10 = vor.u32 %v1315_v25, %v1314_v62  ;;  %v1319_v40 = vor.u32 %v1318_v9, %v1317_v35  ;;  %v1082_v52 = vsub.s32 0, %v8633_v58  ;;  %vm1320_vm12 = vcmp.lt.s32.totalorder %v8656_v44, 1 }
 0x10d   : > { %vm1323_vm3 = vcmp.lt.s32.totalorder %v8656_v44, 4  ;;  %v1447_v1 = vshrl.u32 %v1446_v53, 23  ;;  %v1230_v29 = vsel %vm1228_vm6, %v1229_v32, %v1225_v14  ;;  %vm1322_vm8 = vcmp.lt.s32.totalorder %v8656_v44, 3 }
 0x10e   : > { %v1328_v23 = vsel %vm1320_vm12, %v8658_v26, %v8662_v12  ;;  %v1329_v38 = vsel %vm1323_vm3, %v1316_v10, 920167782  ;;  %vm1321_vm15 = vcmp.lt.s32.totalorder %v8656_v44, 2  ;;  %v1332_v8 = vsel %vm1320_vm12, %v8662_v12, %v8671_v60 }
 0x10f   : > { %v1330_v22 = vsel %vm1322_vm8, %v8671_v60, %v1329_v38  ;;  %v8694_v4 = vshll.u32 %v1296_v37, 8  ;;  %v788_v14 = vcvt.s32.f32 %v8603_v7  ;;  %v1226_v59 = vmul.u32 %v8505_v49, %v1172_v5 }
 0x110   : > { %v1331_v51 = vsel %vm1321_vm15, %v1328_v23, %v1330_v22  ;;  %v1333_v19 = vsel %vm1323_vm3, %v1319_v40, 1326507024  ;;  %v936_v13 = vor.u32 %v935_v43, %v934_v24  ;;  %v1083_v27 = vsel %vm1081_vm10, %v1082_v52, %v8633_v58 }
 0x111   : > { %v1334_v55 = vsel %vm1322_vm8, %v1316_v10, %v1333_v19  ;;  %v789_v46 = vmul.f32 %v788_v14, %v786_v56  ;;  %v1231_v7 = vadd.s32 %v1230_v29, %v1226_v59  ;;  %v7280_v2 = vadd.s32 4294967169, %v1447_v1 }
 0x112   : > { %v1335_v49 = vsel %vm1321_vm15, %v1332_v8, %v1334_v55  ;;  %v941_v34 = vand.u32 2147483647, %v940_v11  ;;  %v1337_v32 = vand.u32 65535, %v8694_v4  ;;  %v1362_v24 = vshrl.u32 %v1331_v51, 16 }
 0x113   : > { %v1340_v50 = vshrl.u32 %v1335_v49, 16  ;;  %v1084_v43 = vclz %v1083_v27  ;;  %v1361_v53 = vand.u32 65535, %v1331_v51  ;;  %v943_v17 = vcvt.s32.f32 %v936_v13 }
 0x114   : > { %v1339_v62 = vand.u32 65535, %v1335_v49  ;;  %v11976_v35 = vand.u32 2147483647, %v8631_v21  ;;  %v1232_v61 = vadd.s32 536870912, %v1231_v7  ;;  %v1338_v56 = vshrl.u32 %v8694_v4, 16 }
 0x115   : > { %v8712_v25 = vmul.u32 %v1340_v50, %v1337_v32  ;;  %v8716_v9 = vmul.u32 %v1362_v24, %v1337_v32  ;;  %v1453_v37 = vadd.s32 1, %v7280_v2  ;;  %v790_v5 = vxor.u32 2147483648, %v789_v46 }
 0x116   : > { %v792_v11 = vsub.s32 4, %v8371_v18  ;;  %v944_v10 = vmul.f32 %v943_v17, %v941_v34  ;;  %v7272_v52 = vadd.s32 4294967294, %v1084_v43  ;;  %v1363_v1 = vmul.u32 %v1361_v53, %v1337_v32 }
 0x117   : > { %v1345_v40 = vshll.u32 %v8712_v25, 16  ;;  %v8720_v29 = vmul.u32 %v1361_v53, %v1338_v56  ;;  %v1367_v23 = vshll.u32 %v8716_v9, 16  ;;  %vm670_vm7 = vcmp.lt.s32.totalorder %v8106_v6, 0 }
 0x118   : > { %v1341_v38 = vmul.u32 %v1339_v62, %v1337_v32  ;;  %v8724_v22 = vmul.u32 %v1339_v62, %v1338_v56  ;;  %v1450_v8 = vand.u32 8388607, %v11976_v35  ;;  %v8728_v14 = vshrl.u32 %v1232_v61, 30 }
 0x119   : > { %vm1371_vm13 = vc.u32 %v1363_v1, %v1367_v23  ;;  %v8730_v59 = vadd.s32 %v1367_v23, %v1363_v1  ;;  %vm1454_vm11 = vcmp.gt.s32.totalorder %v1453_v37, 0  ;;  %v12119_v51 = vand.u32 2147483647, %v8106_v6 }
 0x11a   : > { %v791_v13 = vsel %vm670_vm7, %v790_v5, %v789_v46  ;;  %v793_v27 = vsel %vm670_vm7, %v792_v11, %v8371_v18  ;;  %v1351_v55 = vadd.s32 %v1345_v40, %v1341_v38  ;;  %v945_v49 = vxor.u32 2147483648, %v944_v10 }
 0x11b   : > { %vm8734_vm14 = vcmp.le.f32.partialorder %v12119_v51, 0.7853982  ;;  %vm7273_vm9 = vcmp.lt.s32.totalorder %v7272_v52, 0  ;;  %vm1349_vm5 = vc.u32 %v1341_v38, %v1345_v40  ;;  %v1369_v2 = vshll.u32 %v8720_v29, 16 }
 0x11c   : > { %v1347_v34 = vshll.u32 %v8724_v22, 16  ;;  %v1372_v32 = vsel %vm1371_vm13, 1, %v11995_v48  ;;  %v1451_v43 = vor.u32 8388608, %v1450_v8  ;;  %v1455_v53 = vsel %vm1454_vm11, %v1453_v37, 0 }
 0x11d   : > { %v1234_v17 = vshll.u32 %v8728_v14, 30  ;;  %v1366_v62 = vmul.u32 %v1362_v24, %v1338_v56  ;;  %vm1375_vm4 = vc.u32 %v8730_v59, %v1369_v2  ;;  %v1457_v18 = vand.u32 31, %v1455_v53 }
 0x11e   : > { %v8748_v46 = vsel %vm8734_vm14, 0, %v793_v27  ;;  %vm825_vm6 = vcmp.lt.s32.totalorder %v8117_v20, 0  ;;  %v1350_v61 = vsel %vm1349_vm5, 1, %v11995_v48  ;;  %vm1353_vm10 = vc.u32 %v1351_v55, %v1347_v34 }
 0x11f   : > { %v8755_v37 = vsel %vm8734_vm14, %v8106_v6, %v791_v13  ;;  %v1344_v24 = vmul.u32 %v1340_v50, %v1338_v56  ;;  %v1374_v5 = vadd.s32 %v1372_v32, %v1366_v62  ;;  %v8757_v11 = vsub.s32 32, %v1457_v18 }
 0x120   : > { %v8761_v40 = vsel %vm825_vm6, %v945_v49, %v944_v10  ;;  %v8764_v1 = vsel %vm7273_vm9, 0, %v7272_v52  ;;  %v1376_v23 = vsel %vm1375_vm4, 1, %v11995_v48  ;;  %v8767_v38 = vshll.u32 %v1451_v43, 8 }
 0x121   : > { %v8769_v8 = vsub.s32 %v1231_v7, %v1234_v17  ;;  %v1352_v51 = vadd.s32 %v1350_v61, %v1344_v24  ;;  %v1354_v19 = vsel %vm1353_vm10, 1, %v11995_v48  ;;  %v1461_v50 = vshrl.u32 %v11986_v30, %v8757_v11 }
 0x122   : > { %v1460_v56 = vshll.u32 %v11988_v28, %v1457_v18  ;;  %v1463_v10 = vshll.u32 %v11986_v30, %v1457_v18  ;;  %v1464_v52 = vshrl.u32 %v11984_v33, %v8757_v11  ;;  %v1467_v13 = vshrl.u32 %v11982_v36, %v8757_v11 }
 0x123   : > { %v1304_v7 = vshrl.u32 %v11988_v28, %v8624_v57  ;;  %v1378_v27 = vadd.s32 %v1376_v23, %v1374_v5  ;;  %v8782_v55 = vshrl.u32 %v1455_v53, 5  ;;  %v1466_v49 = vshll.u32 %v11984_v33, %v1457_v18 }
 0x124   : > { %v8785_v34 = vor.u32 %v1461_v50, %v1460_v56  ;;  %v8787_v32 = vor.u32 %v1464_v52, %v1463_v10  ;;  %v1469_v43 = vshll.u32 %v11982_v36, %v1457_v18  ;;  %v1470_v17 = vshrl.u32 %v11980_v39, %v8757_v11 }
 0x125   : > { %v1356_v62 = vadd.s32 %v1354_v19, %v1352_v51  ;;  %v8792_v61 = vor.u32 %v1467_v13, %v1466_v49  ;;  %v1472_v24 = vshll.u32 %v11980_v39, %v1457_v18  ;;  %v1473_v57 = vshrl.u32 %v11978_v42, %v8757_v11 }
 0x126   : > { %vm1236_vm7 = vcmp.lt.s32.totalorder %v8769_v8, 0  ;;  %v1237_v53 = vsub.s32 0, %v8769_v8  ;;  %v1368_v5 = vshrl.u32 %v8716_v9, 16  ;;  %v1471_v23 = vor.u32 %v1470_v17, %v1469_v43 }
 0x127   : > { %v12122_v50 = vand.u32 2147483647, %v8117_v20  ;;  %v1346_v51 = vshrl.u32 %v8712_v25, 16  ;;  %v1474_v19 = vor.u32 %v1473_v57, %v1472_v24  ;;  %vm1475_vm11 = vcmp.lt.s32.totalorder %v8782_v55, 1 }
 0x128   : > { %vm1478_vm14 = vcmp.lt.s32.totalorder %v8782_v55, 4  ;;  %v1379_v18 = vadd.s32 %v1378_v27, %v1368_v5  ;;  %vm1477_vm9 = vcmp.lt.s32.totalorder %v8782_v55, 3  ;;  %v1483_v9 = vsel %vm1475_vm11, %v8785_v34, %v8787_v32 }
 0x129   : > { %vm8802_vm13 = vcmp.le.f32.partialorder %v12122_v50, 0.7853982  ;;  %v1484_v10 = vsel %vm1478_vm14, %v1471_v23, 920167782  ;;  %v1357_v52 = vadd.s32 %v1356_v62, %v1346_v51  ;;  %vm1476_vm5 = vcmp.lt.s32.totalorder %v8782_v55, 2 }
 0x12a   : > { %v1485_v25 = vsel %vm1477_vm9, %v8792_v61, %v1484_v10  ;;  %v1487_v13 = vsel %vm1475_vm11, %v8787_v32, %v8792_v61  ;;  %v1325_v27 = vsel %vm1323_vm3, %v8671_v60, 2102212464  ;;  %v1370_v49 = vshrl.u32 %v8720_v29, 16 }
 0x12b   : > { %v1486_v43 = vsel %vm1476_vm5, %v1483_v9, %v1485_v25  ;;  %v1488_v17 = vsel %vm1478_vm14, %v1474_v19, 1326507024  ;;  %v1238_v62 = vsel %vm1236_vm7, %v1237_v53, %v8769_v8  ;;  %v1348_v24 = vshrl.u32 %v8724_v22, 16 }
 0x12c   : > { %v1489_v57 = vsel %vm1477_vm9, %v1471_v23, %v1488_v17  ;;  %v1517_v5 = vshrl.u32 %v1486_v43, 16  ;;  %v1324_v60 = vsel %vm1320_vm12, %v1304_v7, %v8658_v26  ;;  %v1380_v50 = vadd.s32 %v1379_v18, %v1370_v49  ;;  %v8849_v23 = vpop.permute.xlu1 %455 }
 0x12d   : > { %v1490_v51 = vsel %vm1476_vm5, %v1487_v13, %v1489_v57  ;;  %v1492_v19 = vand.u32 65535, %v8767_v38  ;;  %v1326_v53 = vsel %vm1322_vm8, %v8662_v12, %v1325_v27  ;;  %v8847_v9 = vadd.s32 %v1357_v52, %v1348_v24 }
 0x12e   : > { %v1494_v22 = vand.u32 65535, %v1490_v51  ;;  %v1495_v10 = vshrl.u32 %v1490_v51, 16  ;;  %v8853_v25 = vmul.f32 %v8755_v37, %v8755_v37  ;;  %v812_v26 = vadd.s32 3, %v8748_v46 }
 0x12f   : > { %v1516_v7 = vand.u32 65535, %v1486_v43  ;;  %v8856_v18 = vmul.u32 %v1517_v5, %v1492_v19  ;;  %v1092_v13 = vsub.s32 4294967266, %v8764_v1  ;;  %v8862_v12 = vadd.s32 %v8730_v59, %v1369_v2 }
 0x130   : > { %12125 = vst [vmem:[#allocation11_spill] sm:$0xff] %v8853_v25  ;;  %v1493_v52 = vshrl.u32 %v8767_v38, 16  ;;  %v8865_v27 = vmul.u32 %v1495_v10, %v1492_v19  ;;  %v8871_v49 = vsel %vm8802_vm13, %v8117_v20, %v8761_v40  ;;  %v1239_v43 = vclz %v1238_v62 }
 0x131   : > { %v1327_v17 = vsel %vm1321_vm15, %v1324_v60, %v1326_v53  ;;  %v1384_v24 = vadd.s32 1, %v1380_v50  ;;  %vm1383_vm12 = vc.u32 %v8847_v9, %v8862_v12  ;;  %v1496_v29 = vmul.u32 %v1494_v22, %v1492_v19  ;;  %v454_v53 = vpop.permute.xlu0 %453 }
 0x132   : > { %v8877_v59 = vmul.u32 %v1494_v22, %v1493_v52  ;;  %v1500_v2 = vshll.u32 %v8865_v27, 16  ;;  %v804_v57 = vmul.f32 -0.00019511016, %v8853_v25  ;;  %v947_v51 = vsub.s32 4, %v8426_v3 }
 0x133   : > { %v8882_v35 = vmul.u32 %v1516_v7, %v1493_v52  ;;  %v1522_v40 = vshll.u32 %v8856_v18, 16  ;;  %v8887_v44 = vmul.f32 %v8871_v49, %v8871_v49  ;;  %v1093_v62 = vadd.s32 127, %v1092_v13  ;;  %v7796_v13 = vld [vmem:[%s8008_s29 + $0x30] sm:$0xff] }
 0x134   : > { %vm1504_vm3 = vc.u32 %v1496_v29, %v1500_v2  ;;  %v1518_v60 = vmul.u32 %v1516_v7, %v1492_v19  ;;  %v7275_v22 = vadd.s32 4294967294, %v1239_v43  ;;  %v1381_v45 = vmul.u32 %v8694_v4, %v1327_v17  ;;  %v518_v7 = vpop.permute.xlu2 %517  ;;  %v582_v17 = vpop.permute.xlu1 %581 }
 0x135   : > { %12126 = vst [vmem:[#allocation12_spill] sm:$0xff] %v8887_v44  ;;  %v1385_v42 = vsel %vm1383_vm12, %v1384_v24, %v1380_v50  ;;  %v1506_v39 = vadd.s32 %v1500_v2, %v1496_v29  ;;  %v1502_v36 = vshll.u32 %v8877_v59, 16  ;;  %v1505_v33 = vsel %vm1504_vm3, 1, %v11995_v48 }
 0x136   : > { %v1521_v30 = vmul.u32 %v1517_v5, %v1493_v52  ;;  %vm1526_vm8 = vc.u32 %v1518_v60, %v1522_v40  ;;  %v1524_v28 = vshll.u32 %v8882_v35, 16  ;;  %v8894_v21 = vadd.s32 %v1522_v40, %v1518_v60 }
 0x137   : > { %v1527_v6 = vsel %vm1526_vm8, 1, %v11995_v48  ;;  %v624_v19 = vsel %vm12077_vm0, %v7796_v13, %v454_v53  ;;  %v1088_v4 = vsub.s32 32, %v8764_v1  ;;  %v8899_v50 = vadd.s32 %v1385_v42, %v1381_v45 }
 0x138   : > { %v1499_v43 = vmul.u32 %v1495_v10, %v1493_v52  ;;  %vm1508_vm15 = vc.u32 %v1506_v39, %v1502_v36  ;;  %v1094_v24 = vshll.u32 %v1093_v62, 23  ;;  %vm7276_vm4 = vcmp.lt.s32.totalorder %v7275_v22, 0 }
 0x139   : > { %v1529_v5 = vadd.s32 %v1527_v6, %v1521_v30  ;;  %vm1530_vm10 = vc.u32 %v8894_v21, %v1524_v28  ;;  %v1072_v29 = vadd.s32 %v8548_v63, %v8532_v47  ;;  %v641_v60 = vsel %vm12074_vm1, %v624_v19, %v518_v7 }
 0x13a   : > { %v1507_v2 = vadd.s32 %v1505_v33, %v1499_v43  ;;  %v1531_v40 = vsel %vm1530_vm10, 1, %v11995_v48  ;;  %v948_v36 = vsel %vm825_vm6, %v947_v51, %v8426_v3  ;;  %v1509_v39 = vsel %vm1508_vm15, 1, %v11995_v48 }
 0x13b   : > { %v8913_v6 = vsel %vm12073_vm2, %v641_v60, %v582_v17  ;;  %v805_v30 = vadd.f32 0.008332121, %v804_v57  ;;  %v1090_v42 = vshrl.u32 %v1072_v29, %v1088_v4  ;;  %v1242_v45 = vsel %vm7276_vm4, 0, %v7275_v22 }
 0x13c   : > { %12127 = vst [vmem:[#allocation13_spill] sm:$0xff] %v8913_v6  ;;  %v1387_v10 = vadd.s32 536870912, %v8899_v50  ;;  %v959_v33 = vmul.f32 -0.00019511016, %v8887_v44  ;;  %v1095_v47 = vor.u32 4788187, %v1094_v24  ;;  %v1533_v63 = vadd.s32 %v1531_v40, %v1529_v5  ;;  %v584_v55 = vpop.permute.xlu2 %583 }
 0x13d   : > { %v1601_v52 = vand.u32 2139095040, %v8913_v6  ;;  %v8918_v62 = vand.u32 3, %v812_v26  ;;  %v8921_v3 = vand.u32 3, %v8748_v46  ;;  %v1089_v51 = vshll.u32 %v8633_v58, %v8764_v1 }
 0x13e   : > { %v1511_v53 = vadd.s32 %v1509_v39, %v1507_v2  ;;  %v8927_v57 = vsel %vm8802_vm13, 0, %v948_v36  ;;  %v1247_v22 = vsub.s32 4294967266, %v1242_v45  ;;  %v1523_v13 = vshrl.u32 %v8856_v18, 16 }
 0x13f   : > { %12128 = vst [vmem:[#allocation14_spill] sm:$0xff] %v8918_v62  ;;  %v1602_v19 = vshrl.u32 %v1601_v52, 23  ;;  %v806_v7 = vmul.f32 %v805_v30, %v8853_v25  ;;  %v1091_v4 = vor.u32 %v1090_v42, %v1089_v51  ;;  %v8931_v26 = vshrl.u32 %v1387_v10, 30  ;;  %v520_v51 = vpop.permute.xlu0 %519 }
 0x140   : > { %12129 = vst [vmem:[#allocation15_spill] sm:$0xff] %v8921_v3  ;;  %v1501_v46 = vshrl.u32 %v8865_v27, 16  ;;  %v960_v43 = vadd.f32 0.008332121, %v959_v33  ;;  %v1096_v17 = vand.u32 2147483647, %v1095_v47  ;;  %v1534_v24 = vadd.s32 %v1533_v63, %v1523_v13 }
 0x141   : > { %v7283_v58 = vadd.s32 4294967169, %v1602_v19  ;;  %v1243_v1 = vsub.s32 32, %v1242_v45  ;;  %v12130_v56 = vmov 683565275   ;;  %v1480_v18 = vsel %vm1478_vm14, %v8792_v61, 2102212464 }
 0x142   : > { %v1459_v5 = vshrl.u32 %v12130_v56, %v8757_v11  ;;  %v1512_v29 = vadd.s32 %v1511_v53, %v1501_v46  ;;  %v1227_v2 = vadd.s32 %v8652_v41, %v8642_v31  ;;  %v1248_v40 = vadd.s32 127, %v1247_v22 }
 0x143   : > { %v1525_v60 = vshrl.u32 %v8882_v35, 16  ;;  %v1608_v27 = vadd.s32 1, %v7283_v58  ;;  %v1098_v36 = vcvt.s32.f32 %v1091_v4  ;;  %v1389_v39 = vshll.u32 %v8931_v26, 30 }
 0x144   : > { %v1479_v30 = vsel %vm1475_vm11, %v1459_v5, %v8785_v34  ;;  %v1503_v11 = vshrl.u32 %v8877_v59, 16  ;;  %v1481_v61 = vsel %vm1477_vm9, %v8787_v32, %v1480_v18  ;;  %v11994_v31 = vand.u32 2147483647, %v8913_v6 }
 0x145   : > { %v1535_v42 = vadd.s32 %v1534_v24, %v1525_v60  ;;  %vm1609_vm6 = vcmp.gt.s32.totalorder %v1608_v27, 0  ;;  %v1099_v41 = vmul.f32 %v1098_v36, %v1096_v17  ;;  %v1245_v10 = vshrl.u32 %v1227_v2, %v1243_v1 }
 0x146   : > { %v8951_v33 = vadd.s32 %v1512_v29, %v1503_v11  ;;  %v1610_v47 = vsel %vm1609_vm6, %v1608_v27, 0  ;;  %v807_v63 = vadd.f32 -0.16666654, %v806_v7  ;;  %v961_v52 = vmul.f32 %v960_v43, %v8887_v44  ;;  %v7797_v7 = vld [vmem:[%s8008_s29 + $0x38] sm:$0xff] }
 0x147   : > { %vm980_vm7 = vcmp.lt.s32.totalorder %v8277_v0, 0  ;;  %v1249_v34 = vshll.u32 %v1248_v40, 23  ;;  %v1612_v59 = vand.u32 31, %v1610_v47  ;;  %v1244_v32 = vshll.u32 %v8769_v8, %v1242_v45 }
 0x148   : > { %v8957_v53 = vsub.s32 %v8899_v50, %v1389_v39  ;;  %v1482_v22 = vsel %vm1476_vm5, %v1479_v30, %v1481_v61  ;;  %v8964_v13 = vadd.s32 %v8894_v21, %v1524_v28  ;;  %v1539_v19 = vadd.s32 1, %v1535_v42 }
 0x149   : > { %v625_v4 = vsel %vm12077_vm0, %v7797_v7, %v8849_v23  ;;  %v1605_v46 = vand.u32 8388607, %v11994_v31  ;;  %v8971_v8 = vsub.s32 32, %v1612_v59  ;;  %v1100_v50 = vxor.u32 2147483648, %v1099_v41 }
 0x14a   : > { %v1246_v45 = vor.u32 %v1245_v10, %v1244_v32  ;;  %vm1538_vm13 = vc.u32 %v8951_v33, %v8964_v13  ;;  %v642_v35 = vsel %vm12074_vm1, %v625_v4, %v520_v51  ;;  %v1250_v28 = vor.u32 4788187, %v1249_v34 }
 0x14b   : > { %v1536_v21 = vmul.u32 %v8767_v38, %v1482_v22  ;;  %v12131_v43 = vmov 2475754826   ;;  %v12132_v23 = vmov 2131351028   ;;  %vm1391_vm11 = vcmp.lt.s32.totalorder %v8957_v53, 0 }
 0x14c   : > { %v1616_v17 = vshrl.u32 %v12131_v43, %v8971_v8  ;;  %v1619_v24 = vshrl.u32 %v12132_v23, %v8971_v8  ;;  %v1392_v58 = vsub.s32 0, %v8957_v53  ;;  %v1615_v1 = vshll.u32 %v12130_v56, %v1612_v59 }
 0x14d   : > { %v12133_v5 = vmov 2102212464   ;;  %v12134_v29 = vand.u32 2147483647, %v8277_v0  ;;  %v1540_v38 = vsel %vm1538_vm13, %v1539_v19, %v1535_v42  ;;  %v1606_v40 = vor.u32 8388608, %v1605_v46 }
 0x14e   : > { %v1622_v18 = vshrl.u32 %v12133_v5, %v8971_v8  ;;  %v1618_v60 = vshll.u32 %v12131_v43, %v1612_v59  ;;  %v8994_v27 = vsel %vm12073_vm2, %v642_v35, %v584_v55  ;;  %v8996_v36 = vshrl.u32 %v1610_v47, 5 }
 0x14f   : > { %vm8988_vm14 = vcmp.le.f32.partialorder %v12134_v29, 0.7853982  ;;  %12137 = vst [vmem:[#allocation16_spill] sm:$0xff] %v8994_v27  ;;  %v8998_v39 = vor.u32 %v1616_v17, %v1615_v1  ;;  %v1621_v30 = vshll.u32 %v12132_v23, %v1612_v59  ;;  %v1624_v11 = vshll.u32 %v12133_v5, %v1612_v59 }
 0x150   : > { %v9002_v61 = vor.u32 %v1619_v24, %v1618_v60  ;;  %v12138_v10 = vmov 920167782   ;;  %v12139_v51 = vmov 1326507024   ;;  %v962_v22 = vadd.f32 -0.16666654, %v961_v52 }
 0x151   : > { %v1625_v34 = vshrl.u32 %v12138_v10, %v8971_v8  ;;  %v1627_v42 = vshll.u32 %v12138_v10, %v1612_v59  ;;  %v1628_v32 = vshrl.u32 %v12139_v51, %v8971_v8  ;;  %v1101_v47 = vsel %vm980_vm7, %v1100_v50, %v1099_v41 }
 0x152   : > { %v9011_v19 = vadd.s32 %v1540_v38, %v1536_v21  ;;  %v9013_v7 = vor.u32 %v1622_v18, %v1621_v30  ;;  %v1251_v4 = vand.u32 2147483647, %v1250_v28  ;;  %v1253_v46 = vcvt.s32.f32 %v1246_v45 }
 0x153   : > { %v1626_v35 = vor.u32 %v1625_v34, %v1624_v11  ;;  %v1629_v55 = vor.u32 %v1628_v32, %v1627_v42  ;;  %v1393_v17 = vsel %vm1391_vm11, %v1392_v58, %v8957_v53  ;;  %vm1630_vm9 = vcmp.lt.s32.totalorder %v8996_v36, 1 }
 0x154   : > { %vm1633_vm5 = vcmp.lt.s32.totalorder %v8996_v36, 4  ;;  %v1756_v52 = vand.u32 2139095040, %v8994_v27  ;;  %vm1632_vm12 = vcmp.lt.s32.totalorder %v8996_v36, 3  ;;  %v1638_v41 = vsel %vm1630_vm9, %v8998_v39, %v9002_v61 }
 0x155   : > { %v1639_v59 = vsel %vm1633_vm5, %v1626_v35, 920167782  ;;  %v9028_v50 = vshll.u32 %v1606_v40, 8  ;;  %v1542_v45 = vadd.s32 536870912, %v9011_v19  ;;  %vm1631_vm3 = vcmp.lt.s32.totalorder %v8996_v36, 2 }
 0x156   : > { %v1640_v28 = vsel %vm1632_vm12, %v9013_v7, %v1639_v59  ;;  %v1642_v21 = vsel %vm1630_vm9, %v9002_v61, %v9013_v7  ;;  %v808_v24 = vmul.f32 %v807_v63, %v8853_v25  ;;  %v967_v58 = vadd.s32 3, %v8927_v57 }
 0x157   : > { %vm1135_vm8 = vcmp.lt.s32.totalorder %v8336_v54, 0  ;;  %v1641_v1 = vsel %vm1631_vm3, %v1638_v41, %v1640_v28  ;;  %v1643_v18 = vsel %vm1633_vm5, %v1629_v55, 1326507024  ;;  %v9049_v29 = vsel %vm8988_vm14, %v8277_v0, %v1101_v47 }
 0x158   : > { %12140 = vst [vmem:[#allocation17_spill] sm:$0xff] %v9049_v29  ;;  %v1254_v38 = vmul.f32 %v1253_v46, %v1251_v4  ;;  %v1644_v40 = vsel %vm1632_vm12, %v1626_v35, %v1643_v18  ;;  %v1757_v63 = vshrl.u32 %v1756_v52, 23  ;;  %v963_v60 = vmul.f32 %v962_v22, %v8887_v44 }
 0x159   : > { %v1394_v30 = vclz %v1393_v17  ;;  %v1645_v11 = vsel %vm1631_vm3, %v1642_v21, %v1644_v40  ;;  %v1647_v34 = vand.u32 65535, %v9028_v50  ;;  %v9057_v42 = vshrl.u32 %v1542_v45, 30 }
 0x15a   : > { %v1650_v32 = vshrl.u32 %v1645_v11, 16  ;;  %v1671_v55 = vand.u32 65535, %v1641_v1  ;;  %v1672_v41 = vshrl.u32 %v1641_v1, 16  ;;  %v9060_v47 = vand.u32 3, %v8927_v57 }
 0x15b   : > { %12141 = vst [vmem:[#allocation18_spill] sm:$0xff] %v9057_v42  ;;  %v1102_v4 = vsub.s32 4, %v8600_v15  ;;  %v9065_v46 = vmul.f32 %v9049_v29, %v9049_v29  ;;  %v12144_v22 = vand.u32 2147483647, %v8336_v54  ;;  %v1255_v17 = vxor.u32 2147483648, %v1254_v38 }
 0x15c   : > { %12142 = vst [vmem:[#allocation19_spill] sm:$0xff] %v9060_v47  ;;  %v1648_v52 = vshrl.u32 %v9028_v50, 16  ;;  %v9074_v59 = vmul.u32 %v1650_v32, %v1647_v34  ;;  %v7286_v45 = vadd.s32 4294967169, %v1757_v63  ;;  %v9076_v57 = vadd.f32 1.0, %v808_v24 }
 0x15d   : > { %12143 = vst [vmem:[#allocation20_spill] sm:$0xff] %v9065_v46  ;;  %vm9069_vm15 = vcmp.le.f32.partialorder %v12144_v22, 0.7853982  ;;  %v9078_v28 = vand.u32 3, %v967_v58  ;;  %v1649_v21 = vand.u32 65535, %v1645_v11  ;;  %v9080_v1 = vmul.u32 %v1672_v41, %v1647_v34 }
 0x15e   : > { %v9082_v18 = vadd.f32 1.0, %v963_v60  ;;  %v7278_v40 = vadd.s32 4294967294, %v1394_v30  ;;  %v1544_v22 = vshll.u32 %v9057_v42, 30  ;;  %v9085_v31 = vmul.u32 %v1671_v55, %v1648_v52 }
 0x15f   : > { %12147 = vst [vmem:[#allocation21_spill] sm:$0xff] %v9078_v28  ;;  %v1114_v48 = vmul.f32 -0.00019511016, %v9065_v46  ;;  %v1655_v62 = vshll.u32 %v9074_v59, 16  ;;  %v1673_v47 = vmul.u32 %v1671_v55, %v1647_v34  ;;  %v1677_v24 = vshll.u32 %v9080_v1, 16 }
 0x160   : > { %v1103_v58 = vsel %vm980_vm7, %v1102_v4, %v8600_v15  ;;  %v1256_v63 = vsel %vm1135_vm8, %v1255_v17, %v1254_v38  ;;  %v1763_v30 = vadd.s32 1, %v7286_v45  ;;  %v1651_v11 = vmul.u32 %v1649_v21, %v1647_v34 }
 0x161   : > { %v9096_v28 = vmul.u32 %v1649_v21, %v1648_v52  ;;  %vm1681_vm4 = vc.u32 %v1673_v47, %v1677_v24  ;;  %v9098_v20 = vadd.s32 %v1677_v24, %v1673_v47  ;;  %v1257_v55 = vsub.s32 4, %v8728_v14 }
 0x162   : > { %vm7279_vm10 = vcmp.lt.s32.totalorder %v7278_v40, 0  ;;  %v9102_v3 = vsub.s32 %v9011_v19, %v1544_v22  ;;  %v12003_v15 = vshll.u32 %v9085_v31, 16  ;;  %v1115_v4 = vadd.f32 0.008332121, %v1114_v48 }
 0x163   : > { %vm1659_vm6 = vc.u32 %v1651_v11, %v1655_v62  ;;  %v1661_v38 = vadd.s32 %v1655_v62, %v1651_v11  ;;  %v12148_v17 = vmov 0   ;;  %v9109_v34 = vsel %vm9069_vm15, %v8336_v54, %v1256_v63 }
 0x164   : > { %v1682_v60 = vsel %vm1681_vm4, 1, %v12148_v17  ;;  %12149 = vst [vmem:[#allocation22_spill] sm:$0xff] %v9109_v34  ;;  %v1676_v47 = vmul.u32 %v1672_v41, %v1648_v52  ;;  %vm1685_vm7 = vc.u32 %v9098_v20, %v12003_v15  ;;  %vm1764_vm13 = vcmp.gt.s32.totalorder %v1763_v30, 0 }
 0x165   : > { %v9114_v19 = vsel %vm7279_vm10, 0, %v7278_v40  ;;  %v1657_v45 = vshll.u32 %v9096_v28, 16  ;;  %v12150_v48 = vand.u32 2147483647, %v8994_v27  ;;  %v1765_v21 = vsel %vm1764_vm13, %v1763_v30, 0 }
 0x166   : > { %v1547_v22 = vsub.s32 0, %v9102_v3  ;;  %v1660_v24 = vsel %vm1659_vm6, 1, %v12148_v17  ;;  %v1684_v63 = vadd.s32 %v1682_v60, %v1676_v47  ;;  %v1767_v11 = vand.u32 31, %v1765_v21 }
 0x167   : > { %v1760_v62 = vand.u32 8388607, %v12150_v48  ;;  %vm1546_vm11 = vcmp.lt.s32.totalorder %v9102_v3, 0  ;;  %v1654_v41 = vmul.u32 %v1650_v32, %v1648_v52  ;;  %vm1663_vm4 = vc.u32 %v1661_v38, %v1657_v45 }
 0x168   : > { %v1686_v15 = vsel %vm1685_vm7, 1, %v12148_v17  ;;  %v9125_v40 = vsel %vm8988_vm14, 0, %v1103_v58  ;;  %v9128_v0 = vmul.f32 %v1115_v4, %v9065_v46  ;;  %v9133_v30 = vsel %vm1135_vm8, %v1257_v55, %v8728_v14 }
 0x169   : > { %v9135_v60 = vsub.s32 32, %v1767_v11  ;;  %v9139_v32 = vmul.f32 %v9109_v34, %v9109_v34  ;;  %v1662_v38 = vadd.s32 %v1660_v24, %v1654_v41  ;;  %v1761_v2 = vor.u32 8388608, %v1760_v62 }
 0x16a   : > { %v1548_v58 = vsel %vm1546_vm11, %v1547_v22, %v9102_v3  ;;  %v1664_v4 = vsel %vm1663_vm4, 1, %v12148_v17  ;;  %v1688_v47 = vadd.s32 %v1686_v15, %v1684_v63  ;;  %v1770_v14 = vshll.u32 %v12130_v56, %v1767_v11 }
 0x16b   : > { %12151 = vst [vmem:[#allocation23_spill] sm:$0xff] %v9139_v32  ;;  %v1771_v45 = vshrl.u32 %v12131_v43, %v9135_v60  ;;  %v1773_v55 = vshll.u32 %v12131_v43, %v1767_v11  ;;  %v1774_v48 = vshrl.u32 %v12132_v23, %v9135_v60  ;;  %v1777_v52 = vshrl.u32 %v12133_v5, %v9135_v60 }
 0x16c   : > { %v9152_v24 = vshrl.u32 %v1765_v21, 5  ;;  %v1776_v62 = vshll.u32 %v12132_v23, %v1767_v11  ;;  %v1779_v22 = vshll.u32 %v12133_v5, %v1767_v11  ;;  %v1780_v15 = vshrl.u32 %v12138_v10, %v9135_v60 }
 0x16d   : > { %v1666_v63 = vadd.s32 %v1664_v4, %v1662_v38  ;;  %v1678_v41 = vshrl.u32 %v9080_v1, 16  ;;  %v9159_v54 = vor.u32 %v1771_v45, %v1770_v14  ;;  %v9161_v44 = vor.u32 %v1774_v48, %v1773_v55 }
 0x16e   : > { %v9163_v25 = vor.u32 %v1777_v52, %v1776_v62  ;;  %v1781_v27 = vor.u32 %v1780_v15, %v1779_v22  ;;  %v1782_v21 = vshll.u32 %v12138_v10, %v1767_v11  ;;  %v1783_v6 = vshrl.u32 %v12139_v51, %v9135_v60 }
 0x16f   : > { %v1402_v42 = vsub.s32 4294967266, %v9114_v19  ;;  %v1549_v34 = vclz %v1548_v58  ;;  %v1656_v29 = vshrl.u32 %v9074_v59, 16  ;;  %v9170_v38 = vshll.u32 %v1761_v2, 8 }
 0x170   : > { %v1689_v1 = vadd.s32 %v1688_v47, %v1678_v41  ;;  %v1784_v4 = vor.u32 %v1783_v6, %v1782_v21  ;;  %vm1785_vm14 = vcmp.lt.s32.totalorder %v9152_v24, 1  ;;  %vm1788_vm8 = vcmp.lt.s32.totalorder %v9152_v24, 4 }
 0x171   : > { %v1667_v52 = vadd.s32 %v1666_v63, %v1656_v29  ;;  %vm1787_vm10 = vcmp.lt.s32.totalorder %v9152_v24, 3  ;;  %v1793_v11 = vsel %vm1785_vm14, %v9159_v54, %v9161_v44  ;;  %v1794_v58 = vsel %vm1788_vm8, %v1781_v27, 920167782 }
 0x172   : > { %v1680_v59 = vshrl.u32 %v9085_v31, 16  ;;  %vm1786_vm6 = vcmp.lt.s32.totalorder %v9152_v24, 2  ;;  %v1795_v6 = vsel %vm1787_vm10, %v9163_v25, %v1794_v58  ;;  %v1797_v29 = vsel %vm1785_vm14, %v9161_v44, %v9163_v25 }
 0x173   : > { %v1403_v2 = vadd.s32 127, %v1402_v42  ;;  %v1658_v47 = vshrl.u32 %v9096_v28, 16  ;;  %v1796_v45 = vsel %vm1786_vm6, %v1793_v11, %v1795_v6  ;;  %v1798_v14 = vsel %vm1788_vm8, %v1784_v4, 1326507024  ;;  %v9202_v42 = vpop.permute.xlu1 %459 }
 0x174   : > { %v1614_v55 = vshrl.u32 %v12130_v56, %v8971_v8  ;;  %v1635_v48 = vsel %vm1633_vm5, %v9013_v7, 2102212464  ;;  %v1690_v62 = vadd.s32 %v1689_v1, %v1680_v59  ;;  %v1799_v22 = vsel %vm1787_vm10, %v1781_v27, %v1798_v14 }
 0x175   : > { %v7281_v28 = vadd.s32 4294967294, %v1549_v34  ;;  %v9204_v15 = vadd.s32 %v1667_v52, %v1658_v47  ;;  %v1800_v63 = vsel %vm1786_vm6, %v1797_v29, %v1799_v22  ;;  %v1827_v41 = vshrl.u32 %v1796_v45, 16 }
 0x176   : > { %v1802_v21 = vand.u32 65535, %v9170_v38  ;;  %v1804_v8 = vand.u32 65535, %v1800_v63  ;;  %v1805_v4 = vshrl.u32 %v1800_v63, 16  ;;  %v1826_v11 = vand.u32 65535, %v1796_v45 }
 0x177   : > { %12152 = vst [vmem:[#allocation24_spill] sm:$0xff] %v9204_v15  ;;  %v1404_v58 = vshll.u32 %v1403_v2, 23  ;;  %v1634_v7 = vsel %vm1630_vm9, %v1614_v55, %v8998_v39  ;;  %v1636_v27 = vsel %vm1632_vm12, %v9002_v61, %v1635_v48  ;;  %v12153_v34 = vshll.u32 %v9085_v31, 16  ;;  %v458_v61 = vpop.permute.xlu0 %457 }
 0x178   : > { %v1382_v52 = vadd.s32 %v8862_v12, %v8847_v9  ;;  %v1694_v59 = vadd.s32 1, %v1690_v62  ;;  %v1803_v6 = vshrl.u32 %v9170_v38, 16  ;;  %v9223_v29 = vmul.u32 %v1827_v41, %v1802_v21 }
 0x179   : > { %v9218_v1 = vadd.s32 %v9098_v20, %v12153_v34  ;;  %v1269_v2 = vmul.f32 -0.00019511016, %v9139_v32  ;;  %vm7282_vm9 = vcmp.lt.s32.totalorder %v7281_v28, 0  ;;  %v9228_v39 = vmul.u32 %v1805_v4, %v1802_v21  ;;  %v7798_v34 = vld [vmem:[%s8008_s29 + $0x40] sm:$0xff] }
 0x17a   : > { %v1399_v20 = vshll.u32 %v8957_v53, %v9114_v19  ;;  %v1637_v9 = vsel %vm1631_vm3, %v1634_v7, %v1636_v27  ;;  %v9234_v12 = vmul.u32 %v1804_v8, %v1803_v6  ;;  %v9236_v31 = vmul.u32 %v1826_v11, %v1803_v6 }
 0x17b   : > { %12154 = vst [vmem:[#allocation25_spill] sm:$0xff] %v9218_v1  ;;  %vm1693_vm5 = vc.u32 %v9204_v15, %v9218_v1  ;;  %v12155_v47 = vsub.s32 32, %v9114_v19  ;;  %v1405_v14 = vor.u32 4788187, %v1404_v58  ;;  %v1806_v55 = vmul.u32 %v1804_v8, %v1802_v21  ;;  %v522_v15 = vpop.permute.xlu2 %521 }
 0x17c   : > { %v1810_v48 = vshll.u32 %v9228_v39, 16  ;;  %v9241_v22 = vsel %vm7282_vm9, 0, %v7281_v28  ;;  %v1695_v63 = vsel %vm1693_vm5, %v1694_v59, %v1690_v62  ;;  %v1828_v53 = vmul.u32 %v1826_v11, %v1802_v21  ;;  %v586_v28 = vpop.permute.xlu1 %585 }
 0x17d   : > { %v1400_v45 = vshrl.u32 %v1382_v52, %v12155_v47  ;;  %v1832_v36 = vshll.u32 %v9223_v29, 16  ;;  %v1691_v7 = vmul.u32 %v9028_v50, %v1637_v9  ;;  %v626_v1 = vsel %vm12077_vm0, %v7798_v34, %v458_v61 }
 0x17e   : > { %vm1814_vm12 = vc.u32 %v1806_v55, %v1810_v48  ;;  %v1816_v27 = vadd.s32 %v1810_v48, %v1806_v55  ;;  %v1812_v19 = vshll.u32 %v9234_v12, 16  ;;  %v1834_v8 = vshll.u32 %v9236_v31, 16 }
 0x17f   : > { %vm1836_vm3 = vc.u32 %v1828_v53, %v1832_v36  ;;  %v9249_v58 = vadd.s32 %v1832_v36, %v1828_v53  ;;  %v9251_v62 = vadd.s32 %v1695_v63, %v1691_v7  ;;  %v1815_v21 = vsel %vm1814_vm12, 1, %v12148_v17 }
 0x180   : > { %v1831_v11 = vmul.u32 %v1827_v41, %v1803_v6  ;;  %v1837_v50 = vsel %vm1836_vm3, 1, %v12148_v17  ;;  %v1809_v52 = vmul.u32 %v1805_v4, %v1803_v6  ;;  %vm1818_vm7 = vc.u32 %v1816_v27, %v1812_v19 }
 0x181   : > { %vm1840_vm13 = vc.u32 %v9249_v58, %v1834_v8  ;;  %v643_v59 = vsel %vm12074_vm1, %v626_v1, %v522_v15  ;;  %v1401_v9 = vor.u32 %v1400_v45, %v1399_v20  ;;  %v1557_v61 = vsub.s32 4294967266, %v9241_v22 }
 0x182   : > { %v1839_v47 = vadd.s32 %v1837_v50, %v1831_v11  ;;  %v9261_v55 = vsel %vm12073_vm2, %v643_v59, %v586_v28  ;;  %v9265_v41 = vmul.f32 %v9076_v57, %v8755_v37  ;;  %v1270_v48 = vadd.f32 0.008332121, %v1269_v2 }
 0x183   : > { %12156 = vst [vmem:[#allocation26_spill] sm:$0xff] %v9261_v55  ;;  %v1817_v4 = vadd.s32 %v1815_v21, %v1809_v52  ;;  %v1841_v6 = vsel %vm1840_vm13, 1, %v12148_v17  ;;  %v9270_v63 = vmul.f32 %v9082_v18, %v8871_v49  ;;  %v1122_v15 = vadd.s32 3, %v9125_v40 }
 0x184   : > { %12157 = vst [vmem:[#allocation27_spill] sm:$0xff] %v9265_v41  ;;  %v1406_v1 = vand.u32 2147483647, %v1405_v14  ;;  %v1819_v20 = vsel %vm1818_vm7, 1, %v12148_v17  ;;  %v1260_v45 = vsel %vm9069_vm15, 0, %v9133_v30  ;;  %v1553_v37 = vsub.s32 32, %v9241_v22 }
 0x185   : > { %12158 = vst [vmem:[#allocation28_spill] sm:$0xff] %v9270_v63  ;;  %v1697_v57 = vadd.s32 536870912, %v9251_v62  ;;  %v1911_v2 = vand.u32 2139095040, %v9261_v55  ;;  %v1117_v53 = vadd.f32 -0.16666654, %v9128_v0  ;;  %v1408_v36 = vcvt.s32.f32 %v1401_v9 }
 0x186   : > { %v1558_v49 = vadd.s32 127, %v1557_v61  ;;  %v1843_v18 = vadd.s32 %v1841_v6, %v1839_v47  ;;  %v1271_v7 = vmul.f32 %v1270_v48, %v9139_v32  ;;  %v1537_v14 = vadd.s32 %v8964_v13, %v8951_v33 }
 0x187   : > { %v1821_v27 = vadd.s32 %v1819_v20, %v1817_v4  ;;  %v1912_v34 = vshrl.u32 %v1911_v2, 23  ;;  %v9284_v35 = vand.u32 3, %v1122_v15  ;;  %v9287_v30 = vand.u32 3, %v9125_v40 }
 0x188   : > { %v1409_v19 = vmul.f32 %v1408_v36, %v1406_v1  ;;  %v1833_v28 = vshrl.u32 %v9223_v29, 16  ;;  %vm1290_vm15 = vcmp.lt.s32.totalorder %v8583_v16, 0  ;;  %v1555_v0 = vshrl.u32 %v1537_v14, %v1553_v37  ;;  %v524_v37 = vpop.permute.xlu0 %523 }
 0x189   : > { %12159 = vst [vmem:[#allocation29_spill] sm:$0xff] %v9284_v35  ;;  %v9291_v21 = vshrl.u32 %v1697_v57, 30  ;;  %v1811_v11 = vshrl.u32 %v9228_v39, 16  ;;  %v7289_v50 = vadd.s32 4294967169, %v1912_v34  ;;  %v1118_v33 = vmul.f32 %v1117_v53, %v9065_v46 }
 0x18a   : > { %12160 = vst [vmem:[#allocation30_spill] sm:$0xff] %v9287_v30  ;;  %v9295_v13 = vadd.s32 3, %v1260_v45  ;;  %v1559_v52 = vshll.u32 %v1558_v49, 23  ;;  %v1844_v59 = vadd.s32 %v1843_v18, %v1833_v28  ;;  %v1272_v9 = vadd.f32 -0.16666654, %v1271_v7  ;;  %v7799_v7 = vld [vmem:[%s8008_s29 + $0x48] sm:$0xff]  ;;  %v588_v28 = vpop.permute.xlu2 %587 }
 0x18b   : > { %v1554_v40 = vshll.u32 %v9102_v3, %v9241_v22  ;;  %v1822_v61 = vadd.s32 %v1821_v27, %v1811_v11  ;;  %v1918_v29 = vadd.s32 1, %v7289_v50  ;;  %v1410_v47 = vxor.u32 2147483648, %v1409_v19 }
 0x18c   : > { %v1769_v48 = vshrl.u32 %v12130_v56, %v9135_v60  ;;  %v1790_v39 = vsel %vm1788_vm8, %v9163_v25, 2102212464  ;;  %v1835_v4 = vshrl.u32 %v9236_v31, 16  ;;  %v1699_v15 = vshll.u32 %v9291_v21, 30 }
 0x18d   : > { %v1556_v6 = vor.u32 %v1555_v0, %v1554_v40  ;;  %v1813_v1 = vshrl.u32 %v9234_v12, 16  ;;  %vm1919_vm11 = vcmp.gt.s32.totalorder %v1918_v29, 0  ;;  %v1560_v3 = vor.u32 4788187, %v1559_v52 }
 0x18e   : > { %v1789_v22 = vsel %vm1785_vm14, %v1769_v48, %v9159_v54  ;;  %v1845_v20 = vadd.s32 %v1844_v59, %v1835_v4  ;;  %v1920_v60 = vsel %vm1919_vm11, %v1918_v29, 0  ;;  %v1791_v25 = vsel %vm1787_vm10, %v9161_v44, %v1790_v39 }
 0x18f   : > { %v9313_v57 = vadd.s32 %v1822_v61, %v1813_v1  ;;  %v12022_v2 = vand.u32 2147483647, %v9261_v55  ;;  %v1922_v53 = vand.u32 31, %v1920_v60  ;;  %v9316_v36 = vadd.f32 1.0, %v1118_v33 }
 0x190   : > { %v1273_v12 = vmul.f32 %v1272_v9, %v9139_v32  ;;  %v9319_v49 = vand.u32 3, %v1260_v45  ;;  %v12162_v54 = vand.u32 2147483647, %v8583_v16  ;;  %v627_v44 = vsel %vm12077_vm0, %v7799_v7, %v9202_v42 }
 0x191   : > { %v9331_v14 = vsub.s32 %v9251_v62, %v1699_v15  ;;  %v9336_v27 = vadd.s32 %v9249_v58, %v1834_v8  ;;  %v9338_v45 = vsub.s32 32, %v1922_v53  ;;  %v644_v34 = vsel %vm12074_vm1, %v627_v44, %v524_v37 }
 0x192   : > { %12161 = vst [vmem:[#allocation31_spill] sm:$0xff] %v9319_v49  ;;  %vm9323_vm4 = vcmp.le.f32.partialorder %v12162_v54, 0.7853982  ;;  %v1411_v0 = vsel %vm1290_vm15, %v1410_v47, %v1409_v19  ;;  %v1563_v11 = vcvt.s32.f32 %v1556_v6  ;;  %v1792_v42 = vsel %vm1786_vm6, %v1789_v22, %v1791_v25  ;;  %v12166_v25 = vld [vmem:[#allocation10_spill] sm:$0xff] }
 0x193   : > { %v1849_v50 = vadd.s32 1, %v1845_v20  ;;  %v1561_v62 = vand.u32 2147483647, %v1560_v3  ;;  %vm1848_vm14 = vc.u32 %v9313_v57, %v9336_v27  ;;  %v1915_v31 = vand.u32 8388607, %v12022_v2 }
 0x194   : > { %v1926_v8 = vshrl.u32 %v12131_v43, %v9338_v45  ;;  %v1929_v58 = vshrl.u32 %v12132_v23, %v9338_v45  ;;  %v1932_v19 = vshrl.u32 %v12133_v5, %v9338_v45  ;;  %v1935_v24 = vshrl.u32 %v12138_v10, %v9338_v45 }
 0x195   : > { %v9358_v33 = vsel %vm12073_vm2, %v644_v34, %v588_v28  ;;  %v1702_v52 = vsub.s32 0, %v9331_v14  ;;  %v1846_v59 = vmul.u32 %v9170_v38, %v1792_v42  ;;  %v1925_v9 = vshll.u32 %v12130_v56, %v1922_v53 }
 0x196   : > { %12165 = vst [vmem:[#allocation32_spill] sm:$0xff] %v9358_v33  ;;  %v1928_v40 = vshll.u32 %v12131_v43, %v1922_v53  ;;  %v1850_v61 = vsel %vm1848_vm14, %v1849_v50, %v1845_v20  ;;  %v9364_v29 = vshrl.u32 %v1920_v60, 5  ;;  %v1931_v47 = vshll.u32 %v12132_v23, %v1922_v53 }
 0x197   : > { %v1934_v48 = vshll.u32 %v12133_v5, %v1922_v53  ;;  %v1916_v39 = vor.u32 8388608, %v1915_v31  ;;  %v9368_v4 = vor.u32 %v1926_v8, %v1925_v9  ;;  %v2066_v15 = vand.u32 2139095040, %v9358_v33 }
 0x198   : > { %v9370_v6 = vor.u32 %v1929_v58, %v1928_v40  ;;  %v9373_v1 = vor.u32 %v1932_v19, %v1931_v47  ;;  %v1937_v3 = vshll.u32 %v12138_v10, %v1922_v53  ;;  %v1938_v22 = vshrl.u32 %v12139_v51, %v9338_v45 }
 0x199   : > { %v1936_v38 = vor.u32 %v1935_v24, %v1934_v48  ;;  %v1412_v20 = vsub.s32 4, %v8931_v26  ;;  %v9382_v60 = vsel %vm9323_vm4, %v8583_v16, %v1411_v0  ;;  %vm1701_vm8 = vcmp.lt.s32.totalorder %v9331_v14, 0 }
 0x19a   : > { %v9385_v37 = vadd.s32 %v1850_v61, %v1846_v59  ;;  %vm1445_vm10 = vcmp.lt.s32.totalorder %v12166_v25, 0  ;;  %v1564_v54 = vmul.f32 %v1563_v11, %v1561_v62  ;;  %v1939_v7 = vor.u32 %v1938_v22, %v1937_v3  ;;  %v12169_v22 = vld [vmem:[#allocation17_spill] sm:$0xff] }
 0x19b   : > { %vm1940_vm6 = vcmp.lt.s32.totalorder %v9364_v29, 1  ;;  %vm1943_vm9 = vcmp.lt.s32.totalorder %v9364_v29, 4  ;;  %vm1942_vm5 = vcmp.lt.s32.totalorder %v9364_v29, 3  ;;  %v9397_v34 = vshll.u32 %v1916_v39, 8 }
 0x19c   : > { %v1948_v53 = vsel %vm1940_vm6, %v9368_v4, %v9370_v6  ;;  %v1949_v44 = vsel %vm1943_vm9, %v1936_v38, 920167782  ;;  %v1703_v28 = vsel %vm1701_vm8, %v1702_v52, %v9331_v14  ;;  %vm1941_vm12 = vcmp.lt.s32.totalorder %v9364_v29, 2 }
 0x19d   : > { %v1950_v0 = vsel %vm1942_vm5, %v9373_v1, %v1949_v44  ;;  %v2067_v11 = vshrl.u32 %v2066_v15, 23  ;;  %v1852_v42 = vadd.s32 536870912, %v9385_v37  ;;  %v1952_v62 = vsel %vm1940_vm6, %v9370_v6, %v9373_v1 }
 0x19e   : > { %v1951_v50 = vsel %vm1941_vm12, %v1948_v53, %v1950_v0  ;;  %v1953_v31 = vsel %vm1943_vm9, %v1939_v7, 1326507024  ;;  %v1274_v8 = vadd.f32 1.0, %v1273_v12  ;;  %v9415_v58 = vmul.f32 %v9382_v60, %v9382_v60  ;;  %v12171_v53 = vld [vmem:[#allocation22_spill] sm:$0xff] }
 0x19f   : > { %v1954_v19 = vsel %vm1942_vm5, %v1936_v38, %v1953_v31  ;;  %v1981_v24 = vand.u32 65535, %v1951_v50  ;;  %v1565_v52 = vxor.u32 2147483648, %v1564_v54  ;;  %v1957_v9 = vand.u32 65535, %v9397_v34 }
 0x1a0   : > { %12167 = vst [vmem:[#allocation33_spill] sm:$0xff] %v9415_v58  ;;  %v1955_v59 = vsel %vm1941_vm12, %v1952_v62, %v1954_v19  ;;  %v1982_v40 = vshrl.u32 %v1951_v50, 16  ;;  %v9423_v61 = vand.u32 3, %v9295_v13  ;;  %v1704_v47 = vclz %v1703_v28 }
 0x1a1   : > { %v1958_v12 = vshrl.u32 %v9397_v34, 16  ;;  %v7292_v48 = vadd.s32 4294967169, %v2067_v11  ;;  %v9426_v39 = vshrl.u32 %v1852_v42, 30  ;;  %v1959_v15 = vand.u32 65535, %v1955_v59 }
 0x1a2   : > { %12168 = vst [vmem:[#allocation34_spill] sm:$0xff] %v9423_v61  ;;  %v1960_v3 = vshrl.u32 %v1955_v59, 16  ;;  %v1984_v38 = vmul.u32 %v1982_v40, %v1957_v9  ;;  %v9430_v7 = vmul.f32 %v9316_v36, %v12169_v22  ;;  %v9433_v44 = vmul.f32 %v1274_v8, %v12171_v53 }
 0x1a3   : > { %v9438_v13 = vsel %vm1290_vm15, %v1412_v20, %v8931_v26  ;;  %v1985_v28 = vmul.u32 %v1981_v24, %v1958_v12  ;;  %v1424_v0 = vmul.f32 -0.00019511016, %v9415_v58  ;;  %v1566_v11 = vsel %vm1445_vm10, %v1565_v52, %v1564_v54 }
 0x1a4   : > { %12170 = vst [vmem:[#allocation17_spill] sm:$0xff] %v9430_v7  ;;  %v1962_v42 = vmul.u32 %v1960_v3, %v1957_v9  ;;  %v1963_v50 = vmul.u32 %v1959_v15, %v1958_v12  ;;  %v9443_v62 = vadd.s32 4294967294, %v1704_v47  ;;  %v1987_v36 = vshll.u32 %v1984_v38, 16 }
 0x1a5   : > { %12172 = vst [vmem:[#allocation22_spill] sm:$0xff] %v9433_v44  ;;  %v2073_v8 = vadd.s32 1, %v7292_v48  ;;  %v12173_v19 = vand.u32 2147483647, %v12166_v25  ;;  %v1854_v26 = vshll.u32 %v9426_v39, 30  ;;  %v1961_v20 = vmul.u32 %v1959_v15, %v1957_v9 }
 0x1a6   : > { %v1965_v22 = vshll.u32 %v1962_v42, 16  ;;  %v1983_v53 = vmul.u32 %v1981_v24, %v1957_v9  ;;  %v1964_v54 = vmul.u32 %v1960_v3, %v1958_v12  ;;  %v1967_v52 = vshll.u32 %v1963_v50, 16 }
 0x1a7   : > { %vm9448_vm3 = vcmp.le.f32.partialorder %v12173_v19, 0.7853982  ;;  %v1986_v2 = vmul.u32 %v1982_v40, %v1958_v12  ;;  %v1989_v47 = vshll.u32 %v1985_v28, 16  ;;  %v1945_v48 = vsel %vm1943_vm9, %v9373_v1, 2102212464 }
 0x1a8   : > { %vm1969_vm7 = vc.u32 %v1961_v20, %v1965_v22  ;;  %v1971_v16 = vadd.s32 %v1965_v22, %v1961_v20  ;;  %vm1991_vm13 = vc.u32 %v1983_v53, %v1987_v36  ;;  %v1993_v31 = vadd.s32 %v1987_v36, %v1983_v53 }
 0x1a9   : > { %v1970_v19 = vsel %vm1969_vm7, 1, %v12148_v17  ;;  %v1992_v61 = vsel %vm1991_vm13, 1, %v12148_v17  ;;  %vm2074_vm15 = vcmp.gt.s32.totalorder %v2073_v8, 0  ;;  %v1924_v9 = vshrl.u32 %v12130_v56, %v9338_v45 }
 0x1aa   : > { %v1972_v15 = vadd.s32 %v1970_v19, %v1964_v54  ;;  %vm1973_vm11 = vc.u32 %v1971_v16, %v1967_v52  ;;  %v1994_v24 = vadd.s32 %v1992_v61, %v1986_v2  ;;  %vm1995_vm14 = vc.u32 %v1993_v31, %v1989_v47 }
 0x1ab   : > { %v1974_v40 = vsel %vm1973_vm11, 1, %v12148_v17  ;;  %v1988_v12 = vshrl.u32 %v1984_v38, 16  ;;  %v1996_v3 = vsel %vm1995_vm14, 1, %v12148_v17  ;;  %v1966_v36 = vshrl.u32 %v1962_v42, 16 }
 0x1ac   : > { %v1976_v20 = vadd.s32 %v1974_v40, %v1972_v15  ;;  %v1998_v1 = vadd.s32 %v1996_v3, %v1994_v24  ;;  %v2075_v22 = vsel %vm2074_vm15, %v2073_v8, 0  ;;  %v1425_v53 = vadd.f32 0.008332121, %v1424_v0 }
 0x1ad   : > { %v1944_v54 = vsel %vm1940_vm6, %v1924_v9, %v9368_v4  ;;  %v1946_v16 = vsel %vm1942_vm5, %v9370_v6, %v1945_v48  ;;  %v2077_v2 = vand.u32 31, %v2075_v22  ;;  %v1968_v45 = vshrl.u32 %v1963_v50, 16 }
 0x1ae   : > { %v1977_v61 = vadd.s32 %v1976_v20, %v1966_v36  ;;  %v1990_v52 = vshrl.u32 %v1985_v28, 16  ;;  %v1999_v38 = vadd.s32 %v1998_v1, %v1988_v12  ;;  %v9471_v42 = vsel %vm9448_vm3, %v12166_v25, %v1566_v11 }
 0x1af   : > { %12176 = vst [vmem:[#allocation35_spill] sm:$0xff] %v9471_v42  ;;  %vm7285_vm8 = vcmp.lt.s32.totalorder %v9443_v62, 0  ;;  %v12177_v0 = vand.u32 2147483647, %v9358_v33  ;;  %v9476_v4 = vsub.s32 32, %v2077_v2  ;;  %v9479_v19 = vsub.s32 %v9385_v37, %v1854_v26 }
 0x1b0   : > { %v9481_v6 = vadd.s32 %v1977_v61, %v1968_v45  ;;  %v9483_v50 = vadd.s32 %v1993_v31, %v1989_v47  ;;  %v2000_v28 = vadd.s32 %v1999_v38, %v1990_v52  ;;  %v1947_v48 = vsel %vm1941_vm12, %v1944_v54, %v1946_v16 }
 0x1b1   : > { %v2070_v8 = vand.u32 8388607, %v12177_v0  ;;  %v2080_v11 = vshll.u32 %v12130_v56, %v2077_v2  ;;  %v2081_v15 = vshrl.u32 %v12131_v43, %v9476_v4  ;;  %v2084_v24 = vshrl.u32 %v12132_v23, %v9476_v4 }
 0x1b2   : > { %vm2003_vm6 = vc.u32 %v9481_v6, %v9483_v50  ;;  %v2004_v37 = vadd.s32 1, %v2000_v28  ;;  %v2083_v26 = vshll.u32 %v12131_v43, %v2077_v2  ;;  %v2087_v31 = vshrl.u32 %v12133_v5, %v9476_v4 }
 0x1b3   : > { %v2071_v47 = vor.u32 8388608, %v2070_v8  ;;  %v9497_v29 = vshrl.u32 %v2075_v22, 5  ;;  %v9499_v9 = vor.u32 %v2081_v15, %v2080_v11  ;;  %v2086_v40 = vshll.u32 %v12132_v23, %v2077_v2  ;;  %v12179_v15 = vld [vmem:[#allocation18_spill] sm:$0xff] }
 0x1b4   : > { %v2005_v12 = vsel %vm2003_vm6, %v2004_v37, %v2000_v28  ;;  %v9502_v3 = vor.u32 %v2084_v24, %v2083_v26  ;;  %v2089_v36 = vshll.u32 %v12133_v5, %v2077_v2  ;;  %v2090_v20 = vshrl.u32 %v12138_v10, %v9476_v4 }
 0x1b5   : > { %v2001_v1 = vmul.u32 %v9397_v34, %v1947_v48  ;;  %v9508_v54 = vor.u32 %v2087_v31, %v2086_v40  ;;  %v2092_v16 = vshll.u32 %v12138_v10, %v2077_v2  ;;  %v2093_v22 = vshrl.u32 %v12139_v51, %v9476_v4 }
 0x1b6   : > { %v9515_v45 = vmul.f32 %v9471_v42, %v9471_v42  ;;  %v9520_v61 = vsel %vm7285_vm8, 0, %v9443_v62  ;;  %v1857_v52 = vsub.s32 0, %v9479_v19  ;;  %v2091_v38 = vor.u32 %v2090_v20, %v2089_v36 }
 0x1b7   : > { %v9523_v34 = vadd.s32 %v2005_v12, %v2001_v1  ;;  %v2094_v0 = vor.u32 %v2093_v22, %v2092_v16  ;;  %vm2095_vm9 = vcmp.lt.s32.totalorder %v9497_v29, 1  ;;  %vm2098_vm5 = vcmp.lt.s32.totalorder %v9497_v29, 4  ;;  %v9564_v1 = vpop.permute.xlu1 %463 }
 0x1b8   : > { %12178 = vst [vmem:[#allocation36_spill] sm:$0xff] %v9515_v45  ;;  %vm1856_vm12 = vcmp.lt.s32.totalorder %v9479_v19, 0  ;;  %vm2097_vm7 = vcmp.lt.s32.totalorder %v9497_v29, 3  ;;  %v2103_v62 = vsel %vm2095_vm9, %v9499_v9, %v9502_v3  ;;  %v2104_v2 = vsel %vm2098_vm5, %v2091_v38, 920167782 }
 0x1b9   : > { %vm2096_vm13 = vcmp.lt.s32.totalorder %v9497_v29, 2  ;;  %v2105_v8 = vsel %vm2097_vm7, %v9508_v54, %v2104_v2  ;;  %v2107_v28 = vsel %vm2095_vm9, %v9502_v3, %v9508_v54  ;;  %v9543_v48 = vshll.u32 %v2071_v47, 8 }
 0x1ba   : > { %v9548_v11 = vsel %vm9323_vm4, 0, %v9438_v13  ;;  %v1567_v24 = vsub.s32 4, %v12179_v15  ;;  %v2106_v37 = vsel %vm2096_vm13, %v2103_v62, %v2105_v8  ;;  %v2108_v26 = vsel %vm2098_vm5, %v2094_v0, 1326507024 }
 0x1bb   : > { %v1426_v31 = vmul.f32 %v1425_v53, %v9415_v58  ;;  %v1858_v40 = vsel %vm1856_vm12, %v1857_v52, %v9479_v19  ;;  %v2007_v47 = vadd.s32 536870912, %v9523_v34  ;;  %v2109_v12 = vsel %vm2097_vm7, %v2091_v38, %v2108_v26  ;;  %v12181_v26 = vld [vmem:[#allocation25_spill] sm:$0xff] }
 0x1bc   : > { %v1579_v18 = vmul.f32 -0.00019511016, %v9515_v45  ;;  %v1708_v13 = vsub.s32 32, %v9520_v61  ;;  %v2110_v36 = vsel %vm2096_vm13, %v2107_v28, %v2109_v12  ;;  %v2137_v20 = vshrl.u32 %v2106_v37, 16  ;;  %v12180_v28 = vld [vmem:[#allocation24_spill] sm:$0xff] }
 0x1bd   : > { %v1712_v16 = vsub.s32 4294967266, %v9520_v61  ;;  %v2112_v53 = vand.u32 65535, %v9543_v48  ;;  %v2114_v22 = vand.u32 65535, %v2110_v36  ;;  %v2136_v52 = vand.u32 65535, %v2106_v37  ;;  %v462_v37 = vpop.permute.xlu0 %461 }
 0x1be   : > { %v9569_v0 = vadd.s32 3, %v9548_v11  ;;  %v1859_v38 = vclz %v1858_v40  ;;  %v2113_v62 = vshrl.u32 %v9543_v48, 16  ;;  %v2115_v2 = vshrl.u32 %v2110_v36, 16 }
 0x1bf   : > { %v9575_v8 = vsel %vm1445_vm10, %v1567_v24, %v12179_v15  ;;  %v1692_v12 = vadd.s32 %v12181_v26, %v12180_v28  ;;  %v9579_v49 = vshrl.u32 %v2007_v47, 30  ;;  %v2139_v35 = vmul.u32 %v2137_v20, %v2112_v53  ;;  %v7800_v28 = vld [vmem:[%s8008_s29 + $0x50] sm:$0xff] }
 0x1c0   : > { %v9581_v44 = vadd.f32 -0.16666654, %v1426_v31  ;;  %v9583_v7 = vadd.f32 0.008332121, %v1579_v18  ;;  %v2117_v40 = vmul.u32 %v2115_v2, %v2112_v53  ;;  %v2118_v32 = vmul.u32 %v2114_v22, %v2113_v62 }
 0x1c1   : > { %v1709_v36 = vshll.u32 %v9331_v14, %v9520_v61  ;;  %v1710_v25 = vshrl.u32 %v1692_v12, %v1708_v13  ;;  %v1713_v15 = vadd.s32 127, %v1712_v16  ;;  %v2140_v24 = vmul.u32 %v2136_v52, %v2113_v62  ;;  %v526_v16 = vpop.permute.xlu2 %525 }
 0x1c2   : > { %v7287_v30 = vadd.s32 4294967294, %v1859_v38  ;;  %v2116_v46 = vmul.u32 %v2114_v22, %v2112_v53  ;;  %v2120_v63 = vshll.u32 %v2117_v40, 16  ;;  %v628_v47 = vsel %vm12077_vm0, %v7800_v28, %v462_v37  ;;  %v590_v37 = vpop.permute.xlu1 %589 }
 0x1c3   : > { %v2009_v26 = vshll.u32 %v9579_v49, 30  ;;  %v2119_v31 = vmul.u32 %v2115_v2, %v2113_v62  ;;  %v2138_v41 = vmul.u32 %v2136_v52, %v2112_v53  ;;  %v2142_v18 = vshll.u32 %v2139_v35, 16 }
 0x1c4   : > { %v2122_v42 = vshll.u32 %v2118_v32, 16  ;;  %vm2124_vm4 = vc.u32 %v2116_v46, %v2120_v63  ;;  %v2126_v33 = vadd.s32 %v2120_v63, %v2116_v46  ;;  %v2141_v55 = vmul.u32 %v2137_v20, %v2113_v62 }
 0x1c5   : > { %v2125_v14 = vsel %vm2124_vm4, 1, %v12148_v17  ;;  %v2144_v61 = vshll.u32 %v2140_v24, 16  ;;  %vm2146_vm10 = vc.u32 %v2138_v41, %v2142_v18  ;;  %v2148_v13 = vadd.s32 %v2142_v18, %v2138_v41 }
 0x1c6   : > { %v1714_v22 = vshll.u32 %v1713_v15, 23  ;;  %v2127_v38 = vadd.s32 %v2125_v14, %v2119_v31  ;;  %vm2128_vm15 = vc.u32 %v2126_v33, %v2122_v42  ;;  %v2147_v12 = vsel %vm2146_vm10, 1, %v12148_v17 }
 0x1c7   : > { %vm7288_vm11 = vcmp.lt.s32.totalorder %v7287_v30, 0  ;;  %v2129_v53 = vsel %vm2128_vm15, 1, %v12148_v17  ;;  %v2149_v52 = vadd.s32 %v2147_v12, %v2141_v55  ;;  %vm2150_vm14 = vc.u32 %v2148_v13, %v2144_v61 }
 0x1c8   : > { %v9594_v46 = vsub.s32 %v9523_v34, %v2009_v26  ;;  %v2121_v63 = vshrl.u32 %v2117_v40, 16  ;;  %v2131_v20 = vadd.s32 %v2129_v53, %v2127_v38  ;;  %v645_v62 = vsel %vm12074_vm1, %v628_v47, %v526_v16 }
 0x1c9   : > { %v2079_v41 = vshrl.u32 %v12130_v56, %v9476_v4  ;;  %v2100_v33 = vsel %vm2098_vm5, %v9508_v54, 2102212464  ;;  %v2151_v42 = vsel %vm2150_vm14, 1, %v12148_v17  ;;  %v9604_v2 = vsel %vm12073_vm2, %v645_v62, %v590_v37 }
 0x1ca   : > { %12182 = vst [vmem:[#allocation18_spill] sm:$0xff] %v9604_v2  ;;  %v2123_v55 = vshrl.u32 %v2118_v32, 16  ;;  %v2132_v15 = vadd.s32 %v2131_v20, %v2121_v63  ;;  %v2143_v34 = vshrl.u32 %v2139_v35, 16  ;;  %v2153_v28 = vadd.s32 %v2151_v42, %v2149_v52  ;;  %v528_v42 = vpop.permute.xlu0 %527 }
 0x1cb   : > { %v1715_v40 = vor.u32 4788187, %v1714_v22  ;;  %v1862_v26 = vsel %vm7288_vm11, 0, %v7287_v30  ;;  %v2099_v4 = vsel %vm2095_vm9, %v2079_v41, %v9499_v9  ;;  %v2221_v47 = vand.u32 2139095040, %v9604_v2 }
 0x1cc   : > { %v2012_v54 = vsub.s32 0, %v9594_v46  ;;  %v9612_v31 = vadd.s32 %v2132_v15, %v2123_v55  ;;  %v2145_v18 = vshrl.u32 %v2140_v24, 16  ;;  %v2154_v14 = vadd.s32 %v2153_v28, %v2143_v34 }
 0x1cd   : > { %vm2011_vm8 = vcmp.lt.s32.totalorder %v9594_v46, 0  ;;  %v2101_v32 = vsel %vm2097_vm7, %v9502_v3, %v2100_v33  ;;  %v9618_v35 = vadd.s32 %v2148_v13, %v2144_v61  ;;  %v2222_v30 = vshrl.u32 %v2221_v47, 23 }
 0x1ce   : > { %v9621_v16 = vand.u32 3, %v9548_v11  ;;  %v1570_v9 = vsel %vm9448_vm3, 0, %v9575_v8  ;;  %v1711_v22 = vor.u32 %v1710_v25, %v1709_v36  ;;  %v2155_v38 = vadd.s32 %v2154_v14, %v2145_v18 }
 0x1cf   : > { %v1428_v24 = vmul.f32 %v9581_v44, %v9415_v58  ;;  %v1867_v12 = vsub.s32 4294967266, %v1862_v26  ;;  %vm2158_vm6 = vc.u32 %v9612_v31, %v9618_v35  ;;  %v7295_v3 = vadd.s32 4294967169, %v2222_v30  ;;  %v592_v30 = vpop.permute.xlu2 %591 }
 0x1d0   : > { %12183 = vst [vmem:[#allocation24_spill] sm:$0xff] %v9621_v16  ;;  %v1581_v61 = vmul.f32 %v9583_v7, %v9515_v45  ;;  %v2013_v11 = vsel %vm2011_vm8, %v2012_v54, %v9594_v46  ;;  %v2102_v13 = vsel %vm2096_vm13, %v2099_v4, %v2101_v32  ;;  %v2159_v59 = vadd.s32 1, %v2155_v38  ;;  %v7801_v4 = vld [vmem:[%s8008_s29 + $0x58] sm:$0xff] }
 0x1d1   : > { %v9636_v25 = vand.u32 3, %v9569_v0  ;;  %v1716_v8 = vand.u32 2147483647, %v1715_v40  ;;  %v1863_v36 = vsub.s32 32, %v1862_v26  ;;  %v2228_v44 = vadd.s32 1, %v7295_v3 }
 0x1d2   : > { %v1587_v37 = vadd.s32 3, %v1570_v9  ;;  %v1718_v53 = vcvt.s32.f32 %v1711_v22  ;;  %v1847_v52 = vadd.s32 %v9336_v27, %v9313_v57  ;;  %v2160_v63 = vsel %vm2158_vm6, %v2159_v59, %v2155_v38  ;;  %v12187_v27 = vld [vmem:[#allocation13_spill] sm:$0xff] }
 0x1d3   : > { %12184 = vst [vmem:[#allocation25_spill] sm:$0xff] %v9636_v25  ;;  %v1868_v20 = vadd.s32 127, %v1867_v12  ;;  %v2014_v7 = vclz %v2013_v11  ;;  %v2156_v62 = vmul.u32 %v9543_v48, %v2102_v13  ;;  %vm2229_vm3 = vcmp.gt.s32.totalorder %v2228_v44, 0 }
 0x1d4   : > { %v1429_v29 = vadd.f32 1.0, %v1428_v24  ;;  %v1582_v41 = vadd.f32 -0.16666654, %v1581_v61  ;;  %v12043_v0 = vand.u32 2147483647, %v9604_v2  ;;  %v2230_v33 = vsel %vm2229_vm3, %v2228_v44, 0 }
 0x1d5   : > { %v1719_v55 = vmul.f32 %v1718_v53, %v1716_v8  ;;  %v1865_v15 = vshrl.u32 %v1847_v52, %v1863_v36  ;;  %v9642_v34 = vadd.s32 %v2160_v63, %v2156_v62  ;;  %v2232_v28 = vand.u32 31, %v2230_v33 }
 0x1d6   : > { %v9644_v40 = vand.u32 3, %v1587_v37  ;;  %v9646_v57 = vand.u32 3, %v1570_v9  ;;  %vm1600_vm9 = vcmp.lt.s32.totalorder %v12187_v27, 0  ;;  %v1864_v48 = vshll.u32 %v9479_v19, %v1862_v26 }
 0x1d7   : > { %v629_v47 = vsel %vm12077_vm0, %v7801_v4, %v9564_v1  ;;  %v1869_v54 = vshll.u32 %v1868_v20, 23  ;;  %v7290_v18 = vadd.s32 4294967294, %v2014_v7  ;;  %v9653_v14 = vsub.s32 32, %v2232_v28  ;;  %v530_v58 = vpop.permute.xlu2 %529 }
 0x1d8   : > { %12185 = vst [vmem:[#allocation37_spill] sm:$0xff] %v9644_v40  ;;  %v646_v32 = vsel %vm12074_vm1, %v629_v47, %v528_v42  ;;  %v9657_v22 = vmul.f32 %v1429_v29, %v9382_v60  ;;  %v1583_v9 = vmul.f32 %v1582_v41, %v9515_v45  ;;  %v1722_v38 = vsub.s32 4, %v9291_v21 }
 0x1d9   : > { %12186 = vst [vmem:[#allocation38_spill] sm:$0xff] %v9646_v57  ;;  %v2225_v19 = vand.u32 8388607, %v12043_v0  ;;  %v1720_v26 = vxor.u32 2147483648, %v1719_v55  ;;  %v1866_v24 = vor.u32 %v1865_v15, %v1864_v48  ;;  %v2162_v1 = vadd.s32 536870912, %v9642_v34 }
 0x1da   : > { %12188 = vst [vmem:[#allocation39_spill] sm:$0xff] %v9657_v22  ;;  %v2236_v12 = vshrl.u32 %v12131_v43, %v9653_v14  ;;  %v2239_v3 = vshrl.u32 %v12132_v23, %v9653_v14  ;;  %v2242_v60 = vshrl.u32 %v12133_v5, %v9653_v14  ;;  %v2245_v61 = vshrl.u32 %v12138_v10, %v9653_v14 }
 0x1db   : > { %v9673_v11 = vsel %vm12073_vm2, %v646_v32, %v592_v30  ;;  %v12190_v13 = vand.u32 2147483647, %v12187_v27  ;;  %v1870_v8 = vor.u32 4788187, %v1869_v54  ;;  %vm7291_vm12 = vcmp.lt.s32.totalorder %v7290_v18, 0 }
 0x1dc   : > { %12189 = vst [vmem:[#allocation40_spill] sm:$0xff] %v9673_v11  ;;  %v2235_v36 = vshll.u32 %v12130_v56, %v2232_v28  ;;  %v2238_v44 = vshll.u32 %v12131_v43, %v2232_v28  ;;  %v2226_v37 = vor.u32 8388608, %v2225_v19  ;;  %v9683_v53 = vshrl.u32 %v2230_v33, 5 }
 0x1dd   : > { %vm9677_vm5 = vcmp.le.f32.partialorder %v12190_v13, 0.7853982  ;;  %v2241_v52 = vshll.u32 %v12132_v23, %v2232_v28  ;;  %v2244_v63 = vshll.u32 %v12133_v5, %v2232_v28  ;;  %v9687_v20 = vshrl.u32 %v2162_v1, 30 }
 0x1de   : > { %v9689_v7 = vor.u32 %v2236_v12, %v2235_v36  ;;  %v9691_v62 = vor.u32 %v2239_v3, %v2238_v44  ;;  %v2376_v29 = vand.u32 2139095040, %v9673_v11  ;;  %v2247_v15 = vshll.u32 %v12138_v10, %v2232_v28 }
 0x1df   : > { %v9694_v41 = vor.u32 %v2242_v60, %v2241_v52  ;;  %v2246_v42 = vor.u32 %v2245_v61, %v2244_v63  ;;  %v2248_v33 = vshrl.u32 %v12139_v51, %v9653_v14  ;;  %v9699_v48 = vadd.f32 1.0, %v1583_v9 }
 0x1e0   : > { %v1721_v4 = vsel %vm1600_vm9, %v1720_v26, %v1719_v55  ;;  %v1871_v47 = vand.u32 2147483647, %v1870_v8  ;;  %v1873_v54 = vcvt.s32.f32 %v1866_v24  ;;  %v9704_v32 = vsel %vm7291_vm12, 0, %v7290_v18 }
 0x1e1   : > { %v2249_v30 = vor.u32 %v2248_v33, %v2247_v15  ;;  %vm2250_vm7 = vcmp.lt.s32.totalorder %v9683_v53, 1  ;;  %vm2253_vm13 = vcmp.lt.s32.totalorder %v9683_v53, 4  ;;  %vm2252_vm4 = vcmp.lt.s32.totalorder %v9683_v53, 3 }
 0x1e2   : > { %v2258_v28 = vsel %vm2250_vm7, %v9689_v7, %v9691_v62  ;;  %v2259_v55 = vsel %vm2253_vm13, %v2246_v42, 920167782  ;;  %v9715_v9 = vshll.u32 %v2226_v37, 8  ;;  %v2164_v18 = vshll.u32 %v9687_v20, 30 }
 0x1e3   : > { %vm2251_vm10 = vcmp.lt.s32.totalorder %v9683_v53, 2  ;;  %v2260_v19 = vsel %vm2252_vm4, %v9694_v41, %v2259_v55  ;;  %v2377_v26 = vshrl.u32 %v2376_v29, 23  ;;  %v1723_v24 = vsel %vm1600_vm9, %v1722_v38, %v9291_v21 }
 0x1e4   : > { %v2261_v1 = vsel %vm2251_vm10, %v2258_v28, %v2260_v19  ;;  %v2262_v12 = vsel %vm2250_vm7, %v9691_v62, %v9694_v41  ;;  %v2263_v3 = vsel %vm2253_vm13, %v2249_v30, 1326507024  ;;  %v9736_v60 = vsel %vm9677_vm5, %v12187_v27, %v1721_v4 }
 0x1e5   : > { %v9738_v61 = vmul.f32 %v1873_v54, %v1871_v47  ;;  %v2264_v21 = vsel %vm2252_vm4, %v2246_v42, %v2263_v3  ;;  %v2291_v38 = vand.u32 65535, %v2261_v1  ;;  %v2022_v13 = vsub.s32 4294967266, %v9704_v32 }
 0x1e6   : > { %v2265_v8 = vsel %vm2251_vm10, %v2262_v12, %v2264_v21  ;;  %v2267_v36 = vand.u32 65535, %v9715_v9  ;;  %v2292_v44 = vshrl.u32 %v2261_v1, 16  ;;  %v9747_v37 = vsub.s32 %v9642_v34, %v2164_v18 }
 0x1e7   : > { %v2268_v52 = vshrl.u32 %v9715_v9, 16  ;;  %v12044_v63 = vand.u32 2147483647, %v9673_v11  ;;  %v7298_v29 = vadd.s32 4294967169, %v2377_v26  ;;  %v9753_v42 = vsel %vm9677_vm5, 0, %v1723_v24 }
 0x1e8   : > { %v2269_v15 = vand.u32 65535, %v2265_v8  ;;  %v2270_v33 = vshrl.u32 %v2265_v8, 16  ;;  %v2294_v4 = vmul.u32 %v2292_v44, %v2267_v36  ;;  %v9757_v47 = vmul.f32 %v9736_v60, %v9736_v60 }
 0x1e9   : > { %v9762_v34 = vadd.s32 %v9483_v50, %v9481_v6  ;;  %v2295_v30 = vmul.u32 %v2291_v38, %v2268_v52  ;;  %v9765_v55 = vadd.s32 127, %v2022_v13  ;;  %vm2166_vm15 = vcmp.lt.s32.totalorder %v9747_v37, 0 }
 0x1ea   : > { %12193 = vst [vmem:[#allocation41_spill] sm:$0xff] %v9757_v47  ;;  %v2272_v59 = vmul.u32 %v2270_v33, %v2267_v36  ;;  %v2273_v18 = vmul.u32 %v2269_v15, %v2268_v52  ;;  %v2297_v19 = vshll.u32 %v2294_v4, 16  ;;  %v9770_v26 = vand.u32 8388607, %v12044_v63 }
 0x1eb   : > { %v2383_v24 = vadd.s32 1, %v7298_v29  ;;  %v2167_v1 = vsub.s32 0, %v9747_v37  ;;  %v2271_v12 = vmul.u32 %v2269_v15, %v2267_v36  ;;  %v2293_v50 = vmul.u32 %v2291_v38, %v2267_v36 }
 0x1ec   : > { %v2275_v6 = vshll.u32 %v2272_v59, 16  ;;  %v2274_v3 = vmul.u32 %v2270_v33, %v2268_v52  ;;  %v2277_v21 = vshll.u32 %v2273_v18, 16  ;;  %v2296_v8 = vmul.u32 %v2292_v44, %v2268_v52 }
 0x1ed   : > { %v2299_v13 = vshll.u32 %v2295_v30, 16  ;;  %vm2301_vm14 = vc.u32 %v2293_v50, %v2297_v19  ;;  %v2303_v54 = vadd.s32 %v2297_v19, %v2293_v50  ;;  %v2255_v28 = vsel %vm2253_vm13, %v9694_v41, 2102212464 }
 0x1ee   : > { %vm2279_vm11 = vc.u32 %v2271_v12, %v2275_v6  ;;  %v2281_v0 = vadd.s32 %v2275_v6, %v2271_v12  ;;  %v2302_v29 = vsel %vm2301_vm14, 1, %v12148_v17  ;;  %vm2384_vm8 = vcmp.gt.s32.totalorder %v2383_v24, 0 }
 0x1ef   : > { %v2280_v63 = vsel %vm2279_vm11, 1, %v12148_v17  ;;  %v2304_v38 = vadd.s32 %v2302_v29, %v2296_v8  ;;  %vm2305_vm3 = vc.u32 %v2303_v54, %v2299_v13  ;;  %v2234_v36 = vshrl.u32 %v12130_v56, %v9653_v14 }
 0x1f0   : > { %v2282_v15 = vadd.s32 %v2280_v63, %v2274_v3  ;;  %vm2283_vm6 = vc.u32 %v2281_v0, %v2277_v21  ;;  %v2298_v52 = vshrl.u32 %v2294_v4, 16  ;;  %v2306_v33 = vsel %vm2305_vm3, 1, %v12148_v17 }
 0x1f1   : > { %v2284_v44 = vsel %vm2283_vm6, 1, %v12148_v17  ;;  %v2276_v19 = vshrl.u32 %v2272_v59, 16  ;;  %v2308_v41 = vadd.s32 %v2306_v33, %v2304_v38  ;;  %v2385_v6 = vsel %vm2384_vm8, %v2383_v24, 0 }
 0x1f2   : > { %v2286_v12 = vadd.s32 %v2284_v44, %v2282_v15  ;;  %v2168_v50 = vsel %vm2166_vm15, %v2167_v1, %v9747_v37  ;;  %v2254_v0 = vsel %vm2250_vm7, %v2234_v36, %v9689_v7  ;;  %v2256_v14 = vsel %vm2252_vm4, %v9691_v62, %v2255_v28 }
 0x1f3   : > { %v2387_v63 = vand.u32 31, %v2385_v6  ;;  %v2278_v4 = vshrl.u32 %v2273_v18, 16  ;;  %v2300_v21 = vshrl.u32 %v2295_v30, 16  ;;  %v2309_v59 = vadd.s32 %v2308_v41, %v2298_v52  ;;  %v12194_v18 = vld [vmem:[#allocation16_spill] sm:$0xff] }
 0x1f4   : > { %v2287_v3 = vadd.s32 %v2286_v12, %v2276_v19  ;;  %v2019_v24 = vshll.u32 %v9594_v46, %v9704_v32  ;;  %v2024_v8 = vshll.u32 %v9765_v55, 23  ;;  %v2381_v1 = vor.u32 8388608, %v9770_v26 }
 0x1f5   : > { %v9795_v29 = vsub.s32 32, %v2387_v63  ;;  %v2257_v7 = vsel %vm2251_vm10, %v2254_v0, %v2256_v14  ;;  %v9801_v62 = vadd.s32 %v2303_v54, %v2299_v13  ;;  %v2310_v28 = vadd.s32 %v2309_v59, %v2300_v21 }
 0x1f6   : > { %v9799_v15 = vadd.s32 %v2287_v3, %v2278_v4  ;;  %vm1755_vm9 = vcmp.lt.s32.totalorder %v12194_v18, 0  ;;  %v2169_v30 = vclz %v2168_v50  ;;  %v2390_v38 = vshll.u32 %v12130_v56, %v2387_v63 }
 0x1f7   : > { %v2391_v46 = vshrl.u32 %v12131_v43, %v9795_v29  ;;  %v2394_v55 = vshrl.u32 %v12132_v23, %v9795_v29  ;;  %v2314_v53 = vadd.s32 1, %v2310_v28  ;;  %v2393_v26 = vshll.u32 %v12131_v43, %v2387_v63 }
 0x1f8   : > { %vm2313_vm5 = vc.u32 %v9799_v15, %v9801_v62  ;;  %v2397_v54 = vshrl.u32 %v12133_v5, %v9795_v29  ;;  %v2311_v13 = vmul.u32 %v9715_v9, %v2257_v7  ;;  %v9815_v36 = vshrl.u32 %v2385_v6, 5 }
 0x1f9   : > { %v9817_v44 = vor.u32 %v2391_v46, %v2390_v38  ;;  %v2396_v52 = vshll.u32 %v12132_v23, %v2387_v63  ;;  %v2315_v33 = vsel %vm2313_vm5, %v2314_v53, %v2310_v28  ;;  %v9820_v19 = vor.u32 %v2394_v55, %v2393_v26 }
 0x1fa   : > { %v2399_v12 = vshll.u32 %v12133_v5, %v2387_v63  ;;  %v2400_v41 = vshrl.u32 %v12138_v10, %v9795_v29  ;;  %v12195_v50 = vand.u32 2147483647, %v12194_v18  ;;  %v2316_v9 = vadd.s32 %v2315_v33, %v2311_v13 }
 0x1fb   : > { %v9831_v6 = vor.u32 %v2397_v54, %v2396_v52  ;;  %v2402_v14 = vshll.u32 %v12138_v10, %v2387_v63  ;;  %v2403_v4 = vshrl.u32 %v12139_v51, %v9795_v29  ;;  %v12198_v3 = vsub.s32 32, %v9704_v32 }
 0x1fc   : > { %vm9827_vm12 = vcmp.le.f32.partialorder %v12195_v50, 0.7853982  ;;  %v2025_v59 = vor.u32 4788187, %v2024_v8  ;;  %v7293_v7 = vadd.s32 4294967294, %v2169_v30  ;;  %v2401_v28 = vor.u32 %v2400_v41, %v2399_v12 }
 0x1fd   : > { %v2020_v21 = vshrl.u32 %v9762_v34, %v12198_v3  ;;  %v2317_v38 = vadd.s32 536870912, %v2316_v9  ;;  %v2404_v46 = vor.u32 %v2403_v4, %v2402_v14  ;;  %vm2405_vm7 = vcmp.lt.s32.totalorder %v9815_v36, 1  ;;  %v9879_v4 = vpop.permute.xlu1 %467 }
 0x1fe   : > { %vm2408_vm13 = vcmp.lt.s32.totalorder %v9815_v36, 4  ;;  %vm2407_vm4 = vcmp.lt.s32.totalorder %v9815_v36, 3  ;;  %v2413_v63 = vsel %vm2405_vm7, %v9817_v44, %v9820_v19  ;;  %v9848_v34 = vshll.u32 %v2381_v1, 8 }
 0x1ff   : > { %v2414_v32 = vsel %vm2408_vm13, %v2401_v28, 920167782  ;;  %v9850_v8 = vshrl.u32 %v2317_v38, 30  ;;  %vm2406_vm10 = vcmp.lt.s32.totalorder %v9815_v36, 2  ;;  %v2417_v55 = vsel %vm2405_vm7, %v9820_v19, %v9831_v6 }
 0x200   : > { %v2415_v30 = vsel %vm2407_vm4, %v9831_v6, %v2414_v32  ;;  %v1742_v53 = vadd.s32 3, %v9753_v42  ;;  %v12199_v26 = vxor.u32 2147483648, %v9738_v61  ;;  %v2418_v13 = vsel %vm2408_vm13, %v2404_v46, 1326507024 }
 0x201   : > { %v2416_v54 = vsel %vm2406_vm10, %v2413_v63, %v2415_v30  ;;  %v2021_v52 = vor.u32 %v2020_v21, %v2019_v24  ;;  %vm7294_vm15 = vcmp.lt.s32.totalorder %v7293_v7, 0  ;;  %v2319_v33 = vshll.u32 %v9850_v8, 30 }
 0x202   : > { %v1876_v1 = vsel %vm1755_vm9, %v12199_v26, %v9738_v61  ;;  %v2419_v12 = vsel %vm2407_vm4, %v2401_v28, %v2418_v13  ;;  %v1734_v41 = vmul.f32 -0.00019511016, %v9757_v47  ;;  %v9875_v50 = vand.u32 3, %v9753_v42  ;;  %v466_v26 = vpop.permute.xlu0 %465 }
 0x203   : > { %v2420_v61 = vsel %vm2406_vm10, %v2417_v55, %v2419_v12  ;;  %v2447_v14 = vshrl.u32 %v2416_v54, 16  ;;  %v2026_v3 = vand.u32 2147483647, %v2025_v59  ;;  %v2422_v24 = vand.u32 65535, %v9848_v34 }
 0x204   : > { %12200 = vst [vmem:[#allocation42_spill] sm:$0xff] %v9875_v50  ;;  %v2424_v21 = vand.u32 65535, %v2420_v61  ;;  %v2446_v38 = vand.u32 65535, %v2416_v54  ;;  %v9885_v28 = vsel %vm9827_vm12, %v12194_v18, %v1876_v1  ;;  %v9887_v46 = vsel %vm7294_vm15, 0, %v7293_v7 }
 0x205   : > { %v2423_v42 = vshrl.u32 %v9848_v34, 16  ;;  %v2425_v63 = vshrl.u32 %v2420_v61, 16  ;;  %v9890_v32 = vand.u32 3, %v1742_v53  ;;  %v2028_v30 = vcvt.s32.f32 %v2021_v52 }
 0x206   : > { %v9892_v55 = vsub.s32 %v2316_v9, %v2319_v33  ;;  %v2449_v59 = vmul.u32 %v2447_v14, %v2422_v24  ;;  %v9894_v13 = vadd.f32 0.008332121, %v1734_v41  ;;  %v9899_v7 = vmul.f32 %v9885_v28, %v9885_v28 }
 0x207   : > { %12201 = vst [vmem:[#allocation43_spill] sm:$0xff] %v9890_v32  ;;  %v2427_v12 = vmul.u32 %v2425_v63, %v2422_v24  ;;  %v2428_v1 = vmul.u32 %v2424_v21, %v2423_v42  ;;  %v9901_v27 = vmul.f32 %v2028_v30, %v2026_v3  ;;  %v2173_v53 = vsub.s32 32, %v9887_v46  ;;  %v7802_v32 = vld [vmem:[%s8008_s29 + $0x60] sm:$0xff] }
 0x208   : > { %v2450_v61 = vmul.u32 %v2446_v38, %v2423_v42  ;;  %v2177_v9 = vsub.s32 4294967266, %v9887_v46  ;;  %v2426_v52 = vmul.u32 %v2424_v21, %v2422_v24  ;;  %v630_v41 = vsel %vm12077_vm0, %v7802_v32, %v466_v26  ;;  %v594_v26 = vpop.permute.xlu1 %593 }
 0x209   : > { %v2430_v33 = vshll.u32 %v2427_v12, 16  ;;  %v2322_v54 = vsub.s32 0, %v9892_v55  ;;  %v2429_v50 = vmul.u32 %v2425_v63, %v2423_v42  ;;  %v2448_v40 = vmul.u32 %v2446_v38, %v2422_v24 }
 0x20a   : > { %v2452_v25 = vshll.u32 %v2449_v59, 16  ;;  %v2432_v57 = vshll.u32 %v2428_v1, 16  ;;  %v2451_v3 = vmul.u32 %v2447_v14, %v2423_v42  ;;  %v2454_v22 = vshll.u32 %v2450_v61, 16 }
 0x20b   : > { %vm2434_vm11 = vc.u32 %v2426_v52, %v2430_v33  ;;  %v2436_v16 = vadd.s32 %v2430_v33, %v2426_v52  ;;  %vm2321_vm8 = vcmp.lt.s32.totalorder %v9892_v55, 0  ;;  %v2178_v63 = vadd.s32 127, %v2177_v9 }
 0x20c   : > { %v2435_v30 = vsel %vm2434_vm11, 1, %v12148_v17  ;;  %vm2456_vm14 = vc.u32 %v2448_v40, %v2452_v25  ;;  %v2458_v45 = vadd.s32 %v2452_v25, %v2448_v40  ;;  %v2410_v14 = vsel %vm2408_vm13, %v9831_v6, 2102212464 }
 0x20d   : > { %v2437_v21 = vadd.s32 %v2435_v30, %v2429_v50  ;;  %vm2438_vm6 = vc.u32 %v2436_v16, %v2432_v57  ;;  %v2457_v32 = vsel %vm2456_vm14, 1, %v12148_v17  ;;  %v2431_v42 = vshrl.u32 %v2427_v12, 16 }
 0x20e   : > { %v2439_v24 = vsel %vm2438_vm6, 1, %v12148_v17  ;;  %v2459_v38 = vadd.s32 %v2457_v32, %v2451_v3  ;;  %vm2460_vm3 = vc.u32 %v2458_v45, %v2454_v22  ;;  %v647_v25 = vsel %vm12074_vm1, %v630_v41, %v530_v58 }
 0x20f   : > { %v2441_v52 = vadd.s32 %v2439_v24, %v2437_v21  ;;  %v2323_v40 = vsel %vm2321_vm8, %v2322_v54, %v9892_v55  ;;  %v2389_v16 = vshrl.u32 %v12130_v56, %v9795_v29  ;;  %v2461_v57 = vsel %vm2460_vm3, 1, %v12148_v17 }
 0x210   : > { %v9921_v50 = vsel %vm12073_vm2, %v647_v25, %v594_v26  ;;  %v2433_v9 = vshrl.u32 %v2428_v1, 16  ;;  %v2453_v3 = vshrl.u32 %v2449_v59, 16  ;;  %v2463_v30 = vadd.s32 %v2461_v57, %v2459_v38 }
 0x211   : > { %12202 = vst [vmem:[#allocation44_spill] sm:$0xff] %v9921_v50  ;;  %v2442_v33 = vadd.s32 %v2441_v52, %v2431_v42  ;;  %v2157_v6 = vadd.s32 %v9618_v35, %v9612_v31  ;;  %v2409_v58 = vsel %vm2405_vm7, %v2389_v16, %v9817_v44  ;;  %v2411_v29 = vsel %vm2407_vm4, %v9820_v19, %v2410_v14  ;;  %v12203_v35 = vld [vmem:[#allocation26_spill] sm:$0xff] }
 0x212   : > { %v2531_v54 = vand.u32 2139095040, %v9921_v50  ;;  %v2324_v12 = vclz %v2323_v40  ;;  %v2455_v1 = vshrl.u32 %v2450_v61, 16  ;;  %v2464_v21 = vadd.s32 %v2463_v30, %v2453_v3 }
 0x213   : > { %v9932_v41 = vadd.s32 %v2442_v33, %v2433_v9  ;;  %v2030_v59 = vxor.u32 2147483648, %v9901_v27  ;;  %v2179_v32 = vshll.u32 %v2178_v63, 23  ;;  %v9935_v26 = vadd.s32 %v2458_v45, %v2454_v22  ;;  %v532_v33 = vpop.permute.xlu0 %531 }
 0x214   : > { %v2532_v31 = vshrl.u32 %v2531_v54, 23  ;;  %vm1910_vm5 = vcmp.lt.s32.totalorder %v12203_v35, 0  ;;  %v2175_v44 = vshrl.u32 %v2157_v6, %v2173_v53  ;;  %v2412_v24 = vsel %vm2406_vm10, %v2409_v58, %v2411_v29  ;;  %v7803_v58 = vld [vmem:[%s8008_s29 + $0x68] sm:$0xff] }
 0x215   : > { %v2465_v19 = vadd.s32 %v2464_v21, %v2455_v1  ;;  %v1736_v38 = vmul.f32 %v9894_v13, %v9757_v47  ;;  %v12204_v61 = vsub.s32 4, %v9426_v39  ;;  %vm2468_vm7 = vc.u32 %v9932_v41, %v9935_v26 }
 0x216   : > { %v7301_v45 = vadd.s32 4294967169, %v2532_v31  ;;  %v1889_v22 = vmul.f32 -0.00019511016, %v9899_v7  ;;  %v2174_v36 = vshll.u32 %v9747_v37, %v9887_v46  ;;  %v7296_v53 = vadd.s32 4294967294, %v2324_v12 }
 0x217   : > { %v1878_v14 = vsel %vm1755_vm9, %v12204_v61, %v9426_v39  ;;  %v2469_v63 = vadd.s32 1, %v2465_v19  ;;  %v2031_v13 = vsel %vm1910_vm5, %v2030_v59, %v9901_v27  ;;  %v2180_v42 = vor.u32 4788187, %v2179_v32  ;;  %v596_v32 = vpop.permute.xlu2 %595 }
 0x218   : > { %v2466_v52 = vmul.u32 %v9848_v34, %v2412_v24  ;;  %v2538_v25 = vadd.s32 1, %v7301_v45  ;;  %v1880_v39 = vsel %vm9827_vm12, 0, %v1878_v14  ;;  %v12205_v40 = vand.u32 2147483647, %v12203_v35 }
 0x219   : > { %v2176_v37 = vor.u32 %v2175_v44, %v2174_v36  ;;  %v2470_v46 = vsel %vm2468_vm7, %v2469_v63, %v2465_v19  ;;  %v1737_v57 = vadd.f32 -0.16666654, %v1736_v38  ;;  %v12057_v27 = vand.u32 2147483647, %v9921_v50  ;;  %v12212_v63 = vld [vmem:[#allocation32_spill] sm:$0xff] }
 0x21a   : > { %vm9960_vm9 = vcmp.le.f32.partialorder %v12205_v40, 0.7853982  ;;  %v2471_v9 = vadd.s32 %v2470_v46, %v2466_v52  ;;  %vm2539_vm13 = vcmp.gt.s32.totalorder %v2538_v25, 0  ;;  %v1890_v34 = vadd.f32 0.008332121, %v1889_v22 }
 0x21b   : > { %v9968_v0 = vsel %vm9960_vm9, %v12203_v35, %v2031_v13  ;;  %vm7297_vm12 = vcmp.lt.s32.totalorder %v7296_v53, 0  ;;  %v2540_v3 = vsel %vm2539_vm13, %v2538_v25, 0  ;;  %v2181_v30 = vand.u32 2147483647, %v2180_v42 }
 0x21c   : > { %12208 = vst [vmem:[#allocation45_spill] sm:$0xff] %v9968_v0  ;;  %v2472_v6 = vadd.s32 536870912, %v2471_v9  ;;  %v631_v29 = vsel %vm12077_vm0, %v7803_v58, %v9879_v4  ;;  %v2542_v54 = vand.u32 31, %v2540_v3  ;;  %v9973_v12 = vadd.s32 3, %v1880_v39 }
 0x21d   : > { %v9975_v1 = vand.u32 3, %v1880_v39  ;;  %v2183_v21 = vcvt.s32.f32 %v2176_v37  ;;  %v648_v59 = vsel %vm12074_vm1, %v631_v29, %v532_v33  ;;  %v9978_v31 = vsel %vm7297_vm12, 0, %v7296_v53 }
 0x21e   : > { %v9980_v44 = vshrl.u32 %v2472_v6, 30  ;;  %v2535_v24 = vand.u32 8388607, %v12057_v27  ;;  %v9984_v19 = vsub.s32 32, %v2542_v54  ;;  %v9987_v4 = vmul.f32 %v1737_v57, %v9757_v47 }
 0x21f   : > { %12209 = vst [vmem:[#allocation46_spill] sm:$0xff] %v9975_v1  ;;  %v9990_v38 = vmul.f32 %v1890_v34, %v9899_v7  ;;  %v9995_v14 = vmul.f32 %v9968_v0, %v9968_v0  ;;  %v2184_v45 = vmul.f32 %v2183_v21, %v2181_v30  ;;  %v10001_v53 = vsel %vm12073_vm2, %v648_v59, %v596_v32 }
 0x220   : > { %12210 = vst [vmem:[#allocation47_spill] sm:$0xff] %v9980_v44  ;;  %v2474_v22 = vshll.u32 %v9980_v44, 30  ;;  %v2546_v36 = vshrl.u32 %v12131_v43, %v9984_v19  ;;  %vm2065_vm4 = vcmp.lt.s32.totalorder %v12212_v63, 0  ;;  %v2332_v13 = vsub.s32 4294967266, %v9978_v31 }
 0x221   : > { %12211 = vst [vmem:[#allocation48_spill] sm:$0xff] %v10001_v53  ;;  %v2549_v42 = vshrl.u32 %v12132_v23, %v9984_v19  ;;  %v2552_v52 = vshrl.u32 %v12133_v5, %v9984_v19  ;;  %v2555_v25 = vshrl.u32 %v12138_v10, %v9984_v19  ;;  %v2536_v40 = vor.u32 8388608, %v2535_v24 }
 0x222   : > { %v10011_v39 = vsub.s32 %v2471_v9, %v2474_v22  ;;  %v2545_v37 = vshll.u32 %v12130_v56, %v2542_v54  ;;  %v2548_v46 = vshll.u32 %v12131_v43, %v2542_v54  ;;  %v10015_v57 = vshrl.u32 %v2540_v3, 5 }
 0x223   : > { %v2551_v33 = vshll.u32 %v12132_v23, %v2542_v54  ;;  %v2554_v34 = vshll.u32 %v12133_v5, %v2542_v54  ;;  %v2686_v30 = vand.u32 2139095040, %v10001_v53  ;;  %v12213_v6 = vand.u32 2147483647, %v12212_v63 }
 0x224   : > { %vm2476_vm15 = vcmp.lt.s32.totalorder %v10011_v39, 0  ;;  %v2477_v9 = vsub.s32 0, %v10011_v39  ;;  %v2547_v29 = vor.u32 %v2546_v36, %v2545_v37  ;;  %v2550_v21 = vor.u32 %v2549_v42, %v2548_v46 }
 0x225   : > { %vm10022_vm10 = vcmp.le.f32.partialorder %v12213_v6, 0.7853982  ;;  %v2553_v3 = vor.u32 %v2552_v52, %v2551_v33  ;;  %v2556_v59 = vor.u32 %v2555_v25, %v2554_v34  ;;  %v2557_v32 = vshll.u32 %v12138_v10, %v2542_v54 }
 0x226   : > { %v2558_v24 = vshrl.u32 %v12139_v51, %v9984_v19  ;;  %v2185_v22 = vxor.u32 2147483648, %v2184_v45  ;;  %v2328_v27 = vsub.s32 32, %v9978_v31  ;;  %v2333_v6 = vadd.s32 127, %v2332_v13 }
 0x227   : > { %v2478_v61 = vsel %vm2476_vm15, %v2477_v9, %v10011_v39  ;;  %vm2560_vm11 = vcmp.lt.s32.totalorder %v10015_v57, 1  ;;  %vm2563_vm14 = vcmp.lt.s32.totalorder %v10015_v57, 4  ;;  %vm2562_vm8 = vcmp.lt.s32.totalorder %v10015_v57, 3 }
 0x228   : > { %v2479_v18 = vclz %v2478_v61  ;;  %v2559_v1 = vor.u32 %v2558_v24, %v2557_v32  ;;  %v2568_v54 = vsel %vm2560_vm11, %v2547_v29, %v2550_v21  ;;  %v2569_v36 = vsel %vm2563_vm14, %v2556_v59, 920167782 }
 0x229   : > { %v10040_v42 = vshll.u32 %v2536_v40, 8  ;;  %v2312_v13 = vadd.s32 %v9801_v62, %v9799_v15  ;;  %vm2561_vm6 = vcmp.lt.s32.totalorder %v10015_v57, 2  ;;  %v2570_v61 = vsel %vm2562_vm8, %v2553_v3, %v2569_v36 }
 0x22a   : > { %v2687_v52 = vshrl.u32 %v2686_v30, 23  ;;  %v2186_v25 = vsel %vm2065_vm4, %v2185_v22, %v2184_v45  ;;  %v2571_v37 = vsel %vm2561_vm6, %v2568_v54, %v2570_v61  ;;  %v2572_v46 = vsel %vm2560_vm11, %v2550_v21, %v2553_v3 }
 0x22b   : > { %v2573_v40 = vsel %vm2563_vm14, %v2559_v1, 1326507024  ;;  %v2330_v33 = vshrl.u32 %v2312_v13, %v2328_v27  ;;  %v7299_v15 = vadd.s32 4294967294, %v2479_v18  ;;  %v2601_v34 = vand.u32 65535, %v2571_v37 }
 0x22c   : > { %v2574_v62 = vsel %vm2562_vm8, %v2556_v59, %v2573_v40  ;;  %v2334_v9 = vshll.u32 %v2333_v6, 23  ;;  %v2577_v45 = vand.u32 65535, %v10040_v42  ;;  %v2602_v32 = vshrl.u32 %v2571_v37, 16 }
 0x22d   : > { %v2575_v30 = vsel %vm2561_vm6, %v2572_v46, %v2574_v62  ;;  %v10063_v24 = vsel %vm10022_vm10, %v12212_v63, %v2186_v25  ;;  %v2329_v27 = vshll.u32 %v9892_v55, %v9978_v31  ;;  %v2578_v18 = vshrl.u32 %v10040_v42, 16 }
 0x22e   : > { %12216 = vst [vmem:[#allocation32_spill] sm:$0xff] %v10063_v24  ;;  %v7304_v1 = vadd.s32 4294967169, %v2687_v52  ;;  %v2565_v59 = vsel %vm2563_vm14, %v2553_v3, 2102212464  ;;  %v2579_v22 = vand.u32 65535, %v2575_v30  ;;  %v2580_v6 = vshrl.u32 %v2575_v30, 16 }
 0x22f   : > { %v2604_v54 = vmul.u32 %v2602_v32, %v2577_v45  ;;  %v10070_v36 = vor.u32 %v2330_v33, %v2329_v27  ;;  %vm7300_vm3 = vcmp.lt.s32.totalorder %v7299_v15, 0  ;;  %v2544_v13 = vshrl.u32 %v12130_v56, %v9984_v19 }
 0x230   : > { %v2605_v61 = vmul.u32 %v2601_v34, %v2578_v18  ;;  %v10074_v25 = vor.u32 4788187, %v2334_v9  ;;  %v2582_v37 = vmul.u32 %v2580_v6, %v2577_v45  ;;  %v2583_v55 = vmul.u32 %v2579_v22, %v2578_v18 }
 0x231   : > { %v2564_v52 = vsel %vm2560_vm11, %v2544_v13, %v2547_v29  ;;  %v2566_v3 = vsel %vm2562_vm8, %v2550_v21, %v2565_v59  ;;  %v2607_v46 = vshll.u32 %v2604_v54, 16  ;;  %v2693_v40 = vadd.s32 1, %v7304_v1 }
 0x232   : > { %v10081_v33 = vsel %vm7300_vm3, 0, %v7299_v15  ;;  %v2581_v62 = vmul.u32 %v2579_v22, %v2577_v45  ;;  %v2585_v30 = vshll.u32 %v2582_v37, 16  ;;  %v2603_v19 = vmul.u32 %v2601_v34, %v2577_v45 }
 0x233   : > { %v2584_v27 = vmul.u32 %v2580_v6, %v2578_v18  ;;  %v2587_v9 = vshll.u32 %v2583_v55, 16  ;;  %v2606_v47 = vmul.u32 %v2602_v32, %v2578_v18  ;;  %v2609_v0 = vshll.u32 %v2605_v61, 16 }
 0x234   : > { %vm2589_vm7 = vc.u32 %v2581_v62, %v2585_v30  ;;  %v2591_v44 = vadd.s32 %v2585_v30, %v2581_v62  ;;  %vm2611_vm13 = vc.u32 %v2603_v19, %v2607_v46  ;;  %v2613_v31 = vadd.s32 %v2607_v46, %v2603_v19 }
 0x235   : > { %v2487_v29 = vsub.s32 4294967266, %v10081_v33  ;;  %v2590_v13 = vsel %vm2589_vm7, 1, %v12148_v17  ;;  %v2612_v21 = vsel %vm2611_vm13, 1, %v12148_v17  ;;  %vm2694_vm12 = vcmp.gt.s32.totalorder %v2693_v40, 0 }
 0x236   : > { %v2592_v15 = vadd.s32 %v2590_v13, %v2584_v27  ;;  %vm2593_vm15 = vc.u32 %v2591_v44, %v2587_v9  ;;  %v2614_v1 = vadd.s32 %v2612_v21, %v2606_v47  ;;  %vm2615_vm11 = vc.u32 %v2613_v31, %v2609_v0 }
 0x237   : > { %v2594_v34 = vsel %vm2593_vm15, 1, %v12148_v17  ;;  %v2608_v45 = vshrl.u32 %v2604_v54, 16  ;;  %v2616_v32 = vsel %vm2615_vm11, 1, %v12148_v17  ;;  %v12217_v18 = vand.u32 2147483647, %v10001_v53 }
 0x238   : > { %v2586_v22 = vshrl.u32 %v2582_v37, 16  ;;  %v2596_v6 = vadd.s32 %v2594_v34, %v2592_v15  ;;  %v2618_v46 = vadd.s32 %v2616_v32, %v2614_v1  ;;  %v2695_v62 = vsel %vm2694_vm12, %v2693_v40, 0 }
 0x239   : > { %v2690_v59 = vand.u32 8388607, %v12217_v18  ;;  %v2467_v30 = vadd.s32 %v9935_v26, %v9932_v41  ;;  %v2488_v19 = vadd.s32 127, %v2487_v29  ;;  %v2567_v47 = vsel %vm2561_vm6, %v2564_v52, %v2566_v3 }
 0x23a   : > { %v2697_v44 = vand.u32 31, %v2695_v62  ;;  %v2588_v27 = vshrl.u32 %v2583_v55, 16  ;;  %v2597_v9 = vadd.s32 %v2596_v6, %v2586_v22  ;;  %v2610_v54 = vshrl.u32 %v2605_v61, 16 }
 0x23b   : > { %v2619_v13 = vadd.s32 %v2618_v46, %v2608_v45  ;;  %v2336_v21 = vand.u32 2147483647, %v10074_v25  ;;  %v2483_v18 = vsub.s32 32, %v10081_v33  ;;  %v2691_v37 = vor.u32 8388608, %v2690_v59 }
 0x23c   : > { %v10096_v15 = vsub.s32 32, %v2697_v44  ;;  %v10098_v40 = vadd.s32 %v2597_v9, %v2588_v27  ;;  %v10100_v1 = vadd.s32 %v2613_v31, %v2609_v0  ;;  %v2621_v26 = vmul.u32 %v10040_v42, %v2567_v47 }
 0x23d   : > { %v2620_v41 = vadd.s32 %v2619_v13, %v2610_v54  ;;  %v2489_v57 = vshll.u32 %v2488_v19, 23  ;;  %v2700_v55 = vshll.u32 %v12130_v56, %v2697_v44  ;;  %v2703_v3 = vshll.u32 %v12131_v43, %v2697_v44 }
 0x23e   : > { %v2701_v61 = vshrl.u32 %v12131_v43, %v10096_v15  ;;  %v2704_v25 = vshrl.u32 %v12132_v23, %v10096_v15  ;;  %vm2623_vm14 = vc.u32 %v10098_v40, %v10100_v1  ;;  %v2707_v0 = vshrl.u32 %v12133_v5, %v10096_v15 }
 0x23f   : > { %v2624_v52 = vadd.s32 1, %v2620_v41  ;;  %v2485_v31 = vshrl.u32 %v2467_v30, %v2483_v18  ;;  %v10113_v42 = vshrl.u32 %v2695_v62, 5  ;;  %v2706_v34 = vshll.u32 %v12132_v23, %v2697_v44 }
 0x240   : > { %v10115_v29 = vor.u32 %v2701_v61, %v2700_v55  ;;  %v10118_v32 = vor.u32 %v2704_v25, %v2703_v3  ;;  %v2709_v59 = vshll.u32 %v12133_v5, %v2697_v44  ;;  %v2710_v22 = vshrl.u32 %v12138_v10, %v10096_v15 }
 0x241   : > { %v2625_v45 = vsel %vm2623_vm14, %v2624_v52, %v2620_v41  ;;  %v10123_v46 = vor.u32 %v2707_v0, %v2706_v34  ;;  %v2712_v19 = vshll.u32 %v12138_v10, %v2697_v44  ;;  %v2713_v62 = vshrl.u32 %v12139_v51, %v10096_v15  ;;  %v12218_v0 = vld [vmem:[#allocation11_spill] sm:$0xff] }
 0x242   : > { %v2626_v6 = vadd.s32 %v2625_v45, %v2621_v26  ;;  %v2484_v30 = vshll.u32 %v10011_v39, %v10081_v33  ;;  %v2490_v47 = vor.u32 4788187, %v2489_v57  ;;  %v2711_v27 = vor.u32 %v2710_v22, %v2709_v59 }
 0x243   : > { %v10130_v9 = vshll.u32 %v2691_v37, 8  ;;  %v2714_v13 = vor.u32 %v2713_v62, %v2712_v19  ;;  %vm2715_vm8 = vcmp.lt.s32.totalorder %v10113_v42, 1  ;;  %vm2718_vm6 = vcmp.lt.s32.totalorder %v10113_v42, 4 }
 0x244   : > { %v2627_v54 = vadd.s32 536870912, %v2626_v6  ;;  %v2486_v18 = vor.u32 %v2485_v31, %v2484_v30  ;;  %vm2717_vm3 = vcmp.lt.s32.totalorder %v10113_v42, 3  ;;  %v2723_v44 = vsel %vm2715_vm8, %v10115_v29, %v10118_v32 }
 0x245   : > { %v2724_v39 = vsel %vm2718_vm6, %v2711_v27, 920167782  ;;  %vm2716_vm7 = vcmp.lt.s32.totalorder %v10113_v42, 2  ;;  %v2727_v41 = vsel %vm2715_vm8, %v10118_v32, %v10123_v46  ;;  %v2338_v26 = vcvt.s32.f32 %v10070_v36 }
 0x246   : > { %v10141_v33 = vshrl.u32 %v2627_v54, 30  ;;  %v2725_v37 = vsel %vm2717_vm3, %v10123_v46, %v2724_v39  ;;  %v2491_v57 = vand.u32 2147483647, %v2490_v47  ;;  %v2728_v61 = vsel %vm2718_vm6, %v2714_v13, 1326507024 }
 0x247   : > { %v2726_v55 = vsel %vm2716_vm7, %v2723_v44, %v2725_v37  ;;  %v10158_v25 = vmul.f32 %v10063_v24, %v10063_v24  ;;  %v2729_v3 = vsel %vm2717_vm3, %v2711_v27, %v2728_v61  ;;  %v797_v31 = vmul.f32 -0.001358992, %v12218_v0 }
 0x248   : > { %v2629_v52 = vshll.u32 %v10141_v33, 30  ;;  %v2339_v34 = vmul.f32 %v2338_v26, %v2336_v21  ;;  %v2493_v36 = vcvt.s32.f32 %v2486_v18  ;;  %v2730_v45 = vsel %vm2716_vm7, %v2727_v41, %v2729_v3 }
 0x249   : > { %v2757_v59 = vshrl.u32 %v2726_v55, 16  ;;  %v2732_v19 = vand.u32 65535, %v10130_v9  ;;  %v2734_v62 = vand.u32 65535, %v2730_v45  ;;  %v2756_v30 = vand.u32 65535, %v2726_v55 }
 0x24a   : > { %v10166_v22 = vsub.s32 %v2626_v6, %v2629_v52  ;;  %v10170_v47 = vadd.f32 -0.16666654, %v9990_v38  ;;  %v2494_v54 = vmul.f32 %v2493_v36, %v2491_v57  ;;  %v2733_v27 = vshrl.u32 %v10130_v9, 16 }
 0x24b   : > { %v2735_v13 = vshrl.u32 %v2730_v45, 16  ;;  %v12219_v21 = vsub.s32 4, %v9579_v49  ;;  %v2759_v44 = vmul.u32 %v2757_v59, %v2732_v19  ;;  %v10183_v39 = vmul.f32 -0.00019511016, %v9995_v14 }
 0x24c   : > { %vm2631_vm13 = vcmp.lt.s32.totalorder %v10166_v22, 0  ;;  %v2632_v6 = vsub.s32 0, %v10166_v22  ;;  %v10186_v38 = vmul.f32 -0.00019511016, %v10158_v25  ;;  %vm2220_vm12 = vcmp.lt.s32.totalorder %v9604_v2, 0 }
 0x24d   : > { %v10178_v18 = vsel %vm1910_vm5, %v12219_v21, %v9579_v49  ;;  %v2737_v37 = vmul.u32 %v2735_v13, %v2732_v19  ;;  %v2738_v41 = vmul.u32 %v2734_v62, %v2733_v27  ;;  %v2340_v26 = vxor.u32 2147483648, %v2339_v34 }
 0x24e   : > { %v2633_v57 = vsel %vm2631_vm13, %v2632_v6, %v10166_v22  ;;  %v2760_v49 = vmul.u32 %v2756_v30, %v2733_v27  ;;  %v798_v55 = vadd.f32 0.041655596, %v797_v31  ;;  %vm12076_vm5 = vcmp.lt.s32.totalorder %v9673_v11, 0 }
 0x24f   : > { %v2495_v61 = vxor.u32 2147483648, %v2494_v54  ;;  %v2634_v52 = vclz %v2633_v57  ;;  %v2736_v3 = vmul.u32 %v2734_v62, %v2732_v19  ;;  %v2740_v36 = vshll.u32 %v2737_v37, 16 }
 0x250   : > { %v2739_v45 = vmul.u32 %v2735_v13, %v2733_v27  ;;  %v2742_v21 = vshll.u32 %v2738_v41, 16  ;;  %v2758_v35 = vmul.u32 %v2756_v30, %v2732_v19  ;;  %v2762_v51 = vshll.u32 %v2759_v44, 16 }
 0x251   : > { %v12220_v10 = vand.u32 2147483647, %v9604_v2  ;;  %v7302_v23 = vadd.s32 4294967294, %v2634_v52  ;;  %vm2744_vm11 = vc.u32 %v2736_v3, %v2740_v36  ;;  %v2746_v6 = vadd.s32 %v2740_v36, %v2736_v3 }
 0x252   : > { %v2761_v31 = vmul.u32 %v2757_v59, %v2733_v27  ;;  %v2745_v43 = vsel %vm2744_vm11, 1, %v12148_v17  ;;  %v2764_v53 = vshll.u32 %v2760_v49, 16  ;;  %vm2766_vm14 = vc.u32 %v2758_v35, %v2762_v51 }
 0x253   : > { %vm10193_vm15 = vcmp.le.f32.partialorder %v12220_v10, 0.7853982  ;;  %v2768_v62 = vadd.s32 %v2762_v51, %v2758_v35  ;;  %vm7303_vm13 = vcmp.lt.s32.totalorder %v7302_v23, 0  ;;  %v2747_v13 = vadd.s32 %v2745_v43, %v2739_v45 }
 0x254   : > { %vm2748_vm2 = vc.u32 %v2746_v6, %v2742_v21  ;;  %v2767_v19 = vsel %vm2766_vm14, 1, %v12148_v17  ;;  %v2637_v30 = vsel %vm7303_vm13, 0, %v7302_v23  ;;  %v2720_v59 = vsel %vm2718_vm6, %v10123_v46, 2102212464 }
 0x255   : > { %v2749_v10 = vsel %vm2748_vm2, 1, %v12148_v17  ;;  %v2769_v57 = vadd.s32 %v2767_v19, %v2761_v31  ;;  %vm2770_vm1 = vc.u32 %v2768_v62, %v2764_v53  ;;  %v2642_v24 = vsub.s32 4294967266, %v2637_v30 }
 0x256   : > { %v2741_v27 = vshrl.u32 %v2737_v37, 16  ;;  %v2751_v52 = vadd.s32 %v2749_v10, %v2747_v13  ;;  %v2341_v51 = vsel %vm2220_vm12, %v2340_v26, %v2339_v34  ;;  %v2699_v43 = vshrl.u32 %v12130_v56, %v10096_v15 }
 0x257   : > { %v2743_v35 = vshrl.u32 %v2738_v41, 16  ;;  %v2771_v23 = vsel %vm2770_vm1, 1, %v12148_v17  ;;  %v2643_v3 = vadd.s32 127, %v2642_v24  ;;  %v2763_v45 = vshrl.u32 %v2759_v44, 16  ;;  %v12223_v24 = vld [vmem:[#allocation12_spill] sm:$0xff] }
 0x258   : > { %v2752_v36 = vadd.s32 %v2751_v52, %v2741_v27  ;;  %v2773_v21 = vadd.s32 %v2771_v23, %v2769_v57  ;;  %v2496_v6 = vsel %vm12076_vm5, %v2495_v61, %v2494_v54  ;;  %v2719_v46 = vsel %vm2715_vm8, %v2699_v43, %v10115_v29 }
 0x259   : > { %v2721_v34 = vsel %vm2717_vm3, %v10118_v32, %v2720_v59  ;;  %v2765_v37 = vshrl.u32 %v2760_v49, 16  ;;  %v2638_v15 = vsub.s32 32, %v2637_v30  ;;  %v952_v31 = vmul.f32 -0.001358992, %v12223_v24 }
 0x25a   : > { %v10216_v41 = vadd.s32 %v2752_v36, %v2743_v35  ;;  %v2774_v26 = vadd.s32 %v2773_v21, %v2763_v45  ;;  %v2187_v44 = vsub.s32 4, %v9687_v20  ;;  %v10223_v54 = vsel %vm10193_vm15, %v9604_v2, %v2341_v51 }
 0x25b   : > { %v12224_v29 = vand.u32 2147483647, %v9673_v11  ;;  %v10231_v32 = vadd.s32 %v2768_v62, %v2764_v53  ;;  %v2622_v49 = vadd.s32 %v10100_v1, %v10098_v40  ;;  %v2644_v13 = vshll.u32 %v2643_v3, 23 }
 0x25c   : > { %v2722_v19 = vsel %vm2716_vm7, %v2719_v46, %v2721_v34  ;;  %v2775_v10 = vadd.s32 %v2774_v26, %v2765_v37  ;;  %v2045_v57 = vadd.f32 0.008332121, %v10183_v39  ;;  %v799_v53 = vmul.f32 %v798_v55, %v12218_v0 }
 0x25d   : > { %vm10227_vm1 = vcmp.le.f32.partialorder %v12224_v29, 0.7853982  ;;  %vm2778_vm2 = vc.u32 %v10216_v41, %v10231_v32  ;;  %v2200_v62 = vadd.f32 0.008332121, %v10186_v38  ;;  %v2640_v40 = vshrl.u32 %v2622_v49, %v2638_v15 }
 0x25e   : > { %v10241_v59 = vsel %vm10227_vm1, %v9673_v11, %v2496_v6  ;;  %v2779_v1 = vadd.s32 1, %v2775_v10  ;;  %v953_v27 = vadd.f32 0.041655596, %v952_v31  ;;  %v1893_v42 = vmul.f32 %v10170_v47, %v9899_v7 }
 0x25f   : > { %v2035_v39 = vsel %vm9960_vm9, 0, %v10178_v18  ;;  %v10254_v52 = vmul.f32 %v10223_v54, %v10223_v54  ;;  %v2776_v51 = vmul.u32 %v10130_v9, %v2722_v19  ;;  %v10259_v55 = vmul.f32 %v10241_v59, %v10241_v59 }
 0x260   : > { %v2639_v38 = vshll.u32 %v10166_v22, %v2637_v30  ;;  %v2645_v43 = vor.u32 4788187, %v2644_v13  ;;  %v2780_v35 = vsel %vm2778_vm2, %v2779_v1, %v2775_v10  ;;  %v10263_v47 = vand.u32 3, %v9973_v12  ;;  %v12229_v12 = vld [vmem:[#allocation35_spill] sm:$0xff] }
 0x261   : > { %12227 = vst [vmem:[#allocation11_spill] sm:$0xff] %v10254_v52  ;;  %v2046_v16 = vmul.f32 %v2045_v57, %v9995_v14  ;;  %v2781_v18 = vadd.s32 %v2780_v35, %v2776_v51  ;;  %v800_v23 = vadd.f32 -0.4999988, %v799_v53  ;;  %v2188_v3 = vsel %vm2065_vm4, %v2187_v44, %v9687_v20 }
 0x262   : > { %12228 = vst [vmem:[#allocation12_spill] sm:$0xff] %v10259_v55  ;;  %v2201_v9 = vmul.f32 %v2200_v62, %v10158_v25  ;;  %v2641_v36 = vor.u32 %v2640_v40, %v2639_v38  ;;  %v954_v45 = vmul.f32 %v953_v27, %v12223_v24  ;;  %v1739_v22 = vadd.f32 1.0, %v9987_v4 }
 0x263   : > { %v1894_v30 = vadd.f32 1.0, %v1893_v42  ;;  %v2052_v21 = vadd.s32 3, %v2035_v39  ;;  %v2782_v6 = vadd.s32 536870912, %v2781_v18  ;;  %v10274_v46 = vmul.f32 %v9699_v48, %v12229_v12  ;;  %v12237_v12 = vld [vmem:[#allocation6_spill] sm:$0xff] }
 0x264   : > { %v2354_v34 = vmul.f32 -0.00019511016, %v10254_v52  ;;  %v2509_v37 = vmul.f32 -0.00019511016, %v10259_v55  ;;  %v2646_v15 = vand.u32 2147483647, %v2645_v43  ;;  %v801_v4 = vmul.f32 %v800_v23, %v12218_v0 }
 0x265   : > { %v2047_v20 = vadd.f32 -0.16666654, %v2046_v16  ;;  %v2190_v26 = vsel %vm10022_vm10, 0, %v2188_v3  ;;  %v10280_v31 = vshrl.u32 %v2782_v6, 30  ;;  %v2202_v44 = vadd.f32 -0.16666654, %v2201_v9 }
 0x266   : > { %v2342_v29 = vsub.s32 4, %v9850_v8  ;;  %v2648_v49 = vcvt.s32.f32 %v2641_v36  ;;  %v955_v13 = vadd.f32 -0.4999988, %v954_v45  ;;  %v10285_v48 = vmul.f32 %v1739_v22, %v9736_v60  ;;  %v12234_v9 = vld [vmem:[#allocation27_spill] sm:$0xff] }
 0x267   : > { %v10288_v19 = vmul.f32 %v1894_v30, %v9885_v28  ;;  %v10290_v10 = vand.u32 3, %v2035_v39  ;;  %v2784_v58 = vshll.u32 %v10280_v31, 30  ;;  %v10293_v57 = vand.u32 3, %v2052_v21  ;;  %v12235_v22 = vld [vmem:[#allocation15_spill] sm:$0xff]  ;;  %v12236_v21 = vld [vmem:[#allocation5_spill] sm:$0xff] }
 0x268   : > { %v2355_v53 = vadd.f32 0.008332121, %v2354_v34  ;;  %v2510_v62 = vadd.f32 0.008332121, %v2509_v37  ;;  %v2649_v0 = vmul.f32 %v2648_v49, %v2646_v15  ;;  %v10295_v40 = vadd.s32 3, %v2190_v26  ;;  %v12238_v37 = vld [vmem:[#allocation19_spill] sm:$0xff] }
 0x269   : > { %v10297_v1 = vand.u32 3, %v2190_v26  ;;  %v10299_v27 = vsub.s32 %v2781_v18, %v2784_v58  ;;  %v802_v60 = vadd.f32 1.0, %v801_v4  ;;  %v10302_v42 = vmul.f32 %v2047_v20, %v9995_v14  ;;  %v12233_v18 = vld [vmem:[#allocation47_spill] sm:$0xff]  ;;  %v12239_v26 = vld [vmem:[#allocation14_spill] sm:$0xff] }
 0x26a   : > { %v10305_v28 = vmul.f32 %v2202_v44, %v10158_v25  ;;  %v10310_v39 = vsel %vm2220_vm12, %v2342_v29, %v9850_v8  ;;  %v956_v51 = vmul.f32 %v955_v13, %v12223_v24  ;;  %v12230_v38 = vand.u32 2147483647, %v9921_v50  ;;  %v12240_v44 = vld [vmem:[#allocation21_spill] sm:$0xff]  ;;  %v10345_v13 = vpop.permute.xlu1 %471 }
 0x26b   : > { %vm2530_vm4 = vcmp.lt.s32.totalorder %v9921_v50, 0  ;;  %vm2786_vm10 = vcmp.lt.s32.totalorder %v10299_v27, 0  ;;  %v2787_v35 = vsub.s32 0, %v10299_v27  ;;  %v2356_v16 = vmul.f32 %v2355_v53, %v10254_v52 }
 0x26c   : > { %vm10315_vm9 = vcmp.le.f32.partialorder %v12230_v38, 0.7853982  ;;  %v2497_v23 = vsub.s32 4, %v12233_v18  ;;  %v2511_v8 = vmul.f32 %v2510_v62, %v10259_v55  ;;  %v2650_v3 = vxor.u32 2147483648, %v2649_v0 }
 0x26d   : > { %v2788_v24 = vsel %vm2786_vm10, %v2787_v35, %v10299_v27  ;;  %v816_v36 = vxor.u32 2147483648, %v12234_v9  ;;  %v819_v45 = vxor.u32 2147483648, %v802_v60  ;;  %vm3293_vm8 = vcmp.lt.s32.totalorder %v12235_v22, 2 }
 0x26e   : > { %v2789_v30 = vclz %v2788_v24  ;;  %v957_v6 = vadd.f32 1.0, %v956_v51  ;;  %vm3294_vm7 = vcmp.eq.s32.totalorder %v12235_v22, 0  ;;  %vm3297_vm12 = vcmp.eq.s32.totalorder %v12235_v22, 2 }
 0x26f   : > { %v2777_v34 = vadd.s32 %v10231_v32, %v10216_v41  ;;  %vm3447_vm11 = vcmp.lt.s32.totalorder %v12238_v37, 2  ;;  %vm3448_vm14 = vcmp.eq.s32.totalorder %v12238_v37, 0  ;;  %vm3451_vm13 = vcmp.eq.s32.totalorder %v12238_v37, 2  ;;  %v12241_v41 = vld [vmem:[#allocation28_spill] sm:$0xff] }
 0x270   : > { %v2651_v15 = vsel %vm2530_vm4, %v2650_v3, %v2649_v0  ;;  %v7305_v20 = vadd.s32 4294967294, %v2789_v30  ;;  %vm814_vm2 = vcmp.lt.s32.totalorder %v12239_v26, 2  ;;  %vm815_vm10 = vcmp.eq.s32.totalorder %v12239_v26, 0 }
 0x271   : > { %v3296_v4 = vsel %vm3294_vm7, %v802_v60, %v816_v36  ;;  %vm818_vm5 = vcmp.eq.s32.totalorder %v12239_v26, 2  ;;  %vm969_vm0 = vcmp.lt.s32.totalorder %v12240_v44, 2  ;;  %vm970_vm3 = vcmp.eq.s32.totalorder %v12240_v44, 0 }
 0x272   : > { %vm7306_vm6 = vcmp.lt.s32.totalorder %v7305_v20, 0  ;;  %v971_v32 = vxor.u32 2147483648, %v12241_v41  ;;  %v974_v29 = vxor.u32 2147483648, %v957_v6  ;;  %v817_v49 = vsel %vm815_vm10, %v802_v60, %v816_v36 }
 0x273   : > { %v10350_v58 = vsel %vm10315_vm9, %v9921_v50, %v2651_v15  ;;  %v2792_v53 = vsel %vm7306_vm6, 0, %v7305_v20  ;;  %v3299_v62 = vsel %vm3297_vm12, %v819_v45, %v12234_v9  ;;  %vm973_vm7 = vcmp.eq.s32.totalorder %v12240_v44, 2 }
 0x274   : > { %12242 = vst [vmem:[#allocation35_spill] sm:$0xff] %v10350_v58  ;;  %v2793_v0 = vsub.s32 32, %v2792_v53  ;;  %v2797_v51 = vsub.s32 4294967266, %v2792_v53  ;;  %v3300_v60 = vsel %vm3293_vm8, %v3296_v4, %v3299_v62  ;;  %v820_v38 = vsel %vm818_vm5, %v819_v45, %v12234_v9  ;;  %v470_v45 = vpop.permute.xlu0 %469  ;;  %v7804_v4 = vld [vmem:[%s8008_s29 + $0x70] sm:$0xff] }
 0x275   : > { %v2794_v35 = vshll.u32 %v10299_v27, %v2792_v53  ;;  %v3450_v3 = vsel %vm3448_vm14, %v957_v6, %v971_v32  ;;  %v3453_v24 = vsel %vm3451_vm13, %v974_v29, %v12241_v41  ;;  %v821_v36 = vsel %vm814_vm2, %v817_v49, %v820_v38 }
 0x276   : > { %v2795_v30 = vshrl.u32 %v2777_v34, %v2793_v0  ;;  %v2798_v15 = vadd.s32 127, %v2797_v51  ;;  %v3454_v22 = vsel %vm3447_vm11, %v3450_v3, %v3453_v24  ;;  %v972_v9 = vsel %vm970_vm3, %v957_v6, %v971_v32 }
 0x277   : > { %vm12243_vm5 = vweird.f32 %v12236_v21  ;;  %vm12244_vm8 = vweird.f32 %v12237_v12  ;;  %v975_v26 = vsel %vm973_vm7, %v974_v29, %v12241_v41  ;;  %vm12245_vm6 = vcmask 23552   ;;  %v534_v29 = vpop.permute.xlu2 %533 }
 0x278   : > { %v3301_v27 = vsel %vm12243_vm5, nan, %v3300_v60  ;;  %v3455_v20 = vsel %vm12244_vm8, nan, %v3454_v22  ;;  %v632_v34 = vsel %vm12245_vm6, %v7804_v4, %v470_v45  ;;  %v2796_v49 = vor.u32 %v2795_v30, %v2794_v35  ;;  %vm12247_vm12 = vmmov %vm12243_vm5  ;;  %v12251_v30 = vld [vmem:[#allocation20_spill] sm:$0xff]  ;;  %v12252_v45 = vld [vmem:[#allocation45_spill] sm:$0xff] }
 0x279   : > { %v2799_v37 = vshll.u32 %v2798_v15, 23  ;;  %v7522_v53 = vpack.i.bf16 %v3455_v20, %v3301_v27  ;;  %v976_v6 = vsel %vm969_vm0, %v972_v9, %v975_v26  ;;  %v2357_v32 = vadd.f32 -0.16666654, %v2356_v16  ;;  %vm12248_vm11 = vmmov %vm12244_vm8  ;;  %v598_v16 = vpop.permute.xlu1 %597  ;;  %v12253_v20 = vld [vmem:[#allocation32_spill] sm:$0xff] }
 0x27a   : > { %vm12246_vm3 = vcmp.lt.s32.totalorder %v9673_v11, 0  ;;  %v822_v0 = vsel %vm12247_vm12, nan, %v821_v36  ;;  %v977_v41 = vsel %vm12248_vm11, nan, %v976_v6  ;;  %v2512_v51 = vadd.f32 -0.16666654, %v2511_v8 }
 0x27b   : > { %v2498_v62 = vsel %vm12246_vm3, %v2497_v23, %v12233_v18  ;;  %v2800_v60 = vor.u32 4788187, %v2799_v37  ;;  %7523 = vrot.lane.b32.xlu1 %v7522_v53, %s7896_s18  ;;  %v7517_v38 = vpack.i.bf16 %v977_v41, %v822_v0  ;;  %vm12249_vm14 = vcmask 48128  }
 0x27c   : > { %v649_v44 = vsel %vm12249_vm14, %v632_v34, %v534_v29  ;;  %v2049_v35 = vadd.f32 1.0, %v10302_v42  ;;  %v2204_v18 = vadd.f32 1.0, %v10305_v28  ;;  %v10395_v23 = vmul.f32 %v10350_v58, %v10350_v58  ;;  %vm12272_vm7 = vmmov %vm12249_vm14 }
 0x27d   : > { %vm12250_vm0 = vcmask 72704   ;;  %v2345_v8 = vsel %vm10193_vm15, 0, %v10310_v39  ;;  %v2801_v12 = vand.u32 2147483647, %v2800_v60  ;;  %v2803_v3 = vcvt.s32.f32 %v2796_v49  ;;  %7518 = vrot.lane.b32.xlu0 %v7517_v38, %s7887_s11 }
 0x27e   : > { %v10398_v21 = vsel %vm12250_vm0, %v649_v44, %v598_v16  ;;  %v10406_v42 = vand.u32 3, %v10295_v40  ;;  %v2500_v28 = vsel %vm10227_vm1, 0, %v2498_v62  ;;  %v2652_v36 = vsub.s32 4, %v10141_v33  ;;  %vm12273_vm8 = vmmov %vm12250_vm0 }
 0x27f   : > { %v2841_v24 = vand.u32 2139095040, %v10398_v21  ;;  %v1107_v15 = vmul.f32 -0.001358992, %v12251_v30  ;;  %v2358_v22 = vmul.f32 %v2357_v32, %v10254_v52  ;;  %v2513_v5 = vmul.f32 %v2512_v51, %v10259_v55  ;;  %v12254_v32 = vld [vmem:[#allocation48_spill] sm:$0xff]  ;;  %v12276_v55 = vld [vmem:[#allocation17_spill] sm:$0xff] }
 0x280   : > { %v2804_v39 = vmul.f32 %v2803_v3, %v2801_v12  ;;  %v10415_v27 = vmul.f32 %v2049_v35, %v12252_v45  ;;  %v10418_v26 = vmul.f32 %v2204_v18, %v12253_v20  ;;  %v2362_v40 = vadd.s32 3, %v2345_v8  ;;  %v7805_v45 = vld [vmem:[%s8008_s29 + $0x78] sm:$0xff] }
 0x281   : > { %v2842_v9 = vshrl.u32 %v2841_v24, 23  ;;  %v2664_v61 = vmul.f32 -0.00019511016, %v10395_v23  ;;  %v2807_v34 = vsub.s32 4, %v10280_v31  ;;  %v12078_v49 = vand.u32 2147483647, %v10398_v21 }
 0x282   : > { %v2805_v4 = vxor.u32 2147483648, %v2804_v39  ;;  %v2517_v53 = vadd.s32 3, %v2500_v28  ;;  %v2653_v6 = vsel %vm2530_vm4, %v2652_v36, %v10141_v33  ;;  %vm2685_vm15 = vcmp.lt.s32.totalorder %v12254_v32, 0 }
 0x283   : > { %v7307_v37 = vadd.s32 4294967169, %v2842_v9  ;;  %v1108_v62 = vadd.f32 0.041655596, %v1107_v15  ;;  %v2359_v0 = vadd.f32 1.0, %v2358_v22  ;;  %v2514_v41 = vadd.f32 1.0, %v2513_v5 }
 0x284   : > { %v2806_v29 = vsel %vm2685_vm15, %v2805_v4, %v2804_v39  ;;  %v10427_v60 = vand.u32 3, %v2362_v40  ;;  %v10429_v38 = vand.u32 3, %v2345_v8  ;;  %v2665_v44 = vadd.f32 0.008332121, %v2664_v61 }
 0x285   : > { %v2848_v51 = vadd.s32 1, %v7307_v37  ;;  %v12257_v16 = vand.u32 2147483647, %v12254_v32  ;;  %v2655_v33 = vsel %vm10315_vm9, 0, %v2653_v6  ;;  %v2808_v18 = vsel %vm2685_vm15, %v2807_v34, %v10280_v31  ;;  %vm12266_vm9 = vmmov %vm12245_vm6 }
 0x286   : > { %12255 = vst [vmem:[#allocation47_spill] sm:$0xff] %v10427_v60  ;;  %v2845_v12 = vand.u32 8388607, %v12078_v49  ;;  %v10442_v3 = vand.u32 3, %v2500_v28  ;;  %v1109_v36 = vmul.f32 %v1108_v62, %v12251_v30  ;;  %v10451_v43 = vmul.f32 %v2359_v0, %v10223_v54  ;;  %v536_v49 = vpop.permute.xlu0 %535 }
 0x287   : > { %12256 = vst [vmem:[#allocation27_spill] sm:$0xff] %v10429_v38  ;;  %vm10433_vm1 = vcmp.le.f32.partialorder %v12257_v16, 0.7853982  ;;  %vm2849_vm4 = vcmp.gt.s32.totalorder %v2848_v51, 0  ;;  %v10454_v31 = vmul.f32 %v2514_v41, %v10241_v59  ;;  %v10456_v15 = vand.u32 3, %v2517_v53 }
 0x288   : > { %12260 = vst [vmem:[#allocation15_spill] sm:$0xff] %v10442_v3  ;;  %v10447_v8 = vsel %vm10433_vm1, %v12254_v32, %v2806_v29  ;;  %v2850_v24 = vsel %vm2849_vm4, %v2848_v51, 0  ;;  %v2666_v28 = vmul.f32 %v2665_v44, %v10395_v23  ;;  %v10459_v5 = vadd.s32 3, %v2655_v33 }
 0x289   : > { %12261 = vst [vmem:[#allocation5_spill] sm:$0xff] %v10447_v8  ;;  %v2852_v22 = vand.u32 31, %v2850_v24  ;;  %v10461_v39 = vand.u32 3, %v2655_v33  ;;  %v10465_v9 = vsel %vm10433_vm1, 0, %v2808_v18  ;;  %v10469_v54 = vmul.f32 %v10447_v8, %v10447_v8 }
 0x28a   : > { %12262 = vst [vmem:[#allocation6_spill] sm:$0xff] %v10451_v43  ;;  %v633_v59 = vsel %vm12266_vm9, %v7805_v45, %v10345_v13  ;;  %v2846_v20 = vor.u32 8388608, %v2845_v12  ;;  %v10474_v61 = vshrl.u32 %v2850_v24, 5  ;;  %v12267_v34 = vmov 2475754826  }
 0x28b   : > { %12263 = vst [vmem:[#allocation19_spill] sm:$0xff] %v10454_v31  ;;  %v2853_v40 = vsub.s32 32, %v2852_v22  ;;  %v2855_v4 = vshll.u32 %v12130_v56, %v2852_v22  ;;  %v2858_v37 = vshll.u32 %v12267_v34, %v2852_v22  ;;  %v1110_v53 = vadd.f32 -0.4999988, %v1109_v36 }
 0x28c   : > { %12264 = vst [vmem:[#allocation14_spill] sm:$0xff] %v10456_v15  ;;  %v12268_v62 = vmov 2131351028   ;;  %v12269_v29 = vmov 2102212464   ;;  %v10487_v45 = vshll.u32 %v2846_v20, 8 }
 0x28d   : > { %12265 = vst [vmem:[#allocation21_spill] sm:$0xff] %v10461_v39  ;;  %v2856_v6 = vshrl.u32 %v12267_v34, %v2853_v40  ;;  %v2859_v0 = vshrl.u32 %v12268_v62, %v2853_v40  ;;  %v2861_v41 = vshll.u32 %v12268_v62, %v2852_v22  ;;  %v2864_v51 = vshll.u32 %v12269_v29, %v2852_v22 }
 0x28e   : > { %v2862_v44 = vshrl.u32 %v12269_v29, %v2853_v40  ;;  %v12270_v13 = vmov 920167782   ;;  %v12271_v33 = vmov 1326507024   ;;  %v2819_v12 = vmul.f32 -0.00019511016, %v10469_v54 }
 0x28f   : > { %v2865_v16 = vshrl.u32 %v12270_v13, %v2853_v40  ;;  %v2867_v35 = vshll.u32 %v12270_v13, %v2852_v22  ;;  %v2868_v18 = vshrl.u32 %v12271_v33, %v2853_v40  ;;  %v2857_v24 = vor.u32 %v2856_v6, %v2855_v4 }
 0x290   : > { %v2860_v36 = vor.u32 %v2859_v0, %v2858_v37  ;;  %v2863_v32 = vor.u32 %v2862_v44, %v2861_v41  ;;  %vm2870_vm13 = vcmp.lt.s32.totalorder %v10474_v61, 1  ;;  %vm2872_vm2 = vcmp.lt.s32.totalorder %v10474_v61, 3  ;;  %v600_v0 = vpop.permute.xlu2 %599 }
 0x291   : > { %v2866_v50 = vor.u32 %v2865_v16, %v2864_v51  ;;  %v2869_v39 = vor.u32 %v2868_v18, %v2867_v35  ;;  %vm2873_vm10 = vcmp.lt.s32.totalorder %v10474_v61, 4  ;;  %v1111_v15 = vmul.f32 %v1110_v53, %v12251_v30 }
 0x292   : > { %v2878_v22 = vsel %vm2870_vm13, %v2857_v24, %v2860_v36  ;;  %v2882_v20 = vsel %vm2870_vm13, %v2860_v36, %v2863_v32  ;;  %v650_v6 = vsel %vm12272_vm7, %v633_v59, %v536_v49  ;;  %v2820_v41 = vadd.f32 0.008332121, %v2819_v12 }
 0x293   : > { %v2879_v4 = vsel %vm2873_vm10, %v2866_v50, 920167782  ;;  %v2883_v37 = vsel %vm2873_vm10, %v2869_v39, 1326507024  ;;  %vm2871_vm5 = vcmp.lt.s32.totalorder %v10474_v61, 2  ;;  %v2887_v39 = vand.u32 65535, %v10487_v45 }
 0x294   : > { %v2880_v51 = vsel %vm2872_vm2, %v2863_v32, %v2879_v4  ;;  %v2884_v30 = vsel %vm2872_vm2, %v2866_v50, %v2883_v37  ;;  %v2888_v49 = vshrl.u32 %v10487_v45, 16  ;;  %v10514_v18 = vsel %vm12273_vm8, %v650_v6, %v600_v0 }
 0x295   : > { %v2881_v53 = vsel %vm2871_vm5, %v2878_v22, %v2880_v51  ;;  %v2885_v44 = vsel %vm2871_vm5, %v2882_v20, %v2884_v30  ;;  %v10516_v12 = vadd.f32 -0.16666654, %v2666_v28  ;;  %v2854_v50 = vshrl.u32 %v12130_v56, %v2853_v40 }
 0x296   : > { %v2889_v59 = vand.u32 65535, %v2885_v44  ;;  %v2890_v16 = vshrl.u32 %v2885_v44, 16  ;;  %v2911_v35 = vand.u32 65535, %v2881_v53  ;;  %v2875_v22 = vsel %vm2873_vm10, %v2863_v32, 2102212464 }
 0x297   : > { %v2912_v4 = vshrl.u32 %v2881_v53, 16  ;;  %v2821_v20 = vmul.f32 %v2820_v41, %v10469_v54  ;;  %v10522_v30 = vadd.f32 1.0, %v1111_v15  ;;  %v2874_v44 = vsel %vm2870_vm13, %v2854_v50, %v2857_v24 }
 0x298   : > { %v2892_v37 = vmul.u32 %v2890_v16, %v2887_v39  ;;  %v2893_v51 = vmul.u32 %v2889_v59, %v2888_v49  ;;  %v2915_v6 = vmul.u32 %v2911_v35, %v2888_v49  ;;  %v12093_v28 = vand.u32 2147483647, %v10514_v18 }
 0x299   : > { %v2914_v60 = vmul.u32 %v2912_v4, %v2887_v39  ;;  %v2876_v40 = vsel %vm2872_vm2, %v2860_v36, %v2875_v22  ;;  %v2891_v0 = vmul.u32 %v2889_v59, %v2887_v39  ;;  %v2894_v11 = vmul.u32 %v2890_v16, %v2888_v49 }
 0x29a   : > { %v2895_v32 = vshll.u32 %v2892_v37, 16  ;;  %v2897_v53 = vshll.u32 %v2893_v51, 16  ;;  %v2913_v2 = vmul.u32 %v2911_v35, %v2887_v39  ;;  %v2916_v41 = vmul.u32 %v2912_v4, %v2888_v49  ;;  %v12274_v39 = vld [vmem:[#allocation30_spill] sm:$0xff] }
 0x29b   : > { %v2917_v3 = vshll.u32 %v2914_v60, 16  ;;  %v2919_v38 = vshll.u32 %v2915_v6, 16  ;;  %v2996_v31 = vand.u32 2139095040, %v10514_v18  ;;  %v3000_v43 = vand.u32 8388607, %v12093_v28 }
 0x29c   : > { %vm2899_vm6 = vc.u32 %v2891_v0, %v2895_v32  ;;  %v2901_v15 = vadd.s32 %v2895_v32, %v2891_v0  ;;  %vm3602_vm11 = vcmp.eq.s32.totalorder %v12274_v39, 0  ;;  %v2896_v49 = vshrl.u32 %v2892_v37, 16 }
 0x29d   : > { %v2900_v24 = vsel %vm2899_vm6, 1, %v12148_v17  ;;  %vm2921_vm3 = vc.u32 %v2913_v2, %v2917_v3  ;;  %v2923_v50 = vadd.s32 %v2917_v3, %v2913_v2  ;;  %v2997_v16 = vshrl.u32 %v2996_v31, 23 }
 0x29e   : > { %v2902_v36 = vadd.s32 %v2900_v24, %v2894_v11  ;;  %vm2903_vm12 = vc.u32 %v2901_v15, %v2897_v53  ;;  %v2922_v59 = vsel %vm2921_vm3, 1, %v12148_v17  ;;  %v3001_v2 = vor.u32 8388608, %v3000_v43  ;;  %v12275_v15 = vld [vmem:[#allocation23_spill] sm:$0xff] }
 0x29f   : > { %v2904_v35 = vsel %vm2903_vm12, 1, %v12148_v17  ;;  %v2924_v22 = vadd.s32 %v2922_v59, %v2916_v41  ;;  %vm2925_vm14 = vc.u32 %v2923_v50, %v2919_v38  ;;  %v7310_v32 = vadd.s32 4294967169, %v2997_v16 }
 0x2a0   : > { %v2906_v4 = vadd.s32 %v2904_v35, %v2902_v36  ;;  %v2926_v0 = vsel %vm2925_vm14, 1, %v12148_v17  ;;  %v2877_v3 = vsel %vm2871_vm5, %v2874_v44, %v2876_v40  ;;  %v2918_v11 = vshrl.u32 %v2914_v60, 16 }
 0x2a1   : > { %v2928_v53 = vadd.s32 %v2926_v0, %v2924_v22  ;;  %v1262_v24 = vmul.f32 -0.001358992, %v12275_v15  ;;  %v2898_v31 = vshrl.u32 %v2893_v51, 16  ;;  %v2920_v8 = vshrl.u32 %v2915_v6, 16 }
 0x2a2   : > { %v2907_v28 = vadd.s32 %v2906_v4, %v2896_v49  ;;  %v3003_v37 = vadd.s32 1, %v7310_v32  ;;  %v1126_v41 = vxor.u32 2147483648, %v12276_v55  ;;  %v12098_v36 = vxor.u32 2147483648, %v10522_v30 }
 0x2a3   : > { %v2929_v58 = vadd.s32 %v2928_v53, %v2918_v11  ;;  %v1263_v59 = vadd.f32 0.041655596, %v1262_v24  ;;  %v10544_v43 = vadd.s32 %v2923_v50, %v2919_v38  ;;  %v10546_v61 = vshll.u32 %v3001_v2, 8  ;;  %v12277_v38 = vld [vmem:[#allocation22_spill] sm:$0xff] }
 0x2a4   : > { %v10542_v35 = vadd.s32 %v2907_v28, %v2898_v31  ;;  %vm3004_vm0 = vcmp.gt.s32.totalorder %v3003_v37, 0  ;;  %vm3605_vm15 = vcmp.eq.s32.totalorder %v12274_v39, 2  ;;  %v10550_v6 = vadd.f32 -0.16666654, %v2821_v20 }
 0x2a5   : > { %v2930_v60 = vadd.s32 %v2929_v58, %v2920_v8  ;;  %v3005_v44 = vsel %vm3004_vm0, %v3003_v37, 0  ;;  %v1264_v51 = vmul.f32 %v1263_v59, %v12275_v15  ;;  %v2931_v40 = vmul.u32 %v10487_v45, %v2877_v3 }
 0x2a6   : > { %vm2933_vm1 = vc.u32 %v10542_v35, %v10544_v43  ;;  %v3007_v28 = vand.u32 31, %v3005_v44  ;;  %vm3601_vm4 = vcmp.lt.s32.totalorder %v12274_v39, 2  ;;  %v3604_v58 = vsel %vm3602_vm11, %v10522_v30, %v1126_v41 }
 0x2a7   : > { %v2934_v16 = vadd.s32 1, %v2930_v60  ;;  %v3607_v8 = vsel %vm3605_vm15, %v12098_v36, %v12276_v55  ;;  %v3006_v45 = vshrl.u32 %v3005_v44, 5  ;;  %v10566_v49 = vshrl.u32 %v10546_v61, 16  ;;  %v12278_v36 = vld [vmem:[#allocation7_spill] sm:$0xff] }
 0x2a8   : > { %v3008_v20 = vsub.s32 32, %v3007_v28  ;;  %v1265_v22 = vadd.f32 -0.4999988, %v1264_v51  ;;  %v3010_v0 = vshll.u32 %v12130_v56, %v3007_v28  ;;  %v3013_v32 = vshll.u32 %v12267_v34, %v3007_v28 }
 0x2a9   : > { %v2935_v4 = vsel %vm2933_vm1, %v2934_v16, %v2930_v60  ;;  %v3016_v2 = vshll.u32 %v12268_v62, %v3007_v28  ;;  %v3019_v24 = vshll.u32 %v12269_v29, %v3007_v28  ;;  %v3022_v59 = vshll.u32 %v12270_v13, %v3007_v28 }
 0x2aa   : > { %v2936_v3 = vadd.s32 %v2935_v4, %v2931_v40  ;;  %v3011_v11 = vshrl.u32 %v12267_v34, %v3008_v20  ;;  %v3014_v53 = vshrl.u32 %v12268_v62, %v3008_v20  ;;  %v3017_v31 = vshrl.u32 %v12269_v29, %v3008_v20  ;;  %v12279_v40 = vld [vmem:[#allocation29_spill] sm:$0xff] }
 0x2ab   : > { %v3020_v37 = vshrl.u32 %v12270_v13, %v3008_v20  ;;  %v3023_v60 = vshrl.u32 %v12271_v33, %v3008_v20  ;;  %vm3025_vm9 = vcmp.lt.s32.totalorder %v3006_v45, 1  ;;  %vm1121_vm13 = vweird.f32 %v12278_v36 }
 0x2ac   : > { %v2937_v44 = vadd.s32 536870912, %v2936_v3  ;;  %v3012_v51 = vor.u32 %v3011_v11, %v3010_v0  ;;  %v3015_v16 = vor.u32 %v3014_v53, %v3013_v32  ;;  %vm1125_vm2 = vcmp.eq.s32.totalorder %v12279_v40, 0 }
 0x2ad   : > { %v3009_v34 = vshrl.u32 %v12130_v56, %v3008_v20  ;;  %v3018_v62 = vor.u32 %v3017_v31, %v3016_v2  ;;  %v3021_v4 = vor.u32 %v3020_v37, %v3019_v24  ;;  %v3024_v50 = vor.u32 %v3023_v60, %v3022_v59 }
 0x2ae   : > { %v10581_v29 = vshrl.u32 %v2937_v44, 30  ;;  %vm3027_vm10 = vcmp.lt.s32.totalorder %v3006_v45, 3  ;;  %vm3028_vm7 = vcmp.lt.s32.totalorder %v3006_v45, 4  ;;  %v3033_v13 = vsel %vm3025_vm9, %v3012_v51, %v3015_v16 }
 0x2af   : > { %v3030_v33 = vsel %vm3028_vm7, %v3018_v62, 2102212464  ;;  %v3034_v28 = vsel %vm3028_vm7, %v3021_v4, 920167782  ;;  %v3037_v0 = vsel %vm3025_vm9, %v3015_v16, %v3018_v62  ;;  %v3038_v32 = vsel %vm3028_vm7, %v3024_v50, 1326507024 }
 0x2b0   : > { %v2939_v11 = vshll.u32 %v10581_v29, 30  ;;  %vm3026_vm5 = vcmp.lt.s32.totalorder %v3006_v45, 2  ;;  %v3035_v53 = vsel %vm3027_vm10, %v3018_v62, %v3034_v28  ;;  %v3608_v56 = vsel %vm3601_vm4, %v3604_v58, %v3607_v8  ;;  %v12280_v45 = vld [vmem:[#allocation31_spill] sm:$0xff] }
 0x2b1   : > { %v3029_v20 = vsel %vm3025_vm9, %v3009_v34, %v3012_v51  ;;  %v3036_v2 = vsel %vm3026_vm5, %v3033_v13, %v3035_v53  ;;  %v3039_v24 = vsel %vm3027_vm10, %v3021_v4, %v3038_v32  ;;  %v1266_v31 = vmul.f32 %v1265_v22, %v12275_v15 }
 0x2b2   : > { %v10593_v37 = vsub.s32 %v2936_v3, %v2939_v11  ;;  %v3031_v50 = vsel %vm3027_vm10, %v3015_v16, %v3030_v33  ;;  %v3040_v59 = vsel %vm3026_vm5, %v3037_v0, %v3039_v24  ;;  %v3066_v60 = vand.u32 65535, %v3036_v2  ;;  %v12281_v11 = vld [vmem:[#allocation34_spill] sm:$0xff] }
 0x2b3   : > { %v3042_v44 = vand.u32 65535, %v10546_v61  ;;  %v3044_v62 = vand.u32 65535, %v3040_v59  ;;  %v3045_v39 = vshrl.u32 %v3040_v59, 16  ;;  %v3067_v58 = vshrl.u32 %v3036_v2, 16 }
 0x2b4   : > { %v2932_v8 = vadd.s32 %v10544_v43, %v10542_v35  ;;  %vm2941_vm8 = vcmp.lt.s32.totalorder %v10593_v37, 0  ;;  %v2942_v51 = vsub.s32 0, %v10593_v37  ;;  %v10603_v15 = vmul.u32 %v3066_v60, %v10566_v49 }
 0x2b5   : > { %v10606_v22 = vsel %vm3026_vm5, %v3029_v20, %v3031_v50  ;;  %v3047_v3 = vmul.u32 %v3045_v39, %v3042_v44  ;;  %v10610_v16 = vsel %vm1121_vm13, nan, %v3608_v56  ;;  %v1127_v35 = vsel %vm1125_vm2, %v10522_v30, %v1126_v41  ;;  %v12282_v50 = vld [vmem:[#allocation8_spill] sm:$0xff] }
 0x2b6   : > { %v2943_v43 = vsel %vm2941_vm8, %v2942_v51, %v10593_v37  ;;  %v3048_v34 = vmul.u32 %v3044_v62, %v10566_v49  ;;  %v3069_v4 = vmul.u32 %v3067_v58, %v3042_v44  ;;  %v10619_v13 = vadd.f32 1.0, %v1266_v31 }
 0x2b7   : > { %vm3756_vm6 = vcmp.eq.s32.totalorder %v12280_v45, 0  ;;  %v2944_v33 = vclz %v2943_v43  ;;  %v3046_v28 = vmul.u32 %v3044_v62, %v3042_v44  ;;  %v3050_v0 = vshll.u32 %v3047_v3, 16 }
 0x2b8   : > { %v3068_v32 = vmul.u32 %v3066_v60, %v3042_v44  ;;  %vm3759_vm3 = vcmp.eq.s32.totalorder %v12280_v45, 2  ;;  %vm1128_vm12 = vcmp.eq.s32.totalorder %v12279_v40, 2  ;;  %vm1280_vm11 = vcmp.eq.s32.totalorder %v12281_v11, 0 }
 0x2b9   : > { %v3049_v41 = vmul.u32 %v3045_v39, %v10566_v49  ;;  %v3071_v53 = vmul.u32 %v3067_v58, %v10566_v49  ;;  %v3072_v56 = vshll.u32 %v3069_v4, 16  ;;  %v3074_v20 = vshll.u32 %v10603_v15, 16 }
 0x2ba   : > { %vm3755_vm14 = vcmp.lt.s32.totalorder %v12280_v45, 2  ;;  %v7308_v2 = vadd.s32 4294967294, %v2944_v33  ;;  %v3051_v24 = vshrl.u32 %v3047_v3, 16  ;;  %vm3054_vm0 = vc.u32 %v3046_v28, %v3050_v0 }
 0x2bb   : > { %v3056_v31 = vadd.s32 %v3050_v0, %v3046_v28  ;;  %vm1276_vm15 = vweird.f32 %v12282_v50  ;;  %vm1124_vm1 = vcmp.lt.s32.totalorder %v12279_v40, 2  ;;  %v3052_v59 = vshll.u32 %v3048_v34, 16 }
 0x2bc   : > { %v3055_v60 = vsel %vm3054_vm0, 1, %v12148_v17  ;;  %vm3076_vm4 = vc.u32 %v3068_v32, %v3072_v56  ;;  %v3078_v44 = vadd.s32 %v3072_v56, %v3068_v32  ;;  %vm1283_vm9 = vcmp.eq.s32.totalorder %v12281_v11, 2 }
 0x2bd   : > { %vm7309_vm2 = vcmp.lt.s32.totalorder %v7308_v2, 0  ;;  %v3053_v49 = vshrl.u32 %v3048_v34, 16  ;;  %v3057_v62 = vadd.s32 %v3055_v60, %v3049_v41  ;;  %v1284_v39 = vxor.u32 2147483648, %v10619_v13 }
 0x2be   : > { %vm1279_vm10 = vcmp.lt.s32.totalorder %v12281_v11, 2  ;;  %v2947_v58 = vsel %vm7309_vm2, 0, %v7308_v2  ;;  %vm3058_vm7 = vc.u32 %v3056_v31, %v3052_v59  ;;  %v3077_v51 = vsel %vm3076_vm4, 1, %v12148_v17 }
 0x2bf   : > { %vm3080_vm5 = vc.u32 %v3078_v44, %v3074_v20  ;;  %v2948_v3 = vsub.s32 32, %v2947_v58  ;;  %v2952_v43 = vsub.s32 4294967266, %v2947_v58  ;;  %v3073_v33 = vshrl.u32 %v3069_v4, 16 }
 0x2c0   : > { %v3075_v28 = vshrl.u32 %v10603_v15, 16  ;;  %v2949_v0 = vshll.u32 %v10593_v37, %v2947_v58  ;;  %v3059_v32 = vsel %vm3058_vm7, 1, %v12148_v17  ;;  %v3079_v34 = vadd.s32 %v3077_v51, %v3071_v53 }
 0x2c1   : > { %v3081_v41 = vsel %vm3080_vm5, 1, %v12148_v17  ;;  %v2950_v56 = vshrl.u32 %v2932_v8, %v2948_v3  ;;  %v2953_v60 = vadd.s32 127, %v2952_v43  ;;  %v3061_v52 = vadd.s32 %v3059_v32, %v3057_v62 }
 0x2c2   : > { %v12283_v2 = vxor.u32 2147483648, %v12277_v38  ;;  %v3083_v59 = vadd.s32 %v3081_v41, %v3079_v34  ;;  %v3761_v15 = vsel %vm3759_vm3, %v1284_v39, %v12277_v38  ;;  %v12284_v37 = vxor.u32 2147483648, %v10522_v30  ;;  %v12287_v41 = vld [vmem:[#allocation36_spill] sm:$0xff] }
 0x2c3   : > { %v2951_v53 = vor.u32 %v2950_v56, %v2949_v0  ;;  %v2954_v62 = vshll.u32 %v2953_v60, 23  ;;  %v3062_v58 = vadd.s32 %v3061_v52, %v3051_v24  ;;  %v10660_v3 = vadd.s32 %v3078_v44, %v3074_v20  ;;  %v12286_v44 = vld [vmem:[#allocation33_spill] sm:$0xff] }
 0x2c4   : > { %v3758_v31 = vsel %vm3756_vm6, %v10619_v13, %v12283_v2  ;;  %v1130_v17 = vsel %vm1128_vm12, %v12284_v37, %v12276_v55  ;;  %v12285_v8 = vmov %v12283_v2  ;;  %v3084_v43 = vadd.s32 %v3083_v59, %v3073_v33 }
 0x2c5   : > { %v1282_v4 = vsel %vm1280_vm11, %v10619_v13, %v12285_v8  ;;  %v3762_v51 = vsel %vm3755_vm14, %v3758_v31, %v3761_v15  ;;  %v1131_v55 = vsel %vm1124_vm1, %v1127_v35, %v1130_v17  ;;  %v2955_v32 = vor.u32 4788187, %v2954_v62  ;;  %v12299_v17 = vld [vmem:[#allocation42_spill] sm:$0xff] }
 0x2c6   : > { %v3763_v30 = vsel %vm1276_vm15, nan, %v3762_v51  ;;  %v10666_v34 = vadd.s32 %v3062_v58, %v3053_v49  ;;  %v1285_v52 = vsel %vm1283_vm9, %v1284_v39, %v12277_v38  ;;  %v3085_v45 = vadd.s32 %v3084_v43, %v3075_v28  ;;  %v12291_v43 = vld [vmem:[#allocation9_spill] sm:$0xff] }
 0x2c7   : > { %v7532_v13 = vpack.i.bf16 %v3763_v30, %v10610_v16  ;;  %v1132_v20 = vsel %vm1121_vm13, nan, %v1131_v55  ;;  %v1286_v24 = vsel %vm1279_vm10, %v1282_v4, %v1285_v52  ;;  %v1417_v33 = vmul.f32 -0.001358992, %v12286_v44 }
 0x2c8   : > { %v2956_v40 = vand.u32 2147483647, %v2955_v32  ;;  %v2958_v35 = vcvt.s32.f32 %v2951_v53  ;;  %vm3088_vm8 = vc.u32 %v10666_v34, %v10660_v3  ;;  %v1287_v16 = vsel %vm1276_vm15, nan, %v1286_v24  ;;  %v12292_v32 = vld [vmem:[#allocation39_spill] sm:$0xff] }
 0x2c9   : > { %7533 = vrot.lane.b32.xlu0 %v7532_v13, %s7896_s18  ;;  %v2668_v38 = vmul.f32 %v10516_v12, %v10395_v23  ;;  %v3089_v36 = vadd.s32 1, %v3085_v45  ;;  %v7527_v49 = vpack.i.bf16 %v1287_v16, %v1132_v20  ;;  %v1418_v39 = vadd.f32 0.041655596, %v1417_v33  ;;  %v12293_v20 = vld [vmem:[#allocation24_spill] sm:$0xff]  ;;  %v12295_v16 = vld [vmem:[#allocation38_spill] sm:$0xff] }
 0x2ca   : > { %v10685_v11 = vand.u32 3, %v10459_v5  ;;  %v2959_v28 = vmul.f32 %v2958_v35, %v2956_v40  ;;  %v3086_v0 = vmul.u32 %v10546_v61, %v10606_v22  ;;  %v1572_v56 = vmul.f32 -0.001358992, %v12287_v41  ;;  %v12294_v40 = vld [vmem:[#allocation10_spill] sm:$0xff] }
 0x2cb   : > { %v2823_v60 = vmul.f32 %v10550_v6, %v10469_v54  ;;  %v2962_v50 = vsub.s32 4, %v10581_v29  ;;  %v3090_v2 = vsel %vm3088_vm8, %v3089_v36, %v3085_v45  ;;  %7528 = vrot.lane.b32.xlu2 %v7527_v49, %s7887_s11  ;;  %v1419_v12 = vmul.f32 %v1418_v39, %v12286_v44  ;;  %v12296_v39 = vld [vmem:[#allocation25_spill] sm:$0xff] }
 0x2cc   : > { %v10696_v31 = vadd.s32 3, %v10465_v9  ;;  %v2960_v5 = vxor.u32 2147483648, %v2959_v28  ;;  %v3091_v59 = vadd.s32 %v3090_v2, %v3086_v0  ;;  %v1573_v15 = vadd.f32 0.041655596, %v1572_v56  ;;  %v12297_v0 = vld [vmem:[#allocation37_spill] sm:$0xff] }
 0x2cd   : > { %v10698_v37 = vadd.f32 1.0, %v2668_v38  ;;  %v10701_v61 = vand.u32 3, %v10465_v9  ;;  %vm2840_vm13 = vcmp.lt.s32.totalorder %v10398_v21, 0  ;;  %v1420_v6 = vadd.f32 -0.4999988, %v1419_v12 }
 0x2ce   : > { %v12288_v22 = vand.u32 2147483647, %v10398_v21  ;;  %v2961_v8 = vsel %vm2840_vm13, %v2960_v5, %v2959_v28  ;;  %v3092_v4 = vadd.s32 536870912, %v3091_v59  ;;  %v1574_v53 = vmul.f32 %v1573_v15, %v12287_v41 }
 0x2cf   : > { %v10711_v62 = vadd.f32 1.0, %v2823_v60  ;;  %v2963_v58 = vsel %vm2840_vm13, %v2962_v50, %v10581_v29  ;;  %v1421_v51 = vmul.f32 %v1420_v6, %v12286_v44  ;;  %vm1431_vm3 = vweird.f32 %v12291_v43 }
 0x2d0   : > { %vm10706_vm6 = vcmp.le.f32.partialorder %v12288_v22, 0.7853982  ;;  %v10725_v55 = vshrl.u32 %v3092_v4, 30  ;;  %v1436_v13 = vxor.u32 2147483648, %v12292_v32  ;;  %v1575_v52 = vadd.f32 -0.4999988, %v1574_v53 }
 0x2d1   : > { %v10717_v9 = vsel %vm10706_vm6, %v10398_v21, %v2961_v8  ;;  %v1422_v45 = vadd.f32 1.0, %v1421_v51  ;;  %v1591_v29 = vxor.u32 2147483648, %v10274_v46  ;;  %vm3909_vm12 = vcmp.lt.s32.totalorder %v12293_v20, 2 }
 0x2d2   : > { %v10723_v30 = vmul.f32 %v10717_v9, %v10717_v9  ;;  %vm3910_vm11 = vcmp.eq.s32.totalorder %v12293_v20, 0  ;;  %v3094_v44 = vshll.u32 %v10725_v55, 30  ;;  %v1576_v33 = vmul.f32 %v1575_v52, %v12287_v41 }
 0x2d3   : > { %vm1586_vm14 = vweird.f32 %v12294_v40  ;;  %vm3913_vm0 = vcmp.eq.s32.totalorder %v12293_v20, 2  ;;  %v1439_v35 = vxor.u32 2147483648, %v1422_v45  ;;  %vm4063_vm15 = vcmp.lt.s32.totalorder %v12295_v16, 2 }
 0x2d4   : > { %v2974_v24 = vmul.f32 -0.00019511016, %v10723_v30  ;;  %vm4064_vm1 = vcmp.eq.s32.totalorder %v12295_v16, 0  ;;  %vm4067_vm4 = vcmp.eq.s32.totalorder %v12295_v16, 2  ;;  %v10739_v36 = vsub.s32 %v3091_v59, %v3094_v44 }
 0x2d5   : > { %v1577_v49 = vadd.f32 1.0, %v1576_v33  ;;  %vm1434_vm9 = vcmp.lt.s32.totalorder %v12296_v39, 2  ;;  %v3912_v28 = vsel %vm3910_vm11, %v1422_v45, %v1436_v13  ;;  %vm1435_vm2 = vcmp.eq.s32.totalorder %v12296_v39, 0 }
 0x2d6   : > { %v2975_v38 = vadd.f32 0.008332121, %v2974_v24  ;;  %vm1438_vm10 = vcmp.eq.s32.totalorder %v12296_v39, 2  ;;  %vm1589_vm7 = vcmp.lt.s32.totalorder %v12297_v0, 2  ;;  %vm3096_vm5 = vcmp.lt.s32.totalorder %v10739_v36, 0 }
 0x2d7   : > { %v3097_v41 = vsub.s32 0, %v10739_v36  ;;  %v3915_v56 = vsel %vm3913_vm0, %v1439_v35, %v12292_v32  ;;  %vm1590_vm8 = vcmp.eq.s32.totalorder %v12297_v0, 0  ;;  %v1594_v60 = vxor.u32 2147483648, %v1577_v49 }
 0x2d8   : > { %v3916_v50 = vsel %vm3909_vm12, %v3912_v28, %v3915_v56  ;;  %v4066_v2 = vsel %vm4064_vm1, %v1577_v49, %v1591_v29  ;;  %v1437_v12 = vsel %vm1435_vm2, %v1422_v45, %v1436_v13  ;;  %v2976_v5 = vmul.f32 %v2975_v38, %v10723_v30 }
 0x2d9   : > { %v3098_v59 = vsel %vm3096_vm5, %v3097_v41, %v10739_v36  ;;  %v3917_v15 = vsel %vm1431_vm3, nan, %v3916_v50  ;;  %vm1593_vm13 = vcmp.eq.s32.totalorder %v12297_v0, 2  ;;  %v4069_v22 = vsel %vm4067_vm4, %v1594_v60, %v10274_v46  ;;  %v12300_v50 = vld [vmem:[#allocation46_spill] sm:$0xff] }
 0x2da   : > { %v3099_v6 = vclz %v3098_v59  ;;  %v1440_v8 = vsel %vm1438_vm10, %v1439_v35, %v12292_v32  ;;  %v1592_v4 = vsel %vm1590_vm8, %v1577_v49, %v1591_v29  ;;  %v3117_v53 = vsub.s32 4, %v10725_v55  ;;  %v12298_v35 = vld [vmem:[#allocation41_spill] sm:$0xff] }
 0x2db   : > { %v4070_v51 = vsel %vm4063_vm15, %v4066_v2, %v4069_v22  ;;  %v1441_v13 = vsel %vm1434_vm9, %v1437_v12, %v1440_v8  ;;  %v1595_v52 = vsel %vm1593_vm13, %v1594_v60, %v10274_v46  ;;  %v2977_v29 = vadd.f32 -0.16666654, %v2976_v5 }
 0x2dc   : > { %v7311_v45 = vadd.s32 4294967294, %v3099_v6  ;;  %v4071_v20 = vsel %vm1586_vm14, nan, %v4070_v51  ;;  %v1442_v24 = vsel %vm1431_vm3, nan, %v1441_v13  ;;  %v1596_v32 = vsel %vm1589_vm7, %v1592_v4, %v1595_v52  ;;  %v12303_v51 = vld [vmem:[#allocation16_spill] sm:$0xff] }
 0x2dd   : > { %v7542_v44 = vpack.i.bf16 %v4071_v20, %v3917_v15  ;;  %v1597_v33 = vsel %vm1586_vm14, nan, %v1596_v32  ;;  %v1727_v16 = vmul.f32 -0.001358992, %v12298_v35  ;;  %vm2995_vm12 = vcmp.lt.s32.totalorder %v10514_v18, 0  ;;  %v12301_v15 = vld [vmem:[#allocation43_spill] sm:$0xff] }
 0x2de   : > { %vm7312_vm11 = vcmp.lt.s32.totalorder %v7311_v45, 0  ;;  %v7537_v46 = vpack.i.bf16 %v1597_v33, %v1442_v24  ;;  %v1882_v38 = vmul.f32 -0.001358992, %v9899_v7  ;;  %v10783_v43 = vsel %vm10706_vm6, 0, %v2963_v58 }
 0x2df   : > { %v3087_v49 = vadd.s32 %v10660_v3, %v10666_v34  ;;  %v3102_v39 = vsel %vm7312_vm11, 0, %v7311_v45  ;;  %7543 = vrot.lane.b32.xlu2 %v7542_v44, %s7896_s18  ;;  %v1728_v40 = vadd.f32 0.041655596, %v1727_v16  ;;  %v10791_v41 = vsel %vm2995_vm12, %v3117_v53, %v10725_v55 }
 0x2e0   : > { %v3103_v28 = vsub.s32 32, %v3102_v39  ;;  %v3107_v0 = vsub.s32 4294967266, %v3102_v39  ;;  %7538 = vrot.lane.b32.xlu1 %v7537_v46, %s7887_s11  ;;  %v1883_v56 = vadd.f32 0.041655596, %v1882_v38  ;;  %vm4218_vm6 = vcmp.eq.s32.totalorder %v12299_v17, 0 }
 0x2e1   : > { %v10796_v58 = vmul.f32 %v2977_v29, %v10723_v30  ;;  %v1729_v3 = vmul.f32 %v1728_v40, %v12298_v35  ;;  %v1746_v34 = vxor.u32 2147483648, %v10285_v48  ;;  %v1901_v60 = vxor.u32 2147483648, %v10288_v19 }
 0x2e2   : > { %vm4372_vm3 = vcmp.eq.s32.totalorder %v12300_v50, 0  ;;  %v3104_v2 = vshll.u32 %v10739_v36, %v3102_v39  ;;  %v3105_v55 = vshrl.u32 %v3087_v49, %v3103_v28  ;;  %v3108_v12 = vadd.s32 127, %v3107_v0  ;;  %v12302_v36 = vld [vmem:[#allocation13_spill] sm:$0xff] }
 0x2e3   : > { %v1884_v5 = vmul.f32 %v1883_v56, %v9899_v7  ;;  %vm4221_vm14 = vcmp.eq.s32.totalorder %v12299_v17, 2  ;;  %v1730_v59 = vadd.f32 -0.4999988, %v1729_v3  ;;  %vm4217_vm0 = vcmp.lt.s32.totalorder %v12299_v17, 2 }
 0x2e4   : > { %vm4375_vm15 = vcmp.eq.s32.totalorder %v12300_v50, 2  ;;  %vm1744_vm1 = vcmp.lt.s32.totalorder %v12301_v15, 2  ;;  %vm1745_vm4 = vcmp.eq.s32.totalorder %v12301_v15, 0  ;;  %vm1748_vm9 = vcmp.eq.s32.totalorder %v12301_v15, 2 }
 0x2e5   : > { %v3106_v6 = vor.u32 %v3105_v55, %v3104_v2  ;;  %v3109_v22 = vshll.u32 %v3108_v12, 23  ;;  %vm1741_vm2 = vweird.f32 %v12302_v36  ;;  %v1885_v8 = vadd.f32 -0.4999988, %v1884_v5 }
 0x2e6   : > { %vm4371_vm10 = vcmp.lt.s32.totalorder %v12300_v50, 2  ;;  %v2037_v4 = vmul.f32 -0.001358992, %v9995_v14  ;;  %v1731_v53 = vmul.f32 %v1730_v59, %v12298_v35  ;;  %vm1896_vm7 = vweird.f32 %v12303_v51 }
 0x2e7   : > { %vm1899_vm5 = vcmp.lt.s32.totalorder %v10263_v47, 2  ;;  %vm1900_vm8 = vcmp.eq.s32.totalorder %v10263_v47, 0  ;;  %v2192_v13 = vmul.f32 -0.001358992, %v10158_v25  ;;  %v12304_v52 = vand.u32 2147483647, %v10514_v18 }
 0x2e8   : > { %v3110_v20 = vor.u32 4788187, %v3109_v22  ;;  %v1886_v24 = vmul.f32 %v1885_v8, %v9899_v7  ;;  %vm1903_vm11 = vcmp.eq.s32.totalorder %v10263_v47, 2  ;;  %v2038_v32 = vadd.f32 0.041655596, %v2037_v4 }
 0x2e9   : > { %vm10820_vm13 = vcmp.le.f32.partialorder %v12304_v52, 0.7853982  ;;  %v3113_v29 = vcvt.s32.f32 %v3106_v6  ;;  %v1732_v44 = vadd.f32 1.0, %v1731_v53  ;;  %v2056_v33 = vxor.u32 2147483648, %v10415_v27  ;;  %v12307_v53 = vld [vmem:[#allocation26_spill] sm:$0xff] }
 0x2ea   : > { %v2193_v35 = vadd.f32 0.041655596, %v2192_v13  ;;  %v3111_v16 = vand.u32 2147483647, %v3110_v20  ;;  %v1887_v46 = vadd.f32 1.0, %v1886_v24  ;;  %v2039_v38 = vmul.f32 %v2038_v32, %v9995_v14 }
 0x2eb   : > { %v2211_v49 = vxor.u32 2147483648, %v10418_v26  ;;  %v1749_v39 = vxor.u32 2147483648, %v1732_v44  ;;  %v4220_v40 = vsel %vm4218_vm6, %v1732_v44, %v1746_v34  ;;  %v1747_v7 = vsel %vm1745_vm4, %v1732_v44, %v1746_v34 }
 0x2ec   : > { %v2194_v28 = vmul.f32 %v2193_v35, %v10158_v25  ;;  %v3114_v0 = vmul.f32 %v3113_v29, %v3111_v16  ;;  %v1904_v56 = vxor.u32 2147483648, %v1887_v46  ;;  %v4374_v3 = vsel %vm4372_vm3, %v1887_v46, %v1901_v60 }
 0x2ed   : > { %v1902_v2 = vsel %vm1900_vm8, %v1887_v46, %v1901_v60  ;;  %v4223_v55 = vsel %vm4221_vm14, %v1749_v39, %v10285_v48  ;;  %v1750_v12 = vsel %vm1748_vm9, %v1749_v39, %v10285_v48  ;;  %v2040_v5 = vadd.f32 -0.4999988, %v2039_v38 }
 0x2ee   : > { %v2195_v34 = vadd.f32 -0.4999988, %v2194_v28  ;;  %v3115_v59 = vxor.u32 2147483648, %v3114_v0  ;;  %v4224_v6 = vsel %vm4217_vm0, %v4220_v40, %v4223_v55  ;;  %v4377_v22 = vsel %vm4375_vm15, %v1904_v56, %v10288_v19 }
 0x2ef   : > { %v1751_v60 = vsel %vm1744_vm1, %v1747_v7, %v1750_v12  ;;  %vm4525_vm6 = vcmp.lt.s32.totalorder %v10290_v10, 2  ;;  %v4225_v8 = vsel %vm1741_vm2, nan, %v4224_v6  ;;  %v4378_v48 = vsel %vm4371_vm10, %v4374_v3, %v4377_v22 }
 0x2f0   : > { %v1752_v4 = vsel %vm1741_vm2, nan, %v1751_v60  ;;  %v1905_v17 = vsel %vm1903_vm11, %v1904_v56, %v10288_v19  ;;  %vm2051_vm3 = vweird.f32 %v12307_v53  ;;  %v3116_v15 = vsel %vm2995_vm12, %v3115_v59, %v3114_v0  ;;  %v12308_v59 = vld [vmem:[#allocation11_spill] sm:$0xff]  ;;  %v12309_v60 = vld [vmem:[#allocation12_spill] sm:$0xff] }
 0x2f1   : > { %v4379_v13 = vsel %vm1896_vm7, nan, %v4378_v48  ;;  %v1906_v52 = vsel %vm1899_vm5, %v1902_v2, %v1905_v17  ;;  %v2041_v50 = vmul.f32 %v2040_v5, %v9995_v14  ;;  %vm2206_vm14 = vweird.f32 %v12212_v63  ;;  %v12311_v17 = vld [vmem:[#allocation5_spill] sm:$0xff] }
 0x2f2   : > { %v10873_v36 = vsel %vm10820_vm13, %v10514_v18, %v3116_v15  ;;  %v7552_v19 = vpack.i.bf16 %v4379_v13, %v4225_v8  ;;  %v1907_v20 = vsel %vm1896_vm7, nan, %v1906_v52  ;;  %v2196_v24 = vmul.f32 %v2195_v34, %v10158_v25  ;;  %v12310_v8 = vld [vmem:[#allocation35_spill] sm:$0xff] }
 0x2f3   : > { %v10880_v32 = vmul.f32 %v10873_v36, %v10873_v36  ;;  %v7547_v47 = vpack.i.bf16 %v1907_v20, %v1752_v4  ;;  %v2042_v29 = vadd.f32 1.0, %v2041_v50  ;;  %vm4526_vm12 = vcmp.eq.s32.totalorder %v10290_v10, 0  ;;  %v12313_v20 = vld [vmem:[#allocation19_spill] sm:$0xff] }
 0x2f4   : > { %7553 = vrot.lane.b32.xlu1 %v7552_v19, %s7896_s18  ;;  %v2197_v14 = vadd.f32 1.0, %v2196_v24  ;;  %vm4529_vm0 = vcmp.eq.s32.totalorder %v10290_v10, 2  ;;  %vm4679_vm15 = vcmp.lt.s32.totalorder %v10297_v1, 2  ;;  %vm4680_vm1 = vcmp.eq.s32.totalorder %v10297_v1, 0 }
 0x2f5   : > { %v3129_v51 = vmul.f32 -0.00019511016, %v10880_v32  ;;  %7548 = vrot.lane.b32.xlu0 %v7547_v47, %s7887_s11  ;;  %v2059_v25 = vxor.u32 2147483648, %v2042_v29  ;;  %v4528_v44 = vsel %vm4526_vm12, %v2042_v29, %v2056_v33  ;;  %vm4683_vm4 = vcmp.eq.s32.totalorder %v10297_v1, 2 }
 0x2f6   : > { %v2214_v35 = vxor.u32 2147483648, %v2197_v14  ;;  %v4682_v16 = vsel %vm4680_vm1, %v2197_v14, %v2211_v49  ;;  %vm2054_vm9 = vcmp.lt.s32.totalorder %v10293_v57, 2  ;;  %vm2055_vm2 = vcmp.eq.s32.totalorder %v10293_v57, 0 }
 0x2f7   : > { %v3130_v46 = vadd.f32 0.008332121, %v3129_v51  ;;  %v4531_v38 = vsel %vm4529_vm0, %v2059_v25, %v10415_v27  ;;  %v2057_v39 = vsel %vm2055_vm2, %v2042_v29, %v2056_v33  ;;  %vm2058_vm10 = vcmp.eq.s32.totalorder %v10293_v57, 2  ;;  %v12314_v29 = vld [vmem:[#allocation27_spill] sm:$0xff] }
 0x2f8   : > { %v4532_v40 = vsel %vm4525_vm6, %v4528_v44, %v4531_v38  ;;  %v4685_v7 = vsel %vm4683_vm4, %v2214_v35, %v10418_v26  ;;  %v2060_v28 = vsel %vm2058_vm10, %v2059_v25, %v10415_v27  ;;  %vm2209_vm7 = vcmp.lt.s32.totalorder %v10406_v42, 2 }
 0x2f9   : > { %v3131_v0 = vmul.f32 %v3130_v46, %v10880_v32  ;;  %v4533_v56 = vsel %vm2051_vm3, nan, %v4532_v40  ;;  %v4686_v3 = vsel %vm4679_vm15, %v4682_v16, %v4685_v7  ;;  %v2061_v33 = vsel %vm2054_vm9, %v2057_v39, %v2060_v28  ;;  %v12317_v16 = vld [vmem:[#allocation40_spill] sm:$0xff]  ;;  %v12318_v46 = vld [vmem:[#allocation47_spill] sm:$0xff]  ;;  %v12319_v39 = vld [vmem:[#allocation14_spill] sm:$0xff] }
 0x2fa   : > { %v4687_v57 = vsel %vm2206_vm14, nan, %v4686_v3  ;;  %v2062_v10 = vsel %vm2051_vm3, nan, %v2061_v33  ;;  %vm2210_vm5 = vcmp.eq.s32.totalorder %v10406_v42, 0  ;;  %vm2213_vm8 = vcmp.eq.s32.totalorder %v10406_v42, 2 }
 0x2fb   : > { %v3132_v27 = vadd.f32 -0.16666654, %v3131_v0  ;;  %v7562_v2 = vpack.i.bf16 %v4687_v57, %v4533_v56  ;;  %v2212_v55 = vsel %vm2210_vm5, %v2197_v14, %v2211_v49  ;;  %v2215_v12 = vsel %vm2213_vm8, %v2214_v35, %v10418_v26  ;;  %v12315_v14 = vld [vmem:[#allocation15_spill] sm:$0xff] }
 0x2fc   : > { %v2982_v1 = vadd.s32 3, %v10783_v43  ;;  %v3120_v5 = vsel %vm10820_vm13, 0, %v10791_v41  ;;  %v2216_v34 = vsel %vm2209_vm7, %v2212_v55, %v2215_v12  ;;  %v2347_v6 = vmul.f32 -0.001358992, %v12308_v59  ;;  %v12320_v55 = vld [vmem:[#allocation21_spill] sm:$0xff] }
 0x2fd   : > { %v2979_v22 = vadd.f32 1.0, %v10796_v58  ;;  %v3133_v42 = vmul.f32 %v3132_v27, %v10880_v32  ;;  %7563 = vrot.lane.b32.xlu0 %v7562_v2, %s7896_s18  ;;  %v2217_v49 = vsel %vm2206_vm14, nan, %v2216_v34  ;;  %v2502_v26 = vmul.f32 -0.001358992, %v12309_v60 }
 0x2fe   : > { %v10928_v48 = vmul.f32 %v10698_v37, %v12310_v8  ;;  %v10931_v41 = vand.u32 3, %v10696_v31  ;;  %v7557_v45 = vpack.i.bf16 %v2217_v49, %v2062_v10  ;;  %v2348_v4 = vadd.f32 0.041655596, %v2347_v6 }
 0x2ff   : > { %v10935_v58 = vmul.f32 %v10711_v62, %v12311_v17  ;;  %v10938_v53 = vand.u32 3, %v10783_v43  ;;  %v3134_v63 = vadd.f32 1.0, %v3133_v42  ;;  %v2503_v15 = vadd.f32 0.041655596, %v2502_v26  ;;  %v12312_v62 = vld [vmem:[#allocation6_spill] sm:$0xff] }
 0x300   : > { %v10940_v13 = vand.u32 3, %v2982_v1  ;;  %v10942_v52 = vadd.s32 3, %v3120_v5  ;;  %v10944_v37 = vand.u32 3, %v3120_v5  ;;  %7558 = vrot.lane.b32.xlu2 %v7557_v45, %s7887_s11  ;;  %v2349_v31 = vmul.f32 %v2348_v4, %v12308_v59 }
 0x301   : > { %v10949_v50 = vmul.f32 %v2979_v22, %v10717_v9  ;;  %v2366_v19 = vxor.u32 2147483648, %v12312_v62  ;;  %v2504_v43 = vmul.f32 %v2503_v15, %v12309_v60  ;;  %v2521_v24 = vxor.u32 2147483648, %v12313_v20  ;;  %v12316_v9 = vld [vmem:[#allocation18_spill] sm:$0xff]  ;;  %v12322_v15 = vld [vmem:[#allocation48_spill] sm:$0xff] }
 0x302   : > { %v2350_v47 = vadd.f32 -0.4999988, %v2349_v31  ;;  %vm4833_vm13 = vcmp.lt.s32.totalorder %v12314_v29, 2  ;;  %vm4834_vm11 = vcmp.eq.s32.totalorder %v12314_v29, 0  ;;  %vm4837_vm6 = vcmp.eq.s32.totalorder %v12314_v29, 2 }
 0x303   : > { %vm4988_vm3 = vcmp.eq.s32.totalorder %v12315_v14, 0  ;;  %v10959_v51 = vmul.f32 %v3134_v63, %v10873_v36  ;;  %vm2361_vm14 = vweird.f32 %v12316_v9  ;;  %v2505_v25 = vadd.f32 -0.4999988, %v2504_v43  ;;  %v12321_v63 = vld [vmem:[#allocation44_spill] sm:$0xff] }
 0x304   : > { %vm4987_vm12 = vcmp.lt.s32.totalorder %v12315_v14, 2  ;;  %vm4991_vm0 = vcmp.eq.s32.totalorder %v12315_v14, 2  ;;  %v2657_v44 = vmul.f32 -0.001358992, %v10395_v23  ;;  %v2351_v35 = vmul.f32 %v2350_v47, %v12308_v59 }
 0x305   : > { %vm2516_vm15 = vweird.f32 %v12317_v16  ;;  %vm2364_vm1 = vcmp.lt.s32.totalorder %v12318_v46, 2  ;;  %vm2365_vm4 = vcmp.eq.s32.totalorder %v12318_v46, 0  ;;  %v2812_v36 = vmul.f32 -0.001358992, %v10469_v54 }
 0x306   : > { %v2506_v38 = vmul.f32 %v2505_v25, %v12309_v60  ;;  %vm2368_vm9 = vcmp.eq.s32.totalorder %v12318_v46, 2  ;;  %vm2519_vm2 = vcmp.lt.s32.totalorder %v12319_v39, 2  ;;  %v2658_v40 = vadd.f32 0.041655596, %v2657_v44 }
 0x307   : > { %v2352_v7 = vadd.f32 1.0, %v2351_v35  ;;  %vm2520_vm10 = vcmp.eq.s32.totalorder %v12319_v39, 0  ;;  %vm2523_vm7 = vcmp.eq.s32.totalorder %v12319_v39, 2  ;;  %v2813_v28 = vadd.f32 0.041655596, %v2812_v36 }
 0x308   : > { %v2507_v0 = vadd.f32 1.0, %v2506_v38  ;;  %v2659_v56 = vmul.f32 %v2658_v40, %v10395_v23  ;;  %v2676_v3 = vxor.u32 2147483648, %v10928_v48  ;;  %v2831_v33 = vxor.u32 2147483648, %v10935_v58 }
 0x309   : > { %v2369_v57 = vxor.u32 2147483648, %v2352_v7  ;;  %v4836_v10 = vsel %vm4834_vm11, %v2352_v7, %v2366_v19  ;;  %v2367_v27 = vsel %vm2365_vm4, %v2352_v7, %v2366_v19  ;;  %v2814_v2 = vmul.f32 %v2813_v28, %v10469_v54 }
 0x30a   : > { %vm5142_vm5 = vcmp.eq.s32.totalorder %v12320_v55, 0  ;;  %v2524_v12 = vxor.u32 2147483648, %v2507_v0  ;;  %v4990_v1 = vsel %vm4988_vm3, %v2507_v0, %v2521_v24  ;;  %v2522_v5 = vsel %vm2520_vm10, %v2507_v0, %v2521_v24 }
 0x30b   : > { %v2660_v34 = vadd.f32 -0.4999988, %v2659_v56  ;;  %v4839_v59 = vsel %vm4837_vm6, %v2369_v57, %v12312_v62  ;;  %v2370_v6 = vsel %vm2368_vm9, %v2369_v57, %v12312_v62  ;;  %v2815_v22 = vadd.f32 -0.4999988, %v2814_v2 }
 0x30c   : > { %vm5145_vm8 = vcmp.eq.s32.totalorder %v12320_v55, 2  ;;  %v4840_v42 = vsel %vm4833_vm13, %v4836_v10, %v4839_v59  ;;  %v4993_v49 = vsel %vm4991_vm0, %v2524_v12, %v12313_v20  ;;  %v2371_v60 = vsel %vm2364_vm1, %v2367_v27, %v2370_v6  ;;  %v7451_v10 = vld [vmem:[%s11962_s1 + $0x8] sm:$0x30]  ;;  %v7524_v6 = vpop.permute.xlu1 %7523 }
 0x30d   : > { %v2525_v26 = vsel %vm2523_vm7, %v2524_v12, %v12313_v20  ;;  %vm5141_vm11 = vcmp.lt.s32.totalorder %v12320_v55, 2  ;;  %vm5295_vm6 = vcmp.lt.s32.totalorder %v10701_v61, 2  ;;  %v4841_v8 = vsel %vm2361_vm14, nan, %v4840_v42  ;;  %v7461_v59 = vld [vmem:[%s11967_s6 + $0x8] sm:$0x30] }
 0x30e   : > { %v4994_v45 = vsel %vm4987_vm12, %v4990_v1, %v4993_v49  ;;  %v2372_v4 = vsel %vm2361_vm14, nan, %v2371_v60  ;;  %v2526_v17 = vsel %vm2519_vm2, %v2522_v5, %v2525_v26  ;;  %vm2671_vm13 = vweird.f32 %v12321_v63  ;;  %v7519_v49 = vpop.permute.xlu0 %7518 }
 0x30f   : > { %vm2826_vm3 = vweird.f32 %v12322_v15  ;;  %v4995_v31 = vsel %vm2516_vm15, nan, %v4994_v45  ;;  %v2527_v62 = vsel %vm2516_vm15, nan, %v2526_v17  ;;  %v2661_v19 = vmul.f32 %v2660_v34, %v10395_v23  ;;  %v7407_v34 = vld [vmem:[%s11967_s6 + $0x8] sm:$0xf] }
 0x310   : > { %v2816_v43 = vmul.f32 %v2815_v22, %v10469_v54  ;;  %v7572_v20 = vpack.i.bf16 %v4995_v31, %v4841_v8  ;;  %v7567_v24 = vpack.i.bf16 %v2527_v62, %v2372_v4  ;;  %vm5296_vm14 = vcmp.eq.s32.totalorder %v10701_v61, 0 }
 0x311   : > { %vm5299_vm12 = vcmp.eq.s32.totalorder %v10701_v61, 2  ;;  %v2662_v47 = vadd.f32 1.0, %v2661_v19  ;;  %vm2674_vm0 = vcmp.lt.s32.totalorder %v10685_v11, 2  ;;  %vm2675_vm1 = vcmp.eq.s32.totalorder %v10685_v11, 0 }
 0x312   : > { %v2817_v29 = vadd.f32 1.0, %v2816_v43  ;;  %7573 = vrot.lane.b32.xlu2 %v7572_v20, %s7896_s18  ;;  %7568 = vrot.lane.b32.xlu1 %v7567_v24, %s7887_s11  ;;  %vm2678_vm15 = vcmp.eq.s32.totalorder %v10685_v11, 2  ;;  %vm2829_vm4 = vcmp.lt.s32.totalorder %v10931_v41, 2  ;;  %vm2830_vm9 = vcmp.eq.s32.totalorder %v10931_v41, 0 }
 0x313   : > { %v2967_v23 = vmul.f32 -0.001358992, %v10723_v30  ;;  %v2679_v54 = vxor.u32 2147483648, %v2662_v47  ;;  %v5144_v9 = vsel %vm5142_vm5, %v2662_v47, %v2676_v3  ;;  %v2677_v44 = vsel %vm2675_vm1, %v2662_v47, %v2676_v3 }
 0x314   : > { %v2834_v14 = vxor.u32 2147483648, %v2817_v29  ;;  %v5298_v25 = vsel %vm5296_vm14, %v2817_v29, %v2831_v33  ;;  %v2832_v35 = vsel %vm2830_vm9, %v2817_v29, %v2831_v33  ;;  %vm2833_vm2 = vcmp.eq.s32.totalorder %v10931_v41, 2  ;;  %v7367_v41 = vld [vmem:[%s11962_s1 + $0x8] sm:$0xf] }
 0x315   : > { %v2968_v16 = vadd.f32 0.041655596, %v2967_v23  ;;  %v5147_v46 = vsel %vm5145_vm8, %v2679_v54, %v10928_v48  ;;  %v2680_v38 = vsel %vm2678_vm15, %v2679_v54, %v10928_v48  ;;  %v3122_v57 = vmul.f32 -0.001358992, %v10880_v32 }
 0x316   : > { %v5301_v36 = vsel %vm5299_vm12, %v2834_v14, %v10935_v58  ;;  %v2835_v39 = vsel %vm2833_vm2, %v2834_v14, %v10935_v58  ;;  %v5148_v40 = vsel %vm5141_vm11, %v5144_v9, %v5147_v46  ;;  %v2681_v28 = vsel %vm2674_vm0, %v2677_v44, %v2680_v38  ;;  %v7806_v14 = vld [vmem:[%s8008_s29 + $0x8] sm:$0xff]  ;;  %v7460_v46 = vld [vmem:[%s11967_s6] sm:$0xff] }
 0x317   : > { %v5302_v7 = vsel %vm5295_vm6, %v5298_v25, %v5301_v36  ;;  %v2836_v0 = vsel %vm2829_vm4, %v2832_v35, %v2835_v39  ;;  %v5149_v56 = vsel %vm2671_vm13, nan, %v5148_v40  ;;  %v2682_v58 = vsel %vm2671_vm13, nan, %v2681_v28  ;;  %v7807_v35 = vld [vmem:[%s8008_s29] sm:$0xff] }
 0x318   : > { %v5303_v48 = vsel %vm2826_vm3, nan, %v5302_v7  ;;  %v2837_v3 = vsel %vm2826_vm3, nan, %v2836_v0  ;;  %v2969_v11 = vmul.f32 %v2968_v16, %v10723_v30  ;;  %v11067_v27 = vand.u32 3, %v10942_v52 }
 0x319   : > { %v7582_v61 = vpack.i.bf16 %v5303_v48, %v5149_v56  ;;  %v7577_v33 = vpack.i.bf16 %v2837_v3, %v2682_v58  ;;  %v2986_v55 = vxor.u32 2147483648, %v10949_v50  ;;  %v3123_v12 = vadd.f32 0.041655596, %v3122_v57  ;;  %v7808_v57 = vld [vmem:[%s8008_s29 + $0x18] sm:$0xff] }
 0x31a   : > { %v2970_v2 = vadd.f32 -0.4999988, %v2969_v11  ;;  %v3141_v1 = vxor.u32 2147483648, %v10959_v51  ;;  %vm5449_vm10 = vcmp.lt.s32.totalorder %v10938_v53, 2  ;;  %vm5450_vm7 = vcmp.eq.s32.totalorder %v10938_v53, 0 }
 0x31b   : > { %7583 = vrot.lane.b32.xlu1 %v7582_v61, %s7896_s18  ;;  %7578 = vrot.lane.b32.xlu0 %v7577_v33, %s7887_s11  ;;  %vm5453_vm5 = vcmp.eq.s32.totalorder %v10938_v53, 2  ;;  %vm2981_vm8 = vweird.f32 %v10398_v21  ;;  %v3124_v52 = vmul.f32 %v3123_v12, %v10880_v32  ;;  %vm5604_vm11 = vcmp.eq.s32.totalorder %v10944_v37, 0  ;;  %v7450_v53 = vld [vmem:[%s11962_s1] sm:$0xff] }
 0x31c   : > { %v2971_v5 = vmul.f32 %v2970_v2, %v10723_v30  ;;  %vm2984_vm6 = vcmp.lt.s32.totalorder %v10940_v13, 2  ;;  %vm5607_vm13 = vcmp.eq.s32.totalorder %v10944_v37, 2  ;;  %vm2985_vm3 = vcmp.eq.s32.totalorder %v10940_v13, 0 }
 0x31d   : > { %vm2988_vm14 = vcmp.eq.s32.totalorder %v10940_v13, 2  ;;  %v7368_v30 = vor.u32 %v7451_v10, %v7367_v41  ;;  %vm5825_vm12 = vcmask 1044480   ;;  %v3125_v42 = vadd.f32 -0.4999988, %v3124_v52  ;;  %v7809_v10 = vld [vmem:[%s8008_s29 + $0x10] sm:$0xff] }
 0x31e   : > { %v2972_v22 = vadd.f32 1.0, %v2971_v5  ;;  %vm5603_vm0 = vcmp.lt.s32.totalorder %v10944_v37, 2  ;;  %vm3139_vm1 = vcmp.lt.s32.totalorder %v11067_v27, 2  ;;  %vm5826_vm15 = vcmask 1045504  }
 0x31f   : > { %v7897_v60 = vmov 65535   ;;  %v7408_v8 = vor.u32 %v7461_v59, %v7407_v34  ;;  %v7526_v45 = vunpack.i.h.bf16 %v7524_v6  ;;  %v7525_v4 = vunpack.i.l.bf16 %v7524_v6 }
 0x320   : > { %v5827_v26 = vsel %vm5825_vm12, 4294967295, %v7897_v60  ;;  %v2989_v17 = vxor.u32 2147483648, %v2972_v22  ;;  %v3126_v63 = vmul.f32 %v3125_v42, %v10880_v32  ;;  %v5452_v15 = vsel %vm5450_vm7, %v2972_v22, %v2986_v55  ;;  %v7811_v42 = vld [vmem:[%s8008_s29 + $0x20] sm:$0xff] }
 0x321   : > { %v2987_v31 = vsel %vm2985_vm3, %v2972_v22, %v2986_v55  ;;  %v5828_v62 = vsel %vm5826_vm15, %v5827_v26, 0  ;;  %v7521_v19 = vunpack.i.h.bf16 %v7519_v49  ;;  %v7520_v43 = vunpack.i.l.bf16 %v7519_v49 }
 0x322   : > { %vm5756_vm4 = vcmask 121856   ;;  %v3127_v20 = vadd.f32 1.0, %v3126_v63  ;;  %v5455_v24 = vsel %vm5453_vm5, %v2989_v17, %v10949_v50  ;;  %v2990_v47 = vsel %vm2988_vm14, %v2989_v17, %v10949_v50 }
 0x323   : > { %v5830_v32 = vand.u32 %v7368_v30, %v5828_v62  ;;  %v5456_v29 = vsel %vm5449_vm10, %v5452_v15, %v5455_v24  ;;  %v2991_v23 = vsel %vm2984_vm6, %v2987_v31, %v2990_v47  ;;  %v6639_v54 = vand.u32 %v7408_v8, %v5828_v62  ;;  %v7810_v30 = vld [vmem:[%s8008_s29 + $0x28] sm:$0xff]  ;;  %v7812_v62 = vld [vmem:[%s8008_s29 + $0x38] sm:$0xff] }
 0x324   : > { %vm12323_vm9 = vcmask 23552   ;;  %v3144_v25 = vxor.u32 2147483648, %v3127_v20  ;;  %v5606_v44 = vsel %vm5604_vm11, %v3127_v20, %v3141_v1  ;;  %vm3140_vm2 = vcmp.eq.s32.totalorder %v11067_v27, 0 }
 0x325   : > { %v5741_v9 = vsel %vm12323_vm9, %v7806_v14, %v7521_v19  ;;  %vm3143_vm7 = vcmp.eq.s32.totalorder %v11067_v27, 2  ;;  %5838 = vmatpush.bf16.msra.mxu0 %v5830_v32  ;;  %v5457_v13 = vsel %vm2981_vm8, nan, %v5456_v29  ;;  %v3142_v50 = vsel %vm3140_vm2, %v3127_v20, %v3141_v1  ;;  %6647 = vmatpush.bf16.msra.mxu2 %v6639_v54  ;;  %vm12324_vm10 = vmmov %vm12323_vm9 }
 0x326   : > { %v5740_v16 = vsel %vm12324_vm10, %v7807_v35, %v7520_v43  ;;  %v5758_v36 = vsel %vm5756_vm4, %v5741_v9, %v7526_v45  ;;  %v5609_v38 = vsel %vm5607_vm13, %v3144_v25, %v10959_v51  ;;  %v2992_v39 = vsel %vm2981_vm8, nan, %v2991_v23  ;;  %vm12325_vm11 = vmmov %vm12323_vm9  ;;  %v7813_v43 = vld [vmem:[%s8008_s29 + $0x30] sm:$0xff] }
 0x327   : > { %v3145_v40 = vsel %vm3143_vm7, %v3144_v25, %v10959_v51  ;;  %v5757_v7 = vsel %vm5756_vm4, %v5740_v16, %v7525_v4  ;;  %vm3136_vm5 = vweird.f32 %v10514_v18  ;;  %v5610_v28 = vsel %vm5603_vm0, %v5606_v44, %v5609_v38  ;;  %v7529_v18 = vpop.permute.xlu2 %7528  ;;  %vm12326_vm6 = vmmov %vm12323_vm9  ;;  %v7814_v44 = vld [vmem:[%s8008_s29 + $0x48] sm:$0xff] }
 0x328   : > { %v3146_v0 = vsel %vm3139_vm1, %v3142_v50, %v3145_v40  ;;  %v5611_v56 = vsel %vm3136_vm5, nan, %v5610_v28  ;;  %v5773_v58 = vpack.c.bf16 %v5758_v36, %v5757_v7  ;;  %vm5800_vm8 = vcmask 220160   ;;  %vm12327_vm13 = vmmov %vm12326_vm6 }
 0x329   : > { %v3147_v48 = vsel %vm3136_vm5, nan, %v3146_v0  ;;  %5839 = vmatpush.bf16.msra.mxu0 %v7450_v53  ;;  %v7592_v3 = vpack.i.bf16 %v5611_v56, %v5457_v13  ;;  %6648 = vmatpush.bf16.msra.mxu2 %v7460_v46  ;;  %v7531_v37 = vunpack.i.h.bf16 %v7529_v18  ;;  %v7530_v51 = vunpack.i.l.bf16 %v7529_v18  ;;  %vm12328_vm3 = vmmov %vm12326_vm6  ;;  %v7815_v13 = vld [vmem:[%s8008_s29 + $0x40] sm:$0xff]  ;;  %v7816_v0 = vld [vmem:[%s8008_s29 + $0x58] sm:$0xff] }
 0x32a   : > { %v7587_v21 = vpack.i.bf16 %v3147_v48, %v2992_v39  ;;  %vm12329_vm14 = vmmov %vm12328_vm3  ;;  %v7817_v48 = vld [vmem:[%s8008_s29 + $0x50] sm:$0xff] }
 0x32b   : > { %7593 = vrot.lane.b32.xlu0 %v7592_v3, %s7896_s18  ;;  %v5743_v41 = vsel %vm12325_vm11, %v7808_v57, %v7531_v37  ;;  %v5742_v27 = vsel %vm12326_vm6, %v7809_v10, %v7530_v51  ;;  %vm12330_vm12 = vmmov %vm12328_vm3 }
 0x32c   : > { %7588 = vrot.lane.b32.xlu2 %v7587_v21, %s7887_s11  ;;  %7369 = vmatmul.msk.bf16.vlgmr.msra.gmra.mxu0 %vm5800_vm8, %v5773_v58  ;;  %vm12331_vm0 = vmmov %vm12328_vm3  ;;  %s353_s11 = scalar_lea.vmem [#allocation2], %s7262_s25 }
 0x32d   : > { %7409 = vmatmul.msk.bf16.vlgmr.msra.gmra.mxu2 %vm5800_vm8, %v5773_v58  ;;  %vm12332_vm1 = vmmov %vm12331_vm0  ;;  %s7193_s28 = sshll.u32 %s353_s11, 4  ;;  %s7194_s28 = int_to_ptr.vmem [resolvable:$true] %s7193_s28 }
 0x32e   : > { %vm12333_vm15 = vmmov %vm12331_vm0 }
 0x32f   : > { %vm12334_vm9 = vmmov %vm12331_vm0 }
 0x330   : > { %vm12335_vm2 = vmmov %vm12331_vm0 }
 0x331   : > { %vm12336_vm7 = vmmov %vm12331_vm0 }
 0x332   : > { %vm12337_vm10 = vmmov %vm12331_vm0 }
 0x333   : > { %vm12338_vm5 = vmmov %vm12331_vm0 }
 0x339   : > { %v7544_v1 = vpop.permute.xlu2 %7543 }
 0x33a   : > { %v7546_v59 = vunpack.i.h.bf16 %v7544_v1  ;;  %v7545_v6 = vunpack.i.l.bf16 %v7544_v1 }
 0x33b   : > { %v7534_v61 = vpop.permute.xlu0 %7533 }
 0x33c   : > { %v7536_v33 = vunpack.i.h.bf16 %v7534_v61  ;;  %v7535_v11 = vunpack.i.l.bf16 %v7534_v61 }
 0x33e   : > { %v5759_v2 = vsel %vm5756_vm4, %v5742_v27, %v7535_v11  ;;  %v5760_v55 = vsel %vm5756_vm4, %v5743_v41, %v7536_v33  ;;  %v7818_v41 = vld [vmem:[%s8008_s29 + $0x68] sm:$0xff]  ;;  %v7819_v27 = vld [vmem:[%s8008_s29 + $0x60] sm:$0xff] }
 0x33f   : > { %v5774_v12 = vpack.c.bf16 %v5760_v55, %v5759_v2 }
 0x341   : > { %7370 = vmatmul.msk.bf16.gmra.mxu0 %vm5800_vm8, %v5774_v12  ;;  %7410 = vmatmul.msk.bf16.gmra.mxu2 %vm5800_vm8, %v5774_v12 }
 0x352   : > { %v7539_v5 = vpop.permute.xlu1 %7538 }
 0x353   : > { %v7541_v52 = vunpack.i.h.bf16 %v7539_v5  ;;  %v7540_v34 = vunpack.i.l.bf16 %v7539_v5 }
 0x355   : > { %v5745_v22 = vsel %vm12327_vm13, %v7810_v30, %v7541_v52  ;;  %v5744_v49 = vsel %vm12328_vm3, %v7811_v42, %v7540_v34  ;;  %vm6229_vm13 = vcmask 523264  }
 0x356   : > { %v5761_v60 = vsel %vm5756_vm4, %v5744_v49, %v7545_v6  ;;  %v5762_v26 = vsel %vm5756_vm4, %v5745_v22, %v7546_v59  ;;  %v11191_v22 = vld [vmem:[%s11963_s2] ss:$0 sm:$0xff]  ;;  %v7820_v49 = vld [vmem:[%s8008_s29 + $0x78] sm:$0xff] }
 0x357   : > { %v5775_v8 = vpack.c.bf16 %v5762_v26, %v5761_v60  ;;  %v7821_v26 = vld [vmem:[%s8008_s29 + $0x70] sm:$0xff] }
 0x359   : > { %7371 = vmatmul.msk.bf16.gmra.mxu0 %vm5800_vm8, %v5775_v8  ;;  %7411 = vmatmul.msk.bf16.gmra.mxu2 %vm5800_vm8, %v5775_v8 }
 0x35a   : > { %v7559_v29 = vpop.permute.xlu2 %7558 }
 0x35b   : > { %v7561_v54 = vunpack.i.h.bf16 %v7559_v29  ;;  %v7560_v14 = vunpack.i.l.bf16 %v7559_v29 }
 0x35d   : > { %v5749_v53 = vsel %vm12331_vm0, %v7814_v44, %v7561_v54  ;;  %v5748_v50 = vsel %vm12332_vm1, %v7815_v13, %v7560_v14 }
 0x366   : > { %v7554_v45 = vpop.permute.xlu1 %7553 }
 0x367   : > { %v7556_v4 = vunpack.i.h.bf16 %v7554_v45  ;;  %v7555_v17 = vunpack.i.l.bf16 %v7554_v45  ;;  %v7549_v63 = vpop.permute.xlu0 %7548 }
 0x368   : > { %v7551_v15 = vunpack.i.h.bf16 %v7549_v63  ;;  %v7550_v31 = vunpack.i.l.bf16 %v7549_v63 }
 0x36a   : > { %v5747_v19 = vsel %vm12329_vm14, %v7812_v62, %v7551_v15  ;;  %v5746_v20 = vsel %vm12330_vm12, %v7813_v43, %v7550_v31 }
 0x36b   : > { %v5763_v24 = vsel %vm5756_vm4, %v5746_v20, %v7555_v17  ;;  %v5764_v47 = vsel %vm5756_vm4, %v5747_v19, %v7556_v4 }
 0x36c   : > { %v5776_v32 = vpack.c.bf16 %v5764_v47, %v5763_v24  ;;  %v7574_v36 = vpop.permute.xlu2 %7573 }
 0x36d   : > { %v7576_v7 = vunpack.i.h.bf16 %v7574_v36  ;;  %v7575_v28 = vunpack.i.l.bf16 %v7574_v36 }
 0x36e   : > { %7372 = vmatmul.msk.bf16.gmra.mxu0 %vm5800_vm8, %v5776_v32  ;;  %7412 = vmatmul.msk.bf16.gmra.mxu2 %vm5800_vm8, %v5776_v32 }
 0x36f   : > { %v7564_v23 = vpop.permute.xlu0 %7563 }
 0x370   : > { %v7566_v9 = vunpack.i.h.bf16 %v7564_v23  ;;  %v7565_v25 = vunpack.i.l.bf16 %v7564_v23 }
 0x372   : > { %v5765_v35 = vsel %vm5756_vm4, %v5748_v50, %v7565_v25  ;;  %v5766_v16 = vsel %vm5756_vm4, %v5749_v53, %v7566_v9  ;;  %v7455_v50 = vld [vmem:[%s11964_s3 + $0x18] sm:$0xff] }
 0x373   : > { %v5777_v46 = vpack.c.bf16 %v5766_v16, %v5765_v35  ;;  %6258 = vmatpush.bf16.msra.mxu1 %v7455_v50 }
 0x37e   : > { %7373 = vmatmul.msk.bf16.gmra.mxu0 %vm5800_vm8, %v5777_v46  ;;  %7413 = vmatmul.msk.bf16.gmra.mxu2 %vm5800_vm8, %v5777_v46 }
 0x384   : > { %v7569_v38 = vpop.permute.xlu1 %7568 }
 0x385   : > { %v7571_v39 = vunpack.i.h.bf16 %v7569_v38  ;;  %v7570_v40 = vunpack.i.l.bf16 %v7569_v38 }
 0x386   : > { %v7589_v5 = vpop.permute.xlu2 %7588 }
 0x387   : > { %v5751_v56 = vsel %vm12333_vm15, %v7816_v0, %v7571_v39  ;;  %v5750_v58 = vsel %vm12334_vm9, %v7817_v48, %v7570_v40  ;;  %v7591_v34 = vunpack.i.h.bf16 %v7589_v5  ;;  %v7590_v59 = vunpack.i.l.bf16 %v7589_v5 }
 0x388   : > { %v5767_v3 = vsel %vm5756_vm4, %v5750_v58, %v7575_v28  ;;  %v5768_v21 = vsel %vm5756_vm4, %v5751_v56, %v7576_v7 }
 0x389   : > { %v5778_v18 = vpack.c.bf16 %v5768_v21, %v5767_v3  ;;  %v5755_v60 = vsel %vm12337_vm10, %v7820_v49, %v7591_v34  ;;  %v5754_v8 = vsel %vm12338_vm5, %v7821_v26, %v7590_v59  ;;  %v7452_v49 = vld [vmem:[%s11964_s3] sm:$0xff] }
 0x38d   : > { %v7579_v37 = vpop.permute.xlu0 %7578  ;;  %v7584_v51 = vpop.permute.xlu1 %7583 }
 0x38e   : > { %7374 = vmatmul.msk.bf16.gmra.mxu0 %vm5800_vm8, %v5778_v18  ;;  %7414 = vmatmul.msk.bf16.gmra.mxu2 %vm5800_vm8, %v5778_v18  ;;  %v7581_v61 = vunpack.i.h.bf16 %v7579_v37  ;;  %v7580_v33 = vunpack.i.l.bf16 %v7579_v37  ;;  %v7586_v11 = vunpack.i.h.bf16 %v7584_v51  ;;  %v7585_v57 = vunpack.i.l.bf16 %v7584_v51 }
 0x390   : > { %v5753_v10 = vsel %vm12335_vm2, %v7818_v41, %v7581_v61  ;;  %v5752_v2 = vsel %vm12336_vm7, %v7819_v27, %v7580_v33 }
 0x391   : > { %v5769_v55 = vsel %vm5756_vm4, %v5752_v2, %v7585_v57  ;;  %v5770_v12 = vsel %vm5756_vm4, %v5753_v10, %v7586_v11  ;;  %v7454_v57 = vld [vmem:[%s11964_s3 + $0x10] sm:$0xff] }
 0x392   : > { %v5779_v1 = vpack.c.bf16 %v5770_v12, %v5769_v55  ;;  %6259 = vmatpush.bf16.msra.mxu1 %v7454_v57 }
 0x39d   : > { %v7594_v52 = vpop.permute.xlu0 %7593 }
 0x39e   : > { %7375 = vmatmul.msk.bf16.gmra.mxu0 %vm5800_vm8, %v5779_v1  ;;  %7415 = vmatmul.msk.bf16.gmra.mxu2 %vm5800_vm8, %v5779_v1  ;;  %v7596_v6 = vunpack.i.h.bf16 %v7594_v52  ;;  %v7595_v30 = vunpack.i.l.bf16 %v7594_v52  ;;  %v7453_v1 = vld [vmem:[%s11964_s3 + $0x8] sm:$0xff] }
 0x39f   : > { %6260 = vmatpush.bf16.msra.mxu1 %v7453_v1 }
 0x3a0   : > { %v5771_v45 = vsel %vm5756_vm4, %v5754_v8, %v7595_v30  ;;  %v5772_v4 = vsel %vm5756_vm4, %v5755_v60, %v7596_v6 }
 0x3a1   : > { %v5780_v63 = vpack.c.bf16 %v5772_v4, %v5771_v45 }
 0x3a3   : > { %6261 = vmatpush.bf16.msra.mxu1 %v7452_v49 }
 0x3a9   : > { %v5841_v42 = vpop.f32.mrf.mxu0 }
 0x3aa   : > { %v11200_v17 = vadd.f32 %v11191_v22, %v5841_v42 }
 0x3ac   : > { %v11203_v15 = vmul.f32 100.0, %v11200_v17 }
 0x3ae   : > { %7376 = vmatmul.msk.bf16.gmra.mxu0 %vm5800_vm8, %v5780_v63  ;;  %7416 = vmatmul.msk.bf16.gmra.mxu2 %vm5800_vm8, %v5780_v63  ;;  %v5897_v19 = vand.u32 2147483647, %v11203_v15  ;;  %v5961_v2 = vmax.f32 %v11203_v15, 0.0  ;;  %vm6153_vm11 = vcmp.gt.f32.partialorder %v11203_v15, 20.0 }
 0x3b0   : > { %v5913_v24 = vsub.f32 0.0, %v5897_v19 }
 0x3b1   : > { %v5843_v31 = vpop.f32.mrf.mxu0 }
 0x3b2   : > { %v11208_v62 = vadd.f32 %v11191_v22, %v5843_v31  ;;  %v5929_v32 = vmul.f32 1.442695, %v5913_v24 }
 0x3b4   : > { %v11212_v43 = vmul.f32 100.0, %v11208_v62  ;;  %7603 = vpow2.f32 %v5929_v32 }
 0x3b6   : > { %v5898_v20 = vand.u32 2147483647, %v11212_v43  ;;  %v5962_v55 = vmax.f32 %v11212_v43, 0.0  ;;  %vm6154_vm6 = vcmp.gt.f32.partialorder %v11212_v43, 20.0 }
 0x3b8   : > { %v5914_v47 = vsub.f32 0.0, %v5898_v20 }
 0x3ba   : > { %v5931_v29 = vmul.f32 1.442695, %v5914_v47  ;;  %v7604_v14 = vpop.eup %7603 }
 0x3bb   : > { %v5977_v44 = vadd.f32 1.0, %v7604_v14  ;;  %v5980_v39 = vmul.f32 -0.5, %v7604_v14  ;;  %v5983_v21 = vand.u32 2147483647, %v7604_v14 }
 0x3bc   : > { %7605 = vpow2.f32 %v5931_v29 }
 0x3bd   : > { %7607 = vlog2.f32 %v5977_v44  ;;  %v5981_v48 = vadd.f32 1.0, %v5980_v39  ;;  %vm5984_vm4 = vcmp.lt.f32.partialorder %v5983_v21, 0.0004427343 }
 0x3be   : > { %v5846_v23 = vpop.f32.mrf.mxu0 }
 0x3bf   : > { %v11216_v54 = vadd.f32 %v11191_v22, %v5846_v23  ;;  %v5982_v33 = vmul.f32 %v7604_v14, %v5981_v48 }
 0x3c1   : > { %v11219_v25 = vmul.f32 100.0, %v11216_v54 }
 0x3c2   : > { %v7606_v9 = vpop.eup %7605 }
 0x3c3   : > { %v5899_v53 = vand.u32 2147483647, %v11219_v25  ;;  %v5986_v13 = vadd.f32 1.0, %v7606_v9  ;;  %v5989_v40 = vmul.f32 -0.5, %v7606_v9  ;;  %v7608_v28 = vpop.eup %7607  ;;  %v5992_v18 = vand.u32 2147483647, %v7606_v9 }
 0x3c4   : > { %v5979_v37 = vmul.f32 0.6931472, %v7608_v28  ;;  %vm6155_vm12 = vcmp.gt.f32.partialorder %v11219_v25, 20.0 }
 0x3c5   : > { %v5915_v35 = vsub.f32 0.0, %v5899_v53  ;;  %7609 = vlog2.f32 %v5986_v13  ;;  %v5990_v58 = vadd.f32 1.0, %v5989_v40  ;;  %vm5993_vm8 = vcmp.lt.f32.partialorder %v5992_v18, 0.0004427343 }
 0x3c6   : > { %v5848_v16 = vpop.f32.mrf.mxu0  ;;  %v5985_v41 = vsel %vm5984_vm4, %v5982_v33, %v5979_v37  ;;  %v5963_v40 = vmax.f32 %v11219_v25, 0.0 }
 0x3c7   : > { %v11226_v46 = vadd.f32 %v11191_v22, %v5848_v16  ;;  %v5933_v36 = vmul.f32 1.442695, %v5915_v35  ;;  %v5991_v11 = vmul.f32 %v7606_v9, %v5990_v58  ;;  %v6121_v34 = vadd.f32 %v5985_v41, %v5961_v2 }
 0x3c9   : > { %v11229_v38 = vmul.f32 100.0, %v11226_v46  ;;  %7611 = vpow2.f32 %v5933_v36  ;;  %v6137_v60 = vmul.f32 0.01, %v6121_v34 }
 0x3cb   : > { %v5900_v7 = vand.u32 2147483647, %v11229_v38  ;;  %v7610_v56 = vpop.eup %7609  ;;  %v6169_v31 = vsel %vm6153_vm11, %v11200_v17, %v6137_v60  ;;  %vm6156_vm0 = vcmp.gt.f32.partialorder %v11229_v38, 20.0 }
 0x3cc   : > { %v5988_v51 = vmul.f32 0.6931472, %v7610_v56 }
 0x3cd   : > { %v5916_v0 = vsub.f32 0.0, %v5900_v7  ;;  %v5964_v7 = vmax.f32 %v11229_v38, 0.0 }
 0x3ce   : > { %v5994_v10 = vsel %vm5993_vm8, %v5991_v11, %v5988_v51 }
 0x3cf   : > { %v5935_v3 = vmul.f32 1.442695, %v5916_v0  ;;  %v7612_v61 = vpop.eup %7611  ;;  %v6122_v59 = vadd.f32 %v5994_v10, %v5962_v55 }
 0x3d0   : > { %v5995_v27 = vadd.f32 1.0, %v7612_v61  ;;  %v5998_v8 = vmul.f32 -0.5, %v7612_v61  ;;  %v6001_v14 = vand.u32 2147483647, %v7612_v61 }
 0x3d1   : > { %7613 = vpow2.f32 %v5935_v3  ;;  %v6138_v26 = vmul.f32 0.01, %v6122_v59 }
 0x3d2   : > { %7615 = vlog2.f32 %v5995_v27  ;;  %v5999_v29 = vadd.f32 1.0, %v5998_v8  ;;  %vm6002_vm3 = vcmp.lt.f32.partialorder %v6001_v14, 0.0004427343 }
 0x3d3   : > { %v6170_v19 = vsel %vm6154_vm6, %v11208_v62, %v6138_v26 }
 0x3d4   : > { %v6185_v47 = vpack.c.bf16 %v6170_v19, %v6169_v31  ;;  %v6000_v53 = vmul.f32 %v7612_v61, %v5999_v29 }
 0x3d6   : > { %v5851_v12 = vpop.f32.mrf.mxu0  ;;  %7393 = vmatmul.msk.bf16.vlgmr.msra.gmra.mxu1 %vm6229_vm13, %v6185_v47 }
 0x3d7   : > { %v7614_v5 = vpop.eup %7613  ;;  %v11241_v52 = vadd.f32 %v11191_v22, %v5851_v12 }
 0x3d8   : > { %v6004_v6 = vadd.f32 1.0, %v7614_v5  ;;  %v6007_v45 = vmul.f32 -0.5, %v7614_v5  ;;  %v7616_v20 = vpop.eup %7615  ;;  %v6010_v17 = vand.u32 2147483647, %v7614_v5 }
 0x3d9   : > { %v11244_v30 = vmul.f32 100.0, %v11241_v52  ;;  %v5997_v9 = vmul.f32 0.6931472, %v7616_v20 }
 0x3da   : > { %7617 = vlog2.f32 %v6004_v6  ;;  %v6008_v23 = vadd.f32 1.0, %v6007_v45  ;;  %vm6011_vm14 = vcmp.lt.f32.partialorder %v6010_v17, 0.0004427343 }
 0x3db   : > { %v5901_v42 = vand.u32 2147483647, %v11244_v30  ;;  %v6003_v16 = vsel %vm6002_vm3, %v6000_v53, %v5997_v9  ;;  %vm6157_vm9 = vcmp.gt.f32.partialorder %v11244_v30, 20.0 }
 0x3dc   : > { %v6009_v13 = vmul.f32 %v7614_v5, %v6008_v23  ;;  %v6123_v48 = vadd.f32 %v6003_v16, %v5963_v40 }
 0x3dd   : > { %v5917_v4 = vsub.f32 0.0, %v5901_v42 }
 0x3de   : > { %v5853_v63 = vpop.f32.mrf.mxu0  ;;  %v6139_v37 = vmul.f32 0.01, %v6123_v48 }
 0x3df   : > { %v5937_v15 = vmul.f32 1.442695, %v5917_v4  ;;  %v11255_v24 = vadd.f32 %v11191_v22, %v5853_v63 }
 0x3e0   : > { %v7618_v32 = vpop.eup %7617  ;;  %v6171_v12 = vsel %vm6155_vm12, %v11216_v54, %v6139_v37 }
 0x3e1   : > { %7619 = vpow2.f32 %v5937_v15  ;;  %v11258_v43 = vmul.f32 100.0, %v11255_v24  ;;  %v6006_v62 = vmul.f32 0.6931472, %v7618_v32 }
 0x3e3   : > { %v5902_v44 = vand.u32 2147483647, %v11258_v43  ;;  %v6012_v36 = vsel %vm6011_vm14, %v6009_v13, %v6006_v62  ;;  %v5966_v15 = vmax.f32 %v11258_v43, 0.0  ;;  %vm6158_vm2 = vcmp.gt.f32.partialorder %v11258_v43, 20.0 }
 0x3e4   : > { %v6124_v58 = vadd.f32 %v6012_v36, %v5964_v7 }
 0x3e5   : > { %v5918_v50 = vsub.f32 0.0, %v5902_v44 }
 0x3e6   : > { %v6140_v51 = vmul.f32 0.01, %v6124_v58 }
 0x3e7   : > { %v7620_v35 = vpop.eup %7619  ;;  %v5939_v39 = vmul.f32 1.442695, %v5918_v50 }
 0x3e8   : > { %v6013_v28 = vadd.f32 1.0, %v7620_v35  ;;  %v6016_v21 = vmul.f32 -0.5, %v7620_v35  ;;  %v6172_v1 = vsel %vm6156_vm0, %v11226_v46, %v6140_v51  ;;  %v6019_v5 = vand.u32 2147483647, %v7620_v35 }
 0x3e9   : > { %7621 = vpow2.f32 %v5939_v39  ;;  %v6186_v34 = vpack.c.bf16 %v6172_v1, %v6171_v12  ;;  %v5965_v46 = vmax.f32 %v11244_v30, 0.0 }
 0x3ea   : > { %7623 = vlog2.f32 %v6013_v28  ;;  %v6017_v57 = vadd.f32 1.0, %v6016_v21  ;;  %vm6020_vm1 = vcmp.lt.f32.partialorder %v6019_v5, 0.0004427343 }
 0x3eb   : > { %v5856_v0 = vpop.f32.mrf.mxu0  ;;  %7394 = vmatmul.msk.bf16.gmra.mxu1 %vm6229_vm13, %v6186_v34 }
 0x3ec   : > { %v11265_v56 = vadd.f32 %v11191_v22, %v5856_v0  ;;  %v6018_v38 = vmul.f32 %v7620_v35, %v6017_v57 }
 0x3ee   : > { %v11268_v3 = vmul.f32 100.0, %v11265_v56 }
 0x3ef   : > { %v7622_v61 = vpop.eup %7621 }
 0x3f0   : > { %v5903_v18 = vand.u32 2147483647, %v11268_v3  ;;  %v7624_v11 = vpop.eup %7623  ;;  %v6022_v41 = vadd.f32 1.0, %v7622_v61  ;;  %v6025_v10 = vmul.f32 -0.5, %v7622_v61  ;;  %v6028_v49 = vand.u32 2147483647, %v7622_v61 }
 0x3f1   : > { %v6015_v25 = vmul.f32 0.6931472, %v7624_v11  ;;  %v5967_v37 = vmax.f32 %v11268_v3, 0.0  ;;  %vm6159_vm5 = vcmp.gt.f32.partialorder %v11268_v3, 20.0 }
 0x3f2   : > { %v5919_v33 = vsub.f32 0.0, %v5903_v18  ;;  %7625 = vlog2.f32 %v6022_v41  ;;  %v6026_v6 = vadd.f32 1.0, %v6025_v10  ;;  %vm6029_vm15 = vcmp.lt.f32.partialorder %v6028_v49, 0.0004427343 }
 0x3f3   : > { %v5858_v27 = vpop.f32.mrf.mxu0  ;;  %v6021_v60 = vsel %vm6020_vm1, %v6018_v38, %v6015_v25 }
 0x3f4   : > { %v5941_v2 = vmul.f32 1.442695, %v5919_v33  ;;  %v11274_v55 = vadd.f32 %v11191_v22, %v5858_v27  ;;  %v6027_v63 = vmul.f32 %v7622_v61, %v6026_v6  ;;  %v6125_v20 = vadd.f32 %v6021_v60, %v5965_v46 }
 0x3f6   : > { %7627 = vpow2.f32 %v5941_v2  ;;  %v11279_v59 = vmul.f32 100.0, %v11274_v55  ;;  %v6141_v9 = vmul.f32 0.01, %v6125_v20 }
 0x3f8   : > { %v5904_v42 = vand.u32 2147483647, %v11279_v59  ;;  %v7626_v26 = vpop.eup %7625  ;;  %v6173_v13 = vsel %vm6157_vm9, %v11241_v52, %v6141_v9  ;;  %v5968_v5 = vmax.f32 %v11279_v59, 0.0  ;;  %vm6160_vm4 = vcmp.gt.f32.partialorder %v11279_v59, 20.0 }
 0x3f9   : > { %v6024_v4 = vmul.f32 0.6931472, %v7626_v26 }
 0x3fa   : > { %v5920_v54 = vsub.f32 0.0, %v5904_v42 }
 0x3fb   : > { %v5861_v8 = vpop.f32.mrf.mxu0  ;;  %v6030_v32 = vsel %vm6029_vm15, %v6027_v63, %v6024_v4 }
 0x3fc   : > { %v7628_v45 = vpop.eup %7627  ;;  %v5943_v31 = vmul.f32 1.442695, %v5920_v54  ;;  %v11285_v19 = vadd.f32 %v11191_v22, %v5861_v8  ;;  %v6126_v23 = vadd.f32 %v6030_v32, %v5966_v15 }
 0x3fd   : > { %v6031_v47 = vadd.f32 1.0, %v7628_v45  ;;  %v6034_v14 = vmul.f32 -0.5, %v7628_v45  ;;  %v6037_v28 = vand.u32 2147483647, %v7628_v45 }
 0x3fe   : > { %7629 = vpow2.f32 %v5943_v31  ;;  %v11289_v29 = vmul.f32 100.0, %v11285_v19  ;;  %v6142_v62 = vmul.f32 0.01, %v6126_v23 }
 0x3ff   : > { %7631 = vlog2.f32 %v6031_v47  ;;  %v6035_v16 = vadd.f32 1.0, %v6034_v14  ;;  %vm6038_vm7 = vcmp.lt.f32.partialorder %v6037_v28, 0.0004427343 }
 0x400   : > { %v5905_v17 = vand.u32 2147483647, %v11289_v29  ;;  %v6174_v50 = vsel %vm6158_vm2, %v11255_v24, %v6142_v62  ;;  %vm6161_vm6 = vcmp.gt.f32.partialorder %v11289_v29, 20.0 }
 0x401   : > { %v6187_v40 = vpack.c.bf16 %v6174_v50, %v6173_v13  ;;  %v6036_v52 = vmul.f32 %v7628_v45, %v6035_v16 }
 0x402   : > { %v5921_v44 = vsub.f32 0.0, %v5905_v17 }
 0x403   : > { %v5863_v53 = vpop.f32.mrf.mxu0  ;;  %7395 = vmatmul.msk.bf16.gmra.mxu1 %vm6229_vm13, %v6187_v40 }
 0x404   : > { %v7630_v35 = vpop.eup %7629  ;;  %v5945_v36 = vmul.f32 1.442695, %v5921_v44  ;;  %v11297_v39 = vadd.f32 %v11191_v22, %v5863_v53 }
 0x405   : > { %v7632_v7 = vpop.eup %7631  ;;  %v6040_v0 = vadd.f32 1.0, %v7630_v35  ;;  %v6043_v30 = vmul.f32 -0.5, %v7630_v35  ;;  %v6046_v51 = vand.u32 2147483647, %v7630_v35 }
 0x406   : > { %v6033_v48 = vmul.f32 0.6931472, %v7632_v7  ;;  %7633 = vpow2.f32 %v5945_v36  ;;  %v11300_v43 = vmul.f32 100.0, %v11297_v39 }
 0x407   : > { %7635 = vlog2.f32 %v6040_v0  ;;  %v6044_v21 = vadd.f32 1.0, %v6043_v30  ;;  %vm6047_vm10 = vcmp.lt.f32.partialorder %v6046_v51, 0.0004427343 }
 0x408   : > { %v5906_v24 = vand.u32 2147483647, %v11300_v43  ;;  %v6039_v58 = vsel %vm6038_vm7, %v6036_v52, %v6033_v48  ;;  %v5970_v0 = vmax.f32 %v11300_v43, 0.0  ;;  %vm6162_vm3 = vcmp.gt.f32.partialorder %v11300_v43, 20.0 }
 0x409   : > { %v6127_v10 = vadd.f32 %v6039_v58, %v5967_v37  ;;  %v6045_v12 = vmul.f32 %v7630_v35, %v6044_v21 }
 0x40a   : > { %v5922_v18 = vsub.f32 0.0, %v5906_v24 }
 0x40b   : > { %v5866_v61 = vpop.f32.mrf.mxu0  ;;  %v6143_v42 = vmul.f32 0.01, %v6127_v10 }
 0x40c   : > { %v7634_v33 = vpop.eup %7633  ;;  %v5947_v11 = vmul.f32 1.442695, %v5922_v18  ;;  %v11306_v57 = vadd.f32 %v11191_v22, %v5866_v61 }
 0x40d   : > { %v7636_v41 = vpop.eup %7635  ;;  %v6049_v27 = vadd.f32 1.0, %v7634_v33  ;;  %v6052_v25 = vmul.f32 -0.5, %v7634_v33  ;;  %v6055_v8 = vand.u32 2147483647, %v7634_v33  ;;  %v6175_v15 = vsel %vm6159_vm5, %v11265_v56, %v6143_v42 }
 0x40e   : > { %v6042_v2 = vmul.f32 0.6931472, %v7636_v41  ;;  %7637 = vpow2.f32 %v5947_v11  ;;  %v11309_v1 = vmul.f32 100.0, %v11306_v57  ;;  %v5969_v56 = vmax.f32 %v11289_v29, 0.0 }
 0x40f   : > { %7639 = vlog2.f32 %v6049_v27  ;;  %v6053_v46 = vadd.f32 1.0, %v6052_v25  ;;  %vm6056_vm8 = vcmp.lt.f32.partialorder %v6055_v8, 0.0004427343 }
 0x410   : > { %v6048_v34 = vsel %vm6047_vm10, %v6045_v12, %v6042_v2  ;;  %v5907_v38 = vand.u32 2147483647, %v11309_v1  ;;  %vm6163_vm0 = vcmp.gt.f32.partialorder %v11309_v1, 20.0 }
 0x411   : > { %v6128_v6 = vadd.f32 %v6048_v34, %v5968_v5  ;;  %v6054_v23 = vmul.f32 %v7634_v33, %v6053_v46 }
 0x412   : > { %v5923_v49 = vsub.f32 0.0, %v5907_v38 }
 0x413   : > { %v5868_v60 = vpop.f32.mrf.mxu0  ;;  %v6144_v54 = vmul.f32 0.01, %v6128_v6 }
 0x414   : > { %v7638_v26 = vpop.eup %7637  ;;  %v5949_v45 = vmul.f32 1.442695, %v5923_v49  ;;  %v11316_v4 = vadd.f32 %v11191_v22, %v5868_v60 }
 0x415   : > { %v7640_v63 = vpop.eup %7639  ;;  %v6058_v31 = vadd.f32 1.0, %v7638_v26  ;;  %v6061_v20 = vmul.f32 -0.5, %v7638_v26  ;;  %v6176_v47 = vsel %vm6160_vm4, %v11274_v55, %v6144_v54  ;;  %v6064_v44 = vand.u32 2147483647, %v7638_v26 }
 0x416   : > { %v6051_v32 = vmul.f32 0.6931472, %v7640_v63  ;;  %7641 = vpow2.f32 %v5949_v45  ;;  %v11321_v3 = vmul.f32 100.0, %v11316_v4  ;;  %v6188_v59 = vpack.c.bf16 %v6176_v47, %v6175_v15 }
 0x417   : > { %7643 = vlog2.f32 %v6058_v31  ;;  %v6062_v9 = vadd.f32 1.0, %v6061_v20  ;;  %vm6065_vm11 = vcmp.lt.f32.partialorder %v6064_v44, 0.0004427343 }
 0x418   : > { %v5908_v14 = vand.u32 2147483647, %v11321_v3  ;;  %7396 = vmatmul.msk.bf16.gmra.mxu1 %vm6229_vm13, %v6188_v59  ;;  %v6057_v17 = vsel %vm6056_vm8, %v6054_v23, %v6051_v32  ;;  %v5972_v47 = vmax.f32 %v11321_v3, 0.0  ;;  %vm6164_vm1 = vcmp.gt.f32.partialorder %v11321_v3, 20.0 }
 0x419   : > { %v6129_v16 = vadd.f32 %v6057_v17, %v5969_v56  ;;  %v6063_v7 = vmul.f32 %v7638_v26, %v6062_v9 }
 0x41a   : > { %v5924_v62 = vsub.f32 0.0, %v5908_v14 }
 0x41b   : > { %v5871_v55 = vpop.f32.mrf.mxu0  ;;  %v6145_v58 = vmul.f32 0.01, %v6129_v16 }
 0x41c   : > { %v7642_v53 = vpop.eup %7641  ;;  %v5951_v13 = vmul.f32 1.442695, %v5924_v62  ;;  %v11327_v50 = vadd.f32 %v11191_v22, %v5871_v55 }
 0x41d   : > { %v7644_v35 = vpop.eup %7643  ;;  %v6067_v36 = vadd.f32 1.0, %v7642_v53  ;;  %v6070_v30 = vmul.f32 -0.5, %v7642_v53  ;;  %v6073_v33 = vand.u32 2147483647, %v7642_v53  ;;  %v6177_v12 = vsel %vm6161_vm6, %v11285_v19, %v6145_v58 }
 0x41e   : > { %v6060_v40 = vmul.f32 0.6931472, %v7644_v35  ;;  %7645 = vpow2.f32 %v5951_v13  ;;  %v11330_v28 = vmul.f32 100.0, %v11327_v50  ;;  %v5971_v19 = vmax.f32 %v11309_v1, 0.0 }
 0x41f   : > { %7647 = vlog2.f32 %v6067_v36  ;;  %v6071_v61 = vadd.f32 1.0, %v6070_v30  ;;  %vm6074_vm14 = vcmp.lt.f32.partialorder %v6073_v33, 0.0004427343 }
 0x420   : > { %v6066_v48 = vsel %vm6065_vm11, %v6063_v7, %v6060_v40  ;;  %v5909_v52 = vand.u32 2147483647, %v11330_v28  ;;  %vm6165_vm2 = vcmp.gt.f32.partialorder %v11330_v28, 20.0 }
 0x421   : > { %v6130_v24 = vadd.f32 %v6066_v48, %v5970_v0  ;;  %v6072_v25 = vmul.f32 %v7642_v53, %v6071_v61 }
 0x422   : > { %v5925_v21 = vsub.f32 0.0, %v5909_v52 }
 0x423   : > { %v5873_v18 = vpop.f32.mrf.mxu0  ;;  %v6146_v37 = vmul.f32 0.01, %v6130_v24 }
 0x424   : > { %v7646_v51 = vpop.eup %7645  ;;  %v5953_v11 = vmul.f32 1.442695, %v5925_v21  ;;  %v11337_v41 = vadd.f32 %v11191_v22, %v5873_v18 }
 0x425   : > { %v7648_v10 = vpop.eup %7647  ;;  %v6076_v27 = vadd.f32 1.0, %v7646_v51  ;;  %v6079_v2 = vmul.f32 -0.5, %v7646_v51  ;;  %v6178_v5 = vsel %vm6162_vm3, %v11297_v39, %v6146_v37  ;;  %v6082_v60 = vand.u32 2147483647, %v7646_v51 }
 0x426   : > { %v6069_v34 = vmul.f32 0.6931472, %v7648_v10  ;;  %7649 = vpow2.f32 %v5953_v11  ;;  %v11342_v29 = vmul.f32 100.0, %v11337_v41  ;;  %v6189_v43 = vpack.c.bf16 %v6178_v5, %v6177_v12 }
 0x427   : > { %7651 = vlog2.f32 %v6076_v27  ;;  %v6080_v42 = vadd.f32 1.0, %v6079_v2  ;;  %vm6083_vm12 = vcmp.lt.f32.partialorder %v6082_v60, 0.0004427343 }
 0x428   : > { %v5910_v38 = vand.u32 2147483647, %v11342_v29  ;;  %7397 = vmatmul.msk.bf16.gmra.mxu1 %vm6229_vm13, %v6189_v43  ;;  %v6075_v6 = vsel %vm6074_vm14, %v6072_v25, %v6069_v34  ;;  %v5974_v10 = vmax.f32 %v11342_v29, 0.0  ;;  %vm6166_vm7 = vcmp.gt.f32.partialorder %v11342_v29, 20.0 }
 0x429   : > { %v6131_v45 = vadd.f32 %v6075_v6, %v5971_v19  ;;  %v6081_v20 = vmul.f32 %v7646_v51, %v6080_v42 }
 0x42a   : > { %v5926_v49 = vsub.f32 0.0, %v5910_v38 }
 0x42b   : > { %v5876_v39 = vpop.f32.mrf.mxu0  ;;  %v6147_v17 = vmul.f32 0.01, %v6131_v45 }
 0x42c   : > { %v7650_v54 = vpop.eup %7649  ;;  %v5955_v26 = vmul.f32 1.442695, %v5926_v49  ;;  %v11348_v46 = vadd.f32 %v11191_v22, %v5876_v39 }
 0x42d   : > { %v7652_v8 = vpop.eup %7651  ;;  %v6085_v63 = vadd.f32 1.0, %v7650_v54  ;;  %v6088_v59 = vmul.f32 -0.5, %v7650_v54  ;;  %v6091_v53 = vand.u32 2147483647, %v7650_v54  ;;  %v6179_v7 = vsel %vm6163_vm0, %v11306_v57, %v6147_v17 }
 0x42e   : > { %v6078_v31 = vmul.f32 0.6931472, %v7652_v8  ;;  %7653 = vpow2.f32 %v5955_v26  ;;  %v11351_v15 = vmul.f32 100.0, %v11348_v46  ;;  %v5973_v57 = vmax.f32 %v11330_v28, 0.0 }
 0x42f   : > { %7655 = vlog2.f32 %v6085_v63  ;;  %v6089_v55 = vadd.f32 1.0, %v6088_v59  ;;  %vm6092_vm15 = vcmp.lt.f32.partialorder %v6091_v53, 0.0004427343 }
 0x430   : > { %v6084_v32 = vsel %vm6083_vm12, %v6081_v20, %v6078_v31  ;;  %v5911_v23 = vand.u32 2147483647, %v11351_v15  ;;  %v5975_v29 = vmax.f32 %v11351_v15, 0.0  ;;  %vm6167_vm4 = vcmp.gt.f32.partialorder %v11351_v15, 20.0 }
 0x431   : > { %v6132_v14 = vadd.f32 %v6084_v32, %v5972_v47  ;;  %v6090_v30 = vmul.f32 %v7650_v54, %v6089_v55 }
 0x432   : > { %v5927_v9 = vsub.f32 0.0, %v5911_v23 }
 0x433   : > { %v5878_v62 = vpop.f32.mrf.mxu0  ;;  %v6148_v56 = vmul.f32 0.01, %v6132_v14 }
 0x434   : > { %v7654_v44 = vpop.eup %7653  ;;  %v5957_v13 = vmul.f32 1.442695, %v5927_v9  ;;  %v11358_v35 = vadd.f32 %v11191_v22, %v5878_v62  ;;  %v11384_v62 = vld [vmem:[%s11965_s4] ss:$0 sm:$0xff] }
 0x435   : > { %v7656_v16 = vpop.eup %7655  ;;  %v6094_v36 = vadd.f32 1.0, %v7654_v44  ;;  %v6097_v40 = vmul.f32 -0.5, %v7654_v44  ;;  %v6180_v0 = vsel %vm6164_vm1, %v11316_v4, %v6148_v56  ;;  %v6100_v21 = vand.u32 2147483647, %v7654_v44 }
 0x436   : > { %v6087_v48 = vmul.f32 0.6931472, %v7656_v16  ;;  %7657 = vpow2.f32 %v5957_v13  ;;  %v11363_v1 = vmul.f32 100.0, %v11358_v35  ;;  %v6190_v3 = vpack.c.bf16 %v6180_v0, %v6179_v7 }
 0x437   : > { %7659 = vlog2.f32 %v6094_v36  ;;  %v6098_v24 = vadd.f32 1.0, %v6097_v40  ;;  %vm6101_vm9 = vcmp.lt.f32.partialorder %v6100_v21, 0.0004427343 }
 0x438   : > { %v5912_v52 = vand.u32 2147483647, %v11363_v1  ;;  %7398 = vmatmul.msk.bf16.gmra.mxu1 %vm6229_vm13, %v6190_v3  ;;  %v6093_v22 = vsel %vm6092_vm15, %v6090_v30, %v6087_v48  ;;  %vm6168_vm8 = vcmp.gt.f32.partialorder %v11363_v1, 20.0 }
 0x439   : > { %v6133_v51 = vadd.f32 %v6093_v22, %v5973_v57  ;;  %v6099_v11 = vmul.f32 %v7654_v44, %v6098_v24 }
 0x43a   : > { %v5928_v58 = vsub.f32 0.0, %v5912_v52 }
 0x43b   : > { %v6149_v5 = vmul.f32 0.01, %v6133_v51 }
 0x43c   : > { %v7658_v4 = vpop.eup %7657  ;;  %v5959_v18 = vmul.f32 1.442695, %v5928_v58 }
 0x43d   : > { %v7660_v37 = vpop.eup %7659  ;;  %v6103_v61 = vadd.f32 1.0, %v7658_v4  ;;  %v6106_v2 = vmul.f32 -0.5, %v7658_v4  ;;  %v6109_v6 = vand.u32 2147483647, %v7658_v4  ;;  %v6181_v49 = vsel %vm6165_vm2, %v11327_v50, %v6149_v5 }
 0x43e   : > { %v6096_v33 = vmul.f32 0.6931472, %v7660_v37  ;;  %7661 = vpow2.f32 %v5959_v18  ;;  %v5976_v50 = vmax.f32 %v11363_v1, 0.0  ;;  %v7459_v37 = vld [vmem:[%s11966_s5 + $0x18] sm:$0xff] }
 0x43f   : > { %7663 = vlog2.f32 %v6103_v61  ;;  %v6107_v25 = vadd.f32 1.0, %v6106_v2  ;;  %vm6110_vm10 = vcmp.lt.f32.partialorder %v6109_v6, 0.0004427343  ;;  %6742 = vmatpush.bf16.msra.mxu3 %v7459_v37 }
 0x440   : > { %v6102_v27 = vsel %vm6101_vm9, %v6099_v11, %v6096_v33 }
 0x441   : > { %v6134_v12 = vadd.f32 %v6102_v27, %v5974_v10  ;;  %v6108_v26 = vmul.f32 %v7658_v4, %v6107_v25  ;;  %v7458_v25 = vld [vmem:[%s11966_s5 + $0x10] sm:$0xff] }
 0x443   : > { %v6150_v34 = vmul.f32 0.01, %v6134_v12  ;;  %6743 = vmatpush.bf16.msra.mxu3 %v7458_v25 }
 0x444   : > { %v7662_v43 = vpop.eup %7661 }
 0x445   : > { %v7664_v38 = vpop.eup %7663  ;;  %v6112_v42 = vadd.f32 1.0, %v7662_v43  ;;  %v6182_v19 = vsel %vm6166_vm7, %v11337_v41, %v6150_v34  ;;  %v6115_v39 = vmul.f32 -0.5, %v7662_v43  ;;  %v6118_v45 = vand.u32 2147483647, %v7662_v43 }
 0x446   : > { %v6105_v60 = vmul.f32 0.6931472, %v7664_v38  ;;  %v6191_v54 = vpack.c.bf16 %v6182_v19, %v6181_v49 }
 0x447   : > { %7665 = vlog2.f32 %v6112_v42  ;;  %v6116_v28 = vadd.f32 1.0, %v6115_v39  ;;  %vm6119_vm5 = vcmp.lt.f32.partialorder %v6118_v45, 0.0004427343 }
 0x448   : > { %7399 = vmatmul.msk.bf16.gmra.mxu1 %vm6229_vm13, %v6191_v54  ;;  %v6111_v8 = vsel %vm6110_vm10, %v6108_v26, %v6105_v60  ;;  %v7457_v54 = vld [vmem:[%s11966_s5 + $0x8] sm:$0xff] }
 0x449   : > { %v6135_v31 = vadd.f32 %v6111_v8, %v5975_v29  ;;  %v6117_v47 = vmul.f32 %v7662_v43, %v6116_v28  ;;  %6744 = vmatpush.bf16.msra.mxu3 %v7457_v54 }
 0x44b   : > { %v6151_v59 = vmul.f32 0.01, %v6135_v31 }
 0x44d   : > { %v7666_v63 = vpop.eup %7665  ;;  %v6183_v14 = vsel %vm6167_vm4, %v11348_v46, %v6151_v59 }
 0x44e   : > { %v6114_v20 = vmul.f32 0.6931472, %v7666_v63 }
 0x450   : > { %v6120_v41 = vsel %vm6119_vm5, %v6117_v47, %v6114_v20 }
 0x451   : > { %v6136_v32 = vadd.f32 %v6120_v41, %v5976_v50  ;;  %v7456_v41 = vld [vmem:[%s11966_s5] sm:$0xff] }
 0x452   : > { %6745 = vmatpush.bf16.msra.mxu3 %v7456_v41 }
 0x453   : > { %v6152_v23 = vmul.f32 0.01, %v6136_v32  ;;  %v6263_v56 = vpop.f32.mrf.mxu1 }
 0x454   : > { %v11387_v44 = vadd.f32 %v11384_v62, %v6263_v56 }
 0x455   : > { %v6184_v17 = vsel %vm6168_vm8, %v11358_v35, %v6152_v23 }
 0x456   : > { %v6192_v9 = vpack.c.bf16 %v6184_v17, %v6183_v14  ;;  %v11390_v15 = vmul.f32 100.0, %v11387_v44 }
 0x458   : > { %7400 = vmatmul.msk.bf16.gmra.mxu1 %vm6229_vm13, %v6192_v9  ;;  %v6319_v55 = vand.u32 2147483647, %v11390_v15  ;;  %v6383_v42 = vmax.f32 %v11390_v15, 0.0  ;;  %vm6575_vm3 = vcmp.gt.f32.partialorder %v11390_v15, 20.0 }
 0x45a   : > { %v6335_v46 = vsub.f32 0.0, %v6319_v55 }
 0x45b   : > { %v6265_v53 = vpop.f32.mrf.mxu1 }
 0x45c   : > { %v6351_v13 = vmul.f32 1.442695, %v6335_v46  ;;  %v11394_v35 = vadd.f32 %v11384_v62, %v6265_v53 }
 0x45e   : > { %7667 = vpow2.f32 %v6351_v13  ;;  %v11397_v16 = vmul.f32 100.0, %v11394_v35 }
 0x460   : > { %v6320_v36 = vand.u32 2147483647, %v11397_v16  ;;  %v6384_v8 = vmax.f32 %v11397_v16, 0.0  ;;  %vm6576_vm14 = vcmp.gt.f32.partialorder %v11397_v16, 20.0 }
 0x462   : > { %v6336_v40 = vsub.f32 0.0, %v6320_v36 }
 0x464   : > { %v7668_v7 = vpop.eup %7667  ;;  %v6353_v0 = vmul.f32 1.442695, %v6336_v40 }
 0x465   : > { %v6399_v48 = vadd.f32 1.0, %v7668_v7  ;;  %v6402_v52 = vmul.f32 -0.5, %v7668_v7  ;;  %v6405_v33 = vand.u32 2147483647, %v7668_v7 }
 0x466   : > { %7669 = vpow2.f32 %v6353_v0 }
 0x467   : > { %7671 = vlog2.f32 %v6399_v48  ;;  %v6403_v51 = vadd.f32 1.0, %v6402_v52  ;;  %vm11416_vm11 = vcmp.lt.f32.partialorder %v6405_v33, 0.0004427343 }
 0x468   : > { %v6268_v1 = vpop.f32.mrf.mxu1 }
 0x469   : > { %v11401_v3 = vadd.f32 %v11384_v62, %v6268_v1  ;;  %v6404_v12 = vmul.f32 %v7668_v7, %v6403_v51 }
 0x46b   : > { %v11404_v30 = vmul.f32 100.0, %v11401_v3 }
 0x46c   : > { %v7670_v24 = vpop.eup %7669 }
 0x46d   : > { %v6321_v22 = vand.u32 2147483647, %v11404_v30  ;;  %v6408_v58 = vadd.f32 1.0, %v7670_v24  ;;  %v7672_v21 = vpop.eup %7671  ;;  %v6411_v4 = vmul.f32 -0.5, %v7670_v24  ;;  %v6414_v5 = vand.u32 2147483647, %v7670_v24 }
 0x46e   : > { %v6401_v10 = vmul.f32 0.6931472, %v7672_v21  ;;  %v6385_v37 = vmax.f32 %v11404_v30, 0.0  ;;  %vm6577_vm1 = vcmp.gt.f32.partialorder %v11404_v30, 20.0 }
 0x46f   : > { %v6337_v57 = vsub.f32 0.0, %v6321_v22  ;;  %7673 = vlog2.f32 %v6408_v58  ;;  %v6412_v27 = vadd.f32 1.0, %v6411_v4  ;;  %vm6415_vm6 = vcmp.lt.f32.partialorder %v6414_v5, 0.0004427343 }
 0x470   : > { %v6270_v18 = vpop.f32.mrf.mxu1  ;;  %v6407_v6 = vsel %vm11416_vm11, %v6404_v12, %v6401_v10 }
 0x471   : > { %v6355_v61 = vmul.f32 1.442695, %v6337_v57  ;;  %v11411_v11 = vadd.f32 %v11384_v62, %v6270_v18  ;;  %v6413_v19 = vmul.f32 %v7670_v24, %v6412_v27  ;;  %v6543_v29 = vadd.f32 %v6407_v6, %v6383_v42 }
 0x473   : > { %7675 = vpow2.f32 %v6355_v61  ;;  %v11414_v2 = vmul.f32 100.0, %v11411_v11  ;;  %v6559_v32 = vmul.f32 0.01, %v6543_v29 }
 0x475   : > { %v6322_v43 = vand.u32 2147483647, %v11414_v2  ;;  %v7674_v38 = vpop.eup %7673  ;;  %v6591_v9 = vsel %vm6575_vm3, %v11387_v44, %v6559_v32  ;;  %v6386_v12 = vmax.f32 %v11414_v2, 0.0  ;;  %vm6578_vm15 = vcmp.gt.f32.partialorder %v11414_v2, 20.0 }
 0x476   : > { %v6410_v49 = vmul.f32 0.6931472, %v7674_v38 }
 0x477   : > { %v6338_v60 = vsub.f32 0.0, %v6322_v43 }
 0x478   : > { %v6416_v45 = vsel %vm6415_vm6, %v6413_v19, %v6410_v49 }
 0x479   : > { %v7676_v26 = vpop.eup %7675  ;;  %v6544_v31 = vadd.f32 %v6416_v45, %v6384_v8  ;;  %v6357_v20 = vmul.f32 1.442695, %v6338_v60 }
 0x47a   : > { %v6417_v63 = vadd.f32 1.0, %v7676_v26  ;;  %v6420_v14 = vmul.f32 -0.5, %v7676_v26  ;;  %v6423_v7 = vand.u32 2147483647, %v7676_v26 }
 0x47b   : > { %v6560_v59 = vmul.f32 0.01, %v6544_v31 }
 0x47c   : > { %7677 = vlog2.f32 %v6417_v63  ;;  %v6421_v16 = vadd.f32 1.0, %v6420_v14  ;;  %vm6424_vm12 = vcmp.lt.f32.partialorder %v6423_v7, 0.0004427343 }
 0x47d   : > { %7679 = vpow2.f32 %v6357_v20  ;;  %v6592_v56 = vsel %vm6576_vm14, %v11394_v35, %v6560_v59 }
 0x47e   : > { %v6607_v53 = vpack.c.bf16 %v6592_v56, %v6591_v9  ;;  %v6422_v1 = vmul.f32 %v7676_v26, %v6421_v16 }
 0x480   : > { %v6273_v39 = vpop.f32.mrf.mxu1  ;;  %7433 = vmatmul.msk.bf16.vlgmr.msra.gmra.mxu3 %vm6229_vm13, %v6607_v53 }
 0x481   : > { %v11432_v28 = vadd.f32 %v11384_v62, %v6273_v39 }
 0x482   : > { %v7678_v13 = vpop.eup %7677 }
 0x483   : > { %v11435_v47 = vmul.f32 100.0, %v11432_v28  ;;  %v7680_v36 = vpop.eup %7679  ;;  %v6419_v35 = vmul.f32 0.6931472, %v7678_v13 }
 0x484   : > { %v6426_v40 = vadd.f32 1.0, %v7680_v36  ;;  %v6429_v0 = vmul.f32 -0.5, %v7680_v36  ;;  %v6432_v21 = vand.u32 2147483647, %v7680_v36 }
 0x485   : > { %v6323_v50 = vand.u32 2147483647, %v11435_v47  ;;  %v6425_v57 = vsel %vm6424_vm12, %v6422_v1, %v6419_v35  ;;  %v6387_v2 = vmax.f32 %v11435_v47, 0.0  ;;  %vm6579_vm10 = vcmp.gt.f32.partialorder %v11435_v47, 20.0 }
 0x486   : > { %v6430_v22 = vadd.f32 1.0, %v6429_v0  ;;  %v6545_v33 = vadd.f32 %v6425_v57, %v6385_v37  ;;  %vm6433_vm0 = vcmp.lt.f32.partialorder %v6432_v21, 0.0004427343 }
 0x487   : > { %v6339_v23 = vsub.f32 0.0, %v6323_v50 }
 0x488   : > { %v6275_v17 = vpop.f32.mrf.mxu1  ;;  %v6431_v27 = vmul.f32 %v7680_v36, %v6430_v22  ;;  %v6561_v49 = vmul.f32 0.01, %v6545_v33 }
 0x489   : > { %v6359_v55 = vmul.f32 1.442695, %v6339_v23  ;;  %v11446_v46 = vadd.f32 %v11384_v62, %v6275_v17 }
 0x48a   : > { %v6593_v20 = vsel %vm6577_vm1, %v11401_v3, %v6561_v49 }
 0x48b   : > { %7681 = vpow2.f32 %v6359_v55  ;;  %v11449_v15 = vmul.f32 100.0, %v11446_v46 }
 0x48c   : > { %7683 = vlog2.f32 %v6426_v40 }
 0x48d   : > { %v6324_v44 = vand.u32 2147483647, %v11449_v15  ;;  %v6388_v16 = vmax.f32 %v11449_v15, 0.0  ;;  %vm6580_vm7 = vcmp.gt.f32.partialorder %v11449_v15, 20.0 }
 0x48f   : > { %v6340_v48 = vsub.f32 0.0, %v6324_v44 }
 0x491   : > { %v7682_v52 = vpop.eup %7681  ;;  %v6361_v24 = vmul.f32 1.442695, %v6340_v48 }
 0x492   : > { %v6435_v4 = vadd.f32 1.0, %v7682_v52  ;;  %v7684_v51 = vpop.eup %7683  ;;  %v6438_v5 = vmul.f32 -0.5, %v7682_v52  ;;  %v6441_v26 = vand.u32 2147483647, %v7682_v52 }
 0x493   : > { %7685 = vpow2.f32 %v6361_v24  ;;  %v6428_v10 = vmul.f32 0.6931472, %v7684_v51 }
 0x494   : > { %7687 = vlog2.f32 %v6435_v4  ;;  %v6439_v60 = vadd.f32 1.0, %v6438_v5  ;;  %vm6442_vm9 = vcmp.lt.f32.partialorder %v6441_v26, 0.0004427343 }
 0x495   : > { %v6278_v58 = vpop.f32.mrf.mxu1  ;;  %v6434_v43 = vsel %vm6433_vm0, %v6431_v27, %v6428_v10 }
 0x496   : > { %v11454_v18 = vadd.f32 %v11384_v62, %v6278_v58  ;;  %v6546_v25 = vadd.f32 %v6434_v43, %v6386_v12  ;;  %v6440_v41 = vmul.f32 %v7682_v52, %v6439_v60 }
 0x498   : > { %v11458_v61 = vmul.f32 100.0, %v11454_v18  ;;  %v6562_v45 = vmul.f32 0.01, %v6546_v25 }
 0x499   : > { %v7686_v6 = vpop.eup %7685 }
 0x49a   : > { %v6325_v34 = vand.u32 2147483647, %v11458_v61  ;;  %v7688_v19 = vpop.eup %7687  ;;  %v6444_v39 = vadd.f32 1.0, %v7686_v6  ;;  %v6447_v8 = vmul.f32 -0.5, %v7686_v6  ;;  %v6594_v50 = vsel %vm6578_vm15, %v11411_v11, %v6562_v45 }
 0x49b   : > { %v6437_v63 = vmul.f32 0.6931472, %v7688_v19  ;;  %v6608_v32 = vpack.c.bf16 %v6594_v50, %v6593_v20  ;;  %v6450_v30 = vand.u32 2147483647, %v7686_v6  ;;  %vm6581_vm11 = vcmp.gt.f32.partialorder %v11458_v61, 20.0 }
 0x49c   : > { %v6341_v38 = vsub.f32 0.0, %v6325_v34  ;;  %7689 = vlog2.f32 %v6444_v39  ;;  %v6448_v59 = vadd.f32 1.0, %v6447_v8  ;;  %v6389_v39 = vmax.f32 %v11458_v61, 0.0 }
 0x49d   : > { %v6280_v42 = vpop.f32.mrf.mxu1  ;;  %v6443_v14 = vsel %vm6442_vm9, %v6440_v41, %v6437_v63  ;;  %7434 = vmatmul.msk.bf16.gmra.mxu3 %vm6229_vm13, %v6608_v32  ;;  %vm6451_vm2 = vcmp.lt.f32.partialorder %v6450_v30, 0.0004427343 }
 0x49e   : > { %v6363_v54 = vmul.f32 1.442695, %v6341_v38  ;;  %v11463_v29 = vadd.f32 %v11384_v62, %v6280_v42  ;;  %v6547_v11 = vadd.f32 %v6443_v14, %v6387_v2  ;;  %v6449_v13 = vmul.f32 %v7686_v6, %v6448_v59 }
 0x4a0   : > { %7691 = vpow2.f32 %v6363_v54  ;;  %v11468_v31 = vmul.f32 100.0, %v11463_v29  ;;  %v6563_v48 = vmul.f32 0.01, %v6547_v11 }
 0x4a2   : > { %v6326_v23 = vand.u32 2147483647, %v11468_v31  ;;  %v7690_v56 = vpop.eup %7689  ;;  %v6595_v37 = vsel %vm6579_vm10, %v11432_v28, %v6563_v48  ;;  %v6390_v20 = vmax.f32 %v11468_v31, 0.0  ;;  %vm6582_vm8 = vcmp.gt.f32.partialorder %v11468_v31, 20.0 }
 0x4a3   : > { %v6446_v53 = vmul.f32 0.6931472, %v7690_v56 }
 0x4a4   : > { %v6342_v17 = vsub.f32 0.0, %v6326_v23 }
 0x4a5   : > { %v6283_v9 = vpop.f32.mrf.mxu1  ;;  %v6452_v0 = vsel %vm6451_vm2, %v6449_v13, %v6446_v53 }
 0x4a6   : > { %v11476_v55 = vadd.f32 %v11384_v62, %v6283_v9  ;;  %v7692_v3 = vpop.eup %7691  ;;  %v6365_v36 = vmul.f32 1.442695, %v6342_v17  ;;  %v6548_v44 = vadd.f32 %v6452_v0, %v6388_v16 }
 0x4a7   : > { %v6453_v40 = vadd.f32 1.0, %v7692_v3  ;;  %v6456_v52 = vmul.f32 -0.5, %v7692_v3  ;;  %v6459_v5 = vand.u32 2147483647, %v7692_v3 }
 0x4a8   : > { %v11480_v7 = vmul.f32 100.0, %v11476_v55  ;;  %7693 = vpow2.f32 %v6365_v36  ;;  %v6564_v1 = vmul.f32 0.01, %v6548_v44 }
 0x4a9   : > { %7695 = vlog2.f32 %v6453_v40  ;;  %v6457_v27 = vadd.f32 1.0, %v6456_v52  ;;  %vm6460_vm5 = vcmp.lt.f32.partialorder %v6459_v5, 0.0004427343 }
 0x4aa   : > { %v6327_v35 = vand.u32 2147483647, %v11480_v7  ;;  %v6596_v57 = vsel %vm6580_vm7, %v11446_v46, %v6564_v1  ;;  %vm6583_vm14 = vcmp.gt.f32.partialorder %v11480_v7, 20.0 }
 0x4ab   : > { %v6609_v15 = vpack.c.bf16 %v6596_v57, %v6595_v37  ;;  %v6458_v46 = vmul.f32 %v7692_v3, %v6457_v27 }
 0x4ac   : > { %v6343_v22 = vsub.f32 0.0, %v6327_v35 }
 0x4ad   : > { %v6285_v24 = vpop.f32.mrf.mxu1  ;;  %7435 = vmatmul.msk.bf16.gmra.mxu3 %vm6229_vm13, %v6609_v15 }
 0x4ae   : > { %v11486_v58 = vadd.f32 %v11384_v62, %v6285_v24  ;;  %v7694_v21 = vpop.eup %7693  ;;  %v6367_v4 = vmul.f32 1.442695, %v6343_v22 }
 0x4af   : > { %v7696_v51 = vpop.eup %7695  ;;  %v6462_v33 = vadd.f32 1.0, %v7694_v21  ;;  %v6465_v12 = vmul.f32 -0.5, %v7694_v21  ;;  %v6468_v38 = vand.u32 2147483647, %v7694_v21 }
 0x4b0   : > { %v11491_v10 = vmul.f32 100.0, %v11486_v58  ;;  %7697 = vpow2.f32 %v6367_v4  ;;  %v6455_v34 = vmul.f32 0.6931472, %v7696_v51 }
 0x4b1   : > { %7699 = vlog2.f32 %v6462_v33  ;;  %v6466_v25 = vadd.f32 1.0, %v6465_v12  ;;  %vm6469_vm4 = vcmp.lt.f32.partialorder %v6468_v38, 0.0004427343 }
 0x4b2   : > { %v6328_v47 = vand.u32 2147483647, %v11491_v10  ;;  %v6461_v19 = vsel %vm6460_vm5, %v6458_v46, %v6455_v34  ;;  %v6392_v27 = vmax.f32 %v11491_v10, 0.0  ;;  %vm6584_vm12 = vcmp.gt.f32.partialorder %v11491_v10, 20.0 }
 0x4b3   : > { %v6467_v8 = vmul.f32 %v7694_v21, %v6466_v25  ;;  %v6549_v63 = vadd.f32 %v6461_v19, %v6389_v39 }
 0x4b4   : > { %v6344_v43 = vsub.f32 0.0, %v6328_v47 }
 0x4b5   : > { %v6288_v28 = vpop.f32.mrf.mxu1  ;;  %v6565_v17 = vmul.f32 0.01, %v6549_v63 }
 0x4b6   : > { %v6369_v6 = vmul.f32 1.442695, %v6344_v43  ;;  %v11496_v42 = vadd.f32 %v11384_v62, %v6288_v28  ;;  %v7698_v49 = vpop.eup %7697 }
 0x4b7   : > { %v7700_v60 = vpop.eup %7699  ;;  %v6471_v54 = vadd.f32 1.0, %v7698_v49  ;;  %v6474_v41 = vmul.f32 -0.5, %v7698_v49  ;;  %v6477_v36 = vand.u32 2147483647, %v7698_v49  ;;  %v6597_v44 = vsel %vm6581_vm11, %v11454_v18, %v6565_v17 }
 0x4b8   : > { %7701 = vpow2.f32 %v6369_v6  ;;  %v6464_v26 = vmul.f32 0.6931472, %v7700_v60  ;;  %v11500_v45 = vmul.f32 100.0, %v11496_v42 }
 0x4b9   : > { %7703 = vlog2.f32 %v6471_v54  ;;  %v6475_v56 = vadd.f32 1.0, %v6474_v41  ;;  %vm6478_vm6 = vcmp.lt.f32.partialorder %v6477_v36, 0.0004427343 }
 0x4ba   : > { %v6470_v50 = vsel %vm6469_vm4, %v6467_v8, %v6464_v26  ;;  %v6329_v32 = vand.u32 2147483647, %v11500_v45  ;;  %vm6585_vm15 = vcmp.gt.f32.partialorder %v11500_v45, 20.0 }
 0x4bb   : > { %v6550_v59 = vadd.f32 %v6470_v50, %v6390_v20  ;;  %v6476_v35 = vmul.f32 %v7698_v49, %v6475_v56 }
 0x4bc   : > { %v6345_v23 = vsub.f32 0.0, %v6329_v32 }
 0x4bd   : > { %v6290_v14 = vpop.f32.mrf.mxu1  ;;  %v6566_v9 = vmul.f32 0.01, %v6550_v59 }
 0x4be   : > { %v7702_v30 = vpop.eup %7701  ;;  %v11506_v2 = vadd.f32 %v11384_v62, %v6290_v14  ;;  %v6371_v53 = vmul.f32 1.442695, %v6345_v23 }
 0x4bf   : > { %v6480_v3 = vadd.f32 1.0, %v7702_v30  ;;  %v6483_v11 = vmul.f32 -0.5, %v7702_v30  ;;  %v7704_v13 = vpop.eup %7703  ;;  %v6598_v40 = vsel %vm6582_vm8, %v11463_v29, %v6566_v9  ;;  %v6486_v24 = vand.u32 2147483647, %v7702_v30 }
 0x4c0   : > { %v11509_v16 = vmul.f32 100.0, %v11506_v2  ;;  %v6473_v0 = vmul.f32 0.6931472, %v7704_v13  ;;  %v6610_v1 = vpack.c.bf16 %v6598_v40, %v6597_v44  ;;  %v6391_v29 = vmax.f32 %v11480_v7, 0.0 }
 0x4c1   : > { %7705 = vlog2.f32 %v6480_v3  ;;  %v6484_v48 = vadd.f32 1.0, %v6483_v11  ;;  %vm6487_vm3 = vcmp.lt.f32.partialorder %v6486_v24, 0.0004427343  ;;  %v6393_v9 = vmax.f32 %v11500_v45, 0.0 }
 0x4c2   : > { %7707 = vpow2.f32 %v6371_v53  ;;  %v6330_v31 = vand.u32 2147483647, %v11509_v16  ;;  %v6479_v22 = vsel %vm6478_vm6, %v6476_v35, %v6473_v0  ;;  %7436 = vmatmul.msk.bf16.gmra.mxu3 %vm6229_vm13, %v6610_v1  ;;  %v6394_v0 = vmax.f32 %v11509_v16, 0.0 }
 0x4c3   : > { %v6485_v37 = vmul.f32 %v7702_v30, %v6484_v48  ;;  %v6551_v18 = vadd.f32 %v6479_v22, %v6391_v29  ;;  %vm6586_vm9 = vcmp.gt.f32.partialorder %v11509_v16, 20.0 }
 0x4c4   : > { %v6346_v52 = vsub.f32 0.0, %v6330_v31 }
 0x4c5   : > { %v6293_v57 = vpop.f32.mrf.mxu1  ;;  %v6567_v25 = vmul.f32 0.01, %v6551_v18 }
 0x4c6   : > { %v6373_v61 = vmul.f32 1.442695, %v6346_v52  ;;  %v11518_v21 = vadd.f32 %v11384_v62, %v6293_v57 }
 0x4c7   : > { %v7706_v4 = vpop.eup %7705  ;;  %v6599_v20 = vsel %vm6583_vm14, %v11476_v55, %v6567_v25 }
 0x4c8   : > { %v7708_v51 = vpop.eup %7707  ;;  %v6482_v33 = vmul.f32 0.6931472, %v7706_v4  ;;  %7709 = vpow2.f32 %v6373_v61  ;;  %v11521_v15 = vmul.f32 100.0, %v11518_v21 }
 0x4c9   : > { %v6489_v12 = vadd.f32 1.0, %v7708_v51  ;;  %v6492_v43 = vmul.f32 -0.5, %v7708_v51  ;;  %v6495_v8 = vand.u32 2147483647, %v7708_v51 }
 0x4ca   : > { %v6488_v5 = vsel %vm6487_vm3, %v6485_v37, %v6482_v33  ;;  %v6331_v47 = vand.u32 2147483647, %v11521_v15  ;;  %vm6587_vm5 = vcmp.gt.f32.partialorder %v11521_v15, 20.0 }
 0x4cb   : > { %v6552_v34 = vadd.f32 %v6488_v5, %v6392_v27  ;;  %7711 = vlog2.f32 %v6489_v12  ;;  %v6493_v60 = vadd.f32 1.0, %v6492_v43  ;;  %vm6496_vm0 = vcmp.lt.f32.partialorder %v6495_v8, 0.0004427343 }
 0x4cc   : > { %v6347_v46 = vsub.f32 0.0, %v6331_v47 }
 0x4cd   : > { %v6295_v28 = vpop.f32.mrf.mxu1  ;;  %v6568_v38 = vmul.f32 0.01, %v6552_v34  ;;  %v6494_v32 = vmul.f32 %v7708_v51, %v6493_v60 }
 0x4ce   : > { %v7710_v6 = vpop.eup %7709  ;;  %v6375_v49 = vmul.f32 1.442695, %v6347_v46  ;;  %v11528_v19 = vadd.f32 %v11384_v62, %v6295_v28  ;;  %v6395_v28 = vmax.f32 %v11521_v15, 0.0 }
 0x4cf   : > { %v6498_v39 = vadd.f32 1.0, %v7710_v6  ;;  %v6501_v54 = vmul.f32 -0.5, %v7710_v6  ;;  %v6600_v26 = vsel %vm6584_vm12, %v11486_v58, %v6568_v38  ;;  %v6504_v30 = vand.u32 2147483647, %v7710_v6 }
 0x4d0   : > { %7713 = vpow2.f32 %v6375_v49  ;;  %v11532_v63 = vmul.f32 100.0, %v11528_v19  ;;  %v6611_v7 = vpack.c.bf16 %v6600_v26, %v6599_v20 }
 0x4d1   : > { %v7712_v50 = vpop.eup %7711  ;;  %7715 = vlog2.f32 %v6498_v39  ;;  %v6502_v59 = vadd.f32 1.0, %v6501_v54  ;;  %vm6505_vm1 = vcmp.lt.f32.partialorder %v6504_v30, 0.0004427343 }
 0x4d2   : > { %v6491_v10 = vmul.f32 0.6931472, %v7712_v50  ;;  %v6332_v41 = vand.u32 2147483647, %v11532_v63  ;;  %7437 = vmatmul.msk.bf16.gmra.mxu3 %vm6229_vm13, %v6611_v7  ;;  %v6396_v54 = vmax.f32 %v11532_v63, 0.0  ;;  %vm6588_vm10 = vcmp.gt.f32.partialorder %v11532_v63, 20.0 }
 0x4d3   : > { %v6503_v11 = vmul.f32 %v7710_v6, %v6502_v59 }
 0x4d4   : > { %v6348_v23 = vsub.f32 0.0, %v6332_v41  ;;  %v6497_v14 = vsel %vm6496_vm0, %v6494_v32, %v6491_v10 }
 0x4d5   : > { %v6298_v58 = vpop.f32.mrf.mxu1  ;;  %v6553_v13 = vadd.f32 %v6497_v14, %v6393_v9 }
 0x4d6   : > { %v7714_v17 = vpop.eup %7713  ;;  %v6377_v56 = vmul.f32 1.442695, %v6348_v23  ;;  %v11539_v55 = vadd.f32 %v11384_v62, %v6298_v58 }
 0x4d7   : > { %v7716_v3 = vpop.eup %7715  ;;  %v6507_v53 = vadd.f32 1.0, %v7714_v17  ;;  %v6510_v48 = vmul.f32 -0.5, %v7714_v17  ;;  %v6569_v52 = vmul.f32 0.01, %v6553_v13  ;;  %v6513_v51 = vand.u32 2147483647, %v7714_v17 }
 0x4d8   : > { %v6500_v36 = vmul.f32 0.6931472, %v7716_v3  ;;  %7717 = vpow2.f32 %v6377_v56  ;;  %v11542_v40 = vmul.f32 100.0, %v11539_v55 }
 0x4d9   : > { %7719 = vlog2.f32 %v6507_v53  ;;  %v6511_v37 = vadd.f32 1.0, %v6510_v48  ;;  %v6601_v5 = vsel %vm6585_vm15, %v11496_v42, %v6569_v52  ;;  %vm6514_vm2 = vcmp.lt.f32.partialorder %v6513_v51, 0.0004427343 }
 0x4da   : > { %v6506_v31 = vsel %vm6505_vm1, %v6503_v11, %v6500_v36  ;;  %v6333_v44 = vand.u32 2147483647, %v11542_v40  ;;  %v6397_v15 = vmax.f32 %v11542_v40, 0.0  ;;  %vm6589_vm6 = vcmp.gt.f32.partialorder %v11542_v40, 20.0  ;;  %v11575_v40 = vld [vmem:[%s11968_s7] ss:$0 sm:$0xff] }
 0x4db   : > { %v6554_v35 = vadd.f32 %v6506_v31, %v6394_v0 }
 0x4dc   : > { %v6349_v1 = vsub.f32 0.0, %v6333_v44 }
 0x4dd   : > { %v6300_v22 = vpop.f32.mrf.mxu1  ;;  %v6570_v24 = vmul.f32 0.01, %v6554_v35 }
 0x4de   : > { %v7718_v57 = vpop.eup %7717  ;;  %v6379_v29 = vmul.f32 1.442695, %v6349_v1  ;;  %v11549_v61 = vadd.f32 %v11384_v62, %v6300_v22  ;;  %v6512_v62 = vmul.f32 %v7714_v17, %v6511_v37 }
 0x4df   : > { %v7720_v4 = vpop.eup %7719  ;;  %v6516_v18 = vadd.f32 1.0, %v7718_v57  ;;  %v6602_v33 = vsel %vm6586_vm9, %v11506_v2, %v6570_v24  ;;  %v6519_v27 = vmul.f32 -0.5, %v7718_v57  ;;  %v6522_v25 = vand.u32 2147483647, %v7718_v57 }
 0x4e0   : > { %7721 = vpow2.f32 %v6379_v29  ;;  %v11553_v12 = vmul.f32 100.0, %v11549_v61  ;;  %v6509_v45 = vmul.f32 0.6931472, %v7720_v4  ;;  %v6612_v16 = vpack.c.bf16 %v6602_v33, %v6601_v5 }
 0x4e1   : > { %7723 = vlog2.f32 %v6516_v18  ;;  %v6520_v34 = vadd.f32 1.0, %v6519_v27  ;;  %vm6523_vm7 = vcmp.lt.f32.partialorder %v6522_v25, 0.0004427343 }
 0x4e2   : > { %v6334_v47 = vand.u32 2147483647, %v11553_v12  ;;  %v6515_v46 = vsel %vm6514_vm2, %v6512_v62, %v6509_v45  ;;  %7438 = vmatmul.msk.bf16.gmra.mxu3 %vm6229_vm13, %v6612_v16  ;;  %v6398_v0 = vmax.f32 %v11553_v12, 0.0  ;;  %vm6590_vm11 = vcmp.gt.f32.partialorder %v11553_v12, 20.0 }
 0x4e3   : > { %v6555_v42 = vadd.f32 %v6515_v46, %v6395_v28  ;;  %v6521_v39 = vmul.f32 %v7718_v57, %v6520_v34 }
 0x4e4   : > { %v6350_v43 = vsub.f32 0.0, %v6334_v47 }
 0x4e5   : > { %v6571_v50 = vmul.f32 0.01, %v6555_v42 }
 0x4e6   : > { %v7722_v2 = vpop.eup %7721  ;;  %v6381_v38 = vmul.f32 1.442695, %v6350_v43 }
 0x4e7   : > { %v7724_v6 = vpop.eup %7723  ;;  %v6525_v49 = vadd.f32 1.0, %v7722_v2  ;;  %v6528_v20 = vmul.f32 -0.5, %v7722_v2  ;;  %v6531_v14 = vand.u32 2147483647, %v7722_v2  ;;  %v6603_v58 = vsel %vm6587_vm5, %v11518_v21, %v6571_v50  ;;  %v6650_v21 = vpop.f32.mrf.mxu2 }
 0x4e8   : > { %v6518_v60 = vmul.f32 0.6931472, %v7724_v6  ;;  %7725 = vpow2.f32 %v6381_v38 }
 0x4e9   : > { %7727 = vlog2.f32 %v6525_v49  ;;  %v6529_v32 = vadd.f32 1.0, %v6528_v20  ;;  %vm6532_vm4 = vcmp.lt.f32.partialorder %v6531_v14, 0.0004427343 }
 0x4ea   : > { %v6524_v26 = vsel %vm6523_vm7, %v6521_v39, %v6518_v60 }
 0x4eb   : > { %v6556_v8 = vadd.f32 %v6524_v26, %v6396_v54  ;;  %v6530_v56 = vmul.f32 %v7722_v2, %v6529_v32 }
 0x4ed   : > { %v6572_v7 = vmul.f32 0.01, %v6556_v8 }
 0x4ee   : > { %v7726_v10 = vpop.eup %7725 }
 0x4ef   : > { %v7728_v41 = vpop.eup %7727  ;;  %v6534_v59 = vadd.f32 1.0, %v7726_v10  ;;  %v6604_v23 = vsel %vm6588_vm10, %v11528_v19, %v6572_v7  ;;  %v6537_v30 = vmul.f32 -0.5, %v7726_v10  ;;  %v6540_v53 = vand.u32 2147483647, %v7726_v10  ;;  %v6652_v24 = vpop.f32.mrf.mxu2 }
 0x4f0   : > { %v6527_v17 = vmul.f32 0.6931472, %v7728_v41  ;;  %v6613_v9 = vpack.c.bf16 %v6604_v23, %v6603_v58 }
 0x4f1   : > { %7729 = vlog2.f32 %v6534_v59  ;;  %v6538_v3 = vadd.f32 1.0, %v6537_v30  ;;  %vm6541_vm8 = vcmp.lt.f32.partialorder %v6540_v53, 0.0004427343 }
 0x4f2   : > { %v6533_v11 = vsel %vm6532_vm4, %v6530_v56, %v6527_v17  ;;  %7439 = vmatmul.msk.bf16.gmra.mxu3 %vm6229_vm13, %v6613_v9 }
 0x4f3   : > { %v6557_v13 = vadd.f32 %v6533_v11, %v6397_v15  ;;  %v6539_v19 = vmul.f32 %v7726_v10, %v6538_v3 }
 0x4f5   : > { %v6573_v35 = vmul.f32 0.01, %v6557_v13 }
 0x4f7   : > { %v7730_v63 = vpop.eup %7729  ;;  %v6605_v52 = vsel %vm6589_vm6, %v11539_v55, %v6573_v35  ;;  %v6655_v57 = vpop.f32.mrf.mxu2 }
 0x4f8   : > { %v6536_v36 = vmul.f32 0.6931472, %v7730_v63 }
 0x4fa   : > { %v6542_v31 = vsel %vm6541_vm8, %v6539_v19, %v6536_v36 }
 0x4fb   : > { %v6558_v44 = vadd.f32 %v6542_v31, %v6398_v0 }
 0x4fd   : > { %v6574_v48 = vmul.f32 0.01, %v6558_v44 }
 0x4ff   : > { %v6606_v1 = vsel %vm6590_vm11, %v11549_v61, %v6574_v48  ;;  %v6657_v4 = vpop.f32.mrf.mxu2 }
 0x500   : > { %v6614_v22 = vpack.c.bf16 %v6606_v1, %v6605_v52 }
 0x502   : > { %7440 = vmatmul.msk.bf16.gmra.mxu3 %vm6229_vm13, %v6614_v22 }
 0x503   : > { %v6747_v29 = vpop.f32.mrf.mxu3 }
 0x504   : > { %v6748_v5 = vadd.f32 %v6747_v29, %v6650_v21 }
 0x506   : > { %v11580_v55 = vadd.f32 %v11575_v40, %v6748_v5 }
 0x507   : > { %v6660_v51 = vpop.f32.mrf.mxu2 }
 0x508   : > { %v11583_v45 = vmul.f32 100.0, %v11580_v55 }
 0x50a   : > { %v6823_v47 = vand.u32 2147483647, %v11583_v45  ;;  %vm7079_vm12 = vcmp.gt.f32.partialorder %v11583_v45, 20.0 }
 0x50b   : > { %v6749_v37 = vpop.f32.mrf.mxu3 }
 0x50c   : > { %v6750_v16 = vadd.f32 %v6749_v37, %v6652_v24  ;;  %v6839_v46 = vsub.f32 0.0, %v6823_v47 }
 0x50e   : > { %v11587_v62 = vadd.f32 %v11575_v40, %v6750_v16  ;;  %v6855_v28 = vmul.f32 1.442695, %v6839_v46 }
 0x50f   : > { %v6662_v33 = vpop.f32.mrf.mxu2 }
 0x510   : > { %v11592_v25 = vmul.f32 100.0, %v11587_v62  ;;  %7731 = vpow2.f32 %v6855_v28 }
 0x512   : > { %v6824_v38 = vand.u32 2147483647, %v11592_v25  ;;  %v6888_v16 = vmax.f32 %v11592_v25, 0.0  ;;  %vm7080_vm0 = vcmp.gt.f32.partialorder %v11592_v25, 20.0 }
 0x514   : > { %v6840_v60 = vsub.f32 0.0, %v6824_v38 }
 0x516   : > { %v6857_v26 = vmul.f32 1.442695, %v6840_v60  ;;  %v7732_v7 = vpop.eup %7731 }
 0x517   : > { %v11577_v61 = vpop.f32.mrf.mxu2  ;;  %v6903_v23 = vadd.f32 1.0, %v7732_v7  ;;  %v6906_v17 = vmul.f32 -0.5, %v7732_v7  ;;  %v6909_v13 = vand.u32 2147483647, %v7732_v7 }
 0x518   : > { %7733 = vpow2.f32 %v6857_v26 }
 0x519   : > { %7735 = vlog2.f32 %v6903_v23  ;;  %v6907_v15 = vadd.f32 1.0, %v6906_v17  ;;  %vm6910_vm3 = vcmp.lt.f32.partialorder %v6909_v13, 0.0004427343 }
 0x51b   : > { %v6908_v48 = vmul.f32 %v7732_v7, %v6907_v15 }
 0x51e   : > { %v7734_v56 = vpop.eup %7733 }
 0x51f   : > { %v11589_v43 = vpop.f32.mrf.mxu2  ;;  %v7736_v63 = vpop.eup %7735  ;;  %v6912_v36 = vadd.f32 1.0, %v7734_v56  ;;  %v6915_v0 = vmul.f32 -0.5, %v7734_v56 }
 0x520   : > { %v6752_v18 = vpop.f32.mrf.mxu3  ;;  %v6905_v19 = vmul.f32 0.6931472, %v7736_v63 }
 0x521   : > { %v6753_v2 = vadd.f32 %v6752_v18, %v6655_v57  ;;  %v6916_v24 = vadd.f32 1.0, %v6915_v0  ;;  %v6887_v57 = vmax.f32 %v11583_v45, 0.0 }
 0x522   : > { %v6911_v22 = vsel %vm6910_vm3, %v6908_v48, %v6905_v19 }
 0x523   : > { %v11596_v6 = vadd.f32 %v11575_v40, %v6753_v2 }
 0x525   : > { %v11601_v39 = vmul.f32 100.0, %v11596_v6 }
 0x527   : > { %v11598_v42 = vpop.f32.mrf.mxu2  ;;  %v6825_v8 = vand.u32 2147483647, %v11601_v39  ;;  %v6889_v0 = vmax.f32 %v11601_v39, 0.0  ;;  %vm7081_vm9 = vcmp.gt.f32.partialorder %v11601_v39, 20.0 }
 0x528   : > { %v6754_v27 = vpop.f32.mrf.mxu3 }
 0x529   : > { %v6755_v54 = vadd.f32 %v6754_v27, %v6657_v4  ;;  %v6841_v41 = vsub.f32 0.0, %v6825_v8  ;;  %v6918_v4 = vand.u32 2147483647, %v7734_v56 }
 0x52b   : > { %v11605_v20 = vadd.f32 %v11575_v40, %v6755_v54  ;;  %v6859_v30 = vmul.f32 1.442695, %v6841_v41  ;;  %vm6919_vm14 = vcmp.lt.f32.partialorder %v6918_v4, 0.0004427343 }
 0x52d   : > { %v11610_v32 = vmul.f32 100.0, %v11605_v20  ;;  %7737 = vpow2.f32 %v6859_v30 }
 0x52e   : > { %7739 = vlog2.f32 %v6912_v36 }
 0x52f   : > { %v11612_v59 = vpop.f32.mrf.mxu2  ;;  %v6826_v58 = vand.u32 2147483647, %v11610_v32  ;;  %vm7082_vm2 = vcmp.gt.f32.partialorder %v11610_v32, 20.0 }
 0x530   : > { %v6757_v12 = vpop.f32.mrf.mxu3 }
 0x531   : > { %v6758_v10 = vadd.f32 %v6757_v12, %v6660_v51  ;;  %v6842_v11 = vsub.f32 0.0, %v6826_v58  ;;  %v6917_v12 = vmul.f32 %v7734_v56, %v6916_v24 }
 0x533   : > { %v11615_v14 = vadd.f32 %v11575_v40, %v6758_v10  ;;  %v6861_v44 = vmul.f32 1.442695, %v6842_v11  ;;  %v7738_v52 = vpop.eup %7737 }
 0x534   : > { %v7740_v51 = vpop.eup %7739  ;;  %v6921_v18 = vadd.f32 1.0, %v7738_v52  ;;  %v6924_v46 = vmul.f32 -0.5, %v7738_v52  ;;  %v6927_v41 = vand.u32 2147483647, %v7738_v52 }
 0x535   : > { %v11621_v3 = vmul.f32 100.0, %v11615_v14  ;;  %7741 = vpow2.f32 %v6861_v44  ;;  %v6914_v5 = vmul.f32 0.6931472, %v7740_v51 }
 0x536   : > { %7743 = vlog2.f32 %v6921_v18  ;;  %v6925_v7 = vadd.f32 1.0, %v6924_v46  ;;  %vm6928_vm1 = vcmp.lt.f32.partialorder %v6927_v41, 0.0004427343 }
 0x537   : > { %v11623_v21 = vpop.f32.mrf.mxu2  ;;  %v6827_v31 = vand.u32 2147483647, %v11621_v3  ;;  %v6920_v2 = vsel %vm6919_vm14, %v6917_v12, %v6914_v5  ;;  %vm7083_vm5 = vcmp.gt.f32.partialorder %v11621_v3, 20.0 }
 0x538   : > { %v6759_v34 = vpop.f32.mrf.mxu3  ;;  %v7048_v60 = vadd.f32 %v6920_v2, %v6888_v16  ;;  %v6926_v15 = vmul.f32 %v7738_v52, %v6925_v7 }
 0x539   : > { %v6760_v53 = vadd.f32 %v6759_v34, %v6662_v33  ;;  %v6843_v29 = vsub.f32 0.0, %v6827_v31  ;;  %v7047_v33 = vadd.f32 %v6911_v22, %v6887_v57 }
 0x53b   : > { %v11627_v35 = vadd.f32 %v11575_v40, %v6760_v53  ;;  %v6863_v47 = vmul.f32 1.442695, %v6843_v29  ;;  %v7063_v54 = vmul.f32 0.01, %v7047_v33  ;;  %v7742_v26 = vpop.eup %7741  ;;  %v6890_v29 = vmax.f32 %v11610_v32, 0.0 }
 0x53c   : > { %v7744_v10 = vpop.eup %7743  ;;  %v6930_v23 = vadd.f32 1.0, %v7742_v26  ;;  %v6933_v11 = vmul.f32 -0.5, %v7742_v26  ;;  %v6936_v44 = vand.u32 2147483647, %v7742_v26 }
 0x53d   : > { %v11633_v37 = vmul.f32 100.0, %v11627_v35  ;;  %7745 = vpow2.f32 %v6863_v47  ;;  %v11648_v30 = vsel %vm7079_vm12, %v11580_v55, %v7063_v54  ;;  %v6923_v56 = vmul.f32 0.6931472, %v7744_v10 }
 0x53e   : > { %7747 = vlog2.f32 %v6930_v23  ;;  %v6934_v36 = vadd.f32 1.0, %v6933_v11  ;;  %vm6937_vm15 = vcmp.lt.f32.partialorder %v6936_v44, 0.0004427343 }
 0x53f   : > { %v6828_v34 = vand.u32 2147483647, %v11633_v37  ;;  %v11638_v28 = vpop.f32.mrf.mxu2  ;;  %v6929_v13 = vsel %vm6928_vm1, %v6926_v15, %v6923_v56  ;;  %vm7084_vm4 = vcmp.gt.f32.partialorder %v11633_v37, 20.0 }
 0x540   : > { %v7049_v52 = vadd.f32 %v6929_v13, %v6889_v0  ;;  %v6935_v57 = vmul.f32 %v7742_v26, %v6934_v36 }
 0x541   : > { %v6844_v8 = vsub.f32 0.0, %v6828_v34 }
 0x543   : > { %v6865_v25 = vmul.f32 1.442695, %v6844_v8  ;;  %v7746_v63 = vpop.eup %7745 }
 0x544   : > { %v6939_v48 = vadd.f32 1.0, %v7746_v63  ;;  %v6942_v18 = vmul.f32 -0.5, %v7746_v63  ;;  %v6945_v2 = vand.u32 2147483647, %v7746_v63 }
 0x545   : > { %v6762_v49 = vpop.f32.mrf.mxu3  ;;  %7749 = vpow2.f32 %v6865_v25 }
 0x546   : > { %v6763_v27 = vadd.f32 %v6762_v49, %v11577_v61  ;;  %v7064_v49 = vmul.f32 0.01, %v7048_v60  ;;  %7751 = vlog2.f32 %v6939_v48  ;;  %v6943_v46 = vadd.f32 1.0, %v6942_v18 }
 0x547   : > { %v6680_v19 = vpop.f32.mrf.mxu2  ;;  %vm6946_vm7 = vcmp.lt.f32.partialorder %v6945_v2, 0.0004427343 }
 0x548   : > { %v11643_v61 = vadd.f32 %v11575_v40, %v6763_v27  ;;  %v11651_v58 = vsel %vm7080_vm0, %v11587_v62, %v7064_v49  ;;  %v6944_v23 = vmul.f32 %v7746_v63, %v6943_v46 }
 0x54a   : > { %v11654_v17 = vmul.f32 100.0, %v11643_v61 }
 0x54c   : > { %v6829_v62 = vand.u32 2147483647, %v11654_v17  ;;  %vm7085_vm11 = vcmp.gt.f32.partialorder %v11654_v17, 20.0 }
 0x54d   : > { %v11607_v50 = vpop.f32.mrf.mxu3 }
 0x54e   : > { %v6765_v45 = vadd.f32 %v11607_v50, %v11589_v43  ;;  %v7748_v50 = vpop.eup %7747  ;;  %v6845_v22 = vsub.f32 0.0, %v6829_v62  ;;  %v6891_v62 = vmax.f32 %v11621_v3, 0.0 }
 0x54f   : > { %v6932_v24 = vmul.f32 0.6931472, %v7748_v50  ;;  %v7750_v5 = vpop.eup %7749  ;;  %v6682_v54 = vpop.f32.mrf.mxu2 }
 0x550   : > { %v11663_v31 = vadd.f32 %v11575_v40, %v6765_v45  ;;  %v6867_v12 = vmul.f32 1.442695, %v6845_v22  ;;  %v7752_v60 = vpop.eup %7751  ;;  %v6948_v49 = vadd.f32 1.0, %v7750_v5  ;;  %v6951_v39 = vmul.f32 -0.5, %v7750_v5 }
 0x551   : > { %v6938_v33 = vsel %vm6937_vm15, %v6935_v57, %v6932_v24  ;;  %v6941_v10 = vmul.f32 0.6931472, %v7752_v60  ;;  %v6954_v63 = vand.u32 2147483647, %v7750_v5 }
 0x552   : > { %v11669_v4 = vmul.f32 100.0, %v11663_v31  ;;  %7753 = vpow2.f32 %v6867_v12  ;;  %v6952_v15 = vadd.f32 1.0, %v6951_v39 }
 0x553   : > { %7755 = vlog2.f32 %v6948_v49  ;;  %v6947_v25 = vsel %vm6946_vm7, %v6944_v23, %v6941_v10  ;;  %vm6955_vm10 = vcmp.lt.f32.partialorder %v6954_v63, 0.0004427343 }
 0x554   : > { %v6830_v16 = vand.u32 2147483647, %v11669_v4  ;;  %vm7086_vm1 = vcmp.gt.f32.partialorder %v11669_v4, 20.0 }
 0x555   : > { %v11618_v9 = vpop.f32.mrf.mxu3 }
 0x556   : > { %v6768_v43 = vadd.f32 %v11618_v9, %v11598_v42  ;;  %v7050_v42 = vadd.f32 %v6938_v33, %v6890_v29  ;;  %v7065_v9 = vmul.f32 0.01, %v7049_v52  ;;  %v6846_v56 = vsub.f32 0.0, %v6830_v16 }
 0x557   : > { %v6953_v52 = vmul.f32 %v7750_v5, %v6952_v15  ;;  %v6685_v22 = vpop.f32.mrf.mxu2 }
 0x558   : > { %v11672_v51 = vadd.f32 %v11575_v40, %v6768_v43  ;;  %v7066_v47 = vmul.f32 0.01, %v7050_v42  ;;  %v11681_v8 = vsel %vm7081_vm9, %v11596_v6, %v7065_v9  ;;  %v11697_v36 = vpop.eup %7753  ;;  %v6869_v43 = vmul.f32 1.442695, %v6846_v56 }
 0x559   : > { %v7756_v44 = vpop.eup %7755  ;;  %v6957_v24 = vadd.f32 1.0, %v11697_v36  ;;  %v6960_v56 = vmul.f32 -0.5, %v11697_v36 }
 0x55a   : > { %v11677_v34 = vmul.f32 100.0, %v11672_v51  ;;  %v11684_v7 = vsel %vm7082_vm2, %v11605_v20, %v7066_v47  ;;  %7757 = vpow2.f32 %v6869_v43  ;;  %v6963_v43 = vand.u32 2147483647, %v11697_v36 }
 0x55b   : > { %7759 = vlog2.f32 %v6957_v24 }
 0x55c   : > { %v6831_v32 = vand.u32 2147483647, %v11677_v34  ;;  %vm6964_vm8 = vcmp.lt.f32.partialorder %v6963_v43, 0.0004427343  ;;  %vm7087_vm2 = vcmp.gt.f32.partialorder %v11677_v34, 20.0 }
 0x55d   : > { %v11629_v1 = vpop.f32.mrf.mxu3 }
 0x55e   : > { %v6770_v6 = vadd.f32 %v11629_v1, %v11612_v59  ;;  %v6847_v50 = vsub.f32 0.0, %v6831_v32  ;;  %v7051_v1 = vadd.f32 %v6947_v25, %v6891_v62 }
 0x560   : > { %v11707_v48 = vadd.f32 %v11575_v40, %v6770_v6  ;;  %v7067_v9 = vmul.f32 0.01, %v7051_v1  ;;  %v6871_v5 = vmul.f32 1.442695, %v6847_v50 }
 0x562   : > { %v11723_v12 = vmul.f32 100.0, %v11707_v48  ;;  %v11737_v49 = vsel %vm7083_vm5, %v11615_v14, %v7067_v9  ;;  %7761 = vpow2.f32 %v6871_v5  ;;  %v6893_v5 = vmax.f32 %v11654_v17, 0.0 }
 0x564   : > { %v6832_v39 = vand.u32 2147483647, %v11723_v12  ;;  %vm7088_vm7 = vcmp.gt.f32.partialorder %v11723_v12, 20.0 }
 0x565   : > { %v11640_v38 = vpop.f32.mrf.mxu3 }
 0x566   : > { %v6773_v13 = vadd.f32 %v11640_v38, %v11623_v21  ;;  %v6950_v38 = vmul.f32 0.6931472, %v7756_v44  ;;  %v6848_v62 = vsub.f32 0.0, %v6832_v39 }
 0x568   : > { %v6956_v18 = vsel %vm6955_vm10, %v6953_v52, %v6950_v38  ;;  %v6873_v24 = vmul.f32 1.442695, %v6848_v62 }
 0x56d   : > { %v6774_v55 = vpop.f32.mrf.mxu3 }
 0x575   : > { %v6777_v27 = vpop.f32.mrf.mxu3 }
 0x576   : > { %v6778_v26 = vadd.f32 %v6777_v27, %v6680_v19  ;;  %v6775_v19 = vadd.f32 %v6774_v55, %v11638_v28  ;;  %v6892_v28 = vmax.f32 %v11633_v37, 0.0  ;;  %v11714_v55 = vadd.f32 %v11575_v40, %v6773_v13 }
 0x578   : > { %v11690_v11 = vadd.f32 %v11575_v40, %v6778_v26  ;;  %v11718_v57 = vadd.f32 %v11575_v40, %v6775_v19  ;;  %v7052_v42 = vadd.f32 %v6956_v18, %v6892_v28  ;;  %v11726_v47 = vmul.f32 100.0, %v11714_v55 }
 0x579   : > { %v6961_v19 = vadd.f32 1.0, %v6960_v56 }
 0x57a   : > { %v11704_v59 = vmul.f32 100.0, %v11690_v11  ;;  %v7068_v2 = vmul.f32 0.01, %v7052_v42  ;;  %v11729_v60 = vmul.f32 100.0, %v11718_v57  ;;  %v6833_v3 = vand.u32 2147483647, %v11726_v47 }
 0x57b   : > { %v6962_v18 = vmul.f32 %v11697_v36, %v6961_v19 }
 0x57c   : > { %v6835_v33 = vand.u32 2147483647, %v11704_v59  ;;  %v11740_v10 = vsel %vm7084_vm4, %v11627_v35, %v7068_v2  ;;  %v6834_v14 = vand.u32 2147483647, %v11729_v60  ;;  %v6849_v44 = vsub.f32 0.0, %v6833_v3 }
 0x57d   : > { %v6779_v45 = vpop.f32.mrf.mxu3 }
 0x57e   : > { %v6780_v20 = vadd.f32 %v6779_v45, %v6682_v54  ;;  %v6851_v26 = vsub.f32 0.0, %v6835_v33  ;;  %v11750_v45 = vpop.eup %7757  ;;  %v6850_v50 = vsub.f32 0.0, %v6834_v14  ;;  %v6875_v33 = vmul.f32 1.442695, %v6849_v44 }
 0x57f   : > { %v7760_v6 = vpop.eup %7759  ;;  %v6969_v2 = vmul.f32 -0.5, %v11750_v45  ;;  %v6895_v14 = vmax.f32 %v11677_v34, 0.0 }
 0x580   : > { %v11701_v0 = vadd.f32 %v11575_v40, %v6780_v20  ;;  %v6687_v20 = vpop.f32.mrf.mxu2  ;;  %v6879_v25 = vmul.f32 1.442695, %v6851_v26  ;;  %v6959_v52 = vmul.f32 0.6931472, %v7760_v6  ;;  %v11759_v28 = vpop.eup %7761 }
 0x581   : > { %v6978_v62 = vmul.f32 -0.5, %v11759_v28 }
 0x582   : > { %v11710_v21 = vmul.f32 100.0, %v11701_v0 }
 0x584   : > { %v6836_v29 = vand.u32 2147483647, %v11710_v21 }
 0x585   : > { %v6782_v27 = vpop.f32.mrf.mxu3 }
 0x586   : > { %v6783_v16 = vadd.f32 %v6782_v27, %v6685_v22  ;;  %v6852_v46 = vsub.f32 0.0, %v6836_v29  ;;  %v6966_v22 = vadd.f32 1.0, %v11750_v45  ;;  %v6877_v27 = vmul.f32 1.442695, %v6850_v50 }
 0x588   : > { %v11732_v54 = vadd.f32 %v11575_v40, %v6783_v16  ;;  %v6881_v37 = vmul.f32 1.442695, %v6852_v46  ;;  %v6975_v16 = vadd.f32 1.0, %v11759_v28 }
 0x58a   : > { %v11744_v23 = vmul.f32 100.0, %v11732_v54  ;;  %7763 = vpow2.f32 %v6881_v37  ;;  %v6894_v37 = vmax.f32 %v11669_v4, 0.0 }
 0x58b   : > { %7765 = vpow2.f32 %v6879_v25  ;;  %v6972_v25 = vand.u32 2147483647, %v11750_v45 }
 0x58c   : > { %v6837_v35 = vand.u32 2147483647, %v11744_v23  ;;  %vm7093_vm15 = vcmp.gt.f32.partialorder %v11744_v23, 20.0 }
 0x58d   : > { %v6784_v15 = vpop.f32.mrf.mxu3  ;;  %vm11801_vm3 = vcmp.lt.f32.partialorder %v6972_v25, 0.0004427343 }
 0x58e   : > { %v6853_v13 = vsub.f32 0.0, %v6837_v35  ;;  %v6785_v63 = vadd.f32 %v6784_v15, %v6687_v20  ;;  %v6970_v20 = vadd.f32 1.0, %v6969_v2 }
 0x590   : > { %v6883_v1 = vmul.f32 1.442695, %v6853_v13  ;;  %v11756_v38 = vadd.f32 %v11575_v40, %v6785_v63  ;;  %v6965_v40 = vsel %vm6964_vm8, %v6962_v18, %v6959_v52  ;;  %v11766_v9 = vpop.eup %7763  ;;  %v6981_v13 = vand.u32 2147483647, %v11759_v28 }
 0x591   : > { %v11771_v26 = vpop.eup %7765  ;;  %v7053_v36 = vadd.f32 %v6965_v40, %v6893_v5  ;;  %v7020_v3 = vadd.f32 1.0, %v11766_v9 }
 0x592   : > { %7767 = vpow2.f32 %v6883_v1  ;;  %v11762_v29 = vmul.f32 100.0, %v11756_v38  ;;  %v7011_v6 = vadd.f32 1.0, %v11771_v26  ;;  %v7017_v5 = vand.u32 2147483647, %v11771_v26 }
 0x593   : > { %7769 = vlog2.f32 %v6966_v22  ;;  %v7069_v63 = vmul.f32 0.01, %v7053_v36  ;;  %v6901_v22 = vmax.f32 %v11744_v23, 0.0  ;;  %vm11797_vm6 = vcmp.lt.f32.partialorder %v6981_v13, 0.0004427343 }
 0x594   : > { %v6838_v42 = vand.u32 2147483647, %v11762_v29  ;;  %7771 = vpow2.f32 %v6873_v24  ;;  %v7014_v24 = vmul.f32 -0.5, %v11771_v26  ;;  %vm11814_vm14 = vcmp.lt.f32.partialorder %v7017_v5, 0.0004427343 }
 0x595   : > { %7773 = vpow2.f32 %v6875_v33  ;;  %v7023_v33 = vmul.f32 -0.5, %v11766_v9  ;;  %v11808_v36 = vsel %vm7085_vm11, %v11643_v61, %v7069_v63  ;;  %vm7094_vm9 = vcmp.gt.f32.partialorder %v11762_v29, 20.0 }
 0x596   : > { %v6854_v46 = vsub.f32 0.0, %v6838_v42  ;;  %7775 = vpow2.f32 %v6877_v27  ;;  %v6971_v42 = vmul.f32 %v11750_v45, %v6970_v20  ;;  %v6902_v45 = vmax.f32 %v11762_v29, 0.0 }
 0x597   : > { %7777 = vlog2.f32 %v6975_v16  ;;  %v6979_v16 = vadd.f32 1.0, %v6978_v62  ;;  %v7015_v25 = vadd.f32 1.0, %v7014_v24  ;;  %v7024_v17 = vadd.f32 1.0, %v7023_v33 }
 0x598   : > { %v7768_v39 = vpop.eup %7767  ;;  %v6885_v56 = vmul.f32 1.442695, %v6854_v46  ;;  %v12352_v63 = vmax.f32 %v11723_v12, 0.0  ;;  %vm7092_vm11 = vcmp.gt.f32.partialorder %v11710_v21, 20.0 }
 0x599   : > { %v7029_v35 = vadd.f32 1.0, %v7768_v39  ;;  %v7770_v15 = vpop.eup %7769  ;;  %v7032_v43 = vmul.f32 -0.5, %v7768_v39 }
 0x59a   : > { %7779 = vpow2.f32 %v6885_v56  ;;  %v11780_v19 = vpop.eup %7771  ;;  %v11793_v27 = vmul.f32 0.6931472, %v7770_v15  ;;  %v7035_v15 = vand.u32 2147483647, %v7768_v39 }
 0x59b   : > { %7781 = vlog2.f32 %v7029_v35  ;;  %v11784_v50 = vpop.eup %7773  ;;  %v7026_v35 = vand.u32 2147483647, %v11766_v9  ;;  %v6987_v1 = vmul.f32 -0.5, %v11780_v19 }
 0x59c   : > { %7783 = vlog2.f32 %v7020_v3  ;;  %v11790_v18 = vpop.eup %7775  ;;  %v7033_v3 = vadd.f32 1.0, %v7032_v43  ;;  %v6993_v43 = vadd.f32 1.0, %v11784_v50  ;;  %vm11825_vm0 = vcmp.lt.f32.partialorder %v7035_v15, 0.0004427343 }
 0x59d   : > { %7785 = vlog2.f32 %v7011_v6  ;;  %v7778_v40 = vpop.eup %7777  ;;  %v6984_v6 = vadd.f32 1.0, %v11780_v19  ;;  %v7002_v13 = vadd.f32 1.0, %v11790_v18  ;;  %vm11820_vm12 = vcmp.lt.f32.partialorder %v7026_v35, 0.0004427343 }
 0x59e   : > { %v6977_v61 = vmul.f32 0.6931472, %v7778_v40  ;;  %v7034_v52 = vmul.f32 %v7768_v39, %v7033_v3  ;;  %v6996_v5 = vmul.f32 -0.5, %v11784_v50  ;;  %v7025_v35 = vmul.f32 %v11766_v9, %v7024_v17 }
 0x59f   : > { %v6988_v15 = vadd.f32 1.0, %v6987_v1  ;;  %v7008_v46 = vand.u32 2147483647, %v11790_v18 }
 0x5a0   : > { %v7780_v56 = vpop.eup %7779  ;;  %v6997_v1 = vadd.f32 1.0, %v6996_v5 }
 0x5a1   : > { %v7782_v20 = vpop.eup %7781  ;;  %v7038_v62 = vadd.f32 1.0, %v7780_v56  ;;  %v7041_v32 = vmul.f32 -0.5, %v7780_v56  ;;  %vm11870_vm4 = vcmp.lt.f32.partialorder %v7008_v46, 0.0004427343 }
 0x5a2   : > { %v7784_v53 = vpop.eup %7783  ;;  %v7031_v41 = vmul.f32 0.6931472, %v7782_v20  ;;  %v6980_v20 = vmul.f32 %v11759_v28, %v6979_v16  ;;  %v7044_v16 = vand.u32 2147483647, %v7780_v56 }
 0x5a3   : > { %7787 = vlog2.f32 %v7038_v62  ;;  %v7786_v44 = vpop.eup %7785  ;;  %v7022_v40 = vmul.f32 0.6931472, %v7784_v53  ;;  %v7042_v3 = vadd.f32 1.0, %v7041_v32  ;;  %v7016_v53 = vmul.f32 %v11771_v26, %v7015_v25 }
 0x5a4   : > { %7789 = vlog2.f32 %v6984_v6  ;;  %v7037_v39 = vsel %vm11825_vm0, %v7034_v52, %v7031_v41  ;;  %v6983_v28 = vsel %vm11797_vm6, %v6980_v20, %v6977_v61  ;;  %v7013_v6 = vmul.f32 0.6931472, %v7786_v44 }
 0x5a5   : > { %7791 = vlog2.f32 %v7002_v13  ;;  %v7005_v62 = vmul.f32 -0.5, %v11790_v18  ;;  %v6990_v41 = vand.u32 2147483647, %v11780_v19  ;;  %v6974_v32 = vsel %vm11801_vm3, %v6971_v42, %v11793_v27 }
 0x5a6   : > { %7793 = vlog2.f32 %v6993_v43  ;;  %v7061_v52 = vadd.f32 %v7037_v39, %v6901_v22  ;;  %v7028_v44 = vsel %vm11820_vm12, %v7025_v35, %v7022_v40  ;;  %v7043_v13 = vmul.f32 %v7780_v56, %v7042_v3 }
 0x5a7   : > { %v7055_v17 = vadd.f32 %v6983_v28, %v6895_v14  ;;  %v7054_v27 = vadd.f32 %v6974_v32, %v6894_v37  ;;  %vm7045_vm10 = vcmp.lt.f32.partialorder %v7044_v16, 0.0004427343  ;;  %v7019_v42 = vsel %vm11814_vm14, %v7016_v53, %v7013_v6 }
 0x5a8   : > { %v6989_v61 = vmul.f32 %v11780_v19, %v6988_v15  ;;  %v7006_v24 = vadd.f32 1.0, %v7005_v62  ;;  %vm6991_vm5 = vcmp.lt.f32.partialorder %v6990_v41, 0.0004427343  ;;  %v7077_v14 = vmul.f32 0.01, %v7061_v52 }
 0x5a9   : > { %v7788_v9 = vpop.eup %7787  ;;  %v7070_v20 = vmul.f32 0.01, %v7054_v27  ;;  %v12351_v40 = vmax.f32 %v11710_v21, 0.0  ;;  %v7071_v35 = vmul.f32 0.01, %v7055_v17  ;;  %v12353_v16 = vmax.f32 %v11704_v59, 0.0 }
 0x5aa   : > { %v7790_v26 = vpop.eup %7789  ;;  %v7040_v25 = vmul.f32 0.6931472, %v7788_v9  ;;  %v7007_v62 = vmul.f32 %v11790_v18, %v7006_v24  ;;  %v6998_v52 = vmul.f32 %v11784_v50, %v6997_v1  ;;  %v6897_v1 = vmax.f32 %v11726_v47, 0.0  ;;  %v7443_v24 = vld [vmem:[%s11969_s8] sm:$0xf] }
 0x5ab   : > { %v7792_v22 = vpop.eup %7791  ;;  %v6986_v2 = vmul.f32 0.6931472, %v7790_v26  ;;  %v7060_v37 = vadd.f32 %v7028_v44, %v12351_v40  ;;  %v7102_v19 = vsel %vm7086_vm1, %v11663_v31, %v7070_v20  ;;  %v7059_v6 = vadd.f32 %v7019_v42, %v12353_v16 }
 0x5ac   : > { %v7046_v43 = vsel %vm7045_vm10, %v7043_v13, %v7040_v25  ;;  %v7794_v33 = vpop.eup %7793  ;;  %v7004_v39 = vmul.f32 0.6931472, %v7792_v22  ;;  %v7116_v15 = vpack.c.bf16 %v7102_v19, %v11808_v36  ;;  %v7109_v31 = vsel %vm7093_vm15, %v11732_v54, %v7077_v14 }
 0x5ad   : > { %v7062_v56 = vadd.f32 %v7046_v43, %v6902_v45  ;;  %v6992_v5 = vsel %vm6991_vm5, %v6989_v61, %v6986_v2  ;;  %v6999_v45 = vand.u32 2147483647, %v11784_v50  ;;  %v6995_v53 = vmul.f32 0.6931472, %v7794_v33 }
 0x5ae   : > { %v7056_v3 = vadd.f32 %v6992_v5, %v12352_v63  ;;  %v7076_v9 = vmul.f32 0.01, %v7060_v37  ;;  %v7010_v18 = vsel %vm11870_vm4, %v7007_v62, %v7004_v39  ;;  %v7103_v44 = vsel %vm7087_vm2, %v11672_v51, %v7071_v35 }
 0x5af   : > { %v7078_v28 = vmul.f32 0.01, %v7062_v56  ;;  %v6898_v54 = vmax.f32 %v11729_v60, 0.0  ;;  %v7075_v46 = vmul.f32 0.01, %v7059_v6  ;;  %vm7091_vm6 = vcmp.gt.f32.partialorder %v11704_v59, 20.0 }
 0x5b0   : > { %v7072_v32 = vmul.f32 0.01, %v7056_v3  ;;  %vm7000_vm8 = vcmp.lt.f32.partialorder %v6999_v45, 0.0004427343  ;;  %v7108_v34 = vsel %vm7092_vm11, %v11701_v0, %v7076_v9  ;;  %vm7090_vm3 = vcmp.gt.f32.partialorder %v11729_v60, 20.0  ;;  %v7121_v60 = vld [vmem:[%s11970_s9] sm:$0xff] }
 0x5b1   : > { %v7110_v4 = vsel %vm7094_vm9, %v11756_v38, %v7078_v28  ;;  %v7001_v50 = vsel %vm7000_vm8, %v6998_v52, %v6995_v53  ;;  %v7058_v51 = vadd.f32 %v7010_v18, %v6898_v54  ;;  %vm7089_vm14 = vcmp.gt.f32.partialorder %v11726_v47, 20.0  ;;  %7125 = vperm.xlu1 %7597, %v7121_v60  }
 0x5b2   : > { %v7120_v36 = vpack.c.bf16 %v7110_v4, %v7109_v31  ;;  %v7104_v23 = vsel %vm7088_vm7, %v11707_v48, %v7072_v32  ;;  %v7107_v48 = vsel %vm7091_vm6, %v11690_v11, %v7075_v46  ;;  %v7057_v12 = vadd.f32 %v7001_v50, %v6897_v1 }
 0x5b3   : > { %v7117_v38 = vpack.c.bf16 %v7104_v23, %v7103_v44  ;;  %v7119_v26 = vpack.c.bf16 %v7108_v34, %v7107_v48  ;;  %v7074_v25 = vmul.f32 0.01, %v7058_v51  ;;  %v7151_v22 = vsel %vm6229_vm13, %v7116_v15, 0 }
 0x5b4   : > { %v7163_v29 = vsel %vm6229_vm13, %v7120_v36, 0  ;;  %v7073_v13 = vmul.f32 0.01, %v7057_v12  ;;  %v12357_v42 = vpack.c.bf16 %v11684_v7, %v11681_v8  ;;  %v12358_v61 = vpack.c.bf16 %v11651_v58, %v11648_v30 }
 0x5b5   : > { %7165 = vmatpush.bf16.xpose.msrb.mxu0 %v7163_v29  ;;  %v7160_v17 = vsel %vm6229_vm13, %v7119_v26, 0  ;;  %v7106_v21 = vsel %vm7090_vm3, %v11718_v57, %v7074_v25  ;;  %v7154_v11 = vsel %vm6229_vm13, %v7117_v38, 0  ;;  %v7122_v57 = vld [vmem:[%s11970_s9 + $0x8] sm:$0x1] }
 0x5b6   : > { %v7105_v0 = vsel %vm7089_vm14, %v11714_v55, %v7073_v13  ;;  %7130 = vperm.xlu2 %7598, %v7122_v57   ;;  %v12356_v55 = vpack.c.bf16 %v11740_v10, %v11737_v49  ;;  %v7145_v2 = vsel %vm6229_vm13, %v12357_v42, 0  ;;  %v7142_v43 = vsel %vm6229_vm13, %v12358_v61, 0  ;;  %v7462_v49 = vld [vmem:[%s11969_s8] sm:$0x10] }
 0x5b7   : > { %v7118_v27 = vpack.c.bf16 %v7106_v21, %v7105_v0  ;;  %v7444_v10 = vor.u32 %v7462_v49, %v7443_v24 }
 0x5b8   : > { %v7148_v47 = vsel %vm6229_vm13, %v12356_v55, 0 }
 0x5b9   : > { %v7157_v59 = vsel %vm6229_vm13, %v7118_v27, 0 }
 0x5bd   : > { %7166 = vmatpush.bf16.xpose.msrb.mxu0 %v7160_v17 }
 0x5c5   : > { %7167 = vmatpush.bf16.xpose.msrb.mxu0 %v7157_v59 }
 0x5cd   : > { %7168 = vmatpush.bf16.xpose.msrb.mxu0 %v7154_v11 }
 0x5d5   : > { %7169 = vmatpush.bf16.xpose.msrb.mxu0 %v7151_v22 }
 0x5dd   : > { %7170 = vmatpush.bf16.xpose.msrb.mxu0 %v7148_v47 }
 0x5e5   : > { %7171 = vmatpush.bf16.xpose.msrb.mxu0 %v7145_v2 }
 0x5ed   : > { %7172 = vmatpush.bf16.xpose.msrb.mxu0 %v7142_v43 }
 0x5f4   : > { %7445 = vmatmul.msk.bf16.vlgmr.msrb.gmra.mxu0 %vm6229_vm13, %v7444_v10 }
 0x610   : > { %v7131_v58 = vpop.permute.xlu2 %7130 }
 0x623   : > { %v7126_v8 = vpop.permute.xlu1 %7125 }
 0x671   : > { %v7174_v7 = vpop.f32.mrf.mxu0 }
 0x672   : > { %v7175_v30 = vadd.f32 %v7174_v7, %v7126_v8 }
 0x674   : > { %7179 = vst [vmem:[%s353_s11] sm:$0xff] %v7175_v30 }
 0x679   : > { %v7176_v20 = vpop.f32.mrf.mxu0 }
 0x67a   : > { %v7177_v33 = vadd.f32 %v7176_v20, %v7131_v58 }
 0x67c   : > { %7180 = vst [vmem:[%s353_s11 + $0x8] sm:$0x1] %v7177_v33 }
 0x67d   : > { %7849 = shalt.err (!%p7846_p3)
}
 0x67e   : > { %s7898_s21 = smov 128   ;;  %s7899_s11 = smov 256  }
 0x67f   : > { %s7900_s27 = smov 8  }
 0x680   : > { %7463 = dma.vmem_to_hbm [thread:$0]  (%p7994_p5), %s7194_s28, 256, %s7196_s30, %s7182_s12, %s7898_s21, %s7899_s11, %s7900_s27  }
 0x681 PF: > { %p7469_p4 = scmp.ge.s32.totalorder %s7884_s16, 2  ;;  %s7210_s0 = sand.u32 1, %s7872_s13  }
 0x682   : > { %s7211_s20 = scalar_lea.sflag [#allocation3], %s7210_s0 }
 0x683   : > { %p7466_p7 = pnand %p7469_p4, %p7998_p6 }
 0x685   : > { %p7467_p8 = pneg %p7466_p7 }
 0x687   : > { %7867 = dma.done.wait (%p7467_p8), %s7211_s20, 256  }
 0x688   : > { %7869 = vsyncadd (%p7467_p8), %s7211_s20, 4294967040  ;;  %p20_p9 = scmp.ge.s32.totalorder %s7981_s19, 4   ;;  %s12359_s13 = smov %s7876_s14 }
 0x689   : > { %s12360_s14 = smov %s7880_s15  ;;  %s12361_s15 = smov %s7992_s22 }
 0x68a   : > { %s12362_s16 = smov %s7981_s19  ;;  %22 = sbr.rel (!%p20_p9) target bundleno = 5 (0x5), region = 95 }
 0x68f   :  { %7217 = vsyncpa [#allocation3], 1 }
 0x690   :  { %7219 = vsyncpa [#allocation3 + $0x1], 1 }

</bundles_post_ra>
